<compile_context>
chip_gen: v6e
topology: v6e:2x2x1
jax: 0.10.0
libtpu: 0.0.40
codegen_flags: <defaults>
</compile_context>

<pallas_src>
import math

import numpy as np
import jax
import jax.numpy as jnp
from jax.experimental import pallas as pl
from jax.experimental.pallas import tpu as pltpu

VMEM = pl.BlockSpec(memory_space=pltpu.MemorySpace.VMEM)
SMEM = pl.BlockSpec(memory_space=pltpu.MemorySpace.SMEM)

HIDDEN = 32                          # hidden_dim
NUM_HEADS = 8
NUM_ATT_LAYERS = 2
EMBED = HIDDEN * 9                   # 288 real pair features
HEAD_DIM = EMBED // NUM_HEADS        # 36
HEAD_DIM_PAD = 128                   # one full lane tile per head
QKV_WIDTH = NUM_HEADS * HEAD_DIM_PAD  # 1024
EMBED_PAD = 3 * 128                  # 384: three 128-lane group tiles (stitch_h/stitch_t/hadamard)
OUT_DIM = 4
OUT_PAD = 128
ENC_IN_PAD = 128                     # atom feats + motif feats + 2 bias-indicator cols, zero padded
ENC_OUT_PAD = 128                    # 3*HIDDEN = 96 real cols, zero padded

# shared bias buffer offsets (all 128-aligned)
OFF_BQKV = 0                                    # 2 layers x 3072
OFF_BO = NUM_ATT_LAYERS * 3 * QKV_WIDTH         # 6144, 2 layers x 384
OFF_B1 = OFF_BO + NUM_ATT_LAYERS * EMBED_PAD    # 6912 (len 192)
OFF_B2 = OFF_B1 + 256                           # 7168 (len 128)
OFF_B3 = OFF_B2 + 128                           # 7296 (len 64)
OFF_B4 = OFF_B3 + 128                           # 7424 (len 128, padded from 4)
BIAS_TOTAL = OFF_B4 + 128                       # 7552

# packed MLP weight buffer row offsets
MLP_R1 = 0                                      # w1: [384, 192]
MLP_R2 = MLP_R1 + EMBED_PAD                     # w2: [192, 128]
MLP_R3 = MLP_R2 + HIDDEN * 6                    # w3: [128, 64]
MLP_R4 = MLP_R3 + HIDDEN * 4                    # w4: [64, 128]
MLP_ROWS = MLP_R4 + HIDDEN * 2                  # 768
MLP_COLS = HIDDEN * 6                           # 192


# ---------------------------------------------------------------------------
# Fused Pallas kernel
# ---------------------------------------------------------------------------
def _ddi_fused_kernel(scal_ref,                 # SMEM (8,): a00,a01,a10,a11, prelu1..3, pad
                      nodes_ref, pool_ref,      # stacked node feats / pooling matrix
                      enc_w_ref,                # block-diag encoder weights (+ bias rows)
                      wqkv_ref, wo_ref,         # [2,384,3072] / [2,1024,384]
                      bias_ref, mlp_w_ref,      # [1,7552] f32 / [768,192]
                      o_ref):                   # [B,128]
    f32, bf16 = jnp.float32, jnp.bfloat16
    B = pool_ref.shape[0] // 2

    a00, a01 = scal_ref[0], scal_ref[1]
    a10, a11 = scal_ref[2], scal_ref[3]

    # ---- encoder stand-ins: block-diagonal node embedding + global add pool -
    # TODO(synk): DrugEncoder / EncoderModelAtom / Motif message passing not
    # defined in the provided source; linear + add-pool stand-ins used.
    node_emb = jnp.dot(nodes_ref[...], enc_w_ref[...],
                       preferred_element_type=f32)              # [Nn, 128]
    pooled = jnp.dot(pool_ref[...], node_emb,
                     preferred_element_type=f32)                 # [2B, 128] (f32 pooling)
    h = pooled[:B, :]                                            # head graphs
    t = pooled[B:, :]                                            # tail graphs

    # ---- cross-stitch + hadamard: three 128-lane, tile-aligned chunks -------
    pair = jnp.concatenate([a00 * h + a01 * t,
                            a10 * h + a11 * t,
                            h * t], axis=-1)                     # [B, 384]

    # ---- 2-layer 8-head self-attention over the batch-of-pairs axis ---------
    # TODO(synk): MultiLayerSelfAttention source not provided; standard MHA +
    # residual over the batch axis is assumed. Scale is folded into Wq/bq.
    for l in range(NUM_ATT_LAYERS):
        x_b = pair.astype(bf16)
        qkv = (jnp.dot(x_b, wqkv_ref[l], preferred_element_type=f32)
               + bias_ref[:, OFF_BQKV + l * 3 * QKV_WIDTH:
                             OFF_BQKV + (l + 1) * 3 * QKV_WIDTH])   # [B, 3072]
        qkv3 = jnp.swapaxes(
            qkv.reshape(B, 3 * NUM_HEADS, HEAD_DIM_PAD), 0, 1)      # [24, B, 128]
        q = qkv3[0:NUM_HEADS].astype(bf16)                          # [H, B, 128]
        k = qkv3[NUM_HEADS:2 * NUM_HEADS].astype(bf16)
        v = qkv3[2 * NUM_HEADS:3 * NUM_HEADS].astype(bf16)

        s = jnp.einsum('hid,hjd->hij', q, k,
                       preferred_element_type=f32)                  # [H, B, B]
        s = s - jnp.max(s, axis=-1, keepdims=True)
        p = jnp.exp(s)
        p = p * pl.reciprocal(jnp.sum(p, axis=-1, keepdims=True))
        ctx = jnp.einsum('hij,hjd->hid', p.astype(bf16), v,
                         preferred_element_type=f32)                # [H, B, 128]

        wo3 = wo_ref[l].reshape(NUM_HEADS, HEAD_DIM_PAD, EMBED_PAD)  # free major-dim split
        out_h = jnp.einsum('hid,hdn->hin', ctx.astype(bf16), wo3,
                           preferred_element_type=f32)              # [H, B, 384]
        pair = (jnp.sum(out_h, axis=0)
                + bias_ref[:, OFF_BO + l * EMBED_PAD:
                              OFF_BO + (l + 1) * EMBED_PAD]
                + pair)                                             # residual

    # ---- 4-layer PReLU MLP head ---------------------------------------------
    def prelu(val, a):
        return jnp.where(val >= 0.0, val, a * val)

    hid = (jnp.dot(pair.astype(bf16),
                   mlp_w_ref[MLP_R1:MLP_R1 + EMBED_PAD, 0:HIDDEN * 6],
                   preferred_element_type=f32)
           + bias_ref[:, OFF_B1:OFF_B1 + HIDDEN * 6])
    hid = prelu(hid, scal_ref[4])
    hid = (jnp.dot(hid.astype(bf16),
                   mlp_w_ref[MLP_R2:MLP_R2 + HIDDEN * 6, 0:HIDDEN * 4],
                   preferred_element_type=f32)
           + bias_ref[:, OFF_B2:OFF_B2 + HIDDEN * 4])
    hid = prelu(hid, scal_ref[5])
    hid = (jnp.dot(hid.astype(bf16),
                   mlp_w_ref[MLP_R3:MLP_R3 + HIDDEN * 4, 0:HIDDEN * 2],
                   preferred_element_type=f32)
           + bias_ref[:, OFF_B3:OFF_B3 + HIDDEN * 2])
    hid = prelu(hid, scal_ref[6])
    o_ref[...] = (jnp.dot(hid.astype(bf16),
                          mlp_w_ref[MLP_R4:MLP_R4 + HIDDEN * 2, 0:OUT_PAD],
                          preferred_element_type=f32)
                  + bias_ref[:, OFF_B4:OFF_B4 + OUT_PAD])


# ---------------------------------------------------------------------------
# Parameter init (deterministic) with padded / permuted weight layouts
# ---------------------------------------------------------------------------
def _lin(key, k_in, k_out, scale=0.05):
    kw, kb = jax.random.split(key)
    return (jax.random.normal(kw, (k_in, k_out), jnp.float32) * scale,
            jax.random.normal(kb, (k_out,), jnp.float32) * scale)


def _new_positions():
    """Map original 288-dim pair index -> position in the tile-aligned 384 layout.

    Original: group g (atom/bipart/atompos) at [g*96, g*96+96), parts
    [stitch_h, stitch_t, hadamard] at offsets 0/32/64 inside the group.
    New: part p owns lane tile [p*128, p*128+96), group g at offset g*32."""
    pos = np.zeros(EMBED, dtype=np.int32)
    for g in range(3):
        for part in range(3):
            old = g * 96 + part * 32
            new = part * 128 + g * 32
            pos[old:old + 32] = np.arange(new, new + 32)
    return jnp.asarray(pos)


def _rows_to_new(w, new_pos):     # [288, N] -> [384, N], permuted + zero padded rows
    return jnp.zeros((EMBED_PAD, w.shape[1]), w.dtype).at[new_pos, :].set(w)


def _cols_to_new(w, new_pos):     # [R, 288] -> [R, 384]
    return jnp.zeros((w.shape[0], EMBED_PAD), w.dtype).at[:, new_pos].set(w)


def _vec_to_new(b, new_pos):      # [288] -> [384]
    return jnp.zeros((EMBED_PAD,), b.dtype).at[new_pos].set(b)


def _pad_head_cols(w):            # [R, 288] -> [R, 1024]  (per-head out cols 36 -> 128)
    r = w.shape[0]
    w3 = w.reshape(r, NUM_HEADS, HEAD_DIM)
    return jnp.pad(w3, ((0, 0), (0, 0), (0, HEAD_DIM_PAD - HEAD_DIM))).reshape(r, QKV_WIDTH)


def _pad_head_vec(b):             # [288] -> [1024]
    return jnp.pad(b.reshape(NUM_HEADS, HEAD_DIM),
                   ((0, 0), (0, HEAD_DIM_PAD - HEAD_DIM))).reshape(QKV_WIDTH)


def _pad_head_rows(w):            # [288, N] -> [1024, N]  (per-head in rows 36 -> 128)
    w3 = w.reshape(NUM_HEADS, HEAD_DIM, w.shape[1])
    return jnp.pad(w3, ((0, 0), (0, HEAD_DIM_PAD - HEAD_DIM), (0, 0))).reshape(QKV_WIDTH, w.shape[1])


def init_params(key, num_atom_type, motif_dim):
    assert num_atom_type + motif_dim + 2 <= ENC_IN_PAD
    bf16 = jnp.bfloat16
    new_pos = _new_positions()
    keys = jax.random.split(key, 12)
    p = {}

    # cross-stitch 2x2 + PReLU slopes, one SMEM scalar buffer
    p["scal"] = jnp.array([0.9, 0.1, 0.1, 0.9, 0.25, 0.25, 0.25, 0.0], jnp.float32)

    # encoder stand-ins: block-diagonal [128,128] weight, biases as indicator rows
    A, M = num_atom_type, motif_dim
    ea_w, ea_b = _lin(keys[0], A, HIDDEN)    # drug_encoder stand-in      -> cols [0:32)
    ep_w, ep_b = _lin(keys[1], A, HIDDEN)    # atom positional stand-in   -> cols [64:96)
    em_w, em_b = _lin(keys[2], M, HIDDEN)    # motif bipart stand-in      -> cols [32:64)
    enc_w = jnp.zeros((ENC_IN_PAD, ENC_OUT_PAD), jnp.float32)
    enc_w = enc_w.at[0:A, 0:HIDDEN].set(ea_w)
    enc_w = enc_w.at[0:A, 2 * HIDDEN:3 * HIDDEN].set(ep_w)
    enc_w = enc_w.at[A:A + M, HIDDEN:2 * HIDDEN].set(em_w)
    enc_w = enc_w.at[A + M, 0:HIDDEN].set(ea_b)                 # atom bias row
    enc_w = enc_w.at[A + M, 2 * HIDDEN:3 * HIDDEN].set(ep_b)
    enc_w = enc_w.at[A + M + 1, HIDDEN:2 * HIDDEN].set(em_b)    # motif bias row
    p["enc_w"] = enc_w.astype(bf16)

    # attention: fused QKV (rows permuted, head cols padded 36->128), 2 layers stacked
    bias = jnp.zeros((BIAS_TOTAL,), jnp.float32)
    wqkv_layers, wo_layers = [], []
    scale = 1.0 / math.sqrt(HEAD_DIM)
    for l in range(NUM_ATT_LAYERS):
        lk = jax.random.split(keys[3 + l], 4)
        wq, bq = _lin(lk[0], EMBED, EMBED)
        wk, bk = _lin(lk[1], EMBED, EMBED)
        wv, bv = _lin(lk[2], EMBED, EMBED)
        wo, bo = _lin(lk[3], EMBED, EMBED)
        wq, bq = wq * scale, bq * scale          # fold 1/sqrt(d) into Q projection
        wqkv = jnp.concatenate(
            [_pad_head_cols(_rows_to_new(w, new_pos)) for w in (wq, wk, wv)], axis=1)
        bqkv = jnp.concatenate([_pad_head_vec(b) for b in (bq, bk, bv)])
        wo_t = _cols_to_new(_pad_head_rows(wo), new_pos)         # [1024, 384]
        bo_t = _vec_to_new(bo, new_pos)
        wqkv_layers.append(wqkv)
        wo_layers.append(wo_t)
        bias = bias.at[OFF_BQKV + l * 3 * QKV_WIDTH:
                       OFF_BQKV + (l + 1) * 3 * QKV_WIDTH].set(bqkv)
        bias = bias.at[OFF_BO + l * EMBED_PAD:
                       OFF_BO + (l + 1) * EMBED_PAD].set(bo_t)
    p["wqkv"] = jnp.stack(wqkv_layers).astype(bf16)              # [2, 384, 3072]
    p["wo"] = jnp.stack(wo_layers).astype(bf16)                  # [2, 1024, 384]

    # MLP head packed into one buffer; biases into the shared bias buffer
    w1, b1 = _lin(keys[8], EMBED, HIDDEN * 6)
    w2, b2 = _lin(keys[9], HIDDEN * 6, HIDDEN * 4)
    w3, b3 = _lin(keys[10], HIDDEN * 4, HIDDEN * 2)
    w4, b4 = _lin(keys[11], HIDDEN * 2, OUT_DIM)
    mlp_w = jnp.zeros((MLP_ROWS, MLP_COLS), jnp.float32)
    mlp_w = mlp_w.at[MLP_R1:MLP_R1 + EMBED_PAD, 0:HIDDEN * 6].set(_rows_to_new(w1, new_pos))
    mlp_w = mlp_w.at[MLP_R2:MLP_R2 + HIDDEN * 6, 0:HIDDEN * 4].set(w2)
    mlp_w = mlp_w.at[MLP_R3:MLP_R3 + HIDDEN * 4, 0:HIDDEN * 2].set(w3)
    mlp_w = mlp_w.at[MLP_R4:MLP_R4 + HIDDEN * 2, 0:OUT_DIM].set(w4)
    p["mlp_w"] = mlp_w.astype(bf16)
    bias = bias.at[OFF_B1:OFF_B1 + HIDDEN * 6].set(b1)
    bias = bias.at[OFF_B2:OFF_B2 + HIDDEN * 4].set(b2)
    bias = bias.at[OFF_B3:OFF_B3 + HIDDEN * 2].set(b3)
    bias = bias.at[OFF_B4:OFF_B4 + OUT_DIM].set(b4)
    p["bias"] = bias[None, :]                                    # [1, 7552]
    return p


# ---------------------------------------------------------------------------
# Model glue (wrapper builds block-diagonal node features + stacked pooling)
# ---------------------------------------------------------------------------
def ddi_forward(params, head_atom_x, head_atom_batch, tail_atom_x, tail_atom_batch,
                head_motif_x, head_motif_batch, tail_motif_x, tail_motif_batch,
                motif_bipart, num_graphs):
    del motif_bipart  # TODO(synk): Motif bipartite message passing not defined in source.

    A = head_atom_x.shape[1]
    M = head_motif_x.shape[1]
    na_h, na_t = head_atom_x.shape[0], tail_atom_x.shape[0]
    nm_h, nm_t = head_motif_x.shape[0], tail_motif_x.shape[0]
    Na, Nm = na_h + na_t, nm_h + nm_t
    Nn = Na + Nm
    B = num_graphs

    # block-diagonal node feature matrix (+ bias indicator columns), one per node type
    nodes = jnp.zeros((Nn, ENC_IN_PAD), jnp.float32)
    nodes = nodes.at[0:Na, 0:A].set(jnp.concatenate([head_atom_x, tail_atom_x], axis=0))
    nodes = nodes.at[Na:Nn, A:A + M].set(jnp.concatenate([head_motif_x, tail_motif_x], axis=0))
    nodes = nodes.at[0:Na, A + M].set(1.0)        # atom bias indicator
    nodes = nodes.at[Na:Nn, A + M + 1].set(1.0)   # motif bias indicator
    nodes = nodes.astype(jnp.bfloat16)

    # stacked pooling matrix [2B, Nn]: rows 0..B-1 pool head graphs (atoms+motifs),
    # rows B..2B-1 pool tail graphs (f32 so the global add pool sums in f32)
    gids = jnp.arange(B)[:, None]

    def seg(batch_vec):
        return (batch_vec[None, :] == gids).astype(jnp.float32)

    pool = jnp.zeros((2 * B, Nn), jnp.float32)
    pool = pool.at[0:B, 0:na_h].set(seg(head_atom_batch))
    pool = pool.at[B:2 * B, na_h:Na].set(seg(tail_atom_batch))
    pool = pool.at[0:B, Na:Na + nm_h].set(seg(head_motif_batch))
    pool = pool.at[B:2 * B, Na + nm_h:Nn].set(seg(tail_motif_batch))

    out = pl.pallas_call(
        _ddi_fused_kernel,
        out_shape=jax.ShapeDtypeStruct((B, OUT_PAD), jnp.float32),
        in_specs=[SMEM] + [VMEM] * 7,
        out_specs=VMEM,
        compiler_params=pltpu.CompilerParams(vmem_limit_bytes=32 * 1024 * 1024),
    )(params["scal"], nodes, pool, params["enc_w"],
      params["wqkv"], params["wo"], params["bias"], params["mlp_w"])
    return out[:, :OUT_DIM]


# ---------------------------------------------------------------------------
if __name__ == "__main__":
    B = 8                  # number of drug pairs in the batch
    NUM_ATOM_TYPE = 16
    MOTIF_DIM = 64
    N_HEAD_ATOMS, N_TAIL_ATOMS = 40, 48
    N_HEAD_MOTIFS, N_TAIL_MOTIFS = 24, 24

    key = jax.random.PRNGKey(0)
    kp, k1, k2, k3, k4, k5 = jax.random.split(key, 6)

    params = init_params(kp, NUM_ATOM_TYPE, MOTIF_DIM)

    head_atom_x = jax.random.normal(k1, (N_HEAD_ATOMS, NUM_ATOM_TYPE), jnp.float32)
    tail_atom_x = jax.random.normal(k2, (N_TAIL_ATOMS, NUM_ATOM_TYPE), jnp.float32)
    head_motif_x = jax.random.normal(k3, (N_HEAD_MOTIFS, MOTIF_DIM), jnp.float32)
    tail_motif_x = jax.random.normal(k4, (N_TAIL_MOTIFS, MOTIF_DIM), jnp.float32)
    motif_bipart = jax.random.normal(k5, (2, 32), jnp.float32)   # unused (see TODO)

    # node -> graph assignment vectors (sorted, deterministic)
    head_atom_batch = jnp.sort(jnp.arange(N_HEAD_ATOMS) % B)
    tail_atom_batch = jnp.sort(jnp.arange(N_TAIL_ATOMS) % B)
    head_motif_batch = jnp.sort(jnp.arange(N_HEAD_MOTIFS) % B)
    tail_motif_batch = jnp.sort(jnp.arange(N_TAIL_MOTIFS) % B)

    logit = ddi_forward(params, head_atom_x, head_atom_batch,
                        tail_atom_x, tail_atom_batch,
                        head_motif_x, head_motif_batch,
                        tail_motif_x, tail_motif_batch,
                        motif_bipart, B)
    jax.block_until_ready(logit)
    assert logit.shape == (B, OUT_DIM), logit.shape
    assert bool(jnp.all(jnp.isfinite(logit)))
    print("KERNEL_OK")
</pallas_src>

<mosaic_0001>
module attributes {stable_mosaic.version = 11 : i64} {
  func.func @_ddi_fused_kernel(%arg0: memref<8xf32, #tpu.memory_space<smem>>, %arg1: memref<136x128xbf16, #tpu.memory_space<vmem>>, %arg2: memref<16x136xf32, #tpu.memory_space<vmem>>, %arg3: memref<128x128xbf16, #tpu.memory_space<vmem>>, %arg4: memref<2x384x3072xbf16, #tpu.memory_space<vmem>>, %arg5: memref<2x1024x384xbf16, #tpu.memory_space<vmem>>, %arg6: memref<1x7552xf32, #tpu.memory_space<vmem>>, %arg7: memref<768x192xbf16, #tpu.memory_space<vmem>>, %arg8: memref<8x128xf32, #tpu.memory_space<vmem>>) attributes {dimension_semantics = [], scalar_prefetch = 0 : i64, scratch_operands = 0 : i64, tpu.core_type = #tpu.core_type<tc>} {
    %c0 = arith.constant 0 : index
    %0 = memref.load %arg0[%c0] : memref<8xf32, #tpu.memory_space<smem>>
    %c1 = arith.constant 1 : index
    %1 = memref.load %arg0[%c1] : memref<8xf32, #tpu.memory_space<smem>>
    %c2 = arith.constant 2 : index
    %2 = memref.load %arg0[%c2] : memref<8xf32, #tpu.memory_space<smem>>
    %c3 = arith.constant 3 : index
    %3 = memref.load %arg0[%c3] : memref<8xf32, #tpu.memory_space<smem>>
    %c0_0 = arith.constant 0 : index
    %c0_1 = arith.constant 0 : index
    %4 = vector.load %arg1[%c0_0, %c0_1] : memref<136x128xbf16, #tpu.memory_space<vmem>>, vector<136x128xbf16>
    %c0_2 = arith.constant 0 : index
    %c0_3 = arith.constant 0 : index
    %5 = vector.load %arg3[%c0_2, %c0_3] : memref<128x128xbf16, #tpu.memory_space<vmem>>, vector<128x128xbf16>
    %cst = arith.constant dense<0.000000e+00> : vector<136x128xf32>
    %6 = tpu.matmul %4, %5, %cst {dimension_numbers = #tpu.dot_dimension_numbers<[1], [0], [0], [1], [0, 0, 1, 1], [], []>} : vector<136x128xbf16>, vector<128x128xbf16>, vector<136x128xf32> -> vector<136x128xf32>
    %c0_4 = arith.constant 0 : index
    %c0_5 = arith.constant 0 : index
    %7 = vector.load %arg2[%c0_4, %c0_5] : memref<16x136xf32, #tpu.memory_space<vmem>>, vector<16x136xf32>
    %cst_6 = arith.constant dense<0.000000e+00> : vector<16x128xf32>
    %8 = tpu.matmul %7, %6, %cst_6 {dimension_numbers = #tpu.dot_dimension_numbers<[1], [0], [0], [1], [0, 0, 1, 1], [], []>} : vector<16x136xf32>, vector<136x128xf32>, vector<16x128xf32> -> vector<16x128xf32>
    %9 = vector.extract_strided_slice %8 {offsets = [0, 0], sizes = [8, 128], strides = [1, 1]} : vector<16x128xf32> to vector<8x128xf32>
    %10 = vector.extract_strided_slice %8 {offsets = [8, 0], sizes = [8, 128], strides = [1, 1]} : vector<16x128xf32> to vector<8x128xf32>
    %11 = vector.broadcast %0 : f32 to vector<8x128xf32>
    %12 = arith.mulf %11, %9 : vector<8x128xf32>
    %13 = vector.broadcast %1 : f32 to vector<8x128xf32>
    %14 = arith.mulf %13, %10 : vector<8x128xf32>
    %15 = arith.addf %12, %14 : vector<8x128xf32>
    %16 = vector.broadcast %2 : f32 to vector<8x128xf32>
    %17 = arith.mulf %16, %9 : vector<8x128xf32>
    %18 = vector.broadcast %3 : f32 to vector<8x128xf32>
    %19 = arith.mulf %18, %10 : vector<8x128xf32>
    %20 = arith.addf %17, %19 : vector<8x128xf32>
    %21 = arith.mulf %9, %10 : vector<8x128xf32>
    %22 = tpu.concatenate %15, %20, %21 in 1 : vector<8x128xf32>, vector<8x128xf32>, vector<8x128xf32> -> vector<8x384xf32>
    %23 = arith.truncf %22 : vector<8x384xf32> to vector<8x384xbf16>
    %c0_7 = arith.constant 0 : index
    %c0_8 = arith.constant 0 : index
    %c0_9 = arith.constant 0 : index
    %24 = vector.load %arg4[%c0_7, %c0_8, %c0_9] : memref<2x384x3072xbf16, #tpu.memory_space<vmem>>, vector<1x384x3072xbf16>
    %25 = vector.shape_cast %24 : vector<1x384x3072xbf16> to vector<384x3072xbf16>
    %cst_10 = arith.constant dense<0.000000e+00> : vector<8x3072xf32>
    %26 = tpu.matmul %23, %25, %cst_10 {dimension_numbers = #tpu.dot_dimension_numbers<[1], [0], [0], [1], [0, 0, 1, 1], [], []>} : vector<8x384xbf16>, vector<384x3072xbf16>, vector<8x3072xf32> -> vector<8x3072xf32>
    %c0_11 = arith.constant 0 : index
    %c0_12 = arith.constant 0 : index
    %27 = vector.load %arg6[%c0_11, %c0_12] : memref<1x7552xf32, #tpu.memory_space<vmem>>, vector<1x3072xf32>
    %28 = vector.broadcast %27 : vector<1x3072xf32> to vector<8x3072xf32>
    %29 = arith.addf %26, %28 : vector<8x3072xf32>
    %30 = vector.shape_cast %29 : vector<8x3072xf32> to vector<8x24x128xf32>
    %31 = tpu.transpose %30, [1, 0, 2] : vector<8x24x128xf32> -> vector<24x8x128xf32>
    %32 = vector.extract_strided_slice %31 {offsets = [0, 0, 0], sizes = [8, 8, 128], strides = [1, 1, 1]} : vector<24x8x128xf32> to vector<8x8x128xf32>
    %33 = arith.truncf %32 : vector<8x8x128xf32> to vector<8x8x128xbf16>
    %34 = vector.extract_strided_slice %31 {offsets = [8, 0, 0], sizes = [8, 8, 128], strides = [1, 1, 1]} : vector<24x8x128xf32> to vector<8x8x128xf32>
    %35 = arith.truncf %34 : vector<8x8x128xf32> to vector<8x8x128xbf16>
    %36 = vector.extract_strided_slice %31 {offsets = [16, 0, 0], sizes = [8, 8, 128], strides = [1, 1, 1]} : vector<24x8x128xf32> to vector<8x8x128xf32>
    %37 = arith.truncf %36 : vector<8x8x128xf32> to vector<8x8x128xbf16>
    "tpu.trace_start"() <{level = 10 : i32, message = "hid,hjd->hij"}> : () -> ()
    %cst_13 = arith.constant dense<0.000000e+00> : vector<8x8x8xf32>
    %38 = tpu.matmul %33, %35, %cst_13 {dimension_numbers = #tpu.dot_dimension_numbers<[2], [2], [1], [1], [0, 0, 0, 1, 1, 1], [0], [0]>} : vector<8x8x128xbf16>, vector<8x8x128xbf16>, vector<8x8x8xf32> -> vector<8x8x8xf32>
    "tpu.trace_stop"() : () -> ()
    %cst_14 = arith.constant dense<0xFF800000> : vector<8x8xf32>
    %39 = vector.multi_reduction <maximumf>, %38, %cst_14 [2] : vector<8x8x8xf32> to vector<8x8xf32>
    %40 = vector.shape_cast %39 : vector<8x8xf32> to vector<8x8x1xf32>
    %41 = vector.broadcast %40 : vector<8x8x1xf32> to vector<8x8x8xf32>
    %42 = arith.subf %38, %41 : vector<8x8x8xf32>
    %43 = math.exp %42 : vector<8x8x8xf32>
    %cst_15 = arith.constant dense<0.000000e+00> : vector<8x8xf32>
    %44 = vector.multi_reduction <add>, %43, %cst_15 [2] : vector<8x8x8xf32> to vector<8x8xf32>
    %45 = vector.shape_cast %44 : vector<8x8xf32> to vector<8x8x1xf32>
    %46 = tpu.reciprocal %45 : vector<8x8x1xf32> -> vector<8x8x1xf32>
    %47 = vector.broadcast %46 : vector<8x8x1xf32> to vector<8x8x8xf32>
    %48 = arith.mulf %43, %47 : vector<8x8x8xf32>
    %49 = arith.truncf %48 : vector<8x8x8xf32> to vector<8x8x8xbf16>
    "tpu.trace_start"() <{level = 10 : i32, message = "hij,hjd->hid"}> : () -> ()
    %cst_16 = arith.constant dense<0.000000e+00> : vector<8x8x128xf32>
    %50 = tpu.matmul %49, %37, %cst_16 {dimension_numbers = #tpu.dot_dimension_numbers<[2], [1], [1], [2], [0, 0, 0, 1, 1, 2], [0], [0]>} : vector<8x8x8xbf16>, vector<8x8x128xbf16>, vector<8x8x128xf32> -> vector<8x8x128xf32>
    "tpu.trace_stop"() : () -> ()
    %c0_17 = arith.constant 0 : index
    %c0_18 = arith.constant 0 : index
    %c0_19 = arith.constant 0 : index
    %51 = vector.load %arg5[%c0_17, %c0_18, %c0_19] : memref<2x1024x384xbf16, #tpu.memory_space<vmem>>, vector<1x1024x384xbf16>
    %52 = vector.shape_cast %51 : vector<1x1024x384xbf16> to vector<1024x384xbf16>
    %53 = vector.shape_cast %52 : vector<1024x384xbf16> to vector<8x128x384xbf16>
    %54 = arith.truncf %50 : vector<8x8x128xf32> to vector<8x8x128xbf16>
    "tpu.trace_start"() <{level = 10 : i32, message = "hid,hdn->hin"}> : () -> ()
    %cst_20 = arith.constant dense<0.000000e+00> : vector<8x8x384xf32>
    %55 = tpu.matmul %54, %53, %cst_20 {dimension_numbers = #tpu.dot_dimension_numbers<[2], [1], [1], [2], [0, 0, 0, 1, 1, 2], [0], [0]>} : vector<8x8x128xbf16>, vector<8x128x384xbf16>, vector<8x8x384xf32> -> vector<8x8x384xf32>
    "tpu.trace_stop"() : () -> ()
    %cst_21 = arith.constant dense<0.000000e+00> : vector<8x384xf32>
    %56 = vector.multi_reduction <add>, %55, %cst_21 [0] : vector<8x8x384xf32> to vector<8x384xf32>
    %c0_22 = arith.constant 0 : index
    %c6144 = arith.constant 6144 : index
    %57 = vector.load %arg6[%c0_22, %c6144] : memref<1x7552xf32, #tpu.memory_space<vmem>>, vector<1x384xf32>
    %58 = vector.broadcast %57 : vector<1x384xf32> to vector<8x384xf32>
    %59 = arith.addf %56, %58 : vector<8x384xf32>
    %60 = arith.addf %59, %22 : vector<8x384xf32>
    %61 = arith.truncf %60 : vector<8x384xf32> to vector<8x384xbf16>
    %c1_23 = arith.constant 1 : index
    %c0_24 = arith.constant 0 : index
    %c0_25 = arith.constant 0 : index
    %62 = vector.load %arg4[%c1_23, %c0_24, %c0_25] : memref<2x384x3072xbf16, #tpu.memory_space<vmem>>, vector<1x384x3072xbf16>
    %63 = vector.shape_cast %62 : vector<1x384x3072xbf16> to vector<384x3072xbf16>
    %cst_26 = arith.constant dense<0.000000e+00> : vector<8x3072xf32>
    %64 = tpu.matmul %61, %63, %cst_26 {dimension_numbers = #tpu.dot_dimension_numbers<[1], [0], [0], [1], [0, 0, 1, 1], [], []>} : vector<8x384xbf16>, vector<384x3072xbf16>, vector<8x3072xf32> -> vector<8x3072xf32>
    %c0_27 = arith.constant 0 : index
    %c3072 = arith.constant 3072 : index
    %65 = vector.load %arg6[%c0_27, %c3072] : memref<1x7552xf32, #tpu.memory_space<vmem>>, vector<1x3072xf32>
    %66 = vector.broadcast %65 : vector<1x3072xf32> to vector<8x3072xf32>
    %67 = arith.addf %64, %66 : vector<8x3072xf32>
    %68 = vector.shape_cast %67 : vector<8x3072xf32> to vector<8x24x128xf32>
    %69 = tpu.transpose %68, [1, 0, 2] : vector<8x24x128xf32> -> vector<24x8x128xf32>
    %70 = vector.extract_strided_slice %69 {offsets = [0, 0, 0], sizes = [8, 8, 128], strides = [1, 1, 1]} : vector<24x8x128xf32> to vector<8x8x128xf32>
    %71 = arith.truncf %70 : vector<8x8x128xf32> to vector<8x8x128xbf16>
    %72 = vector.extract_strided_slice %69 {offsets = [8, 0, 0], sizes = [8, 8, 128], strides = [1, 1, 1]} : vector<24x8x128xf32> to vector<8x8x128xf32>
    %73 = arith.truncf %72 : vector<8x8x128xf32> to vector<8x8x128xbf16>
    %74 = vector.extract_strided_slice %69 {offsets = [16, 0, 0], sizes = [8, 8, 128], strides = [1, 1, 1]} : vector<24x8x128xf32> to vector<8x8x128xf32>
    %75 = arith.truncf %74 : vector<8x8x128xf32> to vector<8x8x128xbf16>
    "tpu.trace_start"() <{level = 10 : i32, message = "hid,hjd->hij"}> : () -> ()
    %cst_28 = arith.constant dense<0.000000e+00> : vector<8x8x8xf32>
    %76 = tpu.matmul %71, %73, %cst_28 {dimension_numbers = #tpu.dot_dimension_numbers<[2], [2], [1], [1], [0, 0, 0, 1, 1, 1], [0], [0]>} : vector<8x8x128xbf16>, vector<8x8x128xbf16>, vector<8x8x8xf32> -> vector<8x8x8xf32>
    "tpu.trace_stop"() : () -> ()
    %cst_29 = arith.constant dense<0xFF800000> : vector<8x8xf32>
    %77 = vector.multi_reduction <maximumf>, %76, %cst_29 [2] : vector<8x8x8xf32> to vector<8x8xf32>
    %78 = vector.shape_cast %77 : vector<8x8xf32> to vector<8x8x1xf32>
    %79 = vector.broadcast %78 : vector<8x8x1xf32> to vector<8x8x8xf32>
    %80 = arith.subf %76, %79 : vector<8x8x8xf32>
    %81 = math.exp %80 : vector<8x8x8xf32>
    %cst_30 = arith.constant dense<0.000000e+00> : vector<8x8xf32>
    %82 = vector.multi_reduction <add>, %81, %cst_30 [2] : vector<8x8x8xf32> to vector<8x8xf32>
    %83 = vector.shape_cast %82 : vector<8x8xf32> to vector<8x8x1xf32>
    %84 = tpu.reciprocal %83 : vector<8x8x1xf32> -> vector<8x8x1xf32>
    %85 = vector.broadcast %84 : vector<8x8x1xf32> to vector<8x8x8xf32>
    %86 = arith.mulf %81, %85 : vector<8x8x8xf32>
    %87 = arith.truncf %86 : vector<8x8x8xf32> to vector<8x8x8xbf16>
    "tpu.trace_start"() <{level = 10 : i32, message = "hij,hjd->hid"}> : () -> ()
    %cst_31 = arith.constant dense<0.000000e+00> : vector<8x8x128xf32>
    %88 = tpu.matmul %87, %75, %cst_31 {dimension_numbers = #tpu.dot_dimension_numbers<[2], [1], [1], [2], [0, 0, 0, 1, 1, 2], [0], [0]>} : vector<8x8x8xbf16>, vector<8x8x128xbf16>, vector<8x8x128xf32> -> vector<8x8x128xf32>
    "tpu.trace_stop"() : () -> ()
    %c1_32 = arith.constant 1 : index
    %c0_33 = arith.constant 0 : index
    %c0_34 = arith.constant 0 : index
    %89 = vector.load %arg5[%c1_32, %c0_33, %c0_34] : memref<2x1024x384xbf16, #tpu.memory_space<vmem>>, vector<1x1024x384xbf16>
    %90 = vector.shape_cast %89 : vector<1x1024x384xbf16> to vector<1024x384xbf16>
    %91 = vector.shape_cast %90 : vector<1024x384xbf16> to vector<8x128x384xbf16>
    %92 = arith.truncf %88 : vector<8x8x128xf32> to vector<8x8x128xbf16>
    "tpu.trace_start"() <{level = 10 : i32, message = "hid,hdn->hin"}> : () -> ()
    %cst_35 = arith.constant dense<0.000000e+00> : vector<8x8x384xf32>
    %93 = tpu.matmul %92, %91, %cst_35 {dimension_numbers = #tpu.dot_dimension_numbers<[2], [1], [1], [2], [0, 0, 0, 1, 1, 2], [0], [0]>} : vector<8x8x128xbf16>, vector<8x128x384xbf16>, vector<8x8x384xf32> -> vector<8x8x384xf32>
    "tpu.trace_stop"() : () -> ()
    %cst_36 = arith.constant dense<0.000000e+00> : vector<8x384xf32>
    %94 = vector.multi_reduction <add>, %93, %cst_36 [0] : vector<8x8x384xf32> to vector<8x384xf32>
    %c0_37 = arith.constant 0 : index
    %c6528 = arith.constant 6528 : index
    %95 = vector.load %arg6[%c0_37, %c6528] : memref<1x7552xf32, #tpu.memory_space<vmem>>, vector<1x384xf32>
    %96 = vector.broadcast %95 : vector<1x384xf32> to vector<8x384xf32>
    %97 = arith.addf %94, %96 : vector<8x384xf32>
    %98 = arith.addf %97, %60 : vector<8x384xf32>
    %99 = arith.truncf %98 : vector<8x384xf32> to vector<8x384xbf16>
    %c0_38 = arith.constant 0 : index
    %c0_39 = arith.constant 0 : index
    %100 = vector.load %arg7[%c0_38, %c0_39] : memref<768x192xbf16, #tpu.memory_space<vmem>>, vector<384x192xbf16>
    %cst_40 = arith.constant dense<0.000000e+00> : vector<8x192xf32>
    %101 = tpu.matmul %99, %100, %cst_40 {dimension_numbers = #tpu.dot_dimension_numbers<[1], [0], [0], [1], [0, 0, 1, 1], [], []>} : vector<8x384xbf16>, vector<384x192xbf16>, vector<8x192xf32> -> vector<8x192xf32>
    %c0_41 = arith.constant 0 : index
    %c6912 = arith.constant 6912 : index
    %102 = vector.load %arg6[%c0_41, %c6912] : memref<1x7552xf32, #tpu.memory_space<vmem>>, vector<1x192xf32>
    %103 = vector.broadcast %102 : vector<1x192xf32> to vector<8x192xf32>
    %104 = arith.addf %101, %103 : vector<8x192xf32>
    %c4 = arith.constant 4 : index
    %105 = memref.load %arg0[%c4] : memref<8xf32, #tpu.memory_space<smem>>
    %cst_42 = arith.constant 0.000000e+00 : f32
    %106 = vector.broadcast %cst_42 : f32 to vector<8x192xf32>
    %107 = arith.cmpf oge, %104, %106 : vector<8x192xf32>
    %108 = vector.broadcast %105 : f32 to vector<8x192xf32>
    %109 = arith.mulf %108, %104 : vector<8x192xf32>
    %110 = arith.select %107, %104, %109 : vector<8x192xi1>, vector<8x192xf32>
    %111 = arith.truncf %110 : vector<8x192xf32> to vector<8x192xbf16>
    %c384 = arith.constant 384 : index
    %c0_43 = arith.constant 0 : index
    %112 = vector.load %arg7[%c384, %c0_43] : memref<768x192xbf16, #tpu.memory_space<vmem>>, vector<192x128xbf16>
    %cst_44 = arith.constant dense<0.000000e+00> : vector<8x128xf32>
    %113 = tpu.matmul %111, %112, %cst_44 {dimension_numbers = #tpu.dot_dimension_numbers<[1], [0], [0], [1], [0, 0, 1, 1], [], []>} : vector<8x192xbf16>, vector<192x128xbf16>, vector<8x128xf32> -> vector<8x128xf32>
    %c0_45 = arith.constant 0 : index
    %c7168 = arith.constant 7168 : index
    %114 = vector.load %arg6[%c0_45, %c7168] : memref<1x7552xf32, #tpu.memory_space<vmem>>, vector<1x128xf32>
    %115 = vector.broadcast %114 : vector<1x128xf32> to vector<8x128xf32>
    %116 = arith.addf %113, %115 : vector<8x128xf32>
    %c5 = arith.constant 5 : index
    %117 = memref.load %arg0[%c5] : memref<8xf32, #tpu.memory_space<smem>>
    %cst_46 = arith.constant 0.000000e+00 : f32
    %118 = vector.broadcast %cst_46 : f32 to vector<8x128xf32>
    %119 = arith.cmpf oge, %116, %118 : vector<8x128xf32>
    %120 = vector.broadcast %117 : f32 to vector<8x128xf32>
    %121 = arith.mulf %120, %116 : vector<8x128xf32>
    %122 = arith.select %119, %116, %121 : vector<8x128xi1>, vector<8x128xf32>
    %123 = arith.truncf %122 : vector<8x128xf32> to vector<8x128xbf16>
    %c576 = arith.constant 576 : index
    %c0_47 = arith.constant 0 : index
    %124 = vector.load %arg7[%c576, %c0_47] : memref<768x192xbf16, #tpu.memory_space<vmem>>, vector<128x64xbf16>
    %cst_48 = arith.constant dense<0.000000e+00> : vector<8x64xf32>
    %125 = tpu.matmul %123, %124, %cst_48 {dimension_numbers = #tpu.dot_dimension_numbers<[1], [0], [0], [1], [0, 0, 1, 1], [], []>} : vector<8x128xbf16>, vector<128x64xbf16>, vector<8x64xf32> -> vector<8x64xf32>
    %c0_49 = arith.constant 0 : index
    %c7296 = arith.constant 7296 : index
    %126 = vector.load %arg6[%c0_49, %c7296] : memref<1x7552xf32, #tpu.memory_space<vmem>>, vector<1x64xf32>
    %127 = vector.broadcast %126 : vector<1x64xf32> to vector<8x64xf32>
    %128 = arith.addf %125, %127 : vector<8x64xf32>
    %c6 = arith.constant 6 : index
    %129 = memref.load %arg0[%c6] : memref<8xf32, #tpu.memory_space<smem>>
    %cst_50 = arith.constant 0.000000e+00 : f32
    %130 = vector.broadcast %cst_50 : f32 to vector<8x64xf32>
    %131 = arith.cmpf oge, %128, %130 : vector<8x64xf32>
    %132 = vector.broadcast %129 : f32 to vector<8x64xf32>
    %133 = arith.mulf %132, %128 : vector<8x64xf32>
    %134 = arith.select %131, %128, %133 : vector<8x64xi1>, vector<8x64xf32>
    %135 = arith.truncf %134 : vector<8x64xf32> to vector<8x64xbf16>
    %c704 = arith.constant 704 : index
    %c0_51 = arith.constant 0 : index
    %136 = vector.load %arg7[%c704, %c0_51] : memref<768x192xbf16, #tpu.memory_space<vmem>>, vector<64x128xbf16>
    %cst_52 = arith.constant dense<0.000000e+00> : vector<8x128xf32>
    %137 = tpu.matmul %135, %136, %cst_52 {dimension_numbers = #tpu.dot_dimension_numbers<[1], [0], [0], [1], [0, 0, 1, 1], [], []>} : vector<8x64xbf16>, vector<64x128xbf16>, vector<8x128xf32> -> vector<8x128xf32>
    %c0_53 = arith.constant 0 : index
    %c7424 = arith.constant 7424 : index
    %138 = vector.load %arg6[%c0_53, %c7424] : memref<1x7552xf32, #tpu.memory_space<vmem>>, vector<1x128xf32>
    %139 = vector.broadcast %138 : vector<1x128xf32> to vector<8x128xf32>
    %140 = arith.addf %137, %139 : vector<8x128xf32>
    %c0_54 = arith.constant 0 : index
    %c0_55 = arith.constant 0 : index
    %141 = vector.load %arg8[%c0_54, %c0_55] : memref<8x128xf32, #tpu.memory_space<vmem>>, vector<8x128xf32>
    tpu.vector_store %arg8[%c0_54, %c0_55], %140 {strides = array<i32>} : memref<8x128xf32, #tpu.memory_space<vmem>>, vector<8x128xf32>,
    return
  }
}

</mosaic_0001>

<bundles_post_ra>
// kernel: tpu_custom_call.1
= control target key start
LH: loop header
LB: loop body
LE: loop exit
PB: predicated region body
PF: predicated region fallthrough
CT: control target
= control target key end

     0   :  { %13 = vsyncpa [#allocation5], 0  ;;  %s22622_s0 = inlined_call_operand.hbm [shape: f32[8], index: 0, kind: input, shape index: {}]   ;;  %s22623_s1 = inlined_call_operand.hbm [shape: bf16[136,128], index: 1, kind: input, shape index: {}]   ;;  %s22624_s2 = inlined_call_operand.hbm [shape: f32[16,136], index: 2, kind: input, shape index: {}]   ;;  %s22625_s3 = inlined_call_operand.hbm [shape: bf16[128,128], index: 3, kind: input, shape index: {}]   ;;  %s22626_s4 = inlined_call_operand.hbm [shape: bf16[2,384,3072], index: 4, kind: input, shape index: {}]   ;;  %s22627_s5 = inlined_call_operand.hbm [shape: bf16[2,1024,384], index: 5, kind: input, shape index: {}]   ;;  %s22628_s6 = inlined_call_operand.hbm [shape: f32[1,7552], index: 6, kind: input, shape index: {}]   ;;  %s22629_s7 = inlined_call_operand.vmem [shape: bf16[768,192], index: 7, kind: input, shape index: {}]   ;;  %s22630_s8 = inlined_call_operand.hbm [shape: f32[8,128], index: 8, kind: output, shape index: {}]  }
   0x1   :  { %14 = vsyncpa [#allocation3], 0 }
   0x2   :  { %15 = vsyncpa [#allocation8], 0 }
   0x3   :  { %16 = vsyncpa [#allocation11], 0 }
   0x4   :  { %17 = vsyncpa [#allocation14], 0 }
   0x5   :  { %18 = vsyncpa [#allocation4], 0  ;;  %s20986_s27 = smov [#allocation7]  }
   0x6   :  { %s44_s28 = sshll.u32 %s20986_s27, 4  ;;  %s45_s28 = int_to_ptr.vmem [resolvable:$true] %s44_s28 }
   0x7   :  { %s20834_s29 = scalar_lea.vmem %s45_s28, 512  ;;  %p20839_p1 = scmp.lt.s32.totalorder %s45_s28, %s45_s28 }
   0x8   :  { %p20835_p0 = scmp.ne.s32.totalorder %s45_s28, %s20834_s29  ;;  %p20840_p2 = scmp.lt.s32.totalorder %s20834_s29, %s20834_s29 }
   0xa   :  { %p20841_p3 = por %p20840_p2, %p20839_p1 }
   0xc   :  { %p20842_p4 = pnand %p20841_p3, %p20835_p0 }
   0xe   :  { %20845 = shalt.err (!%p20842_p4)
}
   0xf   :  { %s20987_s30 = smov 256   ;;  %s20988_s9 = smov 16  }
  0x10   :  { %50 = dma.hbm_to_vmem [thread:$0]  %s22624_s2, 512, %s45_s28, [#allocation8], %s20987_s30, %s20987_s30, %s20988_s9  }
  0x11   :  { %s20989_s12 = smov [#allocation10]  }
  0x12   :  { %s68_s13 = sshll.u32 %s20989_s12, 4  ;;  %s69_s13 = int_to_ptr.vmem [resolvable:$true] %s68_s13 }
  0x13   :  { %s20854_s14 = scalar_lea.vmem %s69_s13, 147456  ;;  %p20859_p6 = scmp.lt.s32.totalorder %s69_s13, %s69_s13 }
  0x14   :  { %p20855_p5 = scmp.ne.s32.totalorder %s69_s13, %s20854_s14  ;;  %p20860_p7 = scmp.lt.s32.totalorder %s20854_s14, %s20854_s14 }
  0x16   :  { %p20861_p8 = por %p20860_p7, %p20859_p6 }
  0x18   :  { %p20862_p9 = pnand %p20861_p8, %p20855_p5 }
  0x1a   :  { %20865 = shalt.err (!%p20862_p9)
}
  0x1b   :  { %s20990_s15 = smov 1536   ;;  %s20991_s16 = smov 96  }
  0x1c   :  { %74 = dma.hbm_to_vmem [thread:$0]  %s22626_s4, 147456, %s69_s13, [#allocation11], %s20990_s15, %s20990_s15, %s20991_s16  }
  0x1d   :  { %s20992_s19 = smov [#allocation2]   ;;  %s20993_s2 = smov [#allocation6]  }
  0x1e   :  { %26 = dma.hbm_to_smem %s22622_s0, 16, %s20992_s19, [#allocation5]  }
  0x1f   :  { %s32_s22 = sshll.u32 %s20993_s2, 4  ;;  %s33_s22 = int_to_ptr.vmem [resolvable:$true] %s32_s22 }
  0x20   :  { %s20882_s23 = scalar_lea.vmem %s33_s22, 1088  ;;  %p20887_p11 = scmp.lt.s32.totalorder %s33_s22, %s33_s22 }
  0x21   :  { %p20883_p10 = scmp.ne.s32.totalorder %s33_s22, %s20882_s23  ;;  %p20888_p12 = scmp.lt.s32.totalorder %s20882_s23, %s20882_s23 }
  0x23   :  { %p20889_p13 = por %p20888_p12, %p20887_p11 }
  0x25   :  { %p20890_p0 = pnand %p20889_p13, %p20883_p10 }
  0x27   :  { %20893 = shalt.err (!%p20890_p0)
}
  0x28   :  { %s20994_s24 = smov 64   ;;  %s20995_s25 = smov 4  }
  0x29   :  { %38 = dma.hbm_to_vmem [thread:$0]  %s22623_s1, 1088, %s33_s22, [#allocation3], %s20994_s24, %s20994_s24, %s20995_s25  }
  0x2a   :  { %s20996_s4 = smov [#allocation9]   ;;  %s20997_s29 = smov [#allocation12]  }
  0x2b   :  { %s56_s28 = sshll.u32 %s20996_s4, 4  ;;  %s80_s0 = sshll.u32 %s20997_s29, 4  ;;  %s57_s28 = int_to_ptr.vmem [resolvable:$true] %s56_s28  ;;  %s81_s0 = int_to_ptr.vmem [resolvable:$true] %s80_s0 }
  0x2c   :  { %s20902_s30 = scalar_lea.vmem %s57_s28, 1024  ;;  %p20907_p2 = scmp.lt.s32.totalorder %s57_s28, %s57_s28 }
  0x2d   :  { %p20903_p1 = scmp.ne.s32.totalorder %s57_s28, %s20902_s30  ;;  %p20908_p3 = scmp.lt.s32.totalorder %s20902_s30, %s20902_s30 }
  0x2f   :  { %p20909_p4 = por %p20908_p3, %p20907_p2 }
  0x31   :  { %p20910_p5 = pnand %p20909_p4, %p20903_p1 }
  0x33   :  { %20913 = shalt.err (!%p20910_p5)
}
  0x34   :  { %62 = dma.hbm_to_vmem [thread:$0]  %s22625_s3, 1024, %s57_s28, [#allocation8], %s20994_s24, %s20994_s24, %s20995_s25  }
  0x35   :  { %s20922_s11 = scalar_lea.vmem %s81_s0, 49152  ;;  %p20927_p7 = scmp.lt.s32.totalorder %s81_s0, %s81_s0 }
  0x36   :  { %p20923_p6 = scmp.ne.s32.totalorder %s81_s0, %s20922_s11  ;;  %p20928_p8 = scmp.lt.s32.totalorder %s20922_s11, %s20922_s11 }
  0x38   :  { %p20929_p9 = por %p20928_p8, %p20927_p7 }
  0x3a   :  { %p20930_p10 = pnand %p20929_p9, %p20923_p6 }
  0x3c   :  { %20933 = shalt.err (!%p20930_p10)
}
  0x3d   :  { %s20998_s1 = smov 192   ;;  %s20999_s12 = smov 12  }
  0x3e   :  { %86 = dma.hbm_to_vmem [thread:$0]  %s22627_s5, 49152, %s81_s0, [#allocation11], %s20998_s1, %s20998_s1, %s20999_s12  }
  0x3f   :  { %s21000_s15 = smov [#allocation13]  }
  0x40   :  { %s93_s16 = sshll.u32 %s21000_s15, 4  ;;  %s94_s16 = int_to_ptr.vmem [resolvable:$true] %s93_s16 }
  0x41   :  { %s20942_s17 = scalar_lea.vmem %s94_s16, 944  ;;  %s20946_s18 = scalar_lea.vmem %s94_s16, 960 }
  0x42   :  { %p20943_p11 = scmp.ne.s32.totalorder %s94_s16, %s20942_s17  ;;  %p20947_p12 = scmp.lt.s32.totalorder %s94_s16, %s94_s16 }
  0x43   :  { %p20948_p13 = scmp.lt.s32.totalorder %s20946_s18, %s20942_s17 }
  0x45   :  { %p20949_p0 = por %p20948_p13, %p20947_p12 }
  0x47   :  { %p20950_p1 = pnand %p20949_p0, %p20943_p11 }
  0x49   :  { %20953 = shalt.err (!%p20950_p1)
}
  0x4a   :  { %96 = dma.hbm_to_vmem [thread:$0]  %s22628_s6, 944, %s94_s16, [#allocation14]  }
  0x4b   :  { %20974 = dma.done.wait [#allocation5], 16  }
  0x4c   :  { %20975 = vsyncadd [#allocation5], 4294967280 }
  0x4d   :  { %20976 = dma.done.wait [#allocation3], 1088  }
  0x4e   :  { %20977 = vsyncadd [#allocation3], 4294966208 }
  0x4f   :  { %20978 = dma.done.wait [#allocation8], 1536  }
  0x50   :  { %20979 = vsyncadd [#allocation8], 4294965760 }
  0x51   :  { %20980 = dma.done.wait [#allocation11], 196608  }
  0x52   :  { %20981 = vsyncadd [#allocation11], 4294770688 }
  0x53   :  { %20982 = dma.done.wait [#allocation14], 944  }
  0x54   :  { %20983 = vsyncadd [#allocation14], 4294966352 }
  0x55   :  { %120 = sfence }
  0x56   :  { %v20134_v0 = vld [vmem:[#allocation9 + $0x38] sm:$0xff]   ;;  %v21001_v1 = vmov 0.0   ;;  %v20135_v2 = vld [vmem:[#allocation9 + $0x30] sm:$0xff]   ;;  %vm21002_vm0 = vmmov 0   ;;  %v20136_v3 = vld [vmem:[#allocation9 + $0x28] sm:$0xff]   ;;  %vm367_vm1 = vcmask 64512  }
  0x57   :  { %19517 = vmatprep.subr.bf16.mxu0 %v21001_v1  ;;  %374 = vmatprep.subr.mxu1 %v21001_v1  ;;  %v20137_v4 = vld [vmem:[#allocation9 + $0x20] sm:$0xff]   ;;  %v20138_v5 = vld [vmem:[#allocation9 + $0x18] sm:$0xff]   ;;  %v20139_v6 = vld [vmem:[#allocation9 + $0x10] sm:$0xff]   ;;  %s122_s5 = sld [smem:[#allocation2]]  ;;  %vm6288_vm2 = vcmask 1043456   ;;  %vm17307_vm5 = vcmask 523264  }
  0x58   :  { %19518 = vmatpush3.bf16.msra.mxu0 %v20134_v0  ;;  %19533 = vmatprep.mubr.msk.bf16.mxu0 %vm21002_vm0, %v21001_v1  ;;  %v20140_v7 = vld [vmem:[#allocation9 + $0x8] sm:$0xff]   ;;  %v20141_v8 = vld [vmem:[#allocation9] sm:$0xff]   ;;  %v20145_v12 = vld [vmem:[#allocation6 + $0x18] sm:$0xff]   ;;  %s17577_s6 = sld [smem:[#allocation2 + $0x2]]  ;;  %s21006_s23 = smov [#allocation15]  }
  0x59   :  { %19519 = vmatprep.subr.bf16.mxu0 %v21001_v1  ;;  %v20142_v9 = vld [vmem:[#allocation6] sm:$0xff]   ;;  %v20143_v10 = vld [vmem:[#allocation6 + $0x8] sm:$0xff]   ;;  %v20144_v11 = vld [vmem:[#allocation6 + $0x10] sm:$0xff]   ;;  %s17576_s20 = sld [smem:[#allocation2 + $0x1]]  ;;  %s17563_s24 = sshll.u32 %s21006_s23, 4  ;;  %s17564_s24 = int_to_ptr.vmem [resolvable:$true] %s17563_s24 }
  0x5a   :  { %v20146_v13 = vld [vmem:[#allocation6 + $0x20] sm:$0xff]   ;;  %v20147_v14 = vld [vmem:[#allocation6 + $0x28] sm:$0xff]   ;;  %v20148_v15 = vld [vmem:[#allocation6 + $0x30] sm:$0xff]   ;;  %s17578_s21 = sld [smem:[#allocation2 + $0x3]]  ;;  %p20959_p3 = scmp.lt.s32.totalorder %s17564_s24, %s17564_s24 }
  0x5b   :  { %v20149_v16 = vld [vmem:[#allocation6 + $0x38] sm:$0xff]   ;;  %v20150_v17 = vld [vmem:[#allocation6 + $0x40] ss:$0 sps:$4 sm:$0xff]   ;;  %v364_v18 = vld [vmem:[#allocation7 + $0x8] sm:$0xff]  ;;  %s19246_s12 = sld [smem:[#allocation2 + $0x4]] }
  0x5c   :  { %19520 = vmatpush3.bf16.msra.mxu0 %v20135_v2  ;;  %17596 = vmatprep.mubr.msk.f32.mxu1 %vm367_vm1, %v364_v18  ;;  %v1015_v19 = vld [vmem:[#allocation10 + $0x1140] sm:$0xff]  ;;  %s19271_s22 = sld [smem:[#allocation2 + $0x6]] }
  0x5d   :  { %19521 = vmatprep.subr.bf16.mxu0 %v21001_v1  ;;  %v1027_v20 = vld [vmem:[#allocation10 + $0x11a0] sm:$0xff] }
  0x5e   :  { %v991_v21 = vld [vmem:[#allocation10 + $0x1080] sm:$0xff]  ;;  %v18150_v22 = vcombine.low %v1015_v19, %v1027_v20  ;;  %v18151_v23 = vcombine.high %v1015_v19, %v1027_v20 }
  0x5f   :  { %v1003_v24 = vld [vmem:[#allocation10 + $0x10e0] sm:$0xff] }
  0x60   :  { %19522 = vmatpush3.bf16.msra.mxu0 %v20136_v3  ;;  %v18127_v25 = vcombine.high %v991_v21, %v1003_v24  ;;  %v967_v26 = vld [vmem:[#allocation10 + $0xfc0] sm:$0xff]  ;;  %v18126_v28 = vcombine.low %v991_v21, %v1003_v24 }
  0x61   :  { %19523 = vmatprep.subr.bf16.mxu0 %v21001_v1  ;;  %v979_v27 = vld [vmem:[#allocation10 + $0x1020] sm:$0xff] }
  0x62   :  { %v18103_v29 = vcombine.high %v967_v26, %v979_v27  ;;  %v18102_v30 = vcombine.low %v967_v26, %v979_v27  ;;  %v943_v31 = vld [vmem:[#allocation10 + $0xf00] sm:$0xff]  ;;  %v366_v27 = vld [vmem:[#allocation7 + $0x18] sm:$0xff] }
  0x63   :  { %v955_v32 = vld [vmem:[#allocation10 + $0xf60] sm:$0xff] }
  0x64   :  { %19524 = vmatpush3.bf16.msra.mxu0 %v20137_v4  ;;  %v18078_v33 = vcombine.low %v943_v31, %v955_v32  ;;  %v18079_v34 = vcombine.high %v943_v31, %v955_v32  ;;  %v919_v35 = vld [vmem:[#allocation10 + $0xe40] sm:$0xff]  ;;  %v365_v31 = vld [vmem:[#allocation7 + $0x10] sm:$0xff] }
  0x65   :  { %19525 = vmatprep.subr.bf16.mxu0 %v21001_v1  ;;  %v931_v36 = vld [vmem:[#allocation10 + $0xea0] sm:$0xff] }
  0x66   :  { %v18054_v37 = vcombine.low %v919_v35, %v931_v36  ;;  %v18055_v38 = vcombine.high %v919_v35, %v931_v36  ;;  %v895_v39 = vld [vmem:[#allocation10 + $0xd80] sm:$0xff] }
  0x67   :  { %v907_v40 = vld [vmem:[#allocation10 + $0xde0] sm:$0xff] }
  0x68   :  { %19526 = vmatpush3.bf16.msra.mxu0 %v20138_v5  ;;  %v18030_v42 = vcombine.low %v895_v39, %v907_v40  ;;  %v18031_v43 = vcombine.high %v895_v39, %v907_v40  ;;  %v871_v48 = vld [vmem:[#allocation10 + $0xcc0] sm:$0xff] }
  0x69   :  { %19527 = vmatprep.subr.bf16.mxu0 %v21001_v1  ;;  %v883_v49 = vld [vmem:[#allocation10 + $0xd20] sm:$0xff] }
  0x6a   :  { %v18006_v50 = vcombine.low %v871_v48, %v883_v49  ;;  %v18007_v51 = vcombine.high %v871_v48, %v883_v49  ;;  %v631_v20 = vld [vmem:[#allocation10 + $0x540] sm:$0xff] }
  0x6b   :  { %v643_v21 = vld [vmem:[#allocation10 + $0x5a0] sm:$0xff] }
  0x6c   :  { %19528 = vmatpush3.bf16.msra.mxu0 %v20139_v6  ;;  %v17767_v24 = vcombine.high %v631_v20, %v643_v21  ;;  %v17766_v26 = vcombine.low %v631_v20, %v643_v21  ;;  %v571_v35 = vld [vmem:[#allocation10 + $0x360] sm:$0xff] }
  0x6d   :  { %19529 = vmatprep.subr.bf16.mxu0 %v21001_v1  ;;  %v547_v39 = vld [vmem:[#allocation10 + $0x2a0] sm:$0xff] }
  0x70   :  { %19530 = vmatpush3.bf16.msra.mxu0 %v20140_v7 }
  0x71   :  { %19531 = vmatprep.subr.bf16.mxu0 %v21001_v1 }
  0x74   :  { %19532 = vmatpush3.bf16.msra.mxu0 %v20141_v8 }
  0x75   :  { %4086 = vmatprep.subr.bf16.mxu0 %v18151_v23  ;;  %v619_v23 = vld [vmem:[#allocation10 + $0x4e0] sm:$0xff] }
  0x77   :  { %19534 = vmatmul.mubr.bf16.vlgmr.msra.gmra.mxu0 %v20142_v9 }
  0x78   :  { %19537 = vmatprep.mubr.msk.bf16.mxu0 %vm21002_vm0, %v21001_v1  ;;  %4087 = vmatpush1.bf16.msra.mxu0 %v18150_v22  ;;  %v607_v22 = vld [vmem:[#allocation10 + $0x480] sm:$0xff] }
  0x79   :  { %4088 = vmatprep.subr.bf16.mxu0 %v18127_v25  ;;  %v363_v25 = vld [vmem:[#allocation7] sm:$0xff]  ;;  %v17742_v32 = vcombine.low %v607_v22, %v619_v23 }
  0x7c   :  { %4089 = vmatpush1.bf16.msra.mxu0 %v18126_v28  ;;  %v17743_v28 = vcombine.high %v607_v22, %v619_v23 }
  0x7d   :  { %4090 = vmatprep.subr.bf16.mxu0 %v18103_v29  ;;  %v583_v29 = vld [vmem:[#allocation10 + $0x3c0] sm:$0xff] }
  0x7f   :  { %19538 = vmatmul.mubr.bf16.gmra.mxu0 %v20143_v10 }
  0x80   :  { %19541 = vmatprep.mubr.msk.bf16.mxu0 %vm21002_vm0, %v21001_v1  ;;  %4091 = vmatpush1.bf16.msra.mxu0 %v18102_v30  ;;  %v595_v30 = vld [vmem:[#allocation10 + $0x420] sm:$0xff] }
  0x81   :  { %4092 = vmatprep.subr.bf16.mxu0 %v18079_v34  ;;  %v559_v34 = vld [vmem:[#allocation10 + $0x300] sm:$0xff]  ;;  %v17718_v36 = vcombine.low %v583_v29, %v595_v30 }
  0x82   :  { %v17694_v40 = vcombine.low %v559_v34, %v571_v35 }
  0x84   :  { %4093 = vmatpush1.bf16.msra.mxu0 %v18078_v33  ;;  %v17719_v33 = vcombine.high %v583_v29, %v595_v30 }
  0x85   :  { %4094 = vmatprep.subr.bf16.mxu0 %v18055_v38  ;;  %v535_v38 = vld [vmem:[#allocation10 + $0x240] sm:$0xff] }
  0x87   :  { %19542 = vmatmul.mubr.bf16.gmra.mxu0 %v20144_v11 }
  0x88   :  { %19545 = vmatprep.mubr.msk.bf16.mxu0 %vm21002_vm0, %v21001_v1  ;;  %4095 = vmatpush1.bf16.msra.mxu0 %v18054_v37  ;;  %v17695_v37 = vcombine.high %v559_v34, %v571_v35  ;;  %v644_v34 = vld [vmem:[#allocation10 + $0x5a8] sm:$0xff] }
  0x89   :  { %4096 = vmatprep.subr.bf16.mxu0 %v18031_v43  ;;  %v523_v43 = vld [vmem:[#allocation10 + $0x1e0] sm:$0xff] }
  0x8c   :  { %4097 = vmatpush1.bf16.msra.mxu0 %v18030_v42  ;;  %v511_v42 = vld [vmem:[#allocation10 + $0x180] sm:$0xff] }
  0x8d   :  { %4098 = vmatprep.subr.bf16.mxu0 %v18007_v51  ;;  %v17646_v48 = vcombine.low %v511_v42, %v523_v43  ;;  %v475_v51 = vld [vmem:[#allocation10 + $0x60] sm:$0xff] }
  0x8f   :  { %19546 = vmatmul.mubr.bf16.gmra.mxu0 %v20145_v12 }
  0x90   :  { %19549 = vmatprep.mubr.msk.bf16.mxu0 %vm21002_vm0, %v21001_v1  ;;  %4099 = vmatpush1.bf16.msra.mxu0 %v18006_v50  ;;  %v463_v50 = vld [vmem:[#allocation10] sm:$0xff] }
  0x97   :  { %19550 = vmatmul.mubr.bf16.gmra.mxu0 %v20146_v13 }
  0x98   :  { %19553 = vmatprep.mubr.msk.bf16.mxu0 %vm21002_vm0, %v21001_v1 }
  0x9f   :  { %19554 = vmatmul.mubr.bf16.gmra.mxu0 %v20147_v14 }
  0xa0   :  { %19557 = vmatprep.mubr.msk.bf16.mxu0 %vm21002_vm0, %v21001_v1 }
  0xa7   :  { %19558 = vmatmul.mubr.bf16.gmra.mxu0 %v20148_v15 }
  0xa8   :  { %19561 = vmatprep.mubr.msk.bf16.mxu0 %vm21002_vm0, %v21001_v1 }
  0xaf   :  { %19562 = vmatmul.mubr.bf16.gmra.mxu0 %v20149_v16 }
  0xb0   :  { %19565 = vmatprep.mubr.msk.bf16.mxu0 %vm21002_vm0, %v21001_v1 }
  0xb7   :  { %19566 = vmatmul.mubr.bf16.gmra.mxu0 %v20150_v17 }
 0x137   :  { %v21101_v41 = vpop.f32.mrf.mxu0 }
 0x139   :  { %v19535_v44 = vpop.f32.mrf.mxu0 }
 0x13a   :  { %v17670_v44 = vcombine.low %v535_v38, %v547_v39 }
 0x13b   :  { %v21103_v45 = vpop.f32.mrf.mxu0 }
 0x13d   :  { %v19536_v46 = vpop.f32.mrf.mxu0 }
 0x13e   :  { %v487_v46 = vld [vmem:[#allocation10 + $0xc0] sm:$0xff] }
 0x13f   :  { %v21105_v47 = vpop.f32.mrf.mxu0 }
 0x141   :  { %v19539_v52 = vpop.f32.mrf.mxu0 }
 0x143   :  { %v304_v53 = vpop.f32.mrf.mxu0 }
 0x145   :  { %v19540_v54 = vpop.f32.mrf.mxu0 }
 0x146   :  { %v823_v54 = vld [vmem:[#allocation10 + $0xb40] sm:$0xff] }
 0x147   :  { %v309_v55 = vpop.f32.mrf.mxu0 }
 0x149   :  { %v19543_v56 = vpop.f32.mrf.mxu0 }
 0x14a   :  { %v17598_v56 = vcombine.low %v463_v50, %v475_v51 }
 0x14b   :  { %v312_v57 = vpop.f32.mrf.mxu0 }
 0x14d   :  { %v19544_v58 = vpop.f32.mrf.mxu0 }
 0x14e   :  { %v799_v58 = vld [vmem:[#allocation10 + $0xa80] sm:$0xff] }
 0x14f   :  { %v317_v59 = vpop.f32.mrf.mxu0 }
 0x151   :  { %v19547_v60 = vpop.f32.mrf.mxu0 }
 0x153   :  { %v320_v61 = vpop.f32.mrf.mxu0 }
 0x155   :  { %v19548_v62 = vpop.f32.mrf.mxu0 }
 0x156   :  { %v775_v62 = vld [vmem:[#allocation10 + $0x9c0] sm:$0xff] }
 0x157   :  { %v325_v63 = vpop.f32.mrf.mxu0 }
 0x159   :  { %v19551_v0 = vpop.f32.mrf.mxu0 }
 0x15b   :  { %v328_v2 = vpop.f32.mrf.mxu0 }
 0x15d   :  { %v19552_v3 = vpop.f32.mrf.mxu0 }
 0x15e   :  { %v751_v3 = vld [vmem:[#allocation10 + $0x900] sm:$0xff] }
 0x15f   :  { %v333_v4 = vpop.f32.mrf.mxu0 }
 0x161   :  { %v19555_v5 = vpop.f32.mrf.mxu0 }
 0x163   :  { %v336_v6 = vpop.f32.mrf.mxu0 }
 0x165   :  { %v19556_v7 = vpop.f32.mrf.mxu0 }
 0x166   :  { %v727_v7 = vld [vmem:[#allocation10 + $0x840] sm:$0xff] }
 0x167   :  { %v341_v8 = vpop.f32.mrf.mxu0 }
 0x169   :  { %v19559_v9 = vpop.f32.mrf.mxu0 }
 0x16b   :  { %v344_v10 = vpop.f32.mrf.mxu0 }
 0x16d   :  { %v19560_v11 = vpop.f32.mrf.mxu0 }
 0x16e   :  { %v703_v11 = vld [vmem:[#allocation10 + $0x780] sm:$0xff] }
 0x16f   :  { %v349_v12 = vpop.f32.mrf.mxu0 }
 0x171   :  { %v19563_v13 = vpop.f32.mrf.mxu0 }
 0x173   :  { %v352_v14 = vpop.f32.mrf.mxu0 }
 0x174   :  { %375 = vmatpush1.msra.mxu1 %v352_v14 }
 0x175   :  { %v19564_v15 = vpop.f32.mrf.mxu0  ;;  %376 = vmatprep.subr.mxu1 %v21001_v1 }
 0x176   :  { %377 = vmatpush1.msra.mxu1 %v349_v12  ;;  %v715_v12 = vld [vmem:[#allocation10 + $0x7e0] sm:$0xff] }
 0x177   :  { %378 = vmatprep.subr.mxu1 %v21001_v1  ;;  %v357_v16 = vpop.f32.mrf.mxu0  ;;  %v17839_v14 = vcombine.high %v703_v11, %v715_v12  ;;  %v17838_v15 = vcombine.low %v703_v11, %v715_v12  ;;  %v572_v11 = vld [vmem:[#allocation10 + $0x368] sm:$0xff] }
 0x178   :  { %379 = vmatpush1.msra.mxu1 %v344_v10  ;;  %v920_v12 = vld [vmem:[#allocation10 + $0xe48] sm:$0xff] }
 0x179   :  { %380 = vmatprep.subr.mxu1 %v21001_v1  ;;  %v19567_v17 = vpop.f32.mrf.mxu0 }
 0x17a   :  { %381 = vmatpush1.msra.mxu1 %v341_v8  ;;  %v739_v8 = vld [vmem:[#allocation10 + $0x8a0] sm:$0xff] }
 0x17b   :  { %382 = vmatprep.subr.mxu1 %v21001_v1  ;;  %v360_v18 = vpop.f32.mrf.mxu0  ;;  %v17863_v10 = vcombine.high %v727_v7, %v739_v8  ;;  %v17862_v13 = vcombine.low %v727_v7, %v739_v8  ;;  %v691_v17 = vld [vmem:[#allocation10 + $0x720] sm:$0xff] }
 0x17c   :  { %383 = vmatpush1.msra.mxu1 %v336_v6  ;;  %v847_v18 = vld [vmem:[#allocation10 + $0xc00] sm:$0xff] }
 0x17d   :  { %384 = vmatprep.subr.mxu1 %v21001_v1  ;;  %v19568_v19 = vpop.f32.mrf.mxu0 }
 0x17e   :  { %385 = vmatpush1.msra.mxu1 %v333_v4  ;;  %v763_v4 = vld [vmem:[#allocation10 + $0x960] sm:$0xff] }
 0x17f   :  { %386 = vmatprep.subr.mxu1 %v21001_v1  ;;  %v17887_v6 = vcombine.high %v751_v3, %v763_v4  ;;  %v17886_v9 = vcombine.low %v751_v3, %v763_v4  ;;  %v859_v19 = vld [vmem:[#allocation10 + $0xc60] sm:$0xff]  ;;  %v596_v3 = vld [vmem:[#allocation10 + $0x428] sm:$0xff] }
 0x180   :  { %387 = vmatpush1.msra.mxu1 %v328_v2  ;;  %v17982_v21 = vcombine.low %v847_v18, %v859_v19  ;;  %v17983_v22 = vcombine.high %v847_v18, %v859_v19  ;;  %v944_v4 = vld [vmem:[#allocation10 + $0xf08] sm:$0xff] }
 0x181   :  { %388 = vmatprep.subr.mxu1 %v21001_v1  ;;  %v536_v18 = vld [vmem:[#allocation10 + $0x248] sm:$0xff] }
 0x182   :  { %389 = vmatpush1.msra.mxu1 %v325_v63  ;;  %v787_v63 = vld [vmem:[#allocation10 + $0xa20] sm:$0xff]  ;;  %4100 = vmatprep.subr.bf16.mxu0 %v17983_v22  ;;  %v548_v19 = vld [vmem:[#allocation10 + $0x2a8] sm:$0xff] }
 0x183   :  { %390 = vmatprep.subr.mxu1 %v21001_v1  ;;  %v17911_v2 = vcombine.high %v775_v62, %v787_v63  ;;  %v17910_v5 = vcombine.low %v775_v62, %v787_v63  ;;  %4101 = vmatpush1.bf16.msra.mxu0 %v17982_v21  ;;  %v908_v21 = vld [vmem:[#allocation10 + $0xde8] sm:$0xff] }
 0x184   :  { %391 = vmatpush1.msra.mxu1 %v320_v61 }
 0x185   :  { %392 = vmatprep.subr.mxu1 %v21001_v1 }
 0x186   :  { %393 = vmatpush1.msra.mxu1 %v317_v59  ;;  %v811_v59 = vld [vmem:[#allocation10 + $0xae0] sm:$0xff] }
 0x187   :  { %394 = vmatprep.subr.mxu1 %v21001_v1  ;;  %v17935_v61 = vcombine.high %v799_v58, %v811_v59  ;;  %v17934_v0 = vcombine.low %v799_v58, %v811_v59  ;;  %v968_v58 = vld [vmem:[#allocation10 + $0xfc8] sm:$0xff] }
 0x188   :  { %395 = vmatpush1.msra.mxu1 %v312_v57  ;;  %v980_v59 = vld [vmem:[#allocation10 + $0x1028] sm:$0xff] }
 0x189   :  { %396 = vmatprep.subr.mxu1 %v21001_v1  ;;  %v18104_v7 = vcombine.low %v968_v58, %v980_v59 }
 0x18a   :  { %397 = vmatpush1.msra.mxu1 %v309_v55  ;;  %v835_v55 = vld [vmem:[#allocation10 + $0xba0] sm:$0xff] }
 0x18b   :  { %398 = vmatprep.subr.mxu1 %v21001_v1  ;;  %v17959_v57 = vcombine.high %v823_v54, %v835_v55  ;;  %v17958_v60 = vcombine.low %v823_v54, %v835_v55 }
 0x18c   :  { %399 = vmatpush1.msra.mxu1 %v304_v53  ;;  %v17599_v53 = vcombine.high %v463_v50, %v475_v51 }
 0x18d   :  { %400 = vmatprep.subr.mxu1 %v21001_v1 }
 0x18e   :  { %401 = vmatpush1.msra.mxu1 %v21105_v47  ;;  %v499_v47 = vld [vmem:[#allocation10 + $0x120] sm:$0xff] }
 0x18f   :  { %402 = vmatprep.subr.mxu1 %v21001_v1  ;;  %v17623_v49 = vcombine.high %v487_v46, %v499_v47  ;;  %v17622_v52 = vcombine.low %v487_v46, %v499_v47  ;;  %v1004_v46 = vld [vmem:[#allocation10 + $0x10e8] sm:$0xff] }
 0x190   :  { %403 = vmatpush1.msra.mxu1 %v21103_v45  ;;  %v17647_v45 = vcombine.high %v511_v42, %v523_v43  ;;  %v456_v42 = vstv %s17578_s21 }
 0x191   :  { %404 = vmatprep.subr.mxu1 %v21001_v1 }
 0x192   :  { %405 = vmatpush1.msra.mxu1 %v21101_v41  ;;  %v17671_v41 = vcombine.high %v535_v38, %v547_v39  ;;  %v449_v38 = vstv %s122_s5  ;;  %v454_v39 = vstv %s17577_s6  ;;  %s19261_s5 = sld [smem:[#allocation2 + $0x5]] }
 0x193   :  { %436 = vmatprep.subr.mxu1 %v21001_v1 }
 0x194   :  { %437 = vmatpush2.msra.mxu1 %v357_v16  ;;  %v679_v16 = vld [vmem:[#allocation10 + $0x6c0] sm:$0xff] }
 0x195   :  { %439 = vmatmul.mubr.f32.vlgmr.msra.gmra.mxu1 %v363_v25  ;;  %4045 = vmatprep.subr.bf16.mxu1 %v17767_v24  ;;  %v17815_v20 = vcombine.high %v679_v16, %v691_v17  ;;  %v17814_v23 = vcombine.low %v679_v16, %v691_v17  ;;  %v655_v24 = vld [vmem:[#allocation10 + $0x600] sm:$0xff] }
 0x196   :  { %17597 = vmatprep.mubr.msk.f32.mxu1 %vm367_vm1, %v366_v27  ;;  %4046 = vmatpush1.bf16.msra.mxu1 %v17766_v26  ;;  %v667_v25 = vld [vmem:[#allocation10 + $0x660] sm:$0xff]  ;;  %v1016_v27 = vld [vmem:[#allocation10 + $0x1148] sm:$0xff] }
 0x197   :  { %4047 = vmatprep.subr.bf16.mxu1 %v17743_v28  ;;  %v17791_v26 = vcombine.high %v655_v24, %v667_v25  ;;  %v1028_v28 = vld [vmem:[#allocation10 + $0x11a8] sm:$0xff]  ;;  %v17790_v29 = vcombine.low %v655_v24, %v667_v25  ;;  %v17673_v24 = vcombine.high %v536_v18, %v548_v19 }
 0x198   :  { %v18153_v30 = vcombine.high %v1016_v27, %v1028_v28 }
 0x199   :  { %444 = vmatmul.mubr.f32.gmra.mxu1 %v365_v31  ;;  %v18152_v31 = vcombine.low %v1016_v27, %v1028_v28  ;;  %v524_v27 = vld [vmem:[#allocation10 + $0x1e8] sm:$0xff] }
 0x19a   :  { %4048 = vmatpush1.bf16.msra.mxu1 %v17742_v32  ;;  %v21003_v32 = vmov 0   ;;  %4168 = vmatprep.subr.bf16.mxu0 %v18153_v30  ;;  %v872_v28 = vld [vmem:[#allocation10 + $0xcc8] sm:$0xff]  ;;  %v17672_v30 = vcombine.low %v536_v18, %v548_v19 }
 0x19b   :  { %4049 = vmatprep.subr.bf16.mxu1 %v17719_v33  ;;  %4118 = vmatprep.mubr.bf16.mxu0 %v21003_v32  ;;  %v632_v33 = vld [vmem:[#allocation10 + $0x548] sm:$0xff] }
 0x19c   :  { %v17769_v35 = vcombine.high %v632_v33, %v644_v34  ;;  %v752_v18 = vld [vmem:[#allocation10 + $0x908] sm:$0xff] }
 0x19d   :  { %v764_v19 = vld [vmem:[#allocation10 + $0x968] sm:$0xff] }
 0x19e   :  { %4050 = vmatpush1.bf16.msra.mxu1 %v17718_v36  ;;  %v17768_v36 = vcombine.low %v632_v33, %v644_v34 }
 0x19f   :  { %4051 = vmatprep.subr.bf16.mxu1 %v17695_v37 }
 0x1a2   :  { %4052 = vmatpush1.bf16.msra.mxu1 %v17694_v40 }
 0x1a3   :  { %4053 = vmatprep.subr.bf16.mxu1 %v17671_v41  ;;  %v451_v41 = vstv %s17576_s20 }
 0x1a6   :  { %4054 = vmatpush1.bf16.msra.mxu1 %v17670_v44 }
 0x1a7   :  { %4055 = vmatprep.subr.bf16.mxu1 %v17647_v45  ;;  %v992_v45 = vld [vmem:[#allocation10 + $0x1088] sm:$0xff] }
 0x1a8   :  { %v18129_v55 = vcombine.high %v992_v45, %v1004_v46  ;;  %v18128_v62 = vcombine.low %v992_v45, %v1004_v46  ;;  %v633_v45 = vld [vmem:[#allocation10 + $0x550] sm:$0xff] }
 0x1a9   :  { %v645_v46 = vld [vmem:[#allocation10 + $0x5b0] sm:$0xff] }
 0x1aa   :  { %4056 = vmatpush1.bf16.msra.mxu1 %v17646_v48 }
 0x1ab   :  { %4057 = vmatprep.subr.bf16.mxu1 %v17623_v49 }
 0x1ae   :  { %4058 = vmatpush1.bf16.msra.mxu1 %v17622_v52 }
 0x1af   :  { %4059 = vmatprep.subr.bf16.mxu1 %v17599_v53 }
 0x1b2   :  { %4060 = vmatpush1.bf16.msra.mxu1 %v17598_v56  ;;  %v608_v56 = vld [vmem:[#allocation10 + $0x488] sm:$0xff] }
 0x1b3   :  { %4061 = vmatprep.subr.bf16.mxu1 %v17959_v57  ;;  %v620_v57 = vld [vmem:[#allocation10 + $0x4e8] sm:$0xff] }
 0x1b4   :  { %v17745_v63 = vcombine.high %v608_v56, %v620_v57 }
 0x1b6   :  { %4062 = vmatpush2.bf16.msra.mxu1 %v17958_v60 }
 0x1b7   :  { %4063 = vmatprep.subr.bf16.mxu1 %v17935_v61 }
 0x1ba   :  { %4064 = vmatpush2.bf16.msra.mxu1 %v17934_v0  ;;  %v18105_v0 = vcombine.high %v968_v58, %v980_v59  ;;  %v621_v58 = vld [vmem:[#allocation10 + $0x4f0] sm:$0xff] }
 0x1bb   :  { %4065 = vmatprep.subr.bf16.mxu1 %v17911_v2  ;;  %v584_v2 = vld [vmem:[#allocation10 + $0x3c8] sm:$0xff] }
 0x1bc   :  { %v17721_v8 = vcombine.high %v584_v2, %v596_v3 }
 0x1be   :  { %4066 = vmatpush2.bf16.msra.mxu1 %v17910_v5  ;;  %v956_v5 = vld [vmem:[#allocation10 + $0xf68] sm:$0xff] }
 0x1bf   :  { %4067 = vmatprep.subr.bf16.mxu1 %v17887_v6  ;;  %v17744_v6 = vcombine.low %v608_v56, %v620_v57  ;;  %v836_v56 = vld [vmem:[#allocation10 + $0xba8] sm:$0xff]  ;;  %v609_v57 = vld [vmem:[#allocation10 + $0x490] sm:$0xff] }
 0x1c2   :  { %4068 = vmatpush2.bf16.msra.mxu1 %v17886_v9  ;;  %v18081_v9 = vcombine.high %v944_v4, %v956_v5 }
 0x1c3   :  { %4069 = vmatprep.subr.bf16.mxu1 %v17863_v10  ;;  %v560_v10 = vld [vmem:[#allocation10 + $0x308] sm:$0xff] }
 0x1c4   :  { %v17697_v16 = vcombine.high %v560_v10, %v572_v11  ;;  %v17696_v22 = vcombine.low %v560_v10, %v572_v11  ;;  %v776_v10 = vld [vmem:[#allocation10 + $0x9c8] sm:$0xff] }
 0x1c5   :  { %v788_v11 = vld [vmem:[#allocation10 + $0xa28] sm:$0xff] }
 0x1c6   :  { %4070 = vmatpush2.bf16.msra.mxu1 %v17862_v13  ;;  %v932_v13 = vld [vmem:[#allocation10 + $0xea8] sm:$0xff] }
 0x1c7   :  { %4071 = vmatprep.subr.bf16.mxu1 %v17839_v14  ;;  %v17720_v14 = vcombine.low %v584_v2, %v596_v3  ;;  %v18057_v17 = vcombine.high %v920_v12, %v932_v13  ;;  %v800_v2 = vld [vmem:[#allocation10 + $0xa88] sm:$0xff] }
 0x1c8   :  { %v812_v3 = vld [vmem:[#allocation10 + $0xae8] sm:$0xff] }
 0x1ca   :  { %4072 = vmatpush2.bf16.msra.mxu1 %v17838_v15  ;;  %v18080_v15 = vcombine.low %v944_v4, %v956_v5  ;;  %v585_v4 = vld [vmem:[#allocation10 + $0x3d0] sm:$0xff] }
 0x1cb   :  { %4073 = vmatprep.subr.bf16.mxu1 %v17815_v20  ;;  %v896_v20 = vld [vmem:[#allocation10 + $0xd88] sm:$0xff]  ;;  %v597_v5 = vld [vmem:[#allocation10 + $0x430] sm:$0xff] }
 0x1cc   :  { %v18033_v25 = vcombine.high %v896_v20, %v908_v21 }
 0x1ce   :  { %4074 = vmatpush2.bf16.msra.mxu1 %v17814_v23  ;;  %v18056_v23 = vcombine.low %v920_v12, %v932_v13  ;;  %v561_v12 = vld [vmem:[#allocation10 + $0x310] sm:$0xff] }
 0x1cf   :  { %4075 = vmatprep.subr.bf16.mxu1 %v17791_v26  ;;  %v512_v26 = vld [vmem:[#allocation10 + $0x188] sm:$0xff]  ;;  %v573_v13 = vld [vmem:[#allocation10 + $0x370] sm:$0xff] }
 0x1d0   :  { %v17649_v33 = vcombine.high %v512_v26, %v524_v27 }
 0x1d2   :  { %4076 = vmatpush2.bf16.msra.mxu1 %v17790_v29  ;;  %v884_v29 = vld [vmem:[#allocation10 + $0xd28] sm:$0xff] }
 0x1d3   :  { %4127 = vmatprep.subr.bf16.mxu1 %v17769_v35  ;;  %v18009_v34 = vcombine.high %v872_v28, %v884_v29  ;;  %v488_v35 = vld [vmem:[#allocation10 + $0xc8] sm:$0xff] }
 0x255   :  { %v440_v37 = vpop.f32.mrf.mxu1 }
 0x256   :  { %v450_v43 = vmul.f32 %v449_v38, %v440_v37  ;;  %v455_v47 = vmul.f32 %v454_v39, %v440_v37  ;;  %v860_v38 = vld [vmem:[#allocation10 + $0xc68] sm:$0xff]  ;;  %v17648_v39 = vcombine.low %v512_v26, %v524_v27 }
 0x257   :  { %v442_v40 = vpop.f32.mrf.mxu1  ;;  %v728_v26 = vld [vmem:[#allocation10 + $0x848] sm:$0xff] }
 0x258   :  { %v18008_v40 = vcombine.low %v872_v28, %v884_v29  ;;  %v740_v27 = vld [vmem:[#allocation10 + $0x8a8] sm:$0xff]  ;;  %v513_v28 = vld [vmem:[#allocation10 + $0x190] sm:$0xff] }
 0x259   :  { %v445_v44 = vpop.f32.mrf.mxu1  ;;  %v525_v29 = vld [vmem:[#allocation10 + $0x1f0] sm:$0xff] }
 0x25a   :  { %v452_v48 = vmul.f32 %v451_v41, %v445_v44  ;;  %v457_v49 = vmul.f32 %v456_v42, %v445_v44  ;;  %v21128_v50 = vmul.f32 %v445_v44, %v440_v37  ;;  %v848_v37 = vld [vmem:[#allocation10 + $0xc08] sm:$0xff] }
 0x25b   :  { %v447_v51 = vpop.f32.mrf.mxu1  ;;  %v17985_v42 = vcombine.high %v848_v37, %v860_v38  ;;  %v476_v44 = vld [vmem:[#allocation10 + $0x68] sm:$0xff] }
 0x25c   :  { %v21130_v52 = vadd.f32 %v452_v48, %v450_v43  ;;  %v21132_v53 = vadd.f32 %v457_v49, %v455_v47  ;;  %v21136_v54 = vpack.c.bf16 %v21128_v50, %v21128_v50  ;;  %v464_v43 = vld [vmem:[#allocation10 + $0x8] sm:$0xff]  ;;  %v17984_v48 = vcombine.low %v848_v37, %v860_v38  ;;  %v489_v37 = vld [vmem:[#allocation10 + $0xd0] sm:$0xff] }
 0x25d   :  { %v17601_v49 = vcombine.high %v464_v43, %v476_v44  ;;  %v17771_v51 = vcombine.high %v633_v45, %v645_v46  ;;  %v17600_v59 = vcombine.low %v464_v43, %v476_v44  ;;  %v501_v38 = vld [vmem:[#allocation10 + $0x130] sm:$0xff]  ;;  %v680_v43 = vld [vmem:[#allocation10 + $0x6c8] sm:$0xff] }
 0x25e   :  { %v21140_v60 = vpack.c.bf16 %v21130_v52, %v21130_v52  ;;  %v21144_v61 = vpack.c.bf16 %v21132_v53, %v21132_v53  ;;  %4119 = vmatmul.mubr.bf16.vlgmr.msra.gmra.mxu0 %v21136_v54  ;;  %v692_v44 = vld [vmem:[#allocation10 + $0x728] sm:$0xff] }
 0x25f   :  { %4169 = vmatpush1.bf16.msra.mxu0 %v18152_v31  ;;  %4200 = vmatprep.mubr.bf16.mxu0 %v21003_v32  ;;  %v18032_v31 = vcombine.low %v896_v20, %v908_v21  ;;  %v537_v20 = vld [vmem:[#allocation10 + $0x250] sm:$0xff] }
 0x260   :  { %4077 = vmatprep.mubr.bf16.mxu1 %v21144_v61  ;;  %4170 = vmatprep.subr.bf16.mxu0 %v18129_v55  ;;  %v824_v55 = vld [vmem:[#allocation10 + $0xb48] sm:$0xff]  ;;  %v549_v21 = vld [vmem:[#allocation10 + $0x2b0] sm:$0xff] }
 0x261   :  { %4078 = vmatmul.mubr.bf16.vlgmr.msra.gmra.mxu1 %v21140_v60 }
 0x262   :  { %4128 = vmatpush1.bf16.msra.mxu1 %v17768_v36  ;;  %4159 = vmatprep.mubr.bf16.mxu1 %v21144_v61  ;;  %v500_v36 = vld [vmem:[#allocation10 + $0x128] sm:$0xff] }
 0x263   :  { %4171 = vmatpush1.bf16.msra.mxu0 %v18128_v62  ;;  %4129 = vmatprep.subr.bf16.mxu1 %v17745_v63  ;;  %v17625_v41 = vcombine.high %v488_v35, %v500_v36  ;;  %v17624_v47 = vcombine.low %v488_v35, %v500_v36  ;;  %v17770_v62 = vcombine.low %v633_v45, %v645_v46  ;;  %v704_v35 = vld [vmem:[#allocation10 + $0x788] sm:$0xff]  ;;  %v465_v45 = vld [vmem:[#allocation10 + $0x10] sm:$0xff] }
 0x264   :  { %4172 = vmatprep.subr.bf16.mxu0 %v18105_v0  ;;  %v17961_v63 = vcombine.high %v824_v55, %v836_v56  ;;  %v17747_v0 = vcombine.high %v609_v57, %v621_v58  ;;  %v716_v36 = vld [vmem:[#allocation10 + $0x7e8] sm:$0xff]  ;;  %v477_v46 = vld [vmem:[#allocation10 + $0x70] sm:$0xff] }
 0x266   :  { %4130 = vmatpush1.bf16.msra.mxu1 %v17744_v6  ;;  %v17960_v6 = vcombine.low %v824_v55, %v836_v56  ;;  %v656_v55 = vld [vmem:[#allocation10 + $0x608] sm:$0xff] }
 0x267   :  { %4173 = vmatpush1.bf16.msra.mxu0 %v18104_v7  ;;  %4131 = vmatprep.subr.bf16.mxu1 %v17721_v8  ;;  %v17746_v7 = vcombine.low %v609_v57, %v621_v58  ;;  %v17937_v8 = vcombine.high %v800_v2, %v812_v3  ;;  %v668_v56 = vld [vmem:[#allocation10 + $0x668] sm:$0xff]  ;;  %v825_v57 = vld [vmem:[#allocation10 + $0xb50] sm:$0xff] }
 0x268   :  { %4174 = vmatprep.subr.bf16.mxu0 %v18081_v9  ;;  %v17723_v9 = vcombine.high %v585_v4, %v597_v5  ;;  %v837_v58 = vld [vmem:[#allocation10 + $0xbb0] sm:$0xff] }
 0x26a   :  { %4132 = vmatpush1.bf16.msra.mxu1 %v17720_v14  ;;  %v17936_v14 = vcombine.low %v800_v2, %v812_v3  ;;  %v1017_v2 = vld [vmem:[#allocation10 + $0x1150] sm:$0xff] }
 0x26b   :  { %4175 = vmatpush1.bf16.msra.mxu0 %v18080_v15  ;;  %4133 = vmatprep.subr.bf16.mxu1 %v17697_v16  ;;  %v17722_v15 = vcombine.low %v585_v4, %v597_v5  ;;  %v17913_v16 = vcombine.high %v776_v10, %v788_v11  ;;  %v1029_v3 = vld [vmem:[#allocation10 + $0x11b0] sm:$0xff] }
 0x26c   :  { %4176 = vmatprep.subr.bf16.mxu0 %v18057_v17  ;;  %v17699_v17 = vcombine.high %v561_v12, %v573_v13  ;;  %v801_v4 = vld [vmem:[#allocation10 + $0xa90] sm:$0xff] }
 0x26d   :  { %v813_v5 = vld [vmem:[#allocation10 + $0xaf0] sm:$0xff] }
 0x26e   :  { %4134 = vmatpush1.bf16.msra.mxu1 %v17696_v22  ;;  %v17912_v22 = vcombine.low %v776_v10, %v788_v11  ;;  %v993_v10 = vld [vmem:[#allocation10 + $0x1090] sm:$0xff] }
 0x26f   :  { %4177 = vmatpush1.bf16.msra.mxu0 %v18056_v23  ;;  %4135 = vmatprep.subr.bf16.mxu1 %v17673_v24  ;;  %v17698_v23 = vcombine.low %v561_v12, %v573_v13  ;;  %v17889_v24 = vcombine.high %v752_v18, %v764_v19  ;;  %v1005_v11 = vld [vmem:[#allocation10 + $0x10f0] sm:$0xff] }
 0x270   :  { %4178 = vmatprep.subr.bf16.mxu0 %v18033_v25  ;;  %v17675_v25 = vcombine.high %v537_v20, %v549_v21  ;;  %v777_v12 = vld [vmem:[#allocation10 + $0x9d0] sm:$0xff] }
 0x271   :  { %v789_v13 = vld [vmem:[#allocation10 + $0xa30] sm:$0xff] }
 0x272   :  { %4136 = vmatpush1.bf16.msra.mxu1 %v17672_v30  ;;  %v17888_v30 = vcombine.low %v752_v18, %v764_v19  ;;  %v969_v18 = vld [vmem:[#allocation10 + $0xfd0] sm:$0xff] }
 0x273   :  { %4179 = vmatpush1.bf16.msra.mxu0 %v18032_v31  ;;  %4137 = vmatprep.subr.bf16.mxu1 %v17649_v33  ;;  %v17674_v31 = vcombine.low %v537_v20, %v549_v21  ;;  %v17865_v33 = vcombine.high %v728_v26, %v740_v27  ;;  %v981_v19 = vld [vmem:[#allocation10 + $0x1030] sm:$0xff] }
 0x274   :  { %4180 = vmatprep.subr.bf16.mxu0 %v18009_v34  ;;  %v17651_v34 = vcombine.high %v513_v28, %v525_v29  ;;  %v753_v20 = vld [vmem:[#allocation10 + $0x910] sm:$0xff] }
 0x275   :  { %v765_v21 = vld [vmem:[#allocation10 + $0x970] sm:$0xff] }
 0x276   :  { %4138 = vmatpush1.bf16.msra.mxu1 %v17648_v39  ;;  %v17864_v39 = vcombine.low %v728_v26, %v740_v27  ;;  %v945_v26 = vld [vmem:[#allocation10 + $0xf10] sm:$0xff] }
 0x277   :  { %4181 = vmatpush1.bf16.msra.mxu0 %v18008_v40  ;;  %4139 = vmatprep.subr.bf16.mxu1 %v17625_v41  ;;  %v17650_v40 = vcombine.low %v513_v28, %v525_v29  ;;  %v17841_v41 = vcombine.high %v704_v35, %v716_v36  ;;  %v957_v27 = vld [vmem:[#allocation10 + $0xf70] sm:$0xff] }
 0x278   :  { %4182 = vmatprep.subr.bf16.mxu0 %v17985_v42  ;;  %v17627_v42 = vcombine.high %v489_v37, %v501_v38  ;;  %v729_v28 = vld [vmem:[#allocation10 + $0x850] sm:$0xff] }
 0x279   :  { %v741_v29 = vld [vmem:[#allocation10 + $0x8b0] sm:$0xff] }
 0x27a   :  { %4140 = vmatpush1.bf16.msra.mxu1 %v17624_v47  ;;  %v17840_v47 = vcombine.low %v704_v35, %v716_v36  ;;  %v921_v35 = vld [vmem:[#allocation10 + $0xe50] sm:$0xff] }
 0x27b   :  { %4183 = vmatpush1.bf16.msra.mxu0 %v17984_v48  ;;  %4141 = vmatprep.subr.bf16.mxu1 %v17601_v49  ;;  %v17626_v48 = vcombine.low %v489_v37, %v501_v38  ;;  %v17817_v49 = vcombine.high %v680_v43, %v692_v44  ;;  %v933_v36 = vld [vmem:[#allocation10 + $0xeb0] sm:$0xff] }
 0x27c   :  { %4209 = vmatprep.subr.bf16.mxu0 %v17771_v51  ;;  %v17603_v51 = vcombine.high %v465_v45, %v477_v46  ;;  %v705_v37 = vld [vmem:[#allocation10 + $0x790] sm:$0xff] }
 0x27d   :  { %v717_v38 = vld [vmem:[#allocation10 + $0x7f0] sm:$0xff] }
 0x27e   :  { %4142 = vmatpush1.bf16.msra.mxu1 %v17600_v59  ;;  %4201 = vmatmul.mubr.bf16.vlgmr.msra.gmra.mxu0 %v21136_v54  ;;  %v17816_v59 = vcombine.low %v680_v43, %v692_v44  ;;  %v897_v43 = vld [vmem:[#allocation10 + $0xd90] sm:$0xff] }
 0x27f   :  { %4210 = vmatpush1.bf16.msra.mxu0 %v17770_v62  ;;  %4241 = vmatprep.mubr.bf16.mxu0 %v21144_v61  ;;  %v17602_v62 = vcombine.low %v465_v45, %v477_v46  ;;  %v909_v44 = vld [vmem:[#allocation10 + $0xdf0] sm:$0xff] }
 0x280   :  { %4143 = vmatprep.subr.bf16.mxu1 %v17961_v63  ;;  %4211 = vmatprep.subr.bf16.mxu0 %v17747_v0  ;;  %v17793_v63 = vcombine.high %v656_v55, %v668_v56  ;;  %v17963_v0 = vcombine.high %v825_v57, %v837_v58  ;;  %v681_v45 = vld [vmem:[#allocation10 + $0x6d0] sm:$0xff] }
 0x281   :  { %v693_v46 = vld [vmem:[#allocation10 + $0x730] sm:$0xff] }
 0x282   :  { %4144 = vmatpush2.bf16.msra.mxu1 %v17960_v6  ;;  %v17792_v6 = vcombine.low %v656_v55, %v668_v56  ;;  %v873_v55 = vld [vmem:[#allocation10 + $0xcd0] sm:$0xff] }
 0x283   :  { %4212 = vmatpush1.bf16.msra.mxu0 %v17746_v7  ;;  %4145 = vmatprep.subr.bf16.mxu1 %v17937_v8  ;;  %v17962_v7 = vcombine.low %v825_v57, %v837_v58  ;;  %v18155_v8 = vcombine.high %v1017_v2, %v1029_v3  ;;  %v885_v56 = vld [vmem:[#allocation10 + $0xd30] sm:$0xff] }
 0x284   :  { %4213 = vmatprep.subr.bf16.mxu0 %v17723_v9  ;;  %v17939_v9 = vcombine.high %v801_v4, %v813_v5  ;;  %v657_v57 = vld [vmem:[#allocation10 + $0x610] sm:$0xff] }
 0x285   :  { %v669_v58 = vld [vmem:[#allocation10 + $0x670] sm:$0xff] }
 0x286   :  { %4146 = vmatpush2.bf16.msra.mxu1 %v17936_v14  ;;  %v18154_v14 = vcombine.low %v1017_v2, %v1029_v3  ;;  %v849_v2 = vld [vmem:[#allocation10 + $0xc10] sm:$0xff] }
 0x287   :  { %4214 = vmatpush1.bf16.msra.mxu0 %v17722_v15  ;;  %4147 = vmatprep.subr.bf16.mxu1 %v17913_v16  ;;  %v17938_v15 = vcombine.low %v801_v4, %v813_v5  ;;  %v18131_v16 = vcombine.high %v993_v10, %v1005_v11  ;;  %v861_v3 = vld [vmem:[#allocation10 + $0xc70] sm:$0xff]  ;;  %v1018_v4 = vld [vmem:[#allocation10 + $0x1158] sm:$0xff] }
 0x288   :  { %4215 = vmatprep.subr.bf16.mxu0 %v17699_v17  ;;  %v17915_v17 = vcombine.high %v777_v12, %v789_v13  ;;  %v1030_v5 = vld [vmem:[#allocation10 + $0x11b8] sm:$0xff] }
 0x28a   :  { %4148 = vmatpush2.bf16.msra.mxu1 %v17912_v22  ;;  %v18130_v22 = vcombine.low %v993_v10, %v1005_v11  ;;  %v634_v10 = vld [vmem:[#allocation10 + $0x558] sm:$0xff] }
 0x28b   :  { %4216 = vmatpush1.bf16.msra.mxu0 %v17698_v23  ;;  %4149 = vmatprep.subr.bf16.mxu1 %v17889_v24  ;;  %v17914_v23 = vcombine.low %v777_v12, %v789_v13  ;;  %v18107_v24 = vcombine.high %v969_v18, %v981_v19  ;;  %v646_v11 = vld [vmem:[#allocation10 + $0x5b8] sm:$0xff] }
 0x28c   :  { %4217 = vmatprep.subr.bf16.mxu0 %v17675_v25  ;;  %v17891_v25 = vcombine.high %v753_v20, %v765_v21  ;;  %v994_v12 = vld [vmem:[#allocation10 + $0x1098] sm:$0xff] }
 0x28d   :  { %v1006_v13 = vld [vmem:[#allocation10 + $0x10f8] sm:$0xff] }
 0x28e   :  { %4150 = vmatpush2.bf16.msra.mxu1 %v17888_v30  ;;  %v18106_v30 = vcombine.low %v969_v18, %v981_v19  ;;  %v610_v18 = vld [vmem:[#allocation10 + $0x498] sm:$0xff] }
 0x28f   :  { %4218 = vmatpush1.bf16.msra.mxu0 %v17674_v31  ;;  %4151 = vmatprep.subr.bf16.mxu1 %v17865_v33  ;;  %v17890_v31 = vcombine.low %v753_v20, %v765_v21  ;;  %v18083_v33 = vcombine.high %v945_v26, %v957_v27  ;;  %v622_v19 = vld [vmem:[#allocation10 + $0x4f8] sm:$0xff] }
 0x290   :  { %4219 = vmatprep.subr.bf16.mxu0 %v17651_v34  ;;  %v17867_v34 = vcombine.high %v729_v28, %v741_v29  ;;  %v970_v20 = vld [vmem:[#allocation10 + $0xfd8] sm:$0xff] }
 0x291   :  { %v982_v21 = vld [vmem:[#allocation10 + $0x1038] sm:$0xff] }
 0x292   :  { %4152 = vmatpush2.bf16.msra.mxu1 %v17864_v39  ;;  %v18082_v39 = vcombine.low %v945_v26, %v957_v27  ;;  %v586_v26 = vld [vmem:[#allocation10 + $0x3d8] sm:$0xff] }
 0x293   :  { %4220 = vmatpush1.bf16.msra.mxu0 %v17650_v40  ;;  %4153 = vmatprep.subr.bf16.mxu1 %v17841_v41  ;;  %v17866_v40 = vcombine.low %v729_v28, %v741_v29  ;;  %v18059_v41 = vcombine.high %v921_v35, %v933_v36  ;;  %v598_v27 = vld [vmem:[#allocation10 + $0x438] sm:$0xff] }
 0x294   :  { %4221 = vmatprep.subr.bf16.mxu0 %v17627_v42  ;;  %v17843_v42 = vcombine.high %v705_v37, %v717_v38  ;;  %v946_v28 = vld [vmem:[#allocation10 + $0xf18] sm:$0xff] }
 0x295   :  { %v958_v29 = vld [vmem:[#allocation10 + $0xf78] sm:$0xff] }
 0x296   :  { %4154 = vmatpush2.bf16.msra.mxu1 %v17840_v47  ;;  %v18058_v47 = vcombine.low %v921_v35, %v933_v36  ;;  %v562_v35 = vld [vmem:[#allocation10 + $0x318] sm:$0xff] }
 0x297   :  { %4222 = vmatpush1.bf16.msra.mxu0 %v17626_v48  ;;  %4155 = vmatprep.subr.bf16.mxu1 %v17817_v49  ;;  %v17842_v48 = vcombine.low %v705_v37, %v717_v38  ;;  %v18035_v49 = vcombine.high %v897_v43, %v909_v44  ;;  %v574_v36 = vld [vmem:[#allocation10 + $0x378] sm:$0xff] }
 0x298   :  { %4223 = vmatprep.subr.bf16.mxu0 %v17603_v51  ;;  %v17819_v51 = vcombine.high %v681_v45, %v693_v46  ;;  %v922_v37 = vld [vmem:[#allocation10 + $0xe58] sm:$0xff] }
 0x299   :  { %v934_v38 = vld [vmem:[#allocation10 + $0xeb8] sm:$0xff] }
 0x29a   :  { %4156 = vmatpush2.bf16.msra.mxu1 %v17816_v59  ;;  %v18034_v59 = vcombine.low %v897_v43, %v909_v44  ;;  %v538_v43 = vld [vmem:[#allocation10 + $0x258] sm:$0xff] }
 0x29b   :  { %4224 = vmatpush1.bf16.msra.mxu0 %v17602_v62  ;;  %4157 = vmatprep.subr.bf16.mxu1 %v17793_v63  ;;  %v17818_v62 = vcombine.low %v681_v45, %v693_v46  ;;  %v18011_v63 = vcombine.high %v873_v55, %v885_v56  ;;  %v550_v44 = vld [vmem:[#allocation10 + $0x2b8] sm:$0xff] }
 0x29c   :  { %4225 = vmatprep.subr.bf16.mxu0 %v17963_v0  ;;  %v17795_v0 = vcombine.high %v657_v57, %v669_v58  ;;  %v898_v45 = vld [vmem:[#allocation10 + $0xd98] sm:$0xff] }
 0x29d   :  { %v910_v46 = vld [vmem:[#allocation10 + $0xdf8] sm:$0xff] }
 0x29e   :  { %4158 = vmatpush2.bf16.msra.mxu1 %v17792_v6  ;;  %v18010_v6 = vcombine.low %v873_v55, %v885_v56  ;;  %v514_v55 = vld [vmem:[#allocation10 + $0x198] sm:$0xff] }
 0x29f   :  { %4226 = vmatpush2.bf16.msra.mxu0 %v17962_v7  ;;  %4250 = vmatprep.subr.bf16.mxu1 %v18155_v8  ;;  %v17794_v7 = vcombine.low %v657_v57, %v669_v58  ;;  %v17987_v8 = vcombine.high %v849_v2, %v861_v3  ;;  %v526_v56 = vld [vmem:[#allocation10 + $0x1f8] sm:$0xff] }
 0x2a0   :  { %4227 = vmatprep.subr.bf16.mxu0 %v17939_v9  ;;  %v18157_v9 = vcombine.high %v1018_v4, %v1030_v5  ;;  %v874_v57 = vld [vmem:[#allocation10 + $0xcd8] sm:$0xff] }
 0x2a1   :  { %4160 = vmatmul.mubr.bf16.vlgmr.msra.gmra.mxu1 %v21140_v60  ;;  %v886_v58 = vld [vmem:[#allocation10 + $0xd38] sm:$0xff] }
 0x2a2   :  { %4251 = vmatpush1.bf16.msra.mxu1 %v18154_v14  ;;  %4282 = vmatprep.mubr.bf16.mxu1 %v21003_v32  ;;  %v17986_v14 = vcombine.low %v849_v2, %v861_v3  ;;  %v490_v2 = vld [vmem:[#allocation10 + $0xd8] sm:$0xff] }
 0x2a3   :  { %4228 = vmatpush2.bf16.msra.mxu0 %v17938_v15  ;;  %4252 = vmatprep.subr.bf16.mxu1 %v18131_v16  ;;  %v18156_v15 = vcombine.low %v1018_v4, %v1030_v5  ;;  %v17773_v16 = vcombine.high %v634_v10, %v646_v11  ;;  %v502_v3 = vld [vmem:[#allocation10 + $0x138] sm:$0xff] }
 0x2a4   :  { %4229 = vmatprep.subr.bf16.mxu0 %v17915_v17  ;;  %v18133_v17 = vcombine.high %v994_v12, %v1006_v13  ;;  %v850_v4 = vld [vmem:[#allocation10 + $0xc18] sm:$0xff] }
 0x2a5   :  { %v862_v5 = vld [vmem:[#allocation10 + $0xc78] sm:$0xff] }
 0x2a6   :  { %4253 = vmatpush1.bf16.msra.mxu1 %v18130_v22  ;;  %v17772_v22 = vcombine.low %v634_v10, %v646_v11  ;;  %v466_v10 = vld [vmem:[#allocation10 + $0x18] sm:$0xff] }
 0x2a7   :  { %4230 = vmatpush2.bf16.msra.mxu0 %v17914_v23  ;;  %4254 = vmatprep.subr.bf16.mxu1 %v18107_v24  ;;  %v18132_v23 = vcombine.low %v994_v12, %v1006_v13  ;;  %v17749_v24 = vcombine.high %v610_v18, %v622_v19  ;;  %v478_v11 = vld [vmem:[#allocation10 + $0x78] sm:$0xff]  ;;  %v635_v12 = vld [vmem:[#allocation10 + $0x560] sm:$0xff] }
 0x2a8   :  { %4231 = vmatprep.subr.bf16.mxu0 %v17891_v25  ;;  %v18109_v25 = vcombine.high %v970_v20, %v982_v21  ;;  %v647_v13 = vld [vmem:[#allocation10 + $0x5c0] sm:$0xff] }
 0x2aa   :  { %4255 = vmatpush1.bf16.msra.mxu1 %v18106_v30  ;;  %v17748_v30 = vcombine.low %v610_v18, %v622_v19  ;;  %v826_v18 = vld [vmem:[#allocation10 + $0xb58] sm:$0xff] }
 0x2ab   :  { %4232 = vmatpush2.bf16.msra.mxu0 %v17890_v31  ;;  %4256 = vmatprep.subr.bf16.mxu1 %v18083_v33  ;;  %v18108_v31 = vcombine.low %v970_v20, %v982_v21  ;;  %v17725_v33 = vcombine.high %v586_v26, %v598_v27  ;;  %v838_v19 = vld [vmem:[#allocation10 + $0xbb8] sm:$0xff]  ;;  %v611_v20 = vld [vmem:[#allocation10 + $0x4a0] sm:$0xff] }
 0x2ac   :  { %4233 = vmatprep.subr.bf16.mxu0 %v17867_v34  ;;  %v18085_v34 = vcombine.high %v946_v28, %v958_v29  ;;  %v623_v21 = vld [vmem:[#allocation10 + $0x500] sm:$0xff] }
 0x2ae   :  { %4257 = vmatpush1.bf16.msra.mxu1 %v18082_v39  ;;  %v17724_v39 = vcombine.low %v586_v26, %v598_v27  ;;  %v802_v26 = vld [vmem:[#allocation10 + $0xa98] sm:$0xff] }
 0x2af   :  { %4234 = vmatpush2.bf16.msra.mxu0 %v17866_v40  ;;  %4258 = vmatprep.subr.bf16.mxu1 %v18059_v41  ;;  %v18084_v40 = vcombine.low %v946_v28, %v958_v29  ;;  %v17701_v41 = vcombine.high %v562_v35, %v574_v36  ;;  %v814_v27 = vld [vmem:[#allocation10 + $0xaf8] sm:$0xff]  ;;  %v587_v28 = vld [vmem:[#allocation10 + $0x3e0] sm:$0xff] }
 0x2b0   :  { %4235 = vmatprep.subr.bf16.mxu0 %v17843_v42  ;;  %v18061_v42 = vcombine.high %v922_v37, %v934_v38  ;;  %v599_v29 = vld [vmem:[#allocation10 + $0x440] sm:$0xff] }
 0x2b2   :  { %4259 = vmatpush1.bf16.msra.mxu1 %v18058_v47  ;;  %v17700_v47 = vcombine.low %v562_v35, %v574_v36  ;;  %v778_v35 = vld [vmem:[#allocation10 + $0x9d8] sm:$0xff] }
 0x2b3   :  { %4236 = vmatpush2.bf16.msra.mxu0 %v17842_v48  ;;  %4260 = vmatprep.subr.bf16.mxu1 %v18035_v49  ;;  %v18060_v48 = vcombine.low %v922_v37, %v934_v38  ;;  %v17677_v49 = vcombine.high %v538_v43, %v550_v44  ;;  %v790_v36 = vld [vmem:[#allocation10 + $0xa38] sm:$0xff]  ;;  %v563_v37 = vld [vmem:[#allocation10 + $0x320] sm:$0xff] }
 0x2b4   :  { %4237 = vmatprep.subr.bf16.mxu0 %v17819_v51  ;;  %v18037_v51 = vcombine.high %v898_v45, %v910_v46  ;;  %v575_v38 = vld [vmem:[#allocation10 + $0x380] sm:$0xff] }
 0x2b6   :  { %4261 = vmatpush1.bf16.msra.mxu1 %v18034_v59  ;;  %v17676_v59 = vcombine.low %v538_v43, %v550_v44  ;;  %v754_v43 = vld [vmem:[#allocation10 + $0x918] sm:$0xff] }
 0x2b7   :  { %4238 = vmatpush2.bf16.msra.mxu0 %v17818_v62  ;;  %4262 = vmatprep.subr.bf16.mxu1 %v18011_v63  ;;  %v18036_v62 = vcombine.low %v898_v45, %v910_v46  ;;  %v17653_v63 = vcombine.high %v514_v55, %v526_v56  ;;  %v766_v44 = vld [vmem:[#allocation10 + $0x978] sm:$0xff]  ;;  %v539_v45 = vld [vmem:[#allocation10 + $0x260] sm:$0xff] }
 0x2b8   :  { %4239 = vmatprep.subr.bf16.mxu0 %v17795_v0  ;;  %v18013_v0 = vcombine.high %v874_v57, %v886_v58  ;;  %v551_v46 = vld [vmem:[#allocation10 + $0x2c0] sm:$0xff] }
 0x2ba   :  { %4263 = vmatpush1.bf16.msra.mxu1 %v18010_v6  ;;  %v17652_v6 = vcombine.low %v514_v55, %v526_v56  ;;  %v730_v55 = vld [vmem:[#allocation10 + $0x858] sm:$0xff] }
 0x2bb   :  { %4240 = vmatpush2.bf16.msra.mxu0 %v17794_v7  ;;  %4264 = vmatprep.subr.bf16.mxu1 %v17987_v8  ;;  %v18012_v7 = vcombine.low %v874_v57, %v886_v58  ;;  %v17629_v8 = vcombine.high %v490_v2, %v502_v3  ;;  %v742_v56 = vld [vmem:[#allocation10 + $0x8b8] sm:$0xff]  ;;  %v515_v57 = vld [vmem:[#allocation10 + $0x1a0] sm:$0xff] }
 0x2bc   :  { %4332 = vmatprep.subr.bf16.mxu0 %v18157_v9  ;;  %v17989_v9 = vcombine.high %v850_v4, %v862_v5  ;;  %v527_v58 = vld [vmem:[#allocation10 + $0x200] sm:$0xff] }
 0x2be   :  { %4242 = vmatmul.mubr.bf16.vlgmr.msra.gmra.mxu0 %v21140_v60  ;;  %4265 = vmatpush1.bf16.msra.mxu1 %v17986_v14  ;;  %v17628_v14 = vcombine.low %v490_v2, %v502_v3  ;;  %v706_v2 = vld [vmem:[#allocation10 + $0x798] sm:$0xff] }
 0x2bf   :  { %4333 = vmatpush1.bf16.msra.mxu0 %v18156_v15  ;;  %4291 = vmatprep.subr.bf16.mxu1 %v17773_v16  ;;  %v17988_v15 = vcombine.low %v850_v4, %v862_v5  ;;  %v17605_v16 = vcombine.high %v466_v10, %v478_v11  ;;  %v718_v3 = vld [vmem:[#allocation10 + $0x7f8] sm:$0xff]  ;;  %v491_v4 = vld [vmem:[#allocation10 + $0xe0] sm:$0xff] }
 0x2c0   :  { %4334 = vmatprep.subr.bf16.mxu0 %v18133_v17  ;;  %4364 = vmatprep.mubr.bf16.mxu0 %v21003_v32  ;;  %v17775_v17 = vcombine.high %v635_v12, %v647_v13  ;;  %v503_v5 = vld [vmem:[#allocation10 + $0x140] sm:$0xff] }
 0x2c1   :  { %4283 = vmatmul.mubr.bf16.vlgmr.msra.gmra.mxu1 %v21136_v54 }
 0x2c2   :  { %4292 = vmatpush1.bf16.msra.mxu1 %v17772_v22  ;;  %4323 = vmatprep.mubr.bf16.mxu1 %v21144_v61  ;;  %v17604_v22 = vcombine.low %v466_v10, %v478_v11  ;;  %v682_v10 = vld [vmem:[#allocation10 + $0x6d8] sm:$0xff] }
 0x2c3   :  { %4335 = vmatpush1.bf16.msra.mxu0 %v18132_v23  ;;  %4293 = vmatprep.subr.bf16.mxu1 %v17749_v24  ;;  %v17774_v23 = vcombine.low %v635_v12, %v647_v13  ;;  %v17965_v24 = vcombine.high %v826_v18, %v838_v19  ;;  %v694_v11 = vld [vmem:[#allocation10 + $0x738] sm:$0xff]  ;;  %v467_v12 = vld [vmem:[#allocation10 + $0x20] sm:$0xff] }
 0x2c4   :  { %4336 = vmatprep.subr.bf16.mxu0 %v18109_v25  ;;  %v17751_v25 = vcombine.high %v611_v20, %v623_v21  ;;  %v479_v13 = vld [vmem:[#allocation10 + $0x80] sm:$0xff] }
 0x2c6   :  { %4294 = vmatpush1.bf16.msra.mxu1 %v17748_v30  ;;  %v17964_v30 = vcombine.low %v826_v18, %v838_v19  ;;  %v658_v18 = vld [vmem:[#allocation10 + $0x618] sm:$0xff] }
 0x2c7   :  { %4337 = vmatpush1.bf16.msra.mxu0 %v18108_v31  ;;  %4295 = vmatprep.subr.bf16.mxu1 %v17725_v33  ;;  %v17750_v31 = vcombine.low %v611_v20, %v623_v21  ;;  %v17941_v33 = vcombine.high %v802_v26, %v814_v27  ;;  %v670_v19 = vld [vmem:[#allocation10 + $0x678] sm:$0xff]  ;;  %v827_v20 = vld [vmem:[#allocation10 + $0xb60] sm:$0xff] }
 0x2c8   :  { %4338 = vmatprep.subr.bf16.mxu0 %v18085_v34  ;;  %v17727_v34 = vcombine.high %v587_v28, %v599_v29  ;;  %v839_v21 = vld [vmem:[#allocation10 + $0xbc0] sm:$0xff] }
 0x2ca   :  { %4296 = vmatpush1.bf16.msra.mxu1 %v17724_v39  ;;  %v17940_v39 = vcombine.low %v802_v26, %v814_v27  ;;  %v1019_v26 = vld [vmem:[#allocation10 + $0x1160] sm:$0xff] }
 0x2cb   :  { %4339 = vmatpush1.bf16.msra.mxu0 %v18084_v40  ;;  %4297 = vmatprep.subr.bf16.mxu1 %v17701_v41  ;;  %v17726_v40 = vcombine.low %v587_v28, %v599_v29  ;;  %v17917_v41 = vcombine.high %v778_v35, %v790_v36  ;;  %v1031_v27 = vld [vmem:[#allocation10 + $0x11c0] sm:$0xff] }
 0x2cc   :  { %4340 = vmatprep.subr.bf16.mxu0 %v18061_v42  ;;  %v17703_v42 = vcombine.high %v563_v37, %v575_v38  ;;  %v803_v28 = vld [vmem:[#allocation10 + $0xaa0] sm:$0xff] }
 0x2cd   :  { %v815_v29 = vld [vmem:[#allocation10 + $0xb00] sm:$0xff] }
 0x2ce   :  { %4298 = vmatpush1.bf16.msra.mxu1 %v17700_v47  ;;  %v17916_v47 = vcombine.low %v778_v35, %v790_v36  ;;  %v995_v35 = vld [vmem:[#allocation10 + $0x10a0] sm:$0xff] }
 0x2cf   :  { %4341 = vmatpush1.bf16.msra.mxu0 %v18060_v48  ;;  %4299 = vmatprep.subr.bf16.mxu1 %v17677_v49  ;;  %v17702_v48 = vcombine.low %v563_v37, %v575_v38  ;;  %v17893_v49 = vcombine.high %v754_v43, %v766_v44  ;;  %v1007_v36 = vld [vmem:[#allocation10 + $0x1100] sm:$0xff] }
 0x2d0   :  { %4342 = vmatprep.subr.bf16.mxu0 %v18037_v51  ;;  %v17679_v51 = vcombine.high %v539_v45, %v551_v46  ;;  %v779_v37 = vld [vmem:[#allocation10 + $0x9e0] sm:$0xff] }
 0x2d1   :  { %v791_v38 = vld [vmem:[#allocation10 + $0xa40] sm:$0xff] }
 0x2d2   :  { %4300 = vmatpush1.bf16.msra.mxu1 %v17676_v59  ;;  %v17892_v59 = vcombine.low %v754_v43, %v766_v44  ;;  %v971_v43 = vld [vmem:[#allocation10 + $0xfe0] sm:$0xff] }
 0x2d3   :  { %4343 = vmatpush1.bf16.msra.mxu0 %v18036_v62  ;;  %4301 = vmatprep.subr.bf16.mxu1 %v17653_v63  ;;  %v17678_v62 = vcombine.low %v539_v45, %v551_v46  ;;  %v17869_v63 = vcombine.high %v730_v55, %v742_v56  ;;  %v983_v44 = vld [vmem:[#allocation10 + $0x1040] sm:$0xff] }
 0x2d4   :  { %4344 = vmatprep.subr.bf16.mxu0 %v18013_v0  ;;  %v17655_v0 = vcombine.high %v515_v57, %v527_v58  ;;  %v755_v45 = vld [vmem:[#allocation10 + $0x920] sm:$0xff] }
 0x2d5   :  { %v767_v46 = vld [vmem:[#allocation10 + $0x980] sm:$0xff] }
 0x2d6   :  { %4302 = vmatpush1.bf16.msra.mxu1 %v17652_v6  ;;  %v17868_v6 = vcombine.low %v730_v55, %v742_v56  ;;  %v947_v55 = vld [vmem:[#allocation10 + $0xf20] sm:$0xff] }
 0x2d7   :  { %4345 = vmatpush1.bf16.msra.mxu0 %v18012_v7  ;;  %4303 = vmatprep.subr.bf16.mxu1 %v17629_v8  ;;  %v17654_v7 = vcombine.low %v515_v57, %v527_v58  ;;  %v17845_v8 = vcombine.high %v706_v2, %v718_v3  ;;  %v959_v56 = vld [vmem:[#allocation10 + $0xf80] sm:$0xff] }
 0x2d8   :  { %4346 = vmatprep.subr.bf16.mxu0 %v17989_v9  ;;  %v17631_v9 = vcombine.high %v491_v4, %v503_v5  ;;  %v731_v57 = vld [vmem:[#allocation10 + $0x860] sm:$0xff] }
 0x2d9   :  { %v743_v58 = vld [vmem:[#allocation10 + $0x8c0] sm:$0xff] }
 0x2da   :  { %4304 = vmatpush1.bf16.msra.mxu1 %v17628_v14  ;;  %v17844_v14 = vcombine.low %v706_v2, %v718_v3  ;;  %v923_v2 = vld [vmem:[#allocation10 + $0xe60] sm:$0xff] }
 0x2db   :  { %4347 = vmatpush1.bf16.msra.mxu0 %v17988_v15  ;;  %4305 = vmatprep.subr.bf16.mxu1 %v17605_v16  ;;  %v17630_v15 = vcombine.low %v491_v4, %v503_v5  ;;  %v17821_v16 = vcombine.high %v682_v10, %v694_v11  ;;  %v935_v3 = vld [vmem:[#allocation10 + $0xec0] sm:$0xff] }
 0x2dc   :  { %4373 = vmatprep.subr.bf16.mxu0 %v17775_v17  ;;  %v17607_v17 = vcombine.high %v467_v12, %v479_v13  ;;  %v707_v4 = vld [vmem:[#allocation10 + $0x7a0] sm:$0xff] }
 0x2dd   :  { %v719_v5 = vld [vmem:[#allocation10 + $0x800] sm:$0xff] }
 0x2de   :  { %4306 = vmatpush1.bf16.msra.mxu1 %v17604_v22  ;;  %4365 = vmatmul.mubr.bf16.vlgmr.msra.gmra.mxu0 %v21136_v54  ;;  %v17820_v22 = vcombine.low %v682_v10, %v694_v11  ;;  %v899_v10 = vld [vmem:[#allocation10 + $0xda0] sm:$0xff] }
 0x2df   :  { %4374 = vmatpush1.bf16.msra.mxu0 %v17774_v23  ;;  %4405 = vmatprep.mubr.bf16.mxu0 %v21144_v61  ;;  %v17606_v23 = vcombine.low %v467_v12, %v479_v13  ;;  %v911_v11 = vld [vmem:[#allocation10 + $0xe00] sm:$0xff] }
 0x2e0   :  { %4307 = vmatprep.subr.bf16.mxu1 %v17965_v24  ;;  %4375 = vmatprep.subr.bf16.mxu0 %v17751_v25  ;;  %v17797_v24 = vcombine.high %v658_v18, %v670_v19  ;;  %v17967_v25 = vcombine.high %v827_v20, %v839_v21  ;;  %v683_v12 = vld [vmem:[#allocation10 + $0x6e0] sm:$0xff] }
 0x2e1   :  { %v695_v13 = vld [vmem:[#allocation10 + $0x740] sm:$0xff] }
 0x2e2   :  { %4308 = vmatpush2.bf16.msra.mxu1 %v17964_v30  ;;  %v17796_v30 = vcombine.low %v658_v18, %v670_v19  ;;  %v875_v18 = vld [vmem:[#allocation10 + $0xce0] sm:$0xff] }
 0x2e3   :  { %4376 = vmatpush1.bf16.msra.mxu0 %v17750_v31  ;;  %4309 = vmatprep.subr.bf16.mxu1 %v17941_v33  ;;  %v17966_v31 = vcombine.low %v827_v20, %v839_v21  ;;  %v18159_v33 = vcombine.high %v1019_v26, %v1031_v27  ;;  %v887_v19 = vld [vmem:[#allocation10 + $0xd40] sm:$0xff] }
 0x2e4   :  { %4377 = vmatprep.subr.bf16.mxu0 %v17727_v34  ;;  %v17943_v34 = vcombine.high %v803_v28, %v815_v29  ;;  %v659_v20 = vld [vmem:[#allocation10 + $0x620] sm:$0xff] }
 0x2e5   :  { %v671_v21 = vld [vmem:[#allocation10 + $0x680] sm:$0xff] }
 0x2e6   :  { %4310 = vmatpush2.bf16.msra.mxu1 %v17940_v39  ;;  %v18158_v39 = vcombine.low %v1019_v26, %v1031_v27  ;;  %v17799_v26 = vcombine.high %v659_v20, %v671_v21  ;;  %v851_v27 = vld [vmem:[#allocation10 + $0xc20] sm:$0xff] }
 0x2e7   :  { %4378 = vmatpush1.bf16.msra.mxu0 %v17726_v40  ;;  %4311 = vmatprep.subr.bf16.mxu1 %v17917_v41  ;;  %v17942_v40 = vcombine.low %v803_v28, %v815_v29  ;;  %v18135_v41 = vcombine.high %v995_v35, %v1007_v36  ;;  %v863_v28 = vld [vmem:[#allocation10 + $0xc80] sm:$0xff]  ;;  %v1020_v29 = vld [vmem:[#allocation10 + $0x1168] sm:$0xff] }
 0x2e8   :  { %4379 = vmatprep.subr.bf16.mxu0 %v17703_v42  ;;  %v17919_v42 = vcombine.high %v779_v37, %v791_v38 }
 0x2ea   :  { %4312 = vmatpush2.bf16.msra.mxu1 %v17916_v47  ;;  %v18134_v47 = vcombine.low %v995_v35, %v1007_v36  ;;  %v17991_v35 = vcombine.high %v851_v27, %v863_v28 }
 0x2eb   :  { %4380 = vmatpush1.bf16.msra.mxu0 %v17702_v48  ;;  %4313 = vmatprep.subr.bf16.mxu1 %v17893_v49  ;;  %v17918_v48 = vcombine.low %v779_v37, %v791_v38  ;;  %v18111_v49 = vcombine.high %v971_v43, %v983_v44  ;;  %v636_v37 = vld [vmem:[#allocation10 + $0x568] sm:$0xff] }
 0x2ec   :  { %4381 = vmatprep.subr.bf16.mxu0 %v17679_v51  ;;  %v17895_v51 = vcombine.high %v755_v45, %v767_v46  ;;  %v648_v38 = vld [vmem:[#allocation10 + $0x5c8] sm:$0xff] }
 0x2ee   :  { %4314 = vmatpush2.bf16.msra.mxu1 %v17892_v59  ;;  %v18110_v59 = vcombine.low %v971_v43, %v983_v44  ;;  %v17777_v44 = vcombine.high %v636_v37, %v648_v38 }
 0x2ef   :  { %4382 = vmatpush1.bf16.msra.mxu0 %v17678_v62  ;;  %4315 = vmatprep.subr.bf16.mxu1 %v17869_v63  ;;  %v17894_v62 = vcombine.low %v755_v45, %v767_v46  ;;  %v18087_v63 = vcombine.high %v947_v55, %v959_v56  ;;  %v21168_v45 = vld [vmem:[#allocation13] sm:$0xff] }
 0x2f0   :  { %4383 = vmatprep.subr.bf16.mxu0 %v17655_v0  ;;  %v17871_v0 = vcombine.high %v731_v57, %v743_v58 }
 0x2f2   :  { %4316 = vmatpush2.bf16.msra.mxu1 %v17868_v6  ;;  %v18086_v6 = vcombine.low %v947_v55, %v959_v56  ;;  %v984_v55 = vld [vmem:[#allocation10 + $0x1048] sm:$0xff] }
 0x2f3   :  { %4384 = vmatpush1.bf16.msra.mxu0 %v17654_v7  ;;  %4317 = vmatprep.subr.bf16.mxu1 %v17845_v8  ;;  %v17870_v7 = vcombine.low %v731_v57, %v743_v58  ;;  %v18063_v8 = vcombine.high %v923_v2, %v935_v3  ;;  %v17776_v57 = vcombine.low %v636_v37, %v648_v38 }
 0x2f4   :  { %4385 = vmatprep.subr.bf16.mxu0 %v17631_v9  ;;  %v17847_v9 = vcombine.high %v707_v4, %v719_v5 }
 0x2f6   :  { %4318 = vmatpush2.bf16.msra.mxu1 %v17844_v14  ;;  %v18062_v14 = vcombine.low %v923_v2, %v935_v3  ;;  %v588_v3 = vld [vmem:[#allocation10 + $0x3e8] sm:$0xff] }
 0x2f7   :  { %4386 = vmatpush1.bf16.msra.mxu0 %v17630_v15  ;;  %4319 = vmatprep.subr.bf16.mxu1 %v17821_v16  ;;  %v17846_v15 = vcombine.low %v707_v4, %v719_v5  ;;  %v18039_v16 = vcombine.high %v899_v10, %v911_v11  ;;  %v600_v4 = vld [vmem:[#allocation10 + $0x448] sm:$0xff] }
 0x2f8   :  { %4387 = vmatprep.subr.bf16.mxu0 %v17607_v17  ;;  %v17823_v17 = vcombine.high %v683_v12, %v695_v13 }
 0x2fa   :  { %4320 = vmatpush2.bf16.msra.mxu1 %v17820_v22  ;;  %v18038_v22 = vcombine.low %v899_v10, %v911_v11 }
 0x2fb   :  { %4388 = vmatpush1.bf16.msra.mxu0 %v17606_v23  ;;  %4321 = vmatprep.subr.bf16.mxu1 %v17797_v24  ;;  %v1045_v23 = vlaneseq  ;;  %v17822_v24 = vcombine.low %v683_v12, %v695_v13  ;;  %v17729_v13 = vcombine.high %v588_v3, %v600_v4 }
 0x2fc   :  { %4389 = vmatprep.subr.bf16.mxu0 %v17967_v25  ;;  %v18015_v25 = vcombine.high %v875_v18, %v887_v19 }
 0x2fe   :  { %4322 = vmatpush2.bf16.msra.mxu1 %v17796_v30  ;;  %v1032_v30 = vld [vmem:[#allocation10 + $0x11c8] sm:$0xff] }
 0x2ff   :  { %4390 = vmatpush2.bf16.msra.mxu0 %v17966_v31  ;;  %4414 = vmatprep.subr.bf16.mxu1 %v18159_v33  ;;  %v18014_v31 = vcombine.low %v875_v18, %v887_v19  ;;  %v21163_v33 = vshrl.u32 %v1045_v23, 7  ;;  %v18161_v36 = vcombine.high %v1020_v29, %v1032_v30  ;;  %v18160_v43 = vcombine.low %v1020_v29, %v1032_v30  ;;  %v564_v18 = vld [vmem:[#allocation10 + $0x328] sm:$0xff] }
 0x300   :  { %4391 = vmatprep.subr.bf16.mxu0 %v17943_v34  ;;  %v17798_v34 = vcombine.low %v659_v20, %v671_v21  ;;  %v576_v19 = vld [vmem:[#allocation10 + $0x388] sm:$0xff] }
 0x301   :  { %4324 = vmatmul.mubr.bf16.vlgmr.msra.gmra.mxu1 %v21140_v60  ;;  %v924_v21 = vld [vmem:[#allocation10 + $0xe68] sm:$0xff] }
 0x302   :  { %4415 = vmatpush1.bf16.msra.mxu1 %v18158_v39  ;;  %4446 = vmatprep.mubr.bf16.mxu1 %v21003_v32  ;;  %v996_v39 = vld [vmem:[#allocation10 + $0x10a8] sm:$0xff] }
 0x303   :  { %4392 = vmatpush2.bf16.msra.mxu0 %v17942_v40  ;;  %4416 = vmatprep.subr.bf16.mxu1 %v18135_v41  ;;  %v1008_v40 = vld [vmem:[#allocation10 + $0x1108] sm:$0xff]  ;;  %v17990_v41 = vcombine.low %v851_v27, %v863_v28  ;;  %v17705_v27 = vcombine.high %v564_v18, %v576_v19 }
 0x304   :  { %4393 = vmatprep.subr.bf16.mxu0 %v17919_v42  ;;  %v21166_v42 = vsub.s32 0, %v21163_v33  ;;  %v18137_v46 = vcombine.high %v996_v39, %v1008_v40  ;;  %v540_v29 = vld [vmem:[#allocation10 + $0x268] sm:$0xff] }
 0x305   :  { %v552_v30 = vld [vmem:[#allocation10 + $0x2c8] sm:$0xff] }
 0x306   :  { %4417 = vmatpush1.bf16.msra.mxu1 %v18134_v47  ;;  %v21171_v47 = vsub.s32 1, %v21163_v33  ;;  %v1048_v58 = vrot.slane %v21168_v45, %v21166_v42  ;;  %v17681_v37 = vcombine.high %v540_v29, %v552_v30 }
 0x307   :  { %4394 = vmatpush2.bf16.msra.mxu0 %v17918_v48  ;;  %4418 = vmatprep.subr.bf16.mxu1 %v18111_v49  ;;  %v612_v48 = vld [vmem:[#allocation10 + $0x4a8] sm:$0xff] }
 0x308   :  { %4395 = vmatprep.subr.bf16.mxu0 %v17895_v51  ;;  %v624_v49 = vld [vmem:[#allocation10 + $0x508] sm:$0xff] }
 0x309   :  { %v972_v51 = vld [vmem:[#allocation10 + $0xfe8] sm:$0xff]  ;;  %v17752_v10 = vcombine.low %v612_v48, %v624_v49 }
 0x30a   :  { %4419 = vmatpush1.bf16.msra.mxu1 %v18110_v59  ;;  %v18136_v59 = vcombine.low %v996_v39, %v1008_v40  ;;  %v18113_v2 = vcombine.high %v972_v51, %v984_v55  ;;  %v18112_v12 = vcombine.low %v972_v51, %v984_v55  ;;  %v516_v39 = vld [vmem:[#allocation10 + $0x1a8] sm:$0xff] }
 0x30b   :  { %4396 = vmatpush2.bf16.msra.mxu0 %v17894_v62  ;;  %4420 = vmatprep.subr.bf16.mxu1 %v18087_v63  ;;  %v17753_v62 = vcombine.high %v612_v48, %v624_v49  ;;  %v528_v40 = vld [vmem:[#allocation10 + $0x208] sm:$0xff] }
 0x30c   :  { %4397 = vmatprep.subr.bf16.mxu0 %v17871_v0  ;;  %v1052_v0 = vrot.slane %v21168_v45, %v21171_v47  ;;  %v17657_v48 = vcombine.high %v516_v39, %v528_v40  ;;  %v492_v51 = vld [vmem:[#allocation10 + $0xe8] sm:$0xff] }
 0x30d   :  { %v504_v55 = vld [vmem:[#allocation10 + $0x148] sm:$0xff] }
 0x30e   :  { %4421 = vmatpush1.bf16.msra.mxu1 %v18086_v6  ;;  %v948_v6 = vld [vmem:[#allocation10 + $0xf28] sm:$0xff] }
 0x30f   :  { %4398 = vmatpush2.bf16.msra.mxu0 %v17870_v7  ;;  %4422 = vmatprep.subr.bf16.mxu1 %v18063_v8  ;;  %v960_v7 = vld [vmem:[#allocation10 + $0xf88] sm:$0xff] }
 0x310   :  { %4399 = vmatprep.subr.bf16.mxu0 %v17847_v9 }
 0x312   :  { %4423 = vmatpush1.bf16.msra.mxu1 %v18062_v14 }
 0x313   :  { %4400 = vmatpush2.bf16.msra.mxu0 %v17846_v15  ;;  %4424 = vmatprep.subr.bf16.mxu1 %v18039_v16 }
 0x314   :  { %4401 = vmatprep.subr.bf16.mxu0 %v17823_v17  ;;  %v18089_v17 = vcombine.high %v948_v6, %v960_v7 }
 0x316   :  { %4425 = vmatpush1.bf16.msra.mxu1 %v18038_v22  ;;  %v936_v22 = vld [vmem:[#allocation10 + $0xec8] sm:$0xff] }
 0x317   :  { %4402 = vmatpush2.bf16.msra.mxu0 %v17822_v24  ;;  %4426 = vmatprep.subr.bf16.mxu1 %v18015_v25  ;;  %v17728_v24 = vcombine.low %v588_v3, %v600_v4  ;;  %v18065_v28 = vcombine.high %v924_v21, %v936_v22  ;;  %v637_v3 = vld [vmem:[#allocation10 + $0x570] sm:$0xff] }
 0x318   :  { %4403 = vmatprep.subr.bf16.mxu0 %v17799_v26  ;;  %v18088_v26 = vcombine.low %v948_v6, %v960_v7  ;;  %v649_v4 = vld [vmem:[#allocation10 + $0x5d0] sm:$0xff] }
 0x31a   :  { %4427 = vmatpush1.bf16.msra.mxu1 %v18014_v31  ;;  %v900_v31 = vld [vmem:[#allocation10 + $0xda8] sm:$0xff] }
 0x31b   :  { %4404 = vmatpush2.bf16.msra.mxu0 %v17798_v34  ;;  %4428 = vmatprep.subr.bf16.mxu1 %v17991_v35  ;;  %v912_v34 = vld [vmem:[#allocation10 + $0xe08] sm:$0xff]  ;;  %v17704_v35 = vcombine.low %v564_v18, %v576_v19 }
 0x31c   :  { %4496 = vmatprep.subr.bf16.mxu0 %v18161_v36  ;;  %v18064_v36 = vcombine.low %v924_v21, %v936_v22  ;;  %v18041_v38 = vcombine.high %v900_v31, %v912_v34  ;;  %v804_v18 = vld [vmem:[#allocation10 + $0xaa8] sm:$0xff]  ;;  %v601_v21 = vld [vmem:[#allocation10 + $0x450] sm:$0xff] }
 0x31d   :  { %v816_v19 = vld [vmem:[#allocation10 + $0xb08] sm:$0xff] }
 0x31e   :  { %4406 = vmatmul.mubr.bf16.vlgmr.msra.gmra.mxu0 %v21140_v60  ;;  %4429 = vmatpush1.bf16.msra.mxu1 %v17990_v41  ;;  %v4120_v56 = vpop.f32.mrf.mxu0  ;;  %v876_v41 = vld [vmem:[#allocation10 + $0xce8] sm:$0xff] }
 0x31f   :  { %4497 = vmatpush1.bf16.msra.mxu0 %v18160_v43  ;;  %4455 = vmatprep.subr.bf16.mxu1 %v17777_v44  ;;  %v888_v43 = vld [vmem:[#allocation10 + $0xd48] sm:$0xff]  ;;  %v17680_v44 = vcombine.low %v540_v29, %v552_v30 }
 0x320   :  { %v4122_v63 = vpop.f32.mrf.mxu0  ;;  %4498 = vmatprep.subr.bf16.mxu0 %v18137_v46  ;;  %4528 = vmatprep.mubr.bf16.mxu0 %v21003_v32  ;;  %v18040_v46 = vcombine.low %v900_v31, %v912_v34  ;;  %v18017_v49 = vcombine.high %v876_v41, %v888_v43  ;;  %v780_v29 = vld [vmem:[#allocation10 + $0x9e8] sm:$0xff]  ;;  %v565_v31 = vld [vmem:[#allocation10 + $0x330] sm:$0xff] }
 0x321   :  { %4447 = vmatmul.mubr.bf16.vlgmr.msra.gmra.mxu1 %v21136_v54  ;;  %v4079_v5 = vpop.f32.mrf.mxu1  ;;  %v792_v30 = vld [vmem:[#allocation10 + $0xa48] sm:$0xff]  ;;  %v577_v34 = vld [vmem:[#allocation10 + $0x390] sm:$0xff] }
 0x322   :  { %v4080_v8 = vadd.f32 %v4079_v5, %v1048_v58  ;;  %4456 = vmatpush1.bf16.msra.mxu1 %v17776_v57  ;;  %4487 = vmatprep.mubr.bf16.mxu1 %v21144_v61  ;;  %v4124_v9 = vpop.f32.mrf.mxu0  ;;  %v864_v57 = vld [vmem:[#allocation10 + $0xc88] sm:$0xff]  ;;  %v17656_v58 = vcombine.low %v516_v39, %v528_v40  ;;  %v17632_v5 = vcombine.low %v492_v51, %v504_v55 }
 0x323   :  { %4499 = vmatpush1.bf16.msra.mxu0 %v18136_v59  ;;  %v4081_v11 = vpop.f32.mrf.mxu1  ;;  %4457 = vmatprep.subr.bf16.mxu1 %v17753_v62  ;;  %v18016_v59 = vcombine.low %v876_v41, %v888_v43  ;;  %v17633_v62 = vcombine.high %v492_v51, %v504_v55  ;;  %v828_v9 = vld [vmem:[#allocation10 + $0xb68] sm:$0xff]  ;;  %v17707_v40 = vcombine.high %v565_v31, %v577_v34 }
 0x324   :  { %v21181_v14 = vadd.f32 %v4120_v56, %v4080_v8  ;;  %v4082_v15 = vadd.f32 %v4081_v11, %v1052_v0  ;;  %v4125_v16 = vpop.f32.mrf.mxu0  ;;  %4500 = vmatprep.subr.bf16.mxu0 %v18113_v2  ;;  %v852_v56 = vld [vmem:[#allocation10 + $0xc28] sm:$0xff]  ;;  %v17779_v8 = vcombine.high %v637_v3, %v649_v4  ;;  %v613_v11 = vld [vmem:[#allocation10 + $0x4b0] sm:$0xff] }
 0x325   :  { %v4083_v20 = vpop.f32.mrf.mxu1  ;;  %v468_v0 = vld [vmem:[#allocation10 + $0x28] sm:$0xff]  ;;  %v17992_v6 = vcombine.low %v852_v56, %v864_v57 }
 0x326   :  { %v21183_v23 = vadd.f32 %v4122_v63, %v4082_v15  ;;  %4458 = vmatpush1.bf16.msra.mxu1 %v17752_v10  ;;  %v17993_v63 = vcombine.high %v852_v56, %v864_v57  ;;  %v480_v2 = vld [vmem:[#allocation10 + $0x88] sm:$0xff]  ;;  %v17778_v15 = vcombine.low %v637_v3, %v649_v4  ;;  %v589_v20 = vld [vmem:[#allocation10 + $0x3f0] sm:$0xff] }
 0x327   :  { %4501 = vmatpush1.bf16.msra.mxu0 %v18112_v12  ;;  %v4084_v25 = vpop.f32.mrf.mxu1  ;;  %4459 = vmatprep.subr.bf16.mxu1 %v17729_v13  ;;  %v17609_v7 = vcombine.high %v468_v0, %v480_v2  ;;  %v840_v10 = vld [vmem:[#allocation10 + $0xbc8] sm:$0xff]  ;;  %v625_v12 = vld [vmem:[#allocation10 + $0x510] sm:$0xff]  ;;  %v17608_v13 = vcombine.low %v468_v0, %v480_v2 }
 0x328   :  { %4502 = vmatprep.subr.bf16.mxu0 %v18089_v17  ;;  %v17969_v16 = vcombine.high %v828_v9, %v840_v10  ;;  %v17755_v17 = vcombine.high %v613_v11, %v625_v12  ;;  %v17754_v25 = vcombine.low %v613_v11, %v625_v12  ;;  %v756_v41 = vld [vmem:[#allocation10 + $0x928] sm:$0xff] }
 0x329   :  { %v768_v43 = vld [vmem:[#allocation10 + $0x988] sm:$0xff] }
 0x32a   :  { %4460 = vmatpush1.bf16.msra.mxu1 %v17728_v24  ;;  %v17968_v24 = vcombine.low %v828_v9, %v840_v10  ;;  %v17897_v51 = vcombine.high %v756_v41, %v768_v43  ;;  %v732_v56 = vld [vmem:[#allocation10 + $0x868] sm:$0xff] }
 0x32b   :  { %4503 = vmatpush1.bf16.msra.mxu0 %v18088_v26  ;;  %4461 = vmatprep.subr.bf16.mxu1 %v17705_v27  ;;  %v17945_v26 = vcombine.high %v804_v18, %v816_v19  ;;  %v744_v57 = vld [vmem:[#allocation10 + $0x8c8] sm:$0xff] }
 0x32c   :  { %4504 = vmatprep.subr.bf16.mxu0 %v18065_v28  ;;  %v17731_v28 = vcombine.high %v589_v20, %v601_v21  ;;  %v17873_v0 = vcombine.high %v732_v56, %v744_v57  ;;  %v708_v3 = vld [vmem:[#allocation10 + $0x7a8] sm:$0xff] }
 0x32d   :  { %v720_v4 = vld [vmem:[#allocation10 + $0x808] sm:$0xff] }
 0x32e   :  { %4462 = vmatpush1.bf16.msra.mxu1 %v17704_v35  ;;  %v17849_v9 = vcombine.high %v708_v3, %v720_v4  ;;  %v684_v11 = vld [vmem:[#allocation10 + $0x6e8] sm:$0xff] }
 0x32f   :  { %4505 = vmatpush1.bf16.msra.mxu0 %v18064_v36  ;;  %4463 = vmatprep.subr.bf16.mxu1 %v17681_v37  ;;  %v17944_v36 = vcombine.low %v804_v18, %v816_v19  ;;  %v17730_v37 = vcombine.low %v589_v20, %v601_v21  ;;  %v696_v12 = vld [vmem:[#allocation10 + $0x748] sm:$0xff] }
 0x330   :  { %4506 = vmatprep.subr.bf16.mxu0 %v18041_v38  ;;  %v17921_v38 = vcombine.high %v780_v29, %v792_v30  ;;  %v17825_v18 = vcombine.high %v684_v11, %v696_v12  ;;  %v660_v20 = vld [vmem:[#allocation10 + $0x628] sm:$0xff] }
 0x331   :  { %v672_v21 = vld [vmem:[#allocation10 + $0x688] sm:$0xff] }
 0x332   :  { %4464 = vmatpush1.bf16.msra.mxu1 %v17680_v44  ;;  %v541_v44 = vld [vmem:[#allocation10 + $0x270] sm:$0xff] }
 0x333   :  { %4507 = vmatpush1.bf16.msra.mxu0 %v18040_v46  ;;  %4465 = vmatprep.subr.bf16.mxu1 %v17657_v48  ;;  %v553_v46 = vld [vmem:[#allocation10 + $0x2d0] sm:$0xff]  ;;  %v17920_v48 = vcombine.low %v780_v29, %v792_v30  ;;  %v17801_v29 = vcombine.high %v660_v20, %v672_v21 }
 0x334   :  { %4508 = vmatprep.subr.bf16.mxu0 %v18017_v49  ;;  %v17706_v49 = vcombine.low %v565_v31, %v577_v34  ;;  %v17683_v55 = vcombine.high %v541_v44, %v553_v46  ;;  %v1021_v31 = vld [vmem:[#allocation10 + $0x1170] sm:$0xff] }
 0x335   :  { %v1033_v34 = vld [vmem:[#allocation10 + $0x11d0] sm:$0xff] }
 0x336   :  { %4466 = vmatpush1.bf16.msra.mxu1 %v17656_v58  ;;  %v517_v58 = vld [vmem:[#allocation10 + $0x1b0] sm:$0xff] }
 0x337   :  { %4509 = vmatpush1.bf16.msra.mxu0 %v18016_v59  ;;  %4467 = vmatprep.subr.bf16.mxu1 %v17633_v62  ;;  %v529_v59 = vld [vmem:[#allocation10 + $0x210] sm:$0xff]  ;;  %v17896_v62 = vcombine.low %v756_v41, %v768_v43  ;;  %v21195_v43 = vsub.s32 3, %v21163_v33 }
 0x338   :  { %4510 = vmatprep.subr.bf16.mxu0 %v17993_v63  ;;  %v17682_v63 = vcombine.low %v541_v44, %v553_v46  ;;  %v17659_v2 = vcombine.high %v517_v58, %v529_v59  ;;  %v997_v44 = vld [vmem:[#allocation10 + $0x10b0] sm:$0xff] }
 0x339   :  { %v1009_v46 = vld [vmem:[#allocation10 + $0x1110] sm:$0xff] }
 0x33a   :  { %4468 = vmatpush1.bf16.msra.mxu1 %v17632_v5  ;;  %v493_v5 = vld [vmem:[#allocation10 + $0xf0] sm:$0xff] }
 0x33b   :  { %4511 = vmatpush1.bf16.msra.mxu0 %v17992_v6  ;;  %4469 = vmatprep.subr.bf16.mxu1 %v17609_v7  ;;  %v505_v6 = vld [vmem:[#allocation10 + $0x150] sm:$0xff]  ;;  %v17872_v7 = vcombine.low %v732_v56, %v744_v57  ;;  %v18162_v57 = vcombine.low %v1021_v31, %v1033_v34 }
 0x33c   :  { %4537 = vmatprep.subr.bf16.mxu0 %v17779_v8  ;;  %v17658_v8 = vcombine.low %v517_v58, %v529_v59  ;;  %v17635_v10 = vcombine.high %v493_v5, %v505_v6  ;;  %v18139_v59 = vcombine.high %v997_v44, %v1009_v46 }
 0x33e   :  { %v21185_v22 = vpop.f32.mrf.mxu0  ;;  %4470 = vmatpush1.bf16.msra.mxu1 %v17608_v13  ;;  %4529 = vmatmul.mubr.bf16.vlgmr.msra.gmra.mxu0 %v21136_v54  ;;  %v469_v13 = vld [vmem:[#allocation10 + $0x30] sm:$0xff] }
 0x33f   :  { %4538 = vmatpush1.bf16.msra.mxu0 %v17778_v15  ;;  %4569 = vmatprep.mubr.bf16.mxu0 %v21144_v61  ;;  %v481_v15 = vld [vmem:[#allocation10 + $0x90] sm:$0xff] }
 0x340   :  { %v21189_v27 = vpop.f32.mrf.mxu0  ;;  %4471 = vmatprep.subr.bf16.mxu1 %v17969_v16  ;;  %4539 = vmatprep.subr.bf16.mxu0 %v17755_v17  ;;  %v17848_v16 = vcombine.low %v708_v3, %v720_v4  ;;  %v17634_v17 = vcombine.low %v493_v5, %v505_v6  ;;  %v17611_v19 = vcombine.high %v469_v13, %v481_v15  ;;  %v21005_v5 = vmov 1934713408  }
 0x341   :  { %v5096_v6 = vunpack.c.l.s4 %v21005_v5 }
 0x342   :  { %v4206_v35 = vpop.f32.mrf.mxu0  ;;  %4472 = vmatpush2.bf16.msra.mxu1 %v17968_v24  ;;  %v829_v24 = vld [vmem:[#allocation10 + $0xb70] sm:$0xff] }
 0x343   :  { %4540 = vmatpush1.bf16.msra.mxu0 %v17754_v25  ;;  %4473 = vmatprep.subr.bf16.mxu1 %v17945_v26  ;;  %v841_v25 = vld [vmem:[#allocation10 + $0xbd0] sm:$0xff]  ;;  %v17824_v26 = vcombine.low %v684_v11, %v696_v12 }
 0x344   :  { %v4207_v39 = vpop.f32.mrf.mxu0  ;;  %4541 = vmatprep.subr.bf16.mxu0 %v17731_v28  ;;  %v17610_v28 = vcombine.low %v469_v13, %v481_v15  ;;  %v17971_v30 = vcombine.high %v829_v24, %v841_v25  ;;  %v805_v35 = vld [vmem:[#allocation10 + $0xab0] sm:$0xff] }
 0x345   :  { %v17970_v39 = vcombine.low %v829_v24, %v841_v25  ;;  %v733_v25 = vld [vmem:[#allocation10 + $0x870] sm:$0xff] }
 0x346   :  { %4474 = vmatpush2.bf16.msra.mxu1 %v17944_v36  ;;  %v817_v36 = vld [vmem:[#allocation10 + $0xb10] sm:$0xff] }
 0x347   :  { %4542 = vmatpush1.bf16.msra.mxu0 %v17730_v37  ;;  %4475 = vmatprep.subr.bf16.mxu1 %v17921_v38  ;;  %v17800_v37 = vcombine.low %v660_v20, %v672_v21  ;;  %v21192_v38 = vsub.s32 2, %v21163_v33  ;;  %v17947_v41 = vcombine.high %v805_v35, %v817_v36  ;;  %v17946_v58 = vcombine.low %v805_v35, %v817_v36  ;;  %v925_v36 = vld [vmem:[#allocation10 + $0xe70] sm:$0xff] }
 0x348   :  { %4543 = vmatprep.subr.bf16.mxu0 %v17707_v40  ;;  %v18163_v40 = vcombine.high %v1021_v31, %v1033_v34  ;;  %v5097_v21 = vunpack.c.0.s8 %v5096_v6 }
 0x349   :  { %v1056_v56 = vrot.slane %v21168_v45, %v21192_v38 }
 0x34a   :  { %4476 = vmatpush2.bf16.msra.mxu1 %v17920_v48  ;;  %v21004_v48 = vmov 1983009808  }
 0x34b   :  { %4544 = vmatpush1.bf16.msra.mxu0 %v17706_v49  ;;  %4477 = vmatprep.subr.bf16.mxu1 %v17897_v51  ;;  %v5032_v49 = vunpack.c.l.s4 %v21004_v48  ;;  %v781_v51 = vld [vmem:[#allocation10 + $0x9f0] sm:$0xff] }
 0x34c   :  { %4545 = vmatprep.subr.bf16.mxu0 %v17683_v55  ;;  %v793_v55 = vld [vmem:[#allocation10 + $0xa50] sm:$0xff] }
 0x34d   :  { %v5033_v4 = vunpack.c.0.s8 %v5032_v49  ;;  %v17922_v12 = vcombine.low %v781_v51, %v793_v55 }
 0x34e   :  { %4478 = vmatpush2.bf16.msra.mxu1 %v17896_v62  ;;  %v1060_v62 = vrot.slane %v21168_v45, %v21195_v43 }
 0x34f   :  { %4546 = vmatpush1.bf16.msra.mxu0 %v17682_v63  ;;  %4479 = vmatprep.subr.bf16.mxu1 %v17873_v0  ;;  %v17923_v63 = vcombine.high %v781_v51, %v793_v55  ;;  %v973_v0 = vld [vmem:[#allocation10 + $0xff0] sm:$0xff]  ;;  %v21205_v20 = vsub.s32 %v5033_v4, %v21163_v33 }
 0x350   :  { %4547 = vmatprep.subr.bf16.mxu0 %v17659_v2  ;;  %v985_v2 = vld [vmem:[#allocation10 + $0x1050] sm:$0xff] }
 0x351   :  { %v18115_v13 = vcombine.high %v973_v0, %v985_v2  ;;  %v697_v4 = vld [vmem:[#allocation10 + $0x750] sm:$0xff] }
 0x352   :  { %4480 = vmatpush2.bf16.msra.mxu1 %v17872_v7  ;;  %v757_v7 = vld [vmem:[#allocation10 + $0x930] sm:$0xff] }
 0x353   :  { %4548 = vmatpush1.bf16.msra.mxu0 %v17658_v8  ;;  %4481 = vmatprep.subr.bf16.mxu1 %v17849_v9  ;;  %v769_v8 = vld [vmem:[#allocation10 + $0x990] sm:$0xff] }
 0x354   :  { %4549 = vmatprep.subr.bf16.mxu0 %v17635_v10  ;;  %v18138_v10 = vcombine.low %v997_v44, %v1009_v46  ;;  %v17898_v34 = vcombine.low %v757_v7, %v769_v8  ;;  %v709_v44 = vld [vmem:[#allocation10 + $0x7b0] sm:$0xff] }
 0x355   :  { %v721_v46 = vld [vmem:[#allocation10 + $0x810] sm:$0xff] }
 0x356   :  { %4482 = vmatpush2.bf16.msra.mxu1 %v17848_v16 }
 0x357   :  { %4550 = vmatpush1.bf16.msra.mxu0 %v17634_v17  ;;  %4483 = vmatprep.subr.bf16.mxu1 %v17825_v18  ;;  %v17899_v17 = vcombine.high %v757_v7, %v769_v8  ;;  %v949_v18 = vld [vmem:[#allocation10 + $0xf30] sm:$0xff] }
 0x358   :  { %4551 = vmatprep.subr.bf16.mxu0 %v17611_v19  ;;  %v961_v19 = vld [vmem:[#allocation10 + $0xf90] sm:$0xff] }
 0x359   :  { %v18091_v35 = vcombine.high %v949_v18, %v961_v19 }
 0x35a   :  { %4484 = vmatpush2.bf16.msra.mxu1 %v17824_v26  ;;  %v745_v26 = vld [vmem:[#allocation10 + $0x8d0] sm:$0xff] }
 0x35b   :  { %4552 = vmatpush1.bf16.msra.mxu0 %v17610_v28  ;;  %4485 = vmatprep.subr.bf16.mxu1 %v17801_v29 }
 0x35c   :  { %4553 = vmatprep.subr.bf16.mxu0 %v17971_v30 }
 0x35e   :  { %4486 = vmatpush2.bf16.msra.mxu1 %v17800_v37 }
 0x35f   :  { %4554 = vmatpush2.bf16.msra.mxu0 %v17970_v39  ;;  %4578 = vmatprep.subr.bf16.mxu1 %v18163_v40  ;;  %v17875_v40 = vcombine.high %v733_v25, %v745_v26 }
 0x360   :  { %4555 = vmatprep.subr.bf16.mxu0 %v17947_v41  ;;  %v937_v41 = vld [vmem:[#allocation10 + $0xed0] sm:$0xff] }
 0x361   :  { %v4161_v3 = vpop.f32.mrf.mxu1  ;;  %4488 = vmatmul.mubr.bf16.vlgmr.msra.gmra.mxu1 %v21140_v60  ;;  %v18066_v5 = vcombine.low %v925_v36, %v937_v41 }
 0x362   :  { %v4162_v9 = vadd.f32 %v4161_v3, %v1056_v56  ;;  %4579 = vmatpush1.bf16.msra.mxu1 %v18162_v57  ;;  %4610 = vmatprep.mubr.bf16.mxu1 %v21003_v32  ;;  %v18067_v56 = vcombine.high %v925_v36, %v937_v41  ;;  %v17851_v57 = vcombine.high %v709_v44, %v721_v46  ;;  %v685_v3 = vld [vmem:[#allocation10 + $0x6f0] sm:$0xff]  ;;  %v1022_v41 = vld [vmem:[#allocation10 + $0x1178] sm:$0xff] }
 0x363   :  { %v4163_v11 = vpop.f32.mrf.mxu1  ;;  %4556 = vmatpush2.bf16.msra.mxu0 %v17946_v58  ;;  %4580 = vmatprep.subr.bf16.mxu1 %v18139_v59  ;;  %v901_v58 = vld [vmem:[#allocation10 + $0xdb0] sm:$0xff] }
 0x364   :  { %v4203_v15 = vadd.f32 %v21185_v22, %v4162_v9  ;;  %v4164_v16 = vadd.f32 %v4163_v11, %v1060_v62  ;;  %4557 = vmatprep.subr.bf16.mxu0 %v17923_v63  ;;  %v18114_v22 = vcombine.low %v973_v0, %v985_v2  ;;  %v913_v2 = vld [vmem:[#allocation10 + $0xe10] sm:$0xff] }
 0x365   :  { %v4165_v24 = vpop.f32.mrf.mxu1  ;;  %v18043_v11 = vcombine.high %v901_v58, %v913_v2  ;;  %v865_v36 = vld [vmem:[#allocation10 + $0xc90] sm:$0xff] }
 0x366   :  { %v5029_v28 = vcombine.low %v21181_v14, %v4203_v15  ;;  %v5030_v29 = vcombine.high %v21181_v14, %v4203_v15  ;;  %v4205_v30 = vadd.f32 %v21189_v27, %v4164_v16  ;;  %4581 = vmatpush1.bf16.msra.mxu1 %v18138_v10  ;;  %v21213_v14 = vsub.s32 %v5097_v21, %v21163_v33  ;;  %v661_v24 = vld [vmem:[#allocation10 + $0x630] sm:$0xff] }
 0x367   :  { %v4166_v31 = vpop.f32.mrf.mxu1  ;;  %4558 = vmatpush2.bf16.msra.mxu0 %v17922_v12  ;;  %4582 = vmatprep.subr.bf16.mxu1 %v18115_v13  ;;  %v18090_v27 = vcombine.low %v949_v18, %v961_v19  ;;  %v17850_v10 = vcombine.low %v709_v44, %v721_v46  ;;  %v17827_v12 = vcombine.high %v685_v3, %v697_v4  ;;  %v877_v18 = vld [vmem:[#allocation10 + $0xcf0] sm:$0xff]  ;;  %v1034_v44 = vld [vmem:[#allocation10 + $0x11d8] sm:$0xff] }
 0x368   :  { %v5045_v37 = vcombine.low %v21183_v23, %v4205_v30  ;;  %v5046_v39 = vcombine.high %v21183_v23, %v4205_v30  ;;  %4559 = vmatprep.subr.bf16.mxu0 %v17899_v17  ;;  %v5037_v48 = vrot.slane %v5029_v28, %v21205_v20  ;;  %v5044_v49 = vrot.slane %v5030_v29, %v21205_v20  ;;  %v889_v19 = vld [vmem:[#allocation10 + $0xd50] sm:$0xff] }
 0x369   :  { %v17874_v23 = vcombine.low %v733_v25, %v745_v26  ;;  %v18042_v21 = vcombine.low %v901_v58, %v913_v2  ;;  %v673_v25 = vld [vmem:[#allocation10 + $0x690] sm:$0xff]  ;;  %v18019_v31 = vcombine.high %v877_v18, %v889_v19  ;;  %v18165_v58 = vcombine.high %v1022_v41, %v1034_v44 }
 0x36a   :  { %v5053_v51 = vrot.slane %v5045_v37, %v21205_v20  ;;  %v5060_v55 = vrot.slane %v5046_v39, %v21205_v20  ;;  %4583 = vmatpush1.bf16.msra.mxu1 %v18114_v22  ;;  %v17826_v22 = vcombine.low %v685_v3, %v697_v4  ;;  %v21239_v2 = vsub.s32 5, %v21163_v33  ;;  %v998_v3 = vld [vmem:[#allocation10 + $0x10b8] sm:$0xff] }
 0x36b   :  { %4560 = vmatpush2.bf16.msra.mxu0 %v17898_v34  ;;  %4584 = vmatprep.subr.bf16.mxu1 %v18091_v35  ;;  %v17803_v34 = vcombine.high %v661_v24, %v673_v25  ;;  %v853_v35 = vld [vmem:[#allocation10 + $0xc30] sm:$0xff]  ;;  %v1010_v4 = vld [vmem:[#allocation10 + $0x1118] sm:$0xff] }
 0x36c   :  { %v5093_v59 = vcombine.low %v5037_v48, %v5053_v51  ;;  %v5094_v62 = vcombine.high %v5037_v48, %v5053_v51  ;;  %v5109_v63 = vcombine.low %v5044_v49, %v5060_v55  ;;  %v5110_v0 = vcombine.high %v5044_v49, %v5060_v55  ;;  %4561 = vmatprep.subr.bf16.mxu0 %v17875_v40 }
 0x36d   :  { %v17802_v55 = vcombine.low %v661_v24, %v673_v25  ;;  %v18140_v24 = vcombine.low %v998_v3, %v1010_v4 }
 0x36e   :  { %v5101_v6 = vrot.slane %v5093_v59, %v21213_v14  ;;  %v5108_v7 = vrot.slane %v5094_v62, %v21213_v14  ;;  %v5117_v8 = vrot.slane %v5109_v63, %v21213_v14  ;;  %v5124_v9 = vrot.slane %v5110_v0, %v21213_v14  ;;  %4585 = vmatpush1.bf16.msra.mxu1 %v18090_v27  ;;  %v638_v59 = vld [vmem:[#allocation10 + $0x578] sm:$0xff] }
 0x36f   :  { %4562 = vmatpush2.bf16.msra.mxu0 %v17874_v23  ;;  %4586 = vmatprep.subr.bf16.mxu1 %v18067_v56  ;;  %v18018_v27 = vcombine.low %v877_v18, %v889_v19  ;;  %v17995_v23 = vcombine.high %v853_v35, %v865_v36  ;;  %v21231_v56 = vsub.s32 4, %v21163_v33  ;;  %v650_v62 = vld [vmem:[#allocation10 + $0x5d8] sm:$0xff] }
 0x370   :  { %v18174_v13 = vcombine.low %v5101_v6, %v5108_v7  ;;  %v18176_v15 = vcombine.high %v5101_v6, %v5108_v7  ;;  %v18178_v16 = vcombine.low %v5117_v8, %v5124_v9  ;;  %v18180_v17 = vcombine.high %v5117_v8, %v5124_v9  ;;  %4563 = vmatprep.subr.bf16.mxu0 %v17851_v57 }
 0x371   :  { %v17994_v7 = vcombine.low %v853_v35, %v865_v36  ;;  %v1064_v8 = vrot.slane %v21168_v45, %v21231_v56  ;;  %v18164_v9 = vcombine.low %v1022_v41, %v1034_v44  ;;  %v17780_v19 = vcombine.low %v638_v59, %v650_v62 }
 0x372   :  { %4587 = vmatpush1.bf16.msra.mxu1 %v18066_v5  ;;  %v5445_v26 = vrot.slane %v18174_v13, %v21205_v20  ;;  %v5461_v28 = vrot.slane %v18176_v15, %v21205_v20  ;;  %v5477_v29 = vrot.slane %v18178_v16, %v21205_v20  ;;  %v5493_v30 = vrot.slane %v18180_v17, %v21205_v20  ;;  %v626_v13 = vld [vmem:[#allocation10 + $0x518] sm:$0xff] }
 0x373   :  { %4564 = vmatpush2.bf16.msra.mxu0 %v17850_v10  ;;  %4588 = vmatprep.subr.bf16.mxu1 %v18043_v11  ;;  %v17781_v10 = vcombine.high %v638_v59, %v650_v62  ;;  %v18141_v11 = vcombine.high %v998_v3, %v1010_v4  ;;  %v1068_v15 = vrot.slane %v21168_v45, %v21239_v2  ;;  %v974_v16 = vld [vmem:[#allocation10 + $0xff8] sm:$0xff] }
 0x374   :  { %4565 = vmatprep.subr.bf16.mxu0 %v17827_v12  ;;  %v5501_v37 = vcombine.low %v5445_v26, %v5461_v28  ;;  %v5533_v39 = vcombine.low %v5477_v29, %v5493_v30  ;;  %v5502_v40 = vcombine.high %v5445_v26, %v5461_v28  ;;  %v5534_v46 = vcombine.high %v5477_v29, %v5493_v30  ;;  %v614_v12 = vld [vmem:[#allocation10 + $0x4b8] sm:$0xff] }
 0x375   :  { %v986_v17 = vld [vmem:[#allocation10 + $0x1058] sm:$0xff]  ;;  %v17757_v25 = vcombine.high %v614_v12, %v626_v13 }
 0x376   :  { %4589 = vmatpush1.bf16.msra.mxu1 %v18042_v21  ;;  %v5509_v48 = vrot.slane %v5501_v37, %v21213_v14  ;;  %v5541_v49 = vrot.slane %v5533_v39, %v21213_v14  ;;  %v5516_v51 = vrot.slane %v5502_v40, %v21213_v14  ;;  %v5548_v57 = vrot.slane %v5534_v46, %v21213_v14  ;;  %v590_v29 = vld [vmem:[#allocation10 + $0x3f8] sm:$0xff] }
 0x377   :  { %4566 = vmatpush2.bf16.msra.mxu0 %v17826_v22  ;;  %4590 = vmatprep.subr.bf16.mxu1 %v18019_v31  ;;  %v18117_v28 = vcombine.high %v974_v16, %v986_v17  ;;  %v602_v30 = vld [vmem:[#allocation10 + $0x458] sm:$0xff]  ;;  %v17756_v37 = vcombine.low %v614_v12, %v626_v13  ;;  %v18116_v40 = vcombine.low %v974_v16, %v986_v17 }
 0x378   :  { %4567 = vmatprep.subr.bf16.mxu0 %v17803_v34  ;;  %v21234_v63 = vcombine.low %v5509_v48, %v5541_v49  ;;  %v21236_v0 = vcombine.high %v5509_v48, %v5541_v49  ;;  %v21241_v5 = vcombine.low %v5516_v51, %v5548_v57  ;;  %v21243_v6 = vcombine.high %v5516_v51, %v5548_v57  ;;  %v950_v31 = vld [vmem:[#allocation10 + $0xf38] sm:$0xff] }
 0x379   :  { %v962_v34 = vld [vmem:[#allocation10 + $0xf98] sm:$0xff]  ;;  %v17733_v41 = vcombine.high %v590_v29, %v602_v30  ;;  %v17732_v57 = vcombine.low %v590_v29, %v602_v30 }
 0x37a   :  { %4591 = vmatpush1.bf16.msra.mxu1 %v18018_v27  ;;  %v18093_v27 = vcombine.high %v950_v31, %v962_v34  ;;  %v566_v48 = vld [vmem:[#allocation10 + $0x338] sm:$0xff]  ;;  %v18092_v59 = vcombine.low %v950_v31, %v962_v34 }
 0x37b   :  { %4568 = vmatpush2.bf16.msra.mxu0 %v17802_v55  ;;  %4592 = vmatprep.subr.bf16.mxu1 %v17995_v23  ;;  %v578_v49 = vld [vmem:[#allocation10 + $0x398] sm:$0xff] }
 0x37c   :  { %4660 = vmatprep.subr.bf16.mxu0 %v18165_v58  ;;  %v926_v55 = vld [vmem:[#allocation10 + $0xe78] sm:$0xff]  ;;  %v17709_v62 = vcombine.high %v566_v48, %v578_v49 }
 0x37d   :  { %v938_v23 = vld [vmem:[#allocation10 + $0xed8] sm:$0xff] }
 0x37e   :  { %v4243_v18 = vpop.f32.mrf.mxu0  ;;  %4570 = vmatmul.mubr.bf16.vlgmr.msra.gmra.mxu0 %v21140_v60  ;;  %4593 = vmatpush1.bf16.msra.mxu1 %v17994_v7  ;;  %v18069_v3 = vcombine.high %v926_v55, %v938_v23  ;;  %v542_v4 = vld [vmem:[#allocation10 + $0x278] sm:$0xff] }
 0x37f   :  { %v4244_v21 = vadd.f32 %v4243_v18, %v1064_v8  ;;  %4661 = vmatpush1.bf16.msra.mxu0 %v18164_v9  ;;  %4619 = vmatprep.subr.bf16.mxu1 %v17781_v10  ;;  %v554_v7 = vld [vmem:[#allocation10 + $0x2d8] sm:$0xff]  ;;  %v17708_v10 = vcombine.low %v566_v48, %v578_v49 }
 0x380   :  { %v4245_v26 = vpop.f32.mrf.mxu0  ;;  %4662 = vmatprep.subr.bf16.mxu0 %v18141_v11  ;;  %4692 = vmatprep.mubr.bf16.mxu0 %v21003_v32  ;;  %v902_v8 = vld [vmem:[#allocation10 + $0xdb8] sm:$0xff]  ;;  %v18068_v11 = vcombine.low %v926_v55, %v938_v23  ;;  %v17685_v12 = vcombine.high %v542_v4, %v554_v7  ;;  %v615_v55 = vld [vmem:[#allocation10 + $0x4c0] sm:$0xff] }
 0x381   :  { %v4246_v45 = vadd.f32 %v4245_v26, %v1068_v15  ;;  %v4284_v22 = vpop.f32.mrf.mxu1  ;;  %4611 = vmatmul.mubr.bf16.vlgmr.msra.gmra.mxu1 %v21136_v54  ;;  %v914_v9 = vld [vmem:[#allocation10 + $0xe18] sm:$0xff]  ;;  %v627_v23 = vld [vmem:[#allocation10 + $0x520] sm:$0xff] }
 0x382   :  { %v21252_v35 = vadd.f32 %v4284_v22, %v4244_v21  ;;  %v4247_v36 = vpop.f32.mrf.mxu0  ;;  %4620 = vmatpush1.bf16.msra.mxu1 %v17780_v19  ;;  %4651 = vmatprep.mubr.bf16.mxu1 %v21144_v61  ;;  %v18045_v13 = vcombine.high %v902_v8, %v914_v9  ;;  %v518_v15 = vld [vmem:[#allocation10 + $0x1b8] sm:$0xff]  ;;  %v17684_v19 = vcombine.low %v542_v4, %v554_v7  ;;  %v591_v7 = vld [vmem:[#allocation10 + $0x400] sm:$0xff] }
 0x383   :  { %v4286_v39 = vpop.f32.mrf.mxu1  ;;  %4663 = vmatpush1.bf16.msra.mxu0 %v18140_v24  ;;  %4621 = vmatprep.subr.bf16.mxu1 %v17757_v25  ;;  %v530_v16 = vld [vmem:[#allocation10 + $0x218] sm:$0xff]  ;;  %v18044_v21 = vcombine.low %v902_v8, %v914_v9  ;;  %v603_v8 = vld [vmem:[#allocation10 + $0x460] sm:$0xff] }
 0x384   :  { %v21255_v44 = vadd.f32 %v4286_v39, %v4246_v45  ;;  %v4248_v46 = vpop.f32.mrf.mxu0  ;;  %4664 = vmatprep.subr.bf16.mxu0 %v18117_v28  ;;  %v878_v17 = vld [vmem:[#allocation10 + $0xcf8] sm:$0xff]  ;;  %v17661_v24 = vcombine.high %v518_v15, %v530_v16  ;;  %v17660_v45 = vcombine.low %v518_v15, %v530_v16  ;;  %v639_v39 = vld [vmem:[#allocation10 + $0x580] sm:$0xff]  ;;  %v17735_v15 = vcombine.high %v591_v7, %v603_v8 }
 0x385   :  { %v4288_v51 = vpop.f32.mrf.mxu1  ;;  %v890_v18 = vld [vmem:[#allocation10 + $0xd58] sm:$0xff] }
 0x386   :  { %4622 = vmatpush1.bf16.msra.mxu1 %v17756_v37  ;;  %v18021_v25 = vcombine.high %v878_v17, %v890_v18  ;;  %v494_v26 = vld [vmem:[#allocation10 + $0xf8] sm:$0xff]  ;;  %v18020_v22 = vcombine.low %v878_v17, %v890_v18  ;;  %v567_v18 = vld [vmem:[#allocation10 + $0x340] sm:$0xff] }
 0x387   :  { %v4289_v58 = vpop.f32.mrf.mxu1  ;;  %4665 = vmatpush1.bf16.msra.mxu0 %v18116_v40  ;;  %4623 = vmatprep.subr.bf16.mxu1 %v17733_v41  ;;  %v506_v28 = vld [vmem:[#allocation10 + $0x158] sm:$0xff]  ;;  %v651_v40 = vld [vmem:[#allocation10 + $0x5e0] sm:$0xff] }
 0x388   :  { %4666 = vmatprep.subr.bf16.mxu0 %v18093_v27  ;;  %v854_v29 = vld [vmem:[#allocation10 + $0xc38] sm:$0xff]  ;;  %v17637_v31 = vcombine.high %v494_v26, %v506_v28  ;;  %v17636_v41 = vcombine.low %v494_v26, %v506_v28  ;;  %v17783_v48 = vcombine.high %v639_v39, %v651_v40  ;;  %v17782_v58 = vcombine.low %v639_v39, %v651_v40 }
 0x389   :  { %v866_v30 = vld [vmem:[#allocation10 + $0xc98] sm:$0xff] }
 0x38a   :  { %4624 = vmatpush1.bf16.msra.mxu1 %v17732_v57  ;;  %v17997_v34 = vcombine.high %v854_v29, %v866_v30  ;;  %v470_v36 = vld [vmem:[#allocation10 + $0x38] sm:$0xff]  ;;  %v17996_v46 = vcombine.low %v854_v29, %v866_v30 }
 0x38b   :  { %4667 = vmatpush1.bf16.msra.mxu0 %v18092_v59  ;;  %4625 = vmatprep.subr.bf16.mxu1 %v17709_v62  ;;  %v482_v37 = vld [vmem:[#allocation10 + $0x98] sm:$0xff]  ;;  %v17759_v62 = vcombine.high %v615_v55, %v627_v23 }
 0x38c   :  { %4668 = vmatprep.subr.bf16.mxu0 %v18069_v3  ;;  %v17613_v27 = vcombine.high %v470_v36, %v482_v37  ;;  %v830_v49 = vld [vmem:[#allocation10 + $0xb78] sm:$0xff]  ;;  %v17612_v57 = vcombine.low %v470_v36, %v482_v37 }
 0x38d   :  { %v842_v51 = vld [vmem:[#allocation10 + $0xbd8] sm:$0xff] }
 0x38e   :  { %4626 = vmatpush1.bf16.msra.mxu1 %v17708_v10  ;;  %v17973_v59 = vcombine.high %v830_v49, %v842_v51  ;;  %v806_v3 = vld [vmem:[#allocation10 + $0xab8] sm:$0xff]  ;;  %v17972_v10 = vcombine.low %v830_v49, %v842_v51 }
 0x38f   :  { %4669 = vmatpush1.bf16.msra.mxu0 %v18068_v11  ;;  %4627 = vmatprep.subr.bf16.mxu1 %v17685_v12  ;;  %v818_v4 = vld [vmem:[#allocation10 + $0xb18] sm:$0xff]  ;;  %v17758_v11 = vcombine.low %v615_v55, %v627_v23 }
 0x390   :  { %4670 = vmatprep.subr.bf16.mxu0 %v18045_v13  ;;  %v17949_v12 = vcombine.high %v806_v3, %v818_v4  ;;  %v782_v16 = vld [vmem:[#allocation10 + $0x9f8] sm:$0xff] }
 0x391   :  { %v794_v17 = vld [vmem:[#allocation10 + $0xa58] sm:$0xff] }
 0x392   :  { %4628 = vmatpush1.bf16.msra.mxu1 %v17684_v19  ;;  %v579_v19 = vld [vmem:[#allocation10 + $0x3a0] sm:$0xff]  ;;  %v17925_v26 = vcombine.high %v782_v16, %v794_v17  ;;  %v758_v30 = vld [vmem:[#allocation10 + $0x938] sm:$0xff] }
 0x393   :  { %4671 = vmatpush1.bf16.msra.mxu0 %v18044_v21  ;;  %4629 = vmatprep.subr.bf16.mxu1 %v17661_v24  ;;  %v17948_v24 = vcombine.low %v806_v3, %v818_v4  ;;  %v17711_v29 = vcombine.high %v567_v18, %v579_v19  ;;  %v17710_v36 = vcombine.low %v567_v18, %v579_v19  ;;  %v734_v40 = vld [vmem:[#allocation10 + $0x878] sm:$0xff] }
 0x394   :  { %4672 = vmatprep.subr.bf16.mxu0 %v18021_v25  ;;  %v17734_v25 = vcombine.low %v591_v7, %v603_v8  ;;  %v710_v23 = vld [vmem:[#allocation10 + $0x7b8] sm:$0xff] }
 0x395   :  { %v686_v8 = vld [vmem:[#allocation10 + $0x6f8] sm:$0xff] }
 0x396   :  { %4630 = vmatpush1.bf16.msra.mxu1 %v17660_v45  ;;  %v770_v45 = vld [vmem:[#allocation10 + $0x998] sm:$0xff] }
 0x397   :  { %4673 = vmatpush1.bf16.msra.mxu0 %v18020_v22  ;;  %4631 = vmatprep.subr.bf16.mxu1 %v17637_v31  ;;  %v543_v22 = vld [vmem:[#allocation10 + $0x280] sm:$0xff]  ;;  %v17901_v37 = vcombine.high %v758_v30, %v770_v45  ;;  %v662_v19 = vld [vmem:[#allocation10 + $0x638] sm:$0xff] }
 0x398   :  { %4674 = vmatprep.subr.bf16.mxu0 %v17997_v34  ;;  %v555_v31 = vld [vmem:[#allocation10 + $0x2e0] sm:$0xff]  ;;  %v17924_v34 = vcombine.low %v782_v16, %v794_v17 }
 0x399   :  { %v17687_v39 = vcombine.high %v543_v22, %v555_v31  ;;  %v17686_v49 = vcombine.low %v543_v22, %v555_v31  ;;  %v1035_v22 = vld [vmem:[#allocation10 + $0x11e0] sm:$0xff] }
 0x39a   :  { %4632 = vmatpush1.bf16.msra.mxu1 %v17636_v41  ;;  %v746_v41 = vld [vmem:[#allocation10 + $0x8d8] sm:$0xff]  ;;  %v807_v31 = vld [vmem:[#allocation10 + $0xac0] sm:$0xff] }
 0x39b   :  { %4675 = vmatpush1.bf16.msra.mxu0 %v17996_v46  ;;  %4633 = vmatprep.subr.bf16.mxu1 %v17613_v27  ;;  %v519_v46 = vld [vmem:[#allocation10 + $0x1c0] sm:$0xff]  ;;  %v17877_v51 = vcombine.high %v734_v40, %v746_v41 }
 0x39c   :  { %4701 = vmatprep.subr.bf16.mxu0 %v17783_v48  ;;  %v531_v27 = vld [vmem:[#allocation10 + $0x220] sm:$0xff]  ;;  %v17900_v48 = vcombine.low %v758_v30, %v770_v45 }
 0x39d   :  { %v17663_v55 = vcombine.high %v519_v46, %v531_v27  ;;  %v17662_v3 = vcombine.low %v519_v46, %v531_v27  ;;  %v1023_v45 = vld [vmem:[#allocation10 + $0x1180] sm:$0xff]  ;;  %v21267_v46 = vsub.s32 7, %v21163_v33 }
 0x39e   :  { %v21257_v9 = vpop.f32.mrf.mxu0  ;;  %4634 = vmatpush1.bf16.msra.mxu1 %v17612_v57  ;;  %4693 = vmatmul.mubr.bf16.vlgmr.msra.gmra.mxu0 %v21136_v54  ;;  %v722_v57 = vld [vmem:[#allocation10 + $0x818] sm:$0xff]  ;;  %v999_v27 = vld [vmem:[#allocation10 + $0x10c0] sm:$0xff] }
 0x39f   :  { %4702 = vmatpush1.bf16.msra.mxu0 %v17782_v58  ;;  %4733 = vmatprep.mubr.bf16.mxu0 %v21144_v61  ;;  %v495_v58 = vld [vmem:[#allocation10 + $0x100] sm:$0xff]  ;;  %v17853_v4 = vcombine.high %v710_v23, %v722_v57 }
 0x3a0   :  { %v21261_v13 = vpop.f32.mrf.mxu0  ;;  %4635 = vmatprep.subr.bf16.mxu1 %v17973_v59  ;;  %4703 = vmatprep.subr.bf16.mxu0 %v17759_v62  ;;  %v507_v59 = vld [vmem:[#allocation10 + $0x160] sm:$0xff]  ;;  %v17876_v62 = vcombine.low %v734_v40, %v746_v41  ;;  %v18167_v40 = vcombine.high %v1023_v45, %v1035_v22 }
 0x3a1   :  { %v17639_v7 = vcombine.high %v495_v58, %v507_v59  ;;  %v17638_v16 = vcombine.low %v495_v58, %v507_v59 }
 0x3a2   :  { %v4370_v21 = vpop.f32.mrf.mxu0  ;;  %4636 = vmatpush2.bf16.msra.mxu1 %v17972_v10  ;;  %v698_v10 = vld [vmem:[#allocation10 + $0x758] sm:$0xff] }
 0x3a3   :  { %4704 = vmatpush1.bf16.msra.mxu0 %v17758_v11  ;;  %4637 = vmatprep.subr.bf16.mxu1 %v17949_v12  ;;  %v471_v11 = vld [vmem:[#allocation10 + $0x40] sm:$0xff]  ;;  %v17829_v17 = vcombine.high %v686_v8, %v698_v10  ;;  %v674_v21 = vld [vmem:[#allocation10 + $0x698] sm:$0xff] }
 0x3a4   :  { %v4371_v28 = vpop.f32.mrf.mxu0  ;;  %4705 = vmatprep.subr.bf16.mxu0 %v17735_v15  ;;  %v483_v12 = vld [vmem:[#allocation10 + $0xa0] sm:$0xff]  ;;  %v17852_v15 = vcombine.low %v710_v23, %v722_v57  ;;  %v18166_v57 = vcombine.low %v1023_v45, %v1035_v22 }
 0x3a5   :  { %v17615_v18 = vcombine.high %v471_v11, %v483_v12  ;;  %v17614_v28 = vcombine.low %v471_v11, %v483_v12 }
 0x3a6   :  { %4638 = vmatpush2.bf16.msra.mxu1 %v17948_v24  ;;  %v831_v24 = vld [vmem:[#allocation10 + $0xb80] sm:$0xff] }
 0x3a7   :  { %4706 = vmatpush1.bf16.msra.mxu0 %v17734_v25  ;;  %4639 = vmatprep.subr.bf16.mxu1 %v17925_v26  ;;  %v843_v25 = vld [vmem:[#allocation10 + $0xbe0] sm:$0xff]  ;;  %v17828_v26 = vcombine.low %v686_v8, %v698_v10 }
 0x3a8   :  { %4707 = vmatprep.subr.bf16.mxu0 %v17711_v29  ;;  %v17805_v29 = vcombine.high %v662_v19, %v674_v21  ;;  %v17975_v30 = vcombine.high %v831_v24, %v843_v25  ;;  %v759_v8 = vld [vmem:[#allocation10 + $0x940] sm:$0xff] }
 0x3a9   :  { %v771_v10 = vld [vmem:[#allocation10 + $0x9a0] sm:$0xff] }
 0x3aa   :  { %4640 = vmatpush2.bf16.msra.mxu1 %v17924_v34  ;;  %v819_v34 = vld [vmem:[#allocation10 + $0xb20] sm:$0xff] }
 0x3ab   :  { %4708 = vmatpush1.bf16.msra.mxu0 %v17710_v36  ;;  %4641 = vmatprep.subr.bf16.mxu1 %v17901_v37  ;;  %v17804_v36 = vcombine.low %v662_v19, %v674_v21  ;;  %v21264_v37 = vsub.s32 6, %v21163_v33  ;;  %v17951_v41 = vcombine.high %v807_v31, %v819_v34  ;;  %v17950_v58 = vcombine.low %v807_v31, %v819_v34  ;;  %v987_v33 = vld [vmem:[#allocation10 + $0x1060] sm:$0xff] }
 0x3ac   :  { %4709 = vmatprep.subr.bf16.mxu0 %v17687_v39  ;;  %v17974_v39 = vcombine.low %v831_v24, %v843_v25  ;;  %v17903_v21 = vcombine.high %v759_v8, %v771_v10  ;;  %v951_v24 = vld [vmem:[#allocation10 + $0xf40] sm:$0xff] }
 0x3ad   :  { %v963_v25 = vld [vmem:[#allocation10 + $0xfa0] sm:$0xff] }
 0x3ae   :  { %4642 = vmatpush2.bf16.msra.mxu1 %v17900_v48  ;;  %v1011_v48 = vld [vmem:[#allocation10 + $0x1120] sm:$0xff] }
 0x3af   :  { %4710 = vmatpush1.bf16.msra.mxu0 %v17686_v49  ;;  %4643 = vmatprep.subr.bf16.mxu1 %v17877_v51  ;;  %v783_v49 = vld [vmem:[#allocation10 + $0xa00] sm:$0xff]  ;;  %v18143_v59 = vcombine.high %v999_v27, %v1011_v48  ;;  %v18142_v12 = vcombine.low %v999_v27, %v1011_v48 }
 0x3b0   :  { %4711 = vmatprep.subr.bf16.mxu0 %v17663_v55  ;;  %v795_v51 = vld [vmem:[#allocation10 + $0xa60] sm:$0xff] }
 0x3b1   :  { %v20823_v55 = vld [vmem:[#allocation13] sm:$0xff] }
 0x3b2   :  { %4644 = vmatpush2.bf16.msra.mxu1 %v17876_v62  ;;  %v1072_v23 = vrot.slane %v20823_v55, %v21264_v37  ;;  %v1076_v62 = vrot.slane %v20823_v55, %v21267_v46  ;;  %v939_v48 = vld [vmem:[#allocation10 + $0xee0] sm:$0xff] }
 0x3b3   :  { %4712 = vmatpush1.bf16.msra.mxu0 %v17662_v3  ;;  %4645 = vmatprep.subr.bf16.mxu1 %v17853_v4  ;;  %v17927_v3 = vcombine.high %v783_v49, %v795_v51  ;;  %v975_v4 = vld [vmem:[#allocation10 + $0x1000] sm:$0xff] }
 0x3b4   :  { %4713 = vmatprep.subr.bf16.mxu0 %v17639_v7  ;;  %v18118_v31 = vcombine.low %v975_v4, %v987_v33 }
 0x3b6   :  { %4646 = vmatpush2.bf16.msra.mxu1 %v17852_v15 }
 0x3b7   :  { %4714 = vmatpush1.bf16.msra.mxu0 %v17638_v16  ;;  %4647 = vmatprep.subr.bf16.mxu1 %v17829_v17  ;;  %v17926_v16 = vcombine.low %v783_v49, %v795_v51  ;;  %v18119_v17 = vcombine.high %v975_v4, %v987_v33  ;;  %v711_v49 = vld [vmem:[#allocation10 + $0x7c0] sm:$0xff] }
 0x3b8   :  { %4715 = vmatprep.subr.bf16.mxu0 %v17615_v18  ;;  %v723_v51 = vld [vmem:[#allocation10 + $0x820] sm:$0xff] }
 0x3ba   :  { %4648 = vmatpush2.bf16.msra.mxu1 %v17828_v26 }
 0x3bb   :  { %4716 = vmatpush1.bf16.msra.mxu0 %v17614_v28  ;;  %4649 = vmatprep.subr.bf16.mxu1 %v17805_v29  ;;  %v735_v28 = vld [vmem:[#allocation10 + $0x880] sm:$0xff] }
 0x3bc   :  { %4717 = vmatprep.subr.bf16.mxu0 %v17975_v30  ;;  %v747_v29 = vld [vmem:[#allocation10 + $0x8e0] sm:$0xff] }
 0x3bd   :  { %v17879_v27 = vcombine.high %v735_v28, %v747_v29 }
 0x3be   :  { %4650 = vmatpush2.bf16.msra.mxu1 %v17804_v36  ;;  %v18095_v36 = vcombine.high %v951_v24, %v963_v25 }
 0x3bf   :  { %4718 = vmatpush2.bf16.msra.mxu0 %v17974_v39  ;;  %4742 = vmatprep.subr.bf16.mxu1 %v18167_v40  ;;  %v927_v39 = vld [vmem:[#allocation10 + $0xe80] sm:$0xff] }
 0x3c0   :  { %4719 = vmatprep.subr.bf16.mxu0 %v17951_v41 }
 0x3c1   :  { %v4325_v7 = vpop.f32.mrf.mxu1  ;;  %4652 = vmatmul.mubr.bf16.vlgmr.msra.gmra.mxu1 %v21140_v60 }
 0x3c2   :  { %v4326_v11 = vadd.f32 %v4325_v7, %v1072_v23  ;;  %4743 = vmatpush1.bf16.msra.mxu1 %v18166_v57  ;;  %4774 = vmatprep.mubr.bf16.mxu1 %v21003_v32 }
 0x3c3   :  { %v4327_v15 = vpop.f32.mrf.mxu1  ;;  %4720 = vmatpush2.bf16.msra.mxu0 %v17950_v58  ;;  %4744 = vmatprep.subr.bf16.mxu1 %v18143_v59  ;;  %v17878_v58 = vcombine.low %v735_v28, %v747_v29  ;;  %v18071_v59 = vcombine.high %v927_v39, %v939_v48 }
 0x3c4   :  { %v4367_v18 = vadd.f32 %v21257_v9, %v4326_v11  ;;  %v4328_v19 = vadd.f32 %v4327_v15, %v1076_v62  ;;  %4721 = vmatprep.subr.bf16.mxu0 %v17927_v3  ;;  %v17902_v9 = vcombine.low %v759_v8, %v771_v10  ;;  %v903_v62 = vld [vmem:[#allocation10 + $0xdc0] sm:$0xff] }
 0x3c5   :  { %v4329_v26 = vpop.f32.mrf.mxu1  ;;  %v915_v8 = vld [vmem:[#allocation10 + $0xe20] sm:$0xff] }
 0x3c6   :  { %v5061_v30 = vcombine.low %v21252_v35, %v4367_v18  ;;  %v5062_v45 = vcombine.high %v21252_v35, %v4367_v18  ;;  %v4369_v22 = vadd.f32 %v21261_v13, %v4328_v19  ;;  %4745 = vmatpush1.bf16.msra.mxu1 %v18142_v12  ;;  %v18094_v35 = vcombine.low %v951_v24, %v963_v25  ;;  %v687_v10 = vld [vmem:[#allocation10 + $0x700] sm:$0xff] }
 0x3c7   :  { %v4330_v34 = vpop.f32.mrf.mxu1  ;;  %4722 = vmatpush2.bf16.msra.mxu0 %v17926_v16  ;;  %4746 = vmatprep.subr.bf16.mxu1 %v18119_v17  ;;  %v699_v11 = vld [vmem:[#allocation10 + $0x760] sm:$0xff]  ;;  %v18070_v12 = vcombine.low %v927_v39, %v939_v48  ;;  %v17854_v19 = vcombine.low %v711_v49, %v723_v51 }
 0x3c8   :  { %v5077_v40 = vcombine.low %v21255_v44, %v4369_v22  ;;  %v5078_v41 = vcombine.high %v21255_v44, %v4369_v22  ;;  %4723 = vmatprep.subr.bf16.mxu0 %v17903_v21  ;;  %v5069_v13 = vrot.slane %v5061_v30, %v21205_v20  ;;  %v5076_v55 = vrot.slane %v5062_v45, %v21205_v20  ;;  %v879_v30 = vld [vmem:[#allocation10 + $0xd00] sm:$0xff] }
 0x3c9   :  { %v17855_v44 = vcombine.high %v711_v49, %v723_v51  ;;  %v18047_v21 = vcombine.high %v903_v62, %v915_v8  ;;  %v17831_v24 = vcombine.high %v687_v10, %v699_v11  ;;  %v891_v45 = vld [vmem:[#allocation10 + $0xd60] sm:$0xff]  ;;  %v18046_v22 = vcombine.low %v903_v62, %v915_v8  ;;  %v21295_v8 = vld [vmem:[#allocation13 + $0x8] sm:$0xff] }
 0x3ca   :  { %v5085_v23 = vrot.slane %v5077_v40, %v21205_v20  ;;  %v5092_v57 = vrot.slane %v5078_v41, %v21205_v20  ;;  %4747 = vmatpush1.bf16.msra.mxu1 %v18118_v31  ;;  %v663_v31 = vld [vmem:[#allocation10 + $0x640] sm:$0xff]  ;;  %v17830_v41 = vcombine.low %v687_v10, %v699_v11  ;;  %v640_v11 = vld [vmem:[#allocation10 + $0x588] sm:$0xff] }
 0x3cb   :  { %4724 = vmatpush2.bf16.msra.mxu0 %v17902_v9  ;;  %4748 = vmatprep.subr.bf16.mxu1 %v18095_v36  ;;  %v675_v34 = vld [vmem:[#allocation10 + $0x6a0] sm:$0xff] }
 0x3cc   :  { %v5125_v3 = vcombine.low %v5069_v13, %v5085_v23  ;;  %v5126_v4 = vcombine.high %v5069_v13, %v5085_v23  ;;  %v5141_v33 = vcombine.low %v5076_v55, %v5092_v57  ;;  %v5142_v7 = vcombine.high %v5076_v55, %v5092_v57  ;;  %4725 = vmatprep.subr.bf16.mxu0 %v17879_v27  ;;  %v855_v49 = vld [vmem:[#allocation10 + $0xc40] sm:$0xff]  ;;  %v1024_v23 = vld [vmem:[#allocation10 + $0x1188] sm:$0xff] }
 0x3cd   :  { %v18023_v27 = vcombine.high %v879_v30, %v891_v45  ;;  %v17807_v48 = vcombine.high %v663_v31, %v675_v34  ;;  %v867_v51 = vld [vmem:[#allocation10 + $0xca0] sm:$0xff]  ;;  %v1036_v57 = vld [vmem:[#allocation10 + $0x11e8] sm:$0xff] }
 0x3ce   :  { %v5133_v15 = vrot.slane %v5125_v3, %v21213_v14  ;;  %v5140_v16 = vrot.slane %v5126_v4, %v21213_v14  ;;  %v5149_v17 = vrot.slane %v5141_v33, %v21213_v14  ;;  %v5156_v18 = vrot.slane %v5142_v7, %v21213_v14  ;;  %4749 = vmatpush1.bf16.msra.mxu1 %v18094_v35 }
 0x3cf   :  { %4726 = vmatpush2.bf16.msra.mxu0 %v17878_v58  ;;  %4750 = vmatprep.subr.bf16.mxu1 %v18071_v59  ;;  %v18022_v59 = vcombine.low %v879_v30, %v891_v45  ;;  %v17806_v4 = vcombine.low %v663_v31, %v675_v34  ;;  %v17999_v33 = vcombine.high %v855_v49, %v867_v51  ;;  %v616_v30 = vld [vmem:[#allocation10 + $0x4c8] sm:$0xff] }
 0x3d0   :  { %v18175_v25 = vcombine.low %v5133_v15, %v5140_v16  ;;  %v18177_v26 = vcombine.high %v5133_v15, %v5140_v16  ;;  %v18179_v28 = vcombine.low %v5149_v17, %v5156_v18  ;;  %v18181_v29 = vcombine.high %v5149_v17, %v5156_v18  ;;  %4727 = vmatprep.subr.bf16.mxu0 %v17855_v44  ;;  %v1000_v17 = vld [vmem:[#allocation10 + $0x10c8] sm:$0xff] }
 0x3d1   :  { %v18169_v10 = vcombine.high %v1024_v23, %v1036_v57  ;;  %v1012_v18 = vld [vmem:[#allocation10 + $0x1128] sm:$0xff] }
 0x3d2   :  { %4751 = vmatpush1.bf16.msra.mxu1 %v18070_v12  ;;  %v5452_v9 = vrot.slane %v18175_v25, %v21205_v20  ;;  %v5468_v36 = vrot.slane %v18177_v26, %v21205_v20  ;;  %v5484_v39 = vrot.slane %v18179_v28, %v21205_v20  ;;  %v5500_v40 = vrot.slane %v18181_v29, %v21205_v20  ;;  %v652_v12 = vld [vmem:[#allocation10 + $0x5e8] sm:$0xff] }
 0x3d3   :  { %4728 = vmatpush2.bf16.msra.mxu0 %v17854_v19  ;;  %4752 = vmatprep.subr.bf16.mxu1 %v18047_v21  ;;  %v1080_v25 = vrot.slane %v21295_v8, %v21166_v42  ;;  %v18168_v26 = vcombine.low %v1024_v23, %v1036_v57  ;;  %v17785_v28 = vcombine.high %v640_v11, %v652_v12  ;;  %v628_v45 = vld [vmem:[#allocation10 + $0x528] sm:$0xff] }
 0x3d4   :  { %4729 = vmatprep.subr.bf16.mxu0 %v17831_v24  ;;  %v5517_v35 = vcombine.low %v5452_v9, %v5468_v36  ;;  %v5549_v13 = vcombine.low %v5484_v39, %v5500_v40  ;;  %v5518_v55 = vcombine.high %v5452_v9, %v5468_v36  ;;  %v5550_v58 = vcombine.high %v5484_v39, %v5500_v40  ;;  %v976_v31 = vld [vmem:[#allocation10 + $0x1008] sm:$0xff] }
 0x3d5   :  { %v17998_v24 = vcombine.low %v855_v49, %v867_v51  ;;  %v18145_v29 = vcombine.high %v1000_v17, %v1012_v18  ;;  %v988_v34 = vld [vmem:[#allocation10 + $0x1068] sm:$0xff]  ;;  %v17784_v36 = vcombine.low %v640_v11, %v652_v12  ;;  %v18144_v40 = vcombine.low %v1000_v17, %v1012_v18 }
 0x3d6   :  { %4753 = vmatpush1.bf16.msra.mxu1 %v18046_v22  ;;  %v5525_v44 = vrot.slane %v5517_v35, %v21213_v14  ;;  %v5557_v62 = vrot.slane %v5549_v13, %v21213_v14  ;;  %v5532_v3 = vrot.slane %v5518_v55, %v21213_v14  ;;  %v5564_v7 = vrot.slane %v5550_v58, %v21213_v14  ;;  %v592_v49 = vld [vmem:[#allocation10 + $0x408] sm:$0xff] }
 0x3d7   :  { %4730 = vmatpush2.bf16.msra.mxu0 %v17830_v41  ;;  %4754 = vmatprep.subr.bf16.mxu1 %v18023_v27  ;;  %v1084_v22 = vrot.slane %v21295_v8, %v21171_v47  ;;  %v17761_v41 = vcombine.high %v616_v30, %v628_v45  ;;  %v604_v51 = vld [vmem:[#allocation10 + $0x468] sm:$0xff] }
 0x3d8   :  { %4731 = vmatprep.subr.bf16.mxu0 %v17807_v48  ;;  %v21297_v15 = vcombine.low %v5525_v44, %v5557_v62  ;;  %v21299_v16 = vcombine.high %v5525_v44, %v5557_v62  ;;  %v21301_v19 = vcombine.low %v5532_v3, %v5564_v7  ;;  %v21303_v21 = vcombine.high %v5532_v3, %v5564_v7  ;;  %v952_v55 = vld [vmem:[#allocation10 + $0xf48] sm:$0xff] }
 0x3d9   :  { %v18121_v48 = vcombine.high %v976_v31, %v988_v34  ;;  %v964_v23 = vld [vmem:[#allocation10 + $0xfa8] sm:$0xff]  ;;  %v18120_v62 = vcombine.low %v976_v31, %v988_v34  ;;  %v17737_v3 = vcombine.high %v592_v49, %v604_v51 }
 0x3da   :  { %4755 = vmatpush1.bf16.msra.mxu1 %v18022_v59  ;;  %v17760_v59 = vcombine.low %v616_v30, %v628_v45  ;;  %v18097_v7 = vcombine.high %v952_v55, %v964_v23  ;;  %v580_v11 = vld [vmem:[#allocation10 + $0x3a8] sm:$0xff] }
 0x3db   :  { %4732 = vmatpush2.bf16.msra.mxu0 %v17806_v4  ;;  %4756 = vmatprep.subr.bf16.mxu1 %v17999_v33  ;;  %v928_v17 = vld [vmem:[#allocation10 + $0xe88] sm:$0xff] }
 0x3dc   :  { %4824 = vmatprep.subr.bf16.mxu0 %v18169_v10  ;;  %v568_v10 = vld [vmem:[#allocation10 + $0x348] sm:$0xff] }
 0x3dd   :  { %v940_v18 = vld [vmem:[#allocation10 + $0xee8] sm:$0xff]  ;;  %v17712_v34 = vcombine.low %v568_v10, %v580_v11 }
 0x3de   :  { %v4407_v9 = vpop.f32.mrf.mxu0  ;;  %4734 = vmatmul.mubr.bf16.vlgmr.msra.gmra.mxu0 %v21140_v60  ;;  %4757 = vmatpush1.bf16.msra.mxu1 %v17998_v24  ;;  %v17736_v24 = vcombine.low %v592_v49, %v604_v51  ;;  %v544_v30 = vld [vmem:[#allocation10 + $0x288] sm:$0xff] }
 0x3df   :  { %v4408_v39 = vadd.f32 %v4407_v9, %v1080_v25  ;;  %4825 = vmatpush1.bf16.msra.mxu0 %v18168_v26  ;;  %4783 = vmatprep.subr.bf16.mxu1 %v17785_v28  ;;  %v18096_v26 = vcombine.low %v952_v55, %v964_v23  ;;  %v17713_v28 = vcombine.high %v568_v10, %v580_v11  ;;  %v556_v45 = vld [vmem:[#allocation10 + $0x2e8] sm:$0xff]  ;;  %v641_v11 = vld [vmem:[#allocation10 + $0x590] sm:$0xff] }
 0x3e0   :  { %v4409_v27 = vpop.f32.mrf.mxu0  ;;  %4826 = vmatprep.subr.bf16.mxu0 %v18145_v29  ;;  %4856 = vmatprep.mubr.bf16.mxu0 %v21003_v32  ;;  %v18073_v29 = vcombine.high %v928_v17, %v940_v18  ;;  %v916_v31 = vld [vmem:[#allocation10 + $0xe28] sm:$0xff]  ;;  %v18072_v9 = vcombine.low %v928_v17, %v940_v18  ;;  %v17688_v49 = vcombine.low %v544_v30, %v556_v45 }
 0x3e1   :  { %v4410_v35 = vadd.f32 %v4409_v27, %v1084_v22  ;;  %v4448_v13 = vpop.f32.mrf.mxu1  ;;  %4775 = vmatmul.mubr.bf16.vlgmr.msra.gmra.mxu1 %v21136_v54  ;;  %v904_v22 = vld [vmem:[#allocation10 + $0xdc8] sm:$0xff] }
 0x3e2   :  { %v21312_v57 = vadd.f32 %v4448_v13, %v4408_v39  ;;  %v4411_v58 = vpop.f32.mrf.mxu0  ;;  %4784 = vmatpush1.bf16.msra.mxu1 %v17784_v36  ;;  %4815 = vmatprep.mubr.bf16.mxu1 %v21144_v61  ;;  %v17689_v36 = vcombine.high %v544_v30, %v556_v45  ;;  %v18049_v39 = vcombine.high %v904_v22, %v916_v31  ;;  %v880_v27 = vld [vmem:[#allocation10 + $0xd08] sm:$0xff]  ;;  %v629_v30 = vld [vmem:[#allocation10 + $0x530] sm:$0xff] }
 0x3e3   :  { %v4450_v44 = vpop.f32.mrf.mxu1  ;;  %4827 = vmatpush1.bf16.msra.mxu0 %v18144_v40  ;;  %4785 = vmatprep.subr.bf16.mxu1 %v17761_v41  ;;  %v520_v40 = vld [vmem:[#allocation10 + $0x1c8] sm:$0xff]  ;;  %v18048_v51 = vcombine.low %v904_v22, %v916_v31 }
 0x3e4   :  { %v21315_v4 = vadd.f32 %v4450_v44, %v4410_v35  ;;  %v4412_v33 = vpop.f32.mrf.mxu0  ;;  %4828 = vmatprep.subr.bf16.mxu0 %v18121_v48  ;;  %v532_v41 = vld [vmem:[#allocation10 + $0x228] sm:$0xff] }
 0x3e5   :  { %v4452_v12 = vpop.f32.mrf.mxu1  ;;  %v892_v48 = vld [vmem:[#allocation10 + $0xd68] sm:$0xff]  ;;  %v17665_v35 = vcombine.high %v520_v40, %v532_v41  ;;  %v17664_v44 = vcombine.low %v520_v40, %v532_v41  ;;  %v605_v40 = vld [vmem:[#allocation10 + $0x470] sm:$0xff] }
 0x3e6   :  { %4786 = vmatpush1.bf16.msra.mxu1 %v17760_v59  ;;  %v18025_v13 = vcombine.high %v880_v27, %v892_v48  ;;  %v496_v55 = vld [vmem:[#allocation10 + $0x108] sm:$0xff]  ;;  %v653_v12 = vld [vmem:[#allocation10 + $0x5f0] sm:$0xff] }
 0x3e7   :  { %v4453_v25 = vpop.f32.mrf.mxu1  ;;  %4829 = vmatpush1.bf16.msra.mxu0 %v18120_v62  ;;  %4787 = vmatprep.subr.bf16.mxu1 %v17737_v3  ;;  %v508_v23 = vld [vmem:[#allocation10 + $0x168] sm:$0xff]  ;;  %v18024_v62 = vcombine.low %v880_v27, %v892_v48  ;;  %v17786_v22 = vcombine.low %v641_v11, %v653_v12 }
 0x3e8   :  { %4830 = vmatprep.subr.bf16.mxu0 %v18097_v7  ;;  %v856_v58 = vld [vmem:[#allocation10 + $0xc48] sm:$0xff]  ;;  %v17641_v3 = vcombine.high %v496_v55, %v508_v23  ;;  %v17640_v17 = vcombine.low %v496_v55, %v508_v23  ;;  %v17787_v25 = vcombine.high %v641_v11, %v653_v12  ;;  %v569_v23 = vld [vmem:[#allocation10 + $0x350] sm:$0xff] }
 0x3e9   :  { %v868_v59 = vld [vmem:[#allocation10 + $0xca8] sm:$0xff]  ;;  %v545_v12 = vld [vmem:[#allocation10 + $0x290] sm:$0xff] }
 0x3ea   :  { %4788 = vmatpush1.bf16.msra.mxu1 %v17736_v24  ;;  %v18001_v33 = vcombine.high %v856_v58, %v868_v59  ;;  %v472_v7 = vld [vmem:[#allocation10 + $0x48] sm:$0xff]  ;;  %v18000_v18 = vcombine.low %v856_v58, %v868_v59  ;;  %v581_v58 = vld [vmem:[#allocation10 + $0x3b0] sm:$0xff] }
 0x3eb   :  { %4831 = vmatpush1.bf16.msra.mxu0 %v18096_v26  ;;  %4789 = vmatprep.subr.bf16.mxu1 %v17713_v28  ;;  %v484_v10 = vld [vmem:[#allocation10 + $0xa8] sm:$0xff] }
 0x3ec   :  { %4832 = vmatprep.subr.bf16.mxu0 %v18073_v29  ;;  %v17617_v24 = vcombine.high %v472_v7, %v484_v10  ;;  %v832_v26 = vld [vmem:[#allocation10 + $0xb88] sm:$0xff]  ;;  %v617_v29 = vld [vmem:[#allocation10 + $0x4d0] sm:$0xff]  ;;  %v17616_v45 = vcombine.low %v472_v7, %v484_v10  ;;  %v17715_v7 = vcombine.high %v569_v23, %v581_v58 }
 0x3ed   :  { %v844_v28 = vld [vmem:[#allocation10 + $0xbe8] sm:$0xff]  ;;  %v17762_v48 = vcombine.low %v617_v29, %v629_v30 }
 0x3ee   :  { %4790 = vmatpush1.bf16.msra.mxu1 %v17712_v34  ;;  %v17977_v31 = vcombine.high %v832_v26, %v844_v28  ;;  %v17763_v34 = vcombine.high %v617_v29, %v629_v30  ;;  %v17976_v27 = vcombine.low %v832_v26, %v844_v28  ;;  %v796_v55 = vld [vmem:[#allocation10 + $0xa68] sm:$0xff]  ;;  %v521_v30 = vld [vmem:[#allocation10 + $0x1d0] sm:$0xff] }
 0x3ef   :  { %4833 = vmatpush1.bf16.msra.mxu0 %v18072_v9  ;;  %4791 = vmatprep.subr.bf16.mxu1 %v17689_v36  ;;  %v808_v9 = vld [vmem:[#allocation10 + $0xac8] sm:$0xff] }
 0x3f0   :  { %4834 = vmatprep.subr.bf16.mxu0 %v18049_v39  ;;  %v820_v36 = vld [vmem:[#allocation10 + $0xb28] sm:$0xff]  ;;  %v593_v39 = vld [vmem:[#allocation10 + $0x410] sm:$0xff] }
 0x3f1   :  { %v760_v10 = vld [vmem:[#allocation10 + $0x948] sm:$0xff] }
 0x3f2   :  { %4792 = vmatpush1.bf16.msra.mxu1 %v17688_v49  ;;  %v17953_v49 = vcombine.high %v808_v9, %v820_v36  ;;  %v772_v11 = vld [vmem:[#allocation10 + $0x9a8] sm:$0xff] }
 0x3f3   :  { %4835 = vmatpush1.bf16.msra.mxu0 %v18048_v51  ;;  %4793 = vmatprep.subr.bf16.mxu1 %v17665_v35  ;;  %v17739_v35 = vcombine.high %v593_v39, %v605_v40  ;;  %v736_v28 = vld [vmem:[#allocation10 + $0x888] sm:$0xff] }
 0x3f4   :  { %4836 = vmatprep.subr.bf16.mxu0 %v18025_v13  ;;  %v784_v13 = vld [vmem:[#allocation10 + $0xa08] sm:$0xff] }
 0x3f5   :  { %v748_v29 = vld [vmem:[#allocation10 + $0x8e8] sm:$0xff] }
 0x3f6   :  { %4794 = vmatpush1.bf16.msra.mxu1 %v17664_v44  ;;  %v17952_v44 = vcombine.low %v808_v9, %v820_v36  ;;  %v712_v36 = vld [vmem:[#allocation10 + $0x7c8] sm:$0xff] }
 0x3f7   :  { %4837 = vmatpush1.bf16.msra.mxu0 %v18024_v62  ;;  %4795 = vmatprep.subr.bf16.mxu1 %v17641_v3  ;;  %v17738_v62 = vcombine.low %v593_v39, %v605_v40  ;;  %v17929_v3 = vcombine.high %v784_v13, %v796_v55  ;;  %v724_v39 = vld [vmem:[#allocation10 + $0x828] sm:$0xff]  ;;  %v497_v40 = vld [vmem:[#allocation10 + $0x110] sm:$0xff] }
 0x3f8   :  { %4838 = vmatprep.subr.bf16.mxu0 %v18001_v33 }
 0x3fa   :  { %4796 = vmatpush1.bf16.msra.mxu1 %v17640_v17  ;;  %v557_v17 = vld [vmem:[#allocation10 + $0x2f0] sm:$0xff] }
 0x3fb   :  { %4839 = vmatpush1.bf16.msra.mxu0 %v18000_v18  ;;  %4797 = vmatprep.subr.bf16.mxu1 %v17617_v24  ;;  %v17928_v18 = vcombine.low %v784_v13, %v796_v55  ;;  %v17714_v24 = vcombine.low %v569_v23, %v581_v58  ;;  %v17691_v26 = vcombine.high %v545_v12, %v557_v17  ;;  %v688_v55 = vld [vmem:[#allocation10 + $0x708] sm:$0xff]  ;;  %v473_v58 = vld [vmem:[#allocation10 + $0x50] sm:$0xff] }
 0x3fc   :  { %4865 = vmatprep.subr.bf16.mxu0 %v17787_v25  ;;  %v17905_v25 = vcombine.high %v760_v10, %v772_v11  ;;  %v700_v23 = vld [vmem:[#allocation10 + $0x768] sm:$0xff] }
 0x3fe   :  { %v21317_v41 = vpop.f32.mrf.mxu0  ;;  %4798 = vmatpush1.bf16.msra.mxu1 %v17616_v45  ;;  %4857 = vmatmul.mubr.bf16.vlgmr.msra.gmra.mxu0 %v21136_v54  ;;  %v533_v45 = vld [vmem:[#allocation10 + $0x230] sm:$0xff] }
 0x3ff   :  { %4866 = vmatpush1.bf16.msra.mxu0 %v17786_v22  ;;  %4897 = vmatprep.mubr.bf16.mxu0 %v21144_v61  ;;  %v17904_v22 = vcombine.low %v760_v10, %v772_v11  ;;  %v17667_v9 = vcombine.high %v521_v30, %v533_v45  ;;  %v676_v10 = vld [vmem:[#allocation10 + $0x6a8] sm:$0xff]  ;;  %v833_v11 = vld [vmem:[#allocation10 + $0xb90] sm:$0xff] }
 0x400   :  { %v21321_v51 = vpop.f32.mrf.mxu0  ;;  %4799 = vmatprep.subr.bf16.mxu1 %v17977_v31  ;;  %4867 = vmatprep.subr.bf16.mxu0 %v17763_v34  ;;  %v17690_v31 = vcombine.low %v545_v12, %v557_v17  ;;  %v17881_v34 = vcombine.high %v736_v28, %v748_v29  ;;  %v845_v12 = vld [vmem:[#allocation10 + $0xbf0] sm:$0xff]  ;;  %v17832_v17 = vcombine.low %v688_v55, %v700_v23 }
 0x402   :  { %v4534_v59 = vpop.f32.mrf.mxu0  ;;  %4800 = vmatpush2.bf16.msra.mxu1 %v17976_v27  ;;  %v509_v27 = vld [vmem:[#allocation10 + $0x170] sm:$0xff] }
 0x403   :  { %4868 = vmatpush1.bf16.msra.mxu0 %v17762_v48  ;;  %4801 = vmatprep.subr.bf16.mxu1 %v17953_v49  ;;  %v17880_v48 = vcombine.low %v736_v28, %v748_v29  ;;  %v17666_v49 = vcombine.low %v521_v30, %v533_v45  ;;  %v17643_v13 = vcombine.high %v497_v40, %v509_v27  ;;  %v485_v59 = vld [vmem:[#allocation10 + $0xb0] sm:$0xff] }
 0x404   :  { %v4535_v33 = vpop.f32.mrf.mxu0  ;;  %4869 = vmatprep.subr.bf16.mxu0 %v17739_v35  ;;  %v17857_v35 = vcombine.high %v712_v36, %v724_v39  ;;  %v1037_v28 = vld [vmem:[#allocation10 + $0x11f0] sm:$0xff] }
 0x405   :  { %v17619_v33 = vcombine.high %v473_v58, %v485_v59  ;;  %v809_v29 = vld [vmem:[#allocation10 + $0xad0] sm:$0xff] }
 0x406   :  { %4802 = vmatpush2.bf16.msra.mxu1 %v17952_v44  ;;  %v17856_v44 = vcombine.low %v712_v36, %v724_v39  ;;  %v821_v30 = vld [vmem:[#allocation10 + $0xb30] sm:$0xff] }
 0x407   :  { %4870 = vmatpush1.bf16.msra.mxu0 %v17738_v62  ;;  %4803 = vmatprep.subr.bf16.mxu1 %v17929_v3  ;;  %v17642_v62 = vcombine.low %v497_v40, %v509_v27  ;;  %v17833_v3 = vcombine.high %v688_v55, %v700_v23  ;;  %v1013_v36 = vld [vmem:[#allocation10 + $0x1130] sm:$0xff]  ;;  %v1088_v27 = vrot.slane %v21295_v8, %v21192_v38 }
 0x408   :  { %4871 = vmatprep.subr.bf16.mxu0 %v17715_v7  ;;  %v664_v7 = vld [vmem:[#allocation10 + $0x648] sm:$0xff]  ;;  %v785_v39 = vld [vmem:[#allocation10 + $0xa10] sm:$0xff] }
 0x409   :  { %v17808_v45 = vcombine.low %v664_v7, %v676_v10  ;;  %v797_v40 = vld [vmem:[#allocation10 + $0xa70] sm:$0xff] }
 0x40a   :  { %4804 = vmatpush2.bf16.msra.mxu1 %v17928_v18  ;;  %v17618_v18 = vcombine.low %v473_v58, %v485_v59  ;;  %v17931_v55 = vcombine.high %v785_v39, %v797_v40  ;;  %v977_v23 = vld [vmem:[#allocation10 + $0x1010] sm:$0xff] }
 0x40b   :  { %4872 = vmatpush1.bf16.msra.mxu0 %v17714_v24  ;;  %4805 = vmatprep.subr.bf16.mxu1 %v17905_v25  ;;  %v17809_v24 = vcombine.high %v664_v7, %v676_v10  ;;  %v17979_v25 = vcombine.high %v833_v11, %v845_v12  ;;  %v989_v58 = vld [vmem:[#allocation10 + $0x1070] sm:$0xff]  ;;  %v17930_v10 = vcombine.low %v785_v39, %v797_v40 }
 0x40c   :  { %4873 = vmatprep.subr.bf16.mxu0 %v17691_v26  ;;  %v1025_v26 = vld [vmem:[#allocation10 + $0x1190] sm:$0xff] }
 0x40e   :  { %4806 = vmatpush2.bf16.msra.mxu1 %v17904_v22  ;;  %v17978_v22 = vcombine.low %v833_v11, %v845_v12  ;;  %v18123_v11 = vcombine.high %v977_v23, %v989_v58 }
 0x40f   :  { %4874 = vmatpush1.bf16.msra.mxu0 %v17690_v31  ;;  %4807 = vmatprep.subr.bf16.mxu1 %v17881_v34  ;;  %v18171_v31 = vcombine.high %v1025_v26, %v1037_v28  ;;  %v17955_v34 = vcombine.high %v809_v29, %v821_v30 }
 0x410   :  { %4875 = vmatprep.subr.bf16.mxu0 %v17667_v9  ;;  %v1001_v9 = vld [vmem:[#allocation10 + $0x10d0] sm:$0xff] }
 0x412   :  { %4808 = vmatpush2.bf16.msra.mxu1 %v17880_v48  ;;  %v18170_v48 = vcombine.low %v1025_v26, %v1037_v28  ;;  %v737_v28 = vld [vmem:[#allocation10 + $0x890] sm:$0xff] }
 0x413   :  { %4876 = vmatpush1.bf16.msra.mxu0 %v17666_v49  ;;  %4809 = vmatprep.subr.bf16.mxu1 %v17857_v35  ;;  %v17954_v49 = vcombine.low %v809_v29, %v821_v30  ;;  %v18147_v35 = vcombine.high %v1001_v9, %v1013_v36  ;;  %v749_v29 = vld [vmem:[#allocation10 + $0x8f0] sm:$0xff] }
 0x414   :  { %4877 = vmatprep.subr.bf16.mxu0 %v17643_v13  ;;  %v1092_v13 = vrot.slane %v21295_v8, %v21195_v43 }
 0x416   :  { %4810 = vmatpush2.bf16.msra.mxu1 %v17856_v44  ;;  %v761_v44 = vld [vmem:[#allocation10 + $0x950] sm:$0xff] }
 0x417   :  { %4878 = vmatpush1.bf16.msra.mxu0 %v17642_v62  ;;  %4811 = vmatprep.subr.bf16.mxu1 %v17833_v3  ;;  %v773_v62 = vld [vmem:[#allocation10 + $0x9b0] sm:$0xff] }
 0x418   :  { %4879 = vmatprep.subr.bf16.mxu0 %v17619_v33  ;;  %v18146_v33 = vcombine.low %v1001_v9, %v1013_v36  ;;  %v929_v36 = vld [vmem:[#allocation10 + $0xe90] sm:$0xff] }
 0x41a   :  { %4812 = vmatpush2.bf16.msra.mxu1 %v17832_v17 }
 0x41b   :  { %4880 = vmatpush1.bf16.msra.mxu0 %v17618_v18  ;;  %4813 = vmatprep.subr.bf16.mxu1 %v17809_v24  ;;  %v17907_v18 = vcombine.high %v761_v44, %v773_v62  ;;  %v953_v24 = vld [vmem:[#allocation10 + $0xf50] sm:$0xff] }
 0x41c   :  { %4881 = vmatprep.subr.bf16.mxu0 %v17979_v25  ;;  %v965_v25 = vld [vmem:[#allocation10 + $0xfb0] sm:$0xff] }
 0x41d   :  { %v18099_v9 = vcombine.high %v953_v24, %v965_v25 }
 0x41e   :  { %4814 = vmatpush2.bf16.msra.mxu1 %v17808_v45 }
 0x41f   :  { %4882 = vmatpush2.bf16.msra.mxu0 %v17978_v22  ;;  %4906 = vmatprep.subr.bf16.mxu1 %v18171_v31  ;;  %v18122_v31 = vcombine.low %v977_v23, %v989_v58  ;;  %v17882_v58 = vcombine.low %v737_v28, %v749_v29 }
 0x420   :  { %4883 = vmatprep.subr.bf16.mxu0 %v17955_v34 }
 0x421   :  { %v4489_v59 = vpop.f32.mrf.mxu1  ;;  %4816 = vmatmul.mubr.bf16.vlgmr.msra.gmra.mxu1 %v21140_v60 }
 0x422   :  { %v4490_v3 = vadd.f32 %v4489_v59, %v1088_v27  ;;  %4907 = vmatpush1.bf16.msra.mxu1 %v18170_v48  ;;  %4938 = vmatprep.mubr.bf16.mxu1 %v21003_v32  ;;  %v17883_v27 = vcombine.high %v737_v28, %v749_v29  ;;  %v941_v48 = vld [vmem:[#allocation10 + $0xef0] sm:$0xff] }
 0x423   :  { %v4491_v7 = vpop.f32.mrf.mxu1  ;;  %4884 = vmatpush2.bf16.msra.mxu0 %v17954_v49  ;;  %4908 = vmatprep.subr.bf16.mxu1 %v18147_v35  ;;  %v713_v49 = vld [vmem:[#allocation10 + $0x7d0] sm:$0xff]  ;;  %v18075_v59 = vcombine.high %v929_v36, %v941_v48 }
 0x424   :  { %v4531_v12 = vadd.f32 %v21317_v41, %v4490_v3  ;;  %v4492_v17 = vadd.f32 %v4491_v7, %v1092_v13  ;;  %4885 = vmatprep.subr.bf16.mxu0 %v17931_v55  ;;  %v17906_v41 = vcombine.low %v761_v44, %v773_v62  ;;  %v725_v35 = vld [vmem:[#allocation10 + $0x830] sm:$0xff] }
 0x425   :  { %v4493_v26 = vpop.f32.mrf.mxu1  ;;  %v905_v44 = vld [vmem:[#allocation10 + $0xdd0] sm:$0xff]  ;;  %v17858_v28 = vcombine.low %v713_v49, %v725_v35 }
 0x426   :  { %v5165_v30 = vcombine.low %v21312_v57, %v4531_v12  ;;  %v5166_v45 = vcombine.high %v21312_v57, %v4531_v12  ;;  %v4533_v22 = vadd.f32 %v21321_v51, %v4492_v17  ;;  %4909 = vmatpush1.bf16.msra.mxu1 %v18146_v33  ;;  %v18098_v57 = vcombine.low %v953_v24, %v965_v25  ;;  %v701_v12 = vld [vmem:[#allocation10 + $0x770] sm:$0xff] }
 0x427   :  { %v4494_v34 = vpop.f32.mrf.mxu1  ;;  %4886 = vmatpush2.bf16.msra.mxu0 %v17930_v10  ;;  %4910 = vmatprep.subr.bf16.mxu1 %v18123_v11  ;;  %v917_v10 = vld [vmem:[#allocation10 + $0xe30] sm:$0xff]  ;;  %v18074_v17 = vcombine.low %v929_v36, %v941_v48 }
 0x428   :  { %v5181_v39 = vcombine.low %v21315_v4, %v4533_v22  ;;  %v5182_v40 = vcombine.high %v21315_v4, %v4533_v22  ;;  %4887 = vmatprep.subr.bf16.mxu0 %v17907_v18  ;;  %v5173_v51 = vrot.slane %v5165_v30, %v21205_v20  ;;  %v5180_v13 = vrot.slane %v5166_v45, %v21205_v20  ;;  %v689_v11 = vld [vmem:[#allocation10 + $0x710] sm:$0xff] }
 0x429   :  { %v17859_v4 = vcombine.high %v713_v49, %v725_v35  ;;  %v18051_v29 = vcombine.high %v905_v44, %v917_v10  ;;  %v17835_v30 = vcombine.high %v689_v11, %v701_v12  ;;  %v881_v45 = vld [vmem:[#allocation10 + $0xd10] sm:$0xff]  ;;  %v17834_v35 = vcombine.low %v689_v11, %v701_v12 }
 0x42a   :  { %v5189_v55 = vrot.slane %v5181_v39, %v21205_v20  ;;  %v5196_v23 = vrot.slane %v5182_v40, %v21205_v20  ;;  %4911 = vmatpush1.bf16.msra.mxu1 %v18122_v31  ;;  %v665_v36 = vld [vmem:[#allocation10 + $0x650] sm:$0xff]  ;;  %v18050_v40 = vcombine.low %v905_v44, %v917_v10 }
 0x42b   :  { %4888 = vmatpush2.bf16.msra.mxu0 %v17906_v41  ;;  %4912 = vmatprep.subr.bf16.mxu1 %v18099_v9  ;;  %v893_v9 = vld [vmem:[#allocation10 + $0xd70] sm:$0xff] }
 0x42c   :  { %v5229_v62 = vcombine.low %v5173_v51, %v5189_v55  ;;  %v5230_v3 = vcombine.high %v5173_v51, %v5189_v55  ;;  %v5245_v33 = vcombine.low %v5180_v13, %v5196_v23  ;;  %v5246_v7 = vcombine.high %v5180_v13, %v5196_v23  ;;  %4889 = vmatprep.subr.bf16.mxu0 %v17883_v27  ;;  %v677_v39 = vld [vmem:[#allocation10 + $0x6b0] sm:$0xff] }
 0x42d   :  { %v18027_v51 = vcombine.high %v881_v45, %v893_v9  ;;  %v17811_v13 = vcombine.high %v665_v36, %v677_v39  ;;  %v857_v55 = vld [vmem:[#allocation10 + $0xc50] sm:$0xff]  ;;  %v17810_v12 = vcombine.low %v665_v36, %v677_v39 }
 0x42e   :  { %v5237_v18 = vrot.slane %v5229_v62, %v21213_v14  ;;  %v5244_v24 = vrot.slane %v5230_v3, %v21213_v14  ;;  %v5253_v25 = vrot.slane %v5245_v33, %v21213_v14  ;;  %v5260_v26 = vrot.slane %v5246_v7, %v21213_v14  ;;  %4913 = vmatpush1.bf16.msra.mxu1 %v18098_v57  ;;  %v869_v23 = vld [vmem:[#allocation10 + $0xcb0] sm:$0xff] }
 0x42f   :  { %4890 = vmatpush2.bf16.msra.mxu0 %v17882_v58  ;;  %4914 = vmatprep.subr.bf16.mxu1 %v18075_v59  ;;  %v1026_v58 = vld [vmem:[#allocation10 + $0x1198] sm:$0xff]  ;;  %v18026_v33 = vcombine.low %v881_v45, %v893_v9 }
 0x430   :  { %v18182_v22 = vcombine.low %v5237_v18, %v5244_v24  ;;  %v18184_v31 = vcombine.high %v5237_v18, %v5244_v24  ;;  %v18186_v34 = vcombine.low %v5253_v25, %v5260_v26  ;;  %v18188_v41 = vcombine.high %v5253_v25, %v5260_v26  ;;  %4891 = vmatprep.subr.bf16.mxu0 %v17859_v4  ;;  %v1038_v59 = vld [vmem:[#allocation10 + $0x11f8] sm:$0xff] }
 0x431   :  { %v18003_v18 = vcombine.high %v857_v55, %v869_v23  ;;  %v18173_v24 = vcombine.high %v1026_v58, %v1038_v59  ;;  %v642_v25 = vld [vmem:[#allocation10 + $0x598] sm:$0xff]  ;;  %v18172_v9 = vcombine.low %v1026_v58, %v1038_v59 }
 0x432   :  { %4915 = vmatpush1.bf16.msra.mxu1 %v18074_v17  ;;  %v5581_v27 = vrot.slane %v18182_v22, %v21205_v20  ;;  %v5597_v48 = vrot.slane %v18184_v31, %v21205_v20  ;;  %v5613_v57 = vrot.slane %v18186_v34, %v21205_v20  ;;  %v5629_v49 = vrot.slane %v18188_v41, %v21205_v20  ;;  %v654_v26 = vld [vmem:[#allocation10 + $0x5f8] sm:$0xff] }
 0x433   :  { %4892 = vmatpush2.bf16.msra.mxu0 %v17858_v28  ;;  %4916 = vmatprep.subr.bf16.mxu1 %v18051_v29  ;;  %v1002_v22 = vld [vmem:[#allocation10 + $0x10d8] sm:$0xff]  ;;  %v18002_v34 = vcombine.low %v857_v55, %v869_v23  ;;  %v1096_v41 = vrot.slane %v21295_v8, %v21231_v56  ;;  %v17789_v36 = vcombine.high %v642_v25, %v654_v26 }
 0x434   :  { %4893 = vmatprep.subr.bf16.mxu0 %v17835_v30  ;;  %v5637_v4 = vcombine.low %v5581_v27, %v5597_v48  ;;  %v5669_v44 = vcombine.low %v5613_v57, %v5629_v49  ;;  %v5638_v62 = vcombine.high %v5581_v27, %v5597_v48  ;;  %v5670_v3 = vcombine.high %v5613_v57, %v5629_v49  ;;  %v1014_v31 = vld [vmem:[#allocation10 + $0x1138] sm:$0xff] }
 0x435   :  { %v18149_v39 = vcombine.high %v1002_v22, %v1014_v31  ;;  %v630_v27 = vld [vmem:[#allocation10 + $0x538] sm:$0xff]  ;;  %v1100_v48 = vrot.slane %v21295_v8, %v21239_v2  ;;  %v18148_v55 = vcombine.low %v1002_v22, %v1014_v31 }
 0x436   :  { %4917 = vmatpush1.bf16.msra.mxu1 %v18050_v40  ;;  %v5645_v7 = vrot.slane %v5637_v4, %v21213_v14  ;;  %v5677_v10 = vrot.slane %v5669_v44, %v21213_v14  ;;  %v5652_v17 = vrot.slane %v5638_v62, %v21213_v14  ;;  %v5684_v11 = vrot.slane %v5670_v3, %v21213_v14  ;;  %v618_v40 = vld [vmem:[#allocation10 + $0x4d8] sm:$0xff] }
 0x437   :  { %4894 = vmatpush2.bf16.msra.mxu0 %v17834_v35  ;;  %4918 = vmatprep.subr.bf16.mxu1 %v18027_v51  ;;  %v978_v57 = vld [vmem:[#allocation10 + $0x1018] sm:$0xff]  ;;  %v17788_v51 = vcombine.low %v642_v25, %v654_v26  ;;  %v17765_v23 = vcombine.high %v618_v40, %v630_v27 }
 0x438   :  { %4895 = vmatprep.subr.bf16.mxu0 %v17811_v13  ;;  %v21351_v28 = vcombine.low %v5645_v7, %v5677_v10  ;;  %v21353_v29 = vcombine.high %v5645_v7, %v5677_v10  ;;  %v21355_v30 = vcombine.low %v5652_v17, %v5684_v11  ;;  %v21357_v45 = vcombine.high %v5652_v17, %v5684_v11  ;;  %v990_v49 = vld [vmem:[#allocation10 + $0x1078] sm:$0xff] }
 0x439   :  { %v18125_v59 = vcombine.high %v978_v57, %v990_v49  ;;  %v594_v4 = vld [vmem:[#allocation10 + $0x418] sm:$0xff]  ;;  %v17764_v17 = vcombine.low %v618_v40, %v630_v27 }
 0x43a   :  { %4919 = vmatpush1.bf16.msra.mxu1 %v18026_v33  ;;  %v606_v44 = vld [vmem:[#allocation10 + $0x478] sm:$0xff] }
 0x43b   :  { %4896 = vmatpush2.bf16.msra.mxu0 %v17810_v12  ;;  %4920 = vmatprep.subr.bf16.mxu1 %v18003_v18  ;;  %v954_v3 = vld [vmem:[#allocation10 + $0xf58] sm:$0xff]  ;;  %v18124_v12 = vcombine.low %v978_v57, %v990_v49  ;;  %v17741_v18 = vcombine.high %v594_v4, %v606_v44 }
 0x43c   :  { %4988 = vmatprep.subr.bf16.mxu0 %v18173_v24  ;;  %v966_v33 = vld [vmem:[#allocation10 + $0xfb8] sm:$0xff] }
 0x43d   :  { %v18101_v26 = vcombine.high %v954_v3, %v966_v33  ;;  %v570_v22 = vld [vmem:[#allocation10 + $0x358] sm:$0xff] }
 0x43e   :  { %v4571_v35 = vpop.f32.mrf.mxu0  ;;  %4898 = vmatmul.mubr.bf16.vlgmr.msra.gmra.mxu0 %v21140_v60  ;;  %4921 = vmatpush1.bf16.msra.mxu1 %v18002_v34  ;;  %v582_v31 = vld [vmem:[#allocation10 + $0x3b8] sm:$0xff] }
 0x43f   :  { %v4572_v13 = vadd.f32 %v4571_v35, %v1096_v41  ;;  %4989 = vmatpush1.bf16.msra.mxu0 %v18172_v9  ;;  %4947 = vmatprep.subr.bf16.mxu1 %v17789_v36  ;;  %v930_v41 = vld [vmem:[#allocation10 + $0xe98] sm:$0xff]  ;;  %v17740_v36 = vcombine.low %v594_v4, %v606_v44  ;;  %v17717_v40 = vcombine.high %v570_v22, %v582_v31 }
 0x440   :  { %v4573_v58 = vpop.f32.mrf.mxu0  ;;  %4990 = vmatprep.subr.bf16.mxu0 %v18149_v39  ;;  %5020 = vmatprep.mubr.bf16.mxu0 %v21003_v32  ;;  %v942_v9 = vld [vmem:[#allocation10 + $0xef8] sm:$0xff] }
 0x441   :  { %v4574_v8 = vadd.f32 %v4573_v58, %v1100_v48  ;;  %v4612_v62 = vpop.f32.mrf.mxu1  ;;  %4939 = vmatmul.mubr.bf16.vlgmr.msra.gmra.mxu1 %v21136_v54  ;;  %v18077_v27 = vcombine.high %v930_v41, %v942_v9  ;;  %v546_v48 = vld [vmem:[#allocation10 + $0x298] sm:$0xff] }
 0x442   :  { %v21366_v7 = vadd.f32 %v4612_v62, %v4572_v13  ;;  %v4575_v10 = vpop.f32.mrf.mxu0  ;;  %4948 = vmatpush1.bf16.msra.mxu1 %v17788_v51  ;;  %4979 = vmatprep.mubr.bf16.mxu1 %v21144_v61  ;;  %v18100_v61 = vcombine.low %v954_v3, %v966_v33  ;;  %v558_v57 = vld [vmem:[#allocation10 + $0x2f8] sm:$0xff]  ;;  %v17716_v51 = vcombine.low %v570_v22, %v582_v31 }
 0x443   :  { %v4614_v11 = vpop.f32.mrf.mxu1  ;;  %4991 = vmatpush1.bf16.msra.mxu0 %v18148_v55  ;;  %4949 = vmatprep.subr.bf16.mxu1 %v17765_v23  ;;  %v906_v49 = vld [vmem:[#allocation10 + $0xdd8] sm:$0xff]  ;;  %v18076_v13 = vcombine.low %v930_v41, %v942_v9  ;;  %v17693_v55 = vcombine.high %v546_v48, %v558_v57 }
 0x444   :  { %v21369_v24 = vadd.f32 %v4614_v11, %v4574_v8  ;;  %v4576_v25 = vpop.f32.mrf.mxu0  ;;  %4992 = vmatprep.subr.bf16.mxu0 %v18125_v59  ;;  %v918_v35 = vld [vmem:[#allocation10 + $0xe38] sm:$0xff]  ;;  %v17692_v8 = vcombine.low %v546_v48, %v558_v57 }
 0x445   :  { %v4616_v34 = vpop.f32.mrf.mxu1  ;;  %v18053_v23 = vcombine.high %v906_v49, %v918_v35  ;;  %v522_v58 = vld [vmem:[#allocation10 + $0x1d8] sm:$0xff]  ;;  %v18052_v62 = vcombine.low %v906_v49, %v918_v35  ;;  %v5853_v49 = vpack.c.bf16 %v21351_v28, %v21351_v28 }
 0x446   :  { %4950 = vmatpush1.bf16.msra.mxu1 %v17764_v17  ;;  %v534_v59 = vld [vmem:[#allocation10 + $0x238] sm:$0xff] }
 0x447   :  { %v4617_v39 = vpop.f32.mrf.mxu1  ;;  %4993 = vmatpush1.bf16.msra.mxu0 %v18124_v12  ;;  %4951 = vmatprep.subr.bf16.mxu1 %v17741_v18  ;;  %v882_v4 = vld [vmem:[#allocation10 + $0xd18] sm:$0xff]  ;;  %v17669_v3 = vcombine.high %v522_v58, %v534_v59  ;;  %v17668_v18 = vcombine.low %v522_v58, %v534_v59 }
 0x448   :  { %4994 = vmatprep.subr.bf16.mxu0 %v18101_v26  ;;  %v894_v44 = vld [vmem:[#allocation10 + $0xd78] sm:$0xff] }
 0x449   :  { %v18029_v33 = vcombine.high %v882_v4, %v894_v44  ;;  %v498_v10 = vld [vmem:[#allocation10 + $0x118] sm:$0xff]  ;;  %v18028_v25 = vcombine.low %v882_v4, %v894_v44 }
 0x44a   :  { %4952 = vmatpush1.bf16.msra.mxu1 %v17740_v36  ;;  %v510_v17 = vld [vmem:[#allocation10 + $0x178] sm:$0xff] }
 0x44b   :  { %4995 = vmatpush1.bf16.msra.mxu0 %v18100_v61  ;;  %4953 = vmatprep.subr.bf16.mxu1 %v17717_v40  ;;  %v858_v11 = vld [vmem:[#allocation10 + $0xc58] sm:$0xff]  ;;  %v17645_v26 = vcombine.high %v498_v10, %v510_v17  ;;  %v17644_v41 = vcombine.low %v498_v10, %v510_v17 }
 0x44c   :  { %4996 = vmatprep.subr.bf16.mxu0 %v18077_v27  ;;  %v870_v12 = vld [vmem:[#allocation10 + $0xcb8] sm:$0xff] }
 0x44d   :  { %v18005_v22 = vcombine.high %v858_v11, %v870_v12  ;;  %v474_v31 = vld [vmem:[#allocation10 + $0x58] sm:$0xff]  ;;  %v18004_v9 = vcombine.low %v858_v11, %v870_v12 }
 0x44e   :  { %4954 = vmatpush1.bf16.msra.mxu1 %v17716_v51  ;;  %v486_v34 = vld [vmem:[#allocation10 + $0xb8] sm:$0xff] }
 0x44f   :  { %4997 = vmatpush1.bf16.msra.mxu0 %v18076_v13  ;;  %4955 = vmatprep.subr.bf16.mxu1 %v17693_v55  ;;  %v17621_v36 = vcombine.high %v474_v31, %v486_v34  ;;  %v834_v39 = vld [vmem:[#allocation10 + $0xb98] sm:$0xff]  ;;  %v17620_v40 = vcombine.low %v474_v31, %v486_v34 }
 0x450   :  { %4998 = vmatprep.subr.bf16.mxu0 %v18053_v23  ;;  %v846_v61 = vld [vmem:[#allocation10 + $0xbf8] sm:$0xff] }
 0x451   :  { %v17981_v27 = vcombine.high %v834_v39, %v846_v61  ;;  %v810_v48 = vld [vmem:[#allocation10 + $0xad8] sm:$0xff]  ;;  %v17980_v51 = vcombine.low %v834_v39, %v846_v61  ;;  %v5856_v61 = vpack.c.bf16 %v21357_v45, %v21357_v45  ;;  %v20824_v45 = vld [vmem:[#allocation13 + $0x8] sm:$0xff] }
 0x452   :  { %4956 = vmatpush1.bf16.msra.mxu1 %v17692_v8  ;;  %v822_v57 = vld [vmem:[#allocation10 + $0xb38] sm:$0xff] }
 0x453   :  { %4999 = vmatpush1.bf16.msra.mxu0 %v18052_v62  ;;  %4957 = vmatprep.subr.bf16.mxu1 %v17669_v3  ;;  %v17957_v13 = vcombine.high %v810_v48, %v822_v57  ;;  %v786_v23 = vld [vmem:[#allocation10 + $0xa18] sm:$0xff]  ;;  %v17956_v28 = vcombine.low %v810_v48, %v822_v57  ;;  %v5854_v3 = vpack.c.bf16 %v21353_v29, %v21353_v29 }
 0x454   :  { %5000 = vmatprep.subr.bf16.mxu0 %v18029_v33  ;;  %v798_v58 = vld [vmem:[#allocation10 + $0xa78] sm:$0xff]  ;;  %v5846_v29 = vpack.c.bf16 %v21236_v0, %v21236_v0  ;;  %v1104_v57 = vrot.slane %v20824_v45, %v21264_v37 }
 0x455   :  { %v17933_v4 = vcombine.high %v786_v23, %v798_v58  ;;  %v762_v8 = vld [vmem:[#allocation10 + $0x958] sm:$0xff]  ;;  %v17932_v33 = vcombine.low %v786_v23, %v798_v58 }
 0x456   :  { %4958 = vmatpush1.bf16.msra.mxu1 %v17668_v18  ;;  %v774_v62 = vld [vmem:[#allocation10 + $0x9b8] sm:$0xff] }
 0x457   :  { %5001 = vmatpush1.bf16.msra.mxu0 %v18028_v25  ;;  %4959 = vmatprep.subr.bf16.mxu1 %v17645_v26  ;;  %v17909_v10 = vcombine.high %v762_v8, %v774_v62  ;;  %v738_v17 = vld [vmem:[#allocation10 + $0x898] sm:$0xff]  ;;  %v5855_v26 = vpack.c.bf16 %v21355_v30, %v21355_v30  ;;  %v5847_v30 = vpack.c.bf16 %v21241_v5, %v21241_v5 }
 0x458   :  { %5002 = vmatprep.subr.bf16.mxu0 %v18005_v22  ;;  %v750_v11 = vld [vmem:[#allocation10 + $0x8f8] sm:$0xff]  ;;  %v5848_v5 = vpack.c.bf16 %v21243_v6, %v21243_v6 }
 0x459   :  { %v17885_v12 = vcombine.high %v738_v17, %v750_v11  ;;  %v714_v18 = vld [vmem:[#allocation10 + $0x7d8] sm:$0xff]  ;;  %v17884_v22 = vcombine.low %v738_v17, %v750_v11 }
 0x45a   :  { %4960 = vmatpush1.bf16.msra.mxu1 %v17644_v41  ;;  %v726_v25 = vld [vmem:[#allocation10 + $0x838] sm:$0xff] }
 0x45b   :  { %5003 = vmatpush1.bf16.msra.mxu0 %v18004_v9  ;;  %4961 = vmatprep.subr.bf16.mxu1 %v17621_v36  ;;  %v17861_v31 = vcombine.high %v714_v18, %v726_v25  ;;  %v690_v34 = vld [vmem:[#allocation10 + $0x718] sm:$0xff]  ;;  %v17860_v0 = vcombine.low %v714_v18, %v726_v25 }
 0x45c   :  { %19569 = vmatprep.subr.bf16.mxu0 %v21001_v1  ;;  %v702_v41 = vld [vmem:[#allocation10 + $0x778] sm:$0xff] }
 0x45d   :  { %v17837_v9 = vcombine.high %v690_v34, %v702_v41  ;;  %v666_v36 = vld [vmem:[#allocation10 + $0x658] sm:$0xff] }
 0x45e   :  { %v21374_v35 = vpop.f32.mrf.mxu0  ;;  %4962 = vmatpush1.bf16.msra.mxu1 %v17620_v40  ;;  %5021 = vmatmul.mubr.bf16.vlgmr.msra.gmra.mxu0 %v21136_v54  ;;  %v5845_v54 = vpack.c.bf16 %v21234_v63, %v21234_v63  ;;  %v17908_v63 = vcombine.low %v762_v8, %v774_v62  ;;  %v678_v39 = vld [vmem:[#allocation10 + $0x6b8] sm:$0xff]  ;;  %v17836_v40 = vcombine.low %v690_v34, %v702_v41 }
 0x45f   :  { %19570 = vmatpush3.bf16.xpose.msra.mxu0 %v5853_v49  ;;  %4963 = vmatprep.subr.bf16.mxu1 %v17981_v27  ;;  %v17813_v27 = vcombine.high %v666_v36, %v678_v39  ;;  %v17812_v48 = vcombine.low %v666_v36, %v678_v39  ;;  %v1108_v49 = vrot.slane %v20824_v45, %v21267_v46  ;;  %v21435_v45 = vld [vmem:[#allocation13 + $0x10] sm:$0xff] }
 0x460   :  { %v21377_v55 = vpop.f32.mrf.mxu0  ;;  %19571 = vmatprep.mubr.msk.bf16.mxu0 %vm21002_vm0, %v21001_v1  ;;  %19575 = vmatprep.subr.bf16.mxu0 %v21001_v1 }
 0x462   :  { %v4698_v59 = vpop.f32.mrf.mxu0  ;;  %4964 = vmatpush2.bf16.msra.mxu1 %v17980_v51 }
 0x463   :  { %4965 = vmatprep.subr.bf16.mxu1 %v17957_v13 }
 0x464   :  { %v4699_v44 = vpop.f32.mrf.mxu0 }
 0x466   :  { %4966 = vmatpush2.bf16.msra.mxu1 %v17956_v28  ;;  %19572 = vmatmul.mubr.bf16.vlgmr.msra.gmra.mxu0 %v5845_v54 }
 0x467   :  { %19576 = vmatpush3.bf16.xpose.msra.mxu0 %v5854_v3  ;;  %4967 = vmatprep.subr.bf16.mxu1 %v17933_v4 }
 0x468   :  { %19577 = vmatprep.mubr.msk.bf16.mxu0 %vm21002_vm0, %v21001_v1  ;;  %19581 = vmatprep.subr.bf16.mxu0 %v21001_v1 }
 0x46a   :  { %4968 = vmatpush2.bf16.msra.mxu1 %v17932_v33 }
 0x46b   :  { %4969 = vmatprep.subr.bf16.mxu1 %v17909_v10 }
 0x46e   :  { %4970 = vmatpush2.bf16.msra.mxu1 %v17908_v63  ;;  %19578 = vmatmul.mubr.bf16.vlgmr.msra.gmra.mxu0 %v5846_v29 }
 0x46f   :  { %19582 = vmatpush3.bf16.xpose.msra.mxu0 %v5855_v26  ;;  %4971 = vmatprep.subr.bf16.mxu1 %v17885_v12 }
 0x470   :  { %19583 = vmatprep.mubr.msk.bf16.mxu0 %vm21002_vm0, %v21001_v1  ;;  %19587 = vmatprep.subr.bf16.mxu0 %v21001_v1 }
 0x472   :  { %4972 = vmatpush2.bf16.msra.mxu1 %v17884_v22 }
 0x473   :  { %4973 = vmatprep.subr.bf16.mxu1 %v17861_v31 }
 0x476   :  { %4974 = vmatpush2.bf16.msra.mxu1 %v17860_v0  ;;  %19584 = vmatmul.mubr.bf16.vlgmr.msra.gmra.mxu0 %v5847_v30 }
 0x477   :  { %19588 = vmatpush3.bf16.xpose.msra.mxu0 %v5856_v61  ;;  %4975 = vmatprep.subr.bf16.mxu1 %v17837_v9 }
 0x478   :  { %19589 = vmatprep.mubr.msk.bf16.mxu0 %vm21002_vm0, %v21001_v1  ;;  %19599 = vmatprep.subr.bf16.mxu0 %v21001_v1 }
 0x47a   :  { %4976 = vmatpush2.bf16.msra.mxu1 %v17836_v40 }
 0x47b   :  { %4977 = vmatprep.subr.bf16.mxu1 %v17813_v27 }
 0x47e   :  { %4978 = vmatpush2.bf16.msra.mxu1 %v17812_v48  ;;  %19590 = vmatmul.mubr.bf16.vlgmr.msra.gmra.mxu0 %v5848_v5 }
 0x47f   :  { %19593 = vmatprep.subr.bf16.mxu1 %v21001_v1  ;;  %19601 = vmatprep.mubr.msk.bf16.mxu0 %vm21002_vm0, %v21001_v1 }
 0x481   :  { %v4653_v51 = vpop.f32.mrf.mxu1  ;;  %4980 = vmatmul.mubr.bf16.vlgmr.msra.gmra.mxu1 %v21140_v60 }
 0x482   :  { %v4654_v13 = vadd.f32 %v4653_v51, %v1104_v57  ;;  %19595 = vmatprep.mubr.msk.bf16.mxu1 %vm21002_vm0, %v21001_v1 }
 0x483   :  { %v4655_v6 = vpop.f32.mrf.mxu1 }
 0x484   :  { %v4695_v23 = vadd.f32 %v21374_v35, %v4654_v13  ;;  %v4656_v58 = vadd.f32 %v4655_v6, %v1108_v49  ;;  %v1112_v6 = vrot.slane %v21435_v45, %v21166_v42 }
 0x485   :  { %v4657_v59 = vpop.f32.mrf.mxu1 }
 0x486   :  { %v5197_v28 = vcombine.low %v21366_v7, %v4695_v23  ;;  %v5198_v4 = vcombine.high %v21366_v7, %v4695_v23  ;;  %v4697_v44 = vadd.f32 %v21377_v55, %v4656_v58  ;;  %v1116_v23 = vrot.slane %v21435_v45, %v21171_v47 }
 0x487   :  { %v4658_v54 = vpop.f32.mrf.mxu1 }
 0x488   :  { %v5213_v8 = vcombine.low %v21369_v24, %v4697_v44  ;;  %v5214_v60 = vcombine.high %v21369_v24, %v4697_v44  ;;  %v5205_v62 = vrot.slane %v5197_v28, %v21205_v20  ;;  %v5212_v3 = vrot.slane %v5198_v4, %v21205_v20 }
 0x489   :  { %v5849_v54 = vpack.c.bf16 %v21297_v15, %v21297_v15 }
 0x48a   :  { %v5221_v33 = vrot.slane %v5213_v8, %v21205_v20  ;;  %v5228_v35 = vrot.slane %v5214_v60, %v21205_v20  ;;  %v5850_v8 = vpack.c.bf16 %v21299_v16, %v21299_v16  ;;  %v5851_v16 = vpack.c.bf16 %v21301_v19, %v21301_v19 }
 0x48b   :  { %v1124_v19 = vrot.slane %v21435_v45, %v21195_v43 }
 0x48c   :  { %v5261_v10 = vcombine.low %v5205_v62, %v5221_v33  ;;  %v5262_v17 = vcombine.high %v5205_v62, %v5221_v33  ;;  %v5277_v11 = vcombine.low %v5212_v3, %v5228_v35  ;;  %v5278_v63 = vcombine.high %v5212_v3, %v5228_v35 }
 0x48e   :  { %v5269_v7 = vrot.slane %v5261_v10, %v21213_v14  ;;  %v5276_v55 = vrot.slane %v5262_v17, %v21213_v14  ;;  %v5285_v12 = vrot.slane %v5277_v11, %v21213_v14  ;;  %v5292_v24 = vrot.slane %v5278_v63, %v21213_v14 }
 0x48f   :  { %v5852_v63 = vpack.c.bf16 %v21303_v21, %v21303_v21 }
 0x490   :  { %v18183_v29 = vcombine.low %v5269_v7, %v5276_v55  ;;  %v18185_v18 = vcombine.high %v5269_v7, %v5276_v55  ;;  %v18187_v25 = vcombine.low %v5285_v12, %v5292_v24  ;;  %v18189_v26 = vcombine.high %v5285_v12, %v5292_v24 }
 0x492   :  { %v5588_v22 = vrot.slane %v18183_v29, %v21205_v20  ;;  %v5604_v31 = vrot.slane %v18185_v18, %v21205_v20  ;;  %v5620_v34 = vrot.slane %v18187_v25, %v21205_v20  ;;  %v5636_v41 = vrot.slane %v18189_v26, %v21205_v20 }
 0x493   :  { %v1120_v29 = vrot.slane %v21435_v45, %v21192_v38 }
 0x494   :  { %v5653_v0 = vcombine.low %v5588_v22, %v5604_v31  ;;  %v5685_v9 = vcombine.low %v5620_v34, %v5636_v41  ;;  %v5654_v30 = vcombine.high %v5588_v22, %v5604_v31  ;;  %v5686_v36 = vcombine.high %v5620_v34, %v5636_v41 }
 0x496   :  { %v5661_v39 = vrot.slane %v5653_v0, %v21213_v14  ;;  %v5693_v61 = vrot.slane %v5685_v9, %v21213_v14  ;;  %v5668_v40 = vrot.slane %v5654_v30, %v21213_v14  ;;  %v5700_v27 = vrot.slane %v5686_v36, %v21213_v14 }
 0x498   :  { %v5705_v48 = vcombine.low %v5661_v39, %v5693_v61  ;;  %v5706_v5 = vcombine.high %v5661_v39, %v5693_v61  ;;  %v5707_v57 = vcombine.low %v5668_v40, %v5700_v27  ;;  %v5708_v49 = vcombine.high %v5668_v40, %v5700_v27 }
 0x49a   :  { %v5857_v51 = vpack.c.bf16 %v5705_v48, %v5705_v48  ;;  %v5858_v13 = vpack.c.bf16 %v5706_v5, %v5706_v5  ;;  %v5859_v3 = vpack.c.bf16 %v5707_v57, %v5707_v57  ;;  %v5860_v33 = vpack.c.bf16 %v5708_v49, %v5708_v49 }
 0x49c   :  { %19594 = vmatpush3.bf16.xpose.msra.mxu1 %v5857_v51  ;;  %19600 = vmatpush3.bf16.xpose.msra.mxu0 %v5858_v13 }
 0x49d   :  { %19605 = vmatprep.subr.bf16.mxu1 %v21001_v1  ;;  %19611 = vmatprep.subr.bf16.mxu0 %v21001_v1 }
 0x49e   :  { %v4735_v58 = vpop.f32.mrf.mxu0 }
 0x49f   :  { %v4736_v59 = vadd.f32 %v4735_v58, %v1112_v6 }
 0x4a0   :  { %v4737_v28 = vpop.f32.mrf.mxu0 }
 0x4a1   :  { %v4738_v4 = vadd.f32 %v4737_v28, %v1116_v23  ;;  %v4776_v44 = vpop.f32.mrf.mxu1 }
 0x4a2   :  { %v4777_v60 = vadd.f32 %v4776_v44, %v4736_v59  ;;  %v4739_v62 = vpop.f32.mrf.mxu0 }
 0x4a3   :  { %v4778_v35 = vpop.f32.mrf.mxu1  ;;  %19596 = vmatmul.mubr.bf16.vlgmr.msra.gmra.mxu1 %v5849_v54  ;;  %19602 = vmatmul.mubr.bf16.vlgmr.msra.gmra.mxu0 %v5850_v8 }
 0x4a4   :  { %v4779_v10 = vadd.f32 %v4778_v35, %v4738_v4  ;;  %v4740_v17 = vpop.f32.mrf.mxu0  ;;  %19606 = vmatpush3.bf16.xpose.msra.mxu1 %v5859_v3  ;;  %19612 = vmatpush3.bf16.xpose.msra.mxu0 %v5860_v33 }
 0x4a5   :  { %v4780_v11 = vpop.f32.mrf.mxu1  ;;  %19607 = vmatprep.mubr.msk.bf16.mxu1 %vm21002_vm0, %v21001_v1  ;;  %19613 = vmatprep.mubr.msk.bf16.mxu0 %vm21002_vm0, %v21001_v1 }
 0x4a6   :  { %19617 = vmatprep.subr.bf16.mxu1 %v21001_v1  ;;  %19623 = vmatprep.subr.bf16.mxu0 %v21001_v1 }
 0x4a7   :  { %v4781_v15 = vpop.f32.mrf.mxu1 }
 0x4ab   :  { %19608 = vmatmul.mubr.bf16.vlgmr.msra.gmra.mxu1 %v5851_v16  ;;  %19614 = vmatmul.mubr.bf16.vlgmr.msra.gmra.mxu0 %v5852_v63 }
 0x4ac   :  { %19619 = vmatprep.mubr.msk.bf16.mxu1 %vm21002_vm0, %v21001_v1  ;;  %19625 = vmatprep.mubr.msk.bf16.mxu0 %vm21002_vm0, %v21001_v1 }
 0x4be   :  { %v4858_v7 = vpop.f32.mrf.mxu0 }
 0x4c0   :  { %v4860_v55 = vpop.f32.mrf.mxu0 }
 0x4c2   :  { %v4862_v12 = vpop.f32.mrf.mxu0 }
 0x4c4   :  { %v4863_v24 = vpop.f32.mrf.mxu0 }
 0x4e1   :  { %v4817_v18 = vpop.f32.mrf.mxu1 }
 0x4e2   :  { %v4818_v21 = vadd.f32 %v4817_v18, %v1120_v29  ;;  %v1128_v29 = vrot.slane %v21435_v45, %v21231_v56 }
 0x4e3   :  { %v4819_v25 = vpop.f32.mrf.mxu1 }
 0x4e4   :  { %v4859_v26 = vadd.f32 %v4858_v7, %v4818_v21  ;;  %v4820_v22 = vadd.f32 %v4819_v25, %v1124_v19  ;;  %v1132_v21 = vrot.slane %v21435_v45, %v21239_v2 }
 0x4e5   :  { %v4821_v31 = vpop.f32.mrf.mxu1 }
 0x4e6   :  { %v5301_v34 = vcombine.low %v4777_v60, %v4859_v26  ;;  %v5302_v41 = vcombine.high %v4777_v60, %v4859_v26  ;;  %v4861_v0 = vadd.f32 %v4860_v55, %v4820_v22 }
 0x4e7   :  { %v4822_v9 = vpop.f32.mrf.mxu1 }
 0x4e8   :  { %v5317_v30 = vcombine.low %v4779_v10, %v4861_v0  ;;  %v5318_v36 = vcombine.high %v4779_v10, %v4861_v0  ;;  %v5309_v39 = vrot.slane %v5301_v34, %v21205_v20  ;;  %v5316_v61 = vrot.slane %v5302_v41, %v21205_v20 }
 0x4ea   :  { %v5325_v40 = vrot.slane %v5317_v30, %v21205_v20  ;;  %v5332_v27 = vrot.slane %v5318_v36, %v21205_v20 }
 0x4ec   :  { %v5365_v48 = vcombine.low %v5309_v39, %v5325_v40  ;;  %v5366_v5 = vcombine.high %v5309_v39, %v5325_v40  ;;  %v5381_v57 = vcombine.low %v5316_v61, %v5332_v27  ;;  %v5382_v49 = vcombine.high %v5316_v61, %v5332_v27 }
 0x4ee   :  { %v5373_v51 = vrot.slane %v5365_v48, %v21213_v14  ;;  %v5380_v13 = vrot.slane %v5366_v5, %v21213_v14  ;;  %v5389_v6 = vrot.slane %v5381_v57, %v21213_v14  ;;  %v5396_v23 = vrot.slane %v5382_v49, %v21213_v14 }
 0x4f0   :  { %v18190_v58 = vcombine.low %v5373_v51, %v5380_v13  ;;  %v18192_v59 = vcombine.high %v5373_v51, %v5380_v13  ;;  %v18194_v28 = vcombine.low %v5389_v6, %v5396_v23  ;;  %v18196_v4 = vcombine.high %v5389_v6, %v5396_v23 }
 0x4f2   :  { %v5717_v44 = vrot.slane %v18190_v58, %v21205_v20  ;;  %v5733_v54 = vrot.slane %v18192_v59, %v21205_v20  ;;  %v5749_v8 = vrot.slane %v18194_v28, %v21205_v20  ;;  %v5765_v60 = vrot.slane %v18196_v4, %v21205_v20 }
 0x4f4   :  { %v5773_v62 = vcombine.low %v5717_v44, %v5733_v54  ;;  %v5805_v3 = vcombine.low %v5749_v8, %v5765_v60  ;;  %v5774_v33 = vcombine.high %v5717_v44, %v5733_v54  ;;  %v5806_v35 = vcombine.high %v5749_v8, %v5765_v60 }
 0x4f6   :  { %v5781_v10 = vrot.slane %v5773_v62, %v21213_v14  ;;  %v5813_v17 = vrot.slane %v5805_v3, %v21213_v14  ;;  %v5788_v11 = vrot.slane %v5774_v33, %v21213_v14  ;;  %v5820_v15 = vrot.slane %v5806_v35, %v21213_v14 }
 0x4f7   :  { %v1136_v33 = vrot.slane %v21435_v45, %v21264_v37 }
 0x4f8   :  { %v5837_v16 = vcombine.low %v5781_v10, %v5813_v17  ;;  %v5838_v63 = vcombine.high %v5781_v10, %v5813_v17  ;;  %v21481_v7 = vcombine.low %v5788_v11, %v5820_v15  ;;  %v21483_v55 = vcombine.high %v5788_v11, %v5820_v15 }
 0x4f9   :  { %v1140_v17 = vrot.slane %v21435_v45, %v21267_v46 }
 0x4fa   :  { %v5861_v12 = vpack.c.bf16 %v5837_v16, %v5837_v16  ;;  %v5862_v24 = vpack.c.bf16 %v5838_v63, %v5838_v63 }
 0x4fc   :  { %v6290_v19 = vsel %vm6288_vm2, %v5861_v12, 0  ;;  %v6336_v18 = vsel %vm6288_vm2, %v5862_v24, 0 }
 0x4fd   :  { %19618 = vmatpush3.bf16.msra.mxu1 %v6290_v19  ;;  %19624 = vmatpush3.bf16.msra.mxu0 %v6336_v18 }
 0x4fe   :  { %v4899_v25 = vpop.f32.mrf.mxu0  ;;  %19629 = vmatprep.subr.bf16.mxu1 %v21001_v1  ;;  %19635 = vmatprep.subr.bf16.mxu0 %v21001_v1 }
 0x4ff   :  { %v4900_v26 = vadd.f32 %v4899_v25, %v1128_v29 }
 0x500   :  { %v4901_v22 = vpop.f32.mrf.mxu0 }
 0x501   :  { %v4902_v31 = vadd.f32 %v4901_v22, %v1132_v21  ;;  %v4940_v34 = vpop.f32.mrf.mxu1 }
 0x502   :  { %v4941_v41 = vadd.f32 %v4940_v34, %v4900_v26  ;;  %v4903_v0 = vpop.f32.mrf.mxu0 }
 0x503   :  { %v4942_v9 = vpop.f32.mrf.mxu1 }
 0x504   :  { %v4943_v30 = vadd.f32 %v4942_v9, %v4902_v31  ;;  %v4904_v36 = vpop.f32.mrf.mxu0 }
 0x505   :  { %v4944_v39 = vpop.f32.mrf.mxu1 }
 0x507   :  { %v4945_v61 = vpop.f32.mrf.mxu1 }
 0x51e   :  { %v5022_v40 = vpop.f32.mrf.mxu0 }
 0x520   :  { %v5024_v27 = vpop.f32.mrf.mxu0 }
 0x522   :  { %v5026_v48 = vpop.f32.mrf.mxu0 }
 0x524   :  { %v5027_v5 = vpop.f32.mrf.mxu0 }
 0x526   :  { %v21493_v57 = vpop.f32.mrf.mxu0 }
 0x527   :  { %v6189_v49 = vsel %vm367_vm1, %v21493_v57, -inf }
 0x528   :  { %6190 = vmax.xlane.f32.xlu0 %v6189_v49  ;;  %v19573_v51 = vpop.f32.mrf.mxu0 }
 0x52a   :  { %v5906_v13 = vpop.f32.mrf.mxu0 }
 0x52c   :  { %v19574_v6 = vpop.f32.mrf.mxu0 }
 0x52e   :  { %v21497_v23 = vpop.f32.mrf.mxu0 }
 0x52f   :  { %v6192_v58 = vsel %vm367_vm1, %v21497_v23, -inf }
 0x530   :  { %6193 = vmax.xlane.f32.xlu0 %v6192_v58  ;;  %v19579_v59 = vpop.f32.mrf.mxu0 }
 0x532   :  { %v5946_v28 = vpop.f32.mrf.mxu0 }
 0x534   :  { %v19580_v4 = vpop.f32.mrf.mxu0 }
 0x536   :  { %v21501_v44 = vpop.f32.mrf.mxu0 }
 0x537   :  { %v6195_v54 = vsel %vm367_vm1, %v21501_v44, -inf }
 0x538   :  { %6196 = vmax.xlane.f32.xlu1 %v6195_v54  ;;  %v19585_v8 = vpop.f32.mrf.mxu0 }
 0x53a   :  { %v5986_v60 = vpop.f32.mrf.mxu0 }
 0x53c   :  { %v19586_v62 = vpop.f32.mrf.mxu0 }
 0x53e   :  { %v21505_v3 = vpop.f32.mrf.mxu0 }
 0x53f   :  { %v6198_v35 = vsel %vm367_vm1, %v21505_v3, -inf }
 0x540   :  { %6199 = vmax.xlane.f32.xlu0 %v6198_v35  ;;  %v19591_v10 = vpop.f32.mrf.mxu0 }
 0x541   :  { %v4981_v11 = vpop.f32.mrf.mxu1 }
 0x542   :  { %v4982_v15 = vadd.f32 %v4981_v11, %v1136_v33  ;;  %v6026_v16 = vpop.f32.mrf.mxu0 }
 0x543   :  { %v4983_v63 = vpop.f32.mrf.mxu1 }
 0x544   :  { %v5023_v12 = vadd.f32 %v5022_v40, %v4982_v15  ;;  %v4984_v24 = vadd.f32 %v4983_v63, %v1140_v17  ;;  %v19592_v29 = vpop.f32.mrf.mxu0 }
 0x545   :  { %v4985_v19 = vpop.f32.mrf.mxu1 }
 0x546   :  { %v5333_v18 = vcombine.low %v4941_v41, %v5023_v12  ;;  %v5334_v21 = vcombine.high %v4941_v41, %v5023_v12  ;;  %v5025_v25 = vadd.f32 %v5024_v27, %v4984_v24 }
 0x547   :  { %v4986_v26 = vpop.f32.mrf.mxu1 }
 0x548   :  { %v5349_v22 = vcombine.low %v4943_v30, %v5025_v25  ;;  %v5350_v31 = vcombine.high %v4943_v30, %v5025_v25  ;;  %v5341_v34 = vrot.slane %v5333_v18, %v21205_v20  ;;  %v5348_v0 = vrot.slane %v5334_v21, %v21205_v20 }
 0x54a   :  { %v5357_v45 = vrot.slane %v5349_v22, %v21205_v20  ;;  %v5364_v9 = vrot.slane %v5350_v31, %v21205_v20 }
 0x54c   :  { %v5397_v36 = vcombine.low %v5341_v34, %v5357_v45  ;;  %v5398_v39 = vcombine.high %v5341_v34, %v5357_v45  ;;  %v5413_v61 = vcombine.low %v5348_v0, %v5364_v9  ;;  %v5414_v40 = vcombine.high %v5348_v0, %v5364_v9 }
 0x54e   :  { %v5405_v48 = vrot.slane %v5397_v36, %v21213_v14  ;;  %v5412_v41 = vrot.slane %v5398_v39, %v21213_v14  ;;  %v5421_v27 = vrot.slane %v5413_v61, %v21213_v14  ;;  %v5428_v30 = vrot.slane %v5414_v40, %v21213_v14 }
 0x550   :  { %v18191_v5 = vcombine.low %v5405_v48, %v5412_v41  ;;  %v18193_v49 = vcombine.high %v5405_v48, %v5412_v41  ;;  %v18195_v51 = vcombine.low %v5421_v27, %v5428_v30  ;;  %v18197_v13 = vcombine.high %v5421_v27, %v5428_v30 }
 0x552   :  { %v5724_v6 = vrot.slane %v18191_v5, %v21205_v20  ;;  %v5740_v58 = vrot.slane %v18193_v49, %v21205_v20  ;;  %v5756_v59 = vrot.slane %v18195_v51, %v21205_v20  ;;  %v5772_v28 = vrot.slane %v18197_v13, %v21205_v20 }
 0x554   :  { %v5789_v4 = vcombine.low %v5724_v6, %v5740_v58  ;;  %v5821_v54 = vcombine.low %v5756_v59, %v5772_v28  ;;  %v5790_v8 = vcombine.high %v5724_v6, %v5740_v58  ;;  %v5822_v60 = vcombine.high %v5756_v59, %v5772_v28 }
 0x556   :  { %v5797_v62 = vrot.slane %v5789_v4, %v21213_v14  ;;  %v5829_v33 = vrot.slane %v5821_v54, %v21213_v14  ;;  %v5804_v35 = vrot.slane %v5790_v8, %v21213_v14  ;;  %v5836_v10 = vrot.slane %v5822_v60, %v21213_v14 }
 0x558   :  { %v21529_v17 = vcombine.low %v5797_v62, %v5829_v33  ;;  %v21531_v11 = vcombine.high %v5797_v62, %v5829_v33  ;;  %v21533_v15 = vcombine.low %v5804_v35, %v5836_v10  ;;  %v21535_v16 = vcombine.high %v5804_v35, %v5836_v10 }
 0x563   :  { %v6063_v63 = vpop.f32.mrf.mxu1  ;;  %v6103_v12 = vpop.f32.mrf.mxu0 }
 0x564   :  { %v6201_v24 = vsel %vm367_vm1, %v6063_v63, -inf  ;;  %v6204_v25 = vsel %vm367_vm1, %v6103_v12, -inf }
 0x565   :  { %v19597_v29 = vpop.f32.mrf.mxu1  ;;  %6202 = vmax.xlane.f32.xlu0 %v6201_v24  ;;  %v19603_v19 = vpop.f32.mrf.mxu0 }
 0x567   :  { %v6066_v18 = vpop.f32.mrf.mxu1  ;;  %v6106_v21 = vpop.f32.mrf.mxu0 }
 0x569   :  { %v19598_v26 = vpop.f32.mrf.mxu1  ;;  %6205 = vmax.xlane.f32.xlu0 %v6204_v25  ;;  %v19604_v22 = vpop.f32.mrf.mxu0 }
 0x56b   :  { %v21539_v31 = vpop.f32.mrf.mxu1  ;;  %v6183_v34 = vpop.f32.mrf.mxu0 }
 0x56c   :  { %v6210_v0 = vsel %vm367_vm1, %v6183_v34, -inf }
 0x56d   :  { %v19609_v45 = vpop.f32.mrf.mxu1  ;;  %6211 = vmax.xlane.f32.xlu0 %v6210_v0  ;;  %v19615_v9 = vpop.f32.mrf.mxu0 }
 0x56f   :  { %v6146_v36 = vpop.f32.mrf.mxu1  ;;  %v6186_v39 = vpop.f32.mrf.mxu0 }
 0x571   :  { %v19610_v61 = vpop.f32.mrf.mxu1  ;;  %v19616_v40 = vpop.f32.mrf.mxu0 }
 0x572   :  { %v5863_v61 = vpack.c.bf16 %v21481_v7, %v21481_v7  ;;  %v5864_v7 = vpack.c.bf16 %v21483_v55, %v21483_v55 }
 0x5b1   :  { %v6191_v48 = vpop.xlane.xlu0 %6190 }
 0x5b2   :  { %v6213_v41 = vsub.f32 %v21493_v57, %v6191_v48 }
 0x5b4   :  { %v6221_v27 = vmul.f32 1.442695, %v6213_v41  ;;  %v6382_v41 = vsel %vm6288_vm2, %v5863_v61, 0  ;;  %v20170_v61 = vld [vmem:[#allocation12 + $0x8] ss:$12 sps:$4 sm:$0xff]  }
 0x5b6   :  { %20759 = vpow2.f32 %v6221_v27 }
 0x5b9   :  { %v6194_v30 = vpop.xlane.xlu0 %6193 }
 0x5ba   :  { %v6214_v5 = vsub.f32 %v21497_v23, %v6194_v30 }
 0x5bc   :  { %v6223_v49 = vmul.f32 1.442695, %v6214_v5 }
 0x5be   :  { %20761 = vpow2.f32 %v6223_v49 }
 0x5c1   :  { %v6197_v51 = vpop.xlane.xlu1 %6196 }
 0x5c2   :  { %v6215_v13 = vsub.f32 %v21501_v44, %v6197_v51  ;;  %v6207_v44 = vsel %vm367_vm1, %v21539_v31, -inf }
 0x5c3   :  { %v20760_v6 = vpop.eup %20759 }
 0x5c4   :  { %v6225_v58 = vmul.f32 1.442695, %v6215_v13  ;;  %v6237_v59 = vsel %vm367_vm1, %v20760_v6, 0.0 }
 0x5c5   :  { %6238 = vadd.xlane.f32.xlu1 %v6237_v59 }
 0x5c6   :  { %20763 = vpow2.f32 %v6225_v58  ;;  %v6428_v58 = vsel %vm6288_vm2, %v5864_v7, 0  ;;  %v20163_v7 = vld [vmem:[#allocation12 + $0x78] ss:$12 sps:$4 sm:$0xff]  }
 0x5c9   :  { %v6200_v28 = vpop.xlane.xlu0 %6199 }
 0x5ca   :  { %v6216_v4 = vsub.f32 %v21505_v3, %v6200_v28  ;;  %v5865_v28 = vpack.c.bf16 %v21529_v17, %v21529_v17  ;;  %v5866_v17 = vpack.c.bf16 %v21531_v11, %v21531_v11 }
 0x5cb   :  { %v20762_v57 = vpop.eup %20761 }
 0x5cc   :  { %v6227_v54 = vmul.f32 1.442695, %v6216_v4  ;;  %v6240_v8 = vsel %vm367_vm1, %v20762_v57, 0.0  ;;  %v6474_v4 = vsel %vm6288_vm2, %v5865_v28, 0 }
 0x5cd   :  { %6241 = vadd.xlane.f32.xlu1 %v6240_v8 }
 0x5ce   :  { %20765 = vpow2.f32 %v6227_v54 }
 0x5d3   :  { %v20764_v23 = vpop.eup %20763 }
 0x5d4   :  { %v6243_v60 = vsel %vm367_vm1, %v20764_v23, 0.0 }
 0x5d5   :  { %6244 = vadd.xlane.f32.xlu1 %v6243_v60 }
 0x5d9   :  { %6208 = vmax.xlane.f32.xlu1 %v6207_v44  ;;  %v6520_v44 = vsel %vm6288_vm2, %v5866_v17, 0  ;;  %v20178_v17 = vld [vmem:[#allocation12 + $0x158] ss:$12 sps:$4 sm:$0xff]  }
 0x5db   :  { %v21551_v62 = vpop.eup %20765 }
 0x5dc   :  { %v6246_v33 = vsel %vm367_vm1, %v21551_v62, 0.0 }
 0x5dd   :  { %6247 = vadd.xlane.f32.xlu1 %v6246_v33 }
 0x5ee   :  { %v6203_v3 = vpop.xlane.xlu0 %6202 }
 0x5ef   :  { %v6217_v35 = vsub.f32 %v6063_v63, %v6203_v3 }
 0x5f1   :  { %v6229_v10 = vmul.f32 1.442695, %v6217_v35 }
 0x5f2   :  { %v6206_v24 = vpop.xlane.xlu0 %6205 }
 0x5f3   :  { %20767 = vpow2.f32 %v6229_v10  ;;  %v6218_v29 = vsub.f32 %v6103_v12, %v6206_v24  ;;  %v5867_v10 = vpack.c.bf16 %v21533_v15, %v21533_v15 }
 0x5f5   :  { %v6231_v19 = vmul.f32 1.442695, %v6218_v29  ;;  %v20157_v29 = vld [vmem:[#allocation12 + $0xac] ss:$12 sps:$4 sm:$0xff]  }
 0x5f6   :  { %v6212_v18 = vpop.xlane.xlu0 %6211 }
 0x5f7   :  { %20769 = vpow2.f32 %v6231_v19  ;;  %v6220_v21 = vsub.f32 %v6183_v34, %v6212_v18 }
 0x5f9   :  { %v6235_v25 = vmul.f32 1.442695, %v6220_v21  ;;  %v6566_v21 = vsel %vm6288_vm2, %v5867_v10, 0  ;;  %v20189_v10 = vld [vmem:[#allocation12 + $0x16c] ss:$12 sps:$4 sm:$0xff]  }
 0x5fb   :  { %20771 = vpow2.f32 %v6235_v25  ;;  %v5868_v25 = vpack.c.bf16 %v21535_v16, %v21535_v16  ;;  %v20151_v16 = vld [vmem:[#allocation12 + $0xb0] ss:$12 sps:$4 sm:$0xff]  }
 0x5fd   :  { %v6612_v15 = vsel %vm6288_vm2, %v5868_v25, 0 }
 0x600   :  { %v21555_v26 = vpop.eup %20767 }
 0x601   :  { %v6249_v22 = vsel %vm367_vm1, %v21555_v26, 0.0 }
 0x602   :  { %6250 = vadd.xlane.f32.xlu0 %v6249_v22 }
 0x604   :  { %v21559_v0 = vpop.eup %20769 }
 0x605   :  { %v6252_v63 = vsel %vm367_vm1, %v21559_v0, 0.0 }
 0x606   :  { %6253 = vadd.xlane.f32.xlu1 %v6252_v63 }
 0x608   :  { %v21563_v45 = vpop.eup %20771 }
 0x609   :  { %v6258_v12 = vsel %vm367_vm1, %v21563_v45, 0.0 }
 0x60a   :  { %6259 = vadd.xlane.f32.xlu1 %v6258_v12  ;;  %v20152_v12 = vld [vmem:[#allocation12 + $0x98] ss:$12 sps:$4 sm:$0xff]  }
 0x64e   :  { %v6239_v34 = vpop.xlane.xlu1 %6238 }
 0x64f   :  { %20773 = vrcp.f32 %v6239_v34  ;;  %v20153_v34 = vld [vmem:[#allocation12 + $0x80] ss:$12 sps:$4 sm:$0xff]  }
 0x656   :  { %v6242_v9 = vpop.xlane.xlu1 %6241 }
 0x657   :  { %20775 = vrcp.f32 %v6242_v9  ;;  %v20154_v9 = vld [vmem:[#allocation12 + $0x68] ss:$12 sps:$4 sm:$0xff]  }
 0x65c   :  { %v20774_v36 = vpop.eup %20773 }
 0x65d   :  { %v6269_v39 = vmul.f32 %v20774_v36, %v20760_v6  ;;  %v20162_v36 = vld [vmem:[#allocation12 + $0x38] ss:$12 sps:$4 sm:$0xff]  }
 0x65e   :  { %v6245_v40 = vpop.xlane.xlu1 %6244 }
 0x65f   :  { %20777 = vrcp.f32 %v6245_v40  ;;  %v6277_v48 = vpack.c.bf16 %v6269_v39, %v6269_v39  ;;  %v20166_v39 = vld [vmem:[#allocation12 + $0x20] ss:$12 sps:$4 sm:$0xff]  }
 0x661   :  { %19620 = vmatmul.mubr.msk.bf16.vlgmr.msra.gmra.mxu1 %vm367_vm1, %v6277_v48 }
 0x662   :  { %19630 = vmatpush3.bf16.msra.mxu1 %v6382_v41  ;;  %v6209_v27 = vpop.xlane.xlu1 %6208  ;;  %19631 = vmatprep.mubr.msk.bf16.mxu1 %vm21002_vm0, %v21001_v1 }
 0x663   :  { %v6219_v30 = vsub.f32 %v21539_v31, %v6209_v27  ;;  %19641 = vmatprep.subr.bf16.mxu1 %v21001_v1  ;;  %v20155_v27 = vld [vmem:[#allocation12 + $0xa8] ss:$12 sps:$4 sm:$0xff]  }
 0x664   :  { %v20776_v5 = vpop.eup %20775 }
 0x665   :  { %v6233_v49 = vmul.f32 1.442695, %v6219_v30  ;;  %v6270_v51 = vmul.f32 %v20776_v5, %v20762_v57  ;;  %v20161_v5 = vld [vmem:[#allocation12 + $0x94] ss:$12 sps:$4 sm:$0xff]  }
 0x666   :  { %v6248_v13 = vpop.xlane.xlu1 %6247 }
 0x667   :  { %20779 = vpow2.f32 %v6233_v49  ;;  %v6278_v6 = vpack.c.bf16 %v6270_v51, %v6270_v51  ;;  %v20159_v49 = vld [vmem:[#allocation12 + $0x90] ss:$12 sps:$4 sm:$0xff]  }
 0x668   :  { %20781 = vrcp.f32 %v6248_v13  ;;  %v20165_v51 = vld [vmem:[#allocation12 + $0x7c] ss:$12 sps:$4 sm:$0xff]   ;;  %v20169_v13 = vld [vmem:[#allocation12 + $0x64] ss:$12 sps:$4 sm:$0xff]  }
 0x669   :  { %19626 = vmatmul.mubr.msk.bf16.vlgmr.msra.gmra.mxu0 %vm367_vm1, %v6278_v6  ;;  %v20167_v6 = vld [vmem:[#allocation12 + $0x60] ss:$12 sps:$4 sm:$0xff]  }
 0x66a   :  { %19636 = vmatpush3.bf16.msra.mxu0 %v6428_v58  ;;  %19637 = vmatprep.mubr.msk.bf16.mxu0 %vm21002_vm0, %v21001_v1  ;;  %v20173_v58 = vld [vmem:[#allocation12 + $0x4c] ss:$12 sps:$4 sm:$0xff]  }
 0x66b   :  { %19647 = vmatprep.subr.bf16.mxu0 %v21001_v1 }
 0x66c   :  { %v20778_v31 = vpop.eup %20777 }
 0x66d   :  { %v6271_v59 = vmul.f32 %v20778_v31, %v20764_v23  ;;  %v20171_v31 = vld [vmem:[#allocation12 + $0x48] ss:$12 sps:$4 sm:$0xff]  }
 0x66f   :  { %v6279_v55 = vpack.c.bf16 %v6271_v59, %v6271_v59  ;;  %v20177_v59 = vld [vmem:[#allocation12 + $0x34] ss:$12 sps:$4 sm:$0xff]  }
 0x671   :  { %19632 = vmatmul.mubr.msk.bf16.vlgmr.msra.gmra.mxu1 %vm367_vm1, %v6279_v55  ;;  %v20174_v55 = vld [vmem:[#allocation12 + $0x170] ss:$12 sps:$4 sm:$0xff]  }
 0x672   :  { %19642 = vmatpush3.bf16.msra.mxu1 %v6474_v4  ;;  %19643 = vmatprep.mubr.msk.bf16.mxu1 %vm21002_vm0, %v21001_v1 }
 0x673   :  { %19653 = vmatprep.subr.bf16.mxu1 %v21001_v1 }
 0x674   :  { %v21589_v57 = vpop.eup %20779 }
 0x675   :  { %v20782_v54 = vpop.eup %20781  ;;  %v6255_v8 = vsel %vm367_vm1, %v21589_v57, 0.0 }
 0x676   :  { %v6272_v23 = vmul.f32 %v20782_v54, %v21551_v62  ;;  %6256 = vadd.xlane.f32.xlu0 %v6255_v8  ;;  %v20175_v54 = vld [vmem:[#allocation12 + $0x30] ss:$12 sps:$4 sm:$0xff]  }
 0x677   :  { %v20181_v8 = vld [vmem:[#allocation12 + $0x1c] ss:$12 sps:$4 sm:$0xff]  }
 0x678   :  { %v6280_v60 = vpack.c.bf16 %v6272_v23, %v6272_v23 }
 0x67a   :  { %19638 = vmatmul.mubr.msk.bf16.vlgmr.msra.gmra.mxu0 %vm367_vm1, %v6280_v60 }
 0x67b   :  { %19648 = vmatpush3.bf16.msra.mxu0 %v6520_v44  ;;  %19649 = vmatprep.mubr.msk.bf16.mxu0 %vm21002_vm0, %v21001_v1  ;;  %v20179_v44 = vld [vmem:[#allocation12 + $0x18] ss:$12 sps:$4 sm:$0xff]  }
 0x67c   :  { %19659 = vmatprep.subr.bf16.mxu0 %v21001_v1 }
 0x68b   :  { %v6251_v33 = vpop.xlane.xlu0 %6250 }
 0x68c   :  { %20783 = vrcp.f32 %v6251_v33  ;;  %v20185_v33 = vld [vmem:[#allocation12 + $0x4] ss:$12 sps:$4 sm:$0xff]  }
 0x68f   :  { %v6254_v3 = vpop.xlane.xlu1 %6253 }
 0x690   :  { %20785 = vrcp.f32 %v6254_v3 }
 0x693   :  { %v6260_v62 = vpop.xlane.xlu1 %6259 }
 0x694   :  { %20787 = vrcp.f32 %v6260_v62  ;;  %v20182_v62 = vld [vmem:[#allocation12 + $0x140] ss:$12 sps:$4 sm:$0xff]  }
 0x699   :  { %v20784_v35 = vpop.eup %20783 }
 0x69a   :  { %v6273_v11 = vmul.f32 %v20784_v35, %v21555_v26 }
 0x69c   :  { %v6281_v24 = vpack.c.bf16 %v6273_v11, %v6273_v11  ;;  %v20183_v11 = vld [vmem:[#allocation12] ss:$12 sps:$4 sm:$0xff]  }
 0x69d   :  { %v20786_v19 = vpop.eup %20785 }
 0x69e   :  { %v6274_v18 = vmul.f32 %v20786_v19, %v21559_v0  ;;  %19644 = vmatmul.mubr.msk.bf16.vlgmr.msra.gmra.mxu1 %vm367_vm1, %v6281_v24 }
 0x69f   :  { %19654 = vmatpush3.bf16.msra.mxu1 %v6566_v21  ;;  %19655 = vmatprep.mubr.msk.bf16.mxu1 %vm21002_vm0, %v21001_v1  ;;  %v20193_v21 = vld [vmem:[#allocation12 + $0x154] ss:$12 sps:$4 sm:$0xff]  }
 0x6a0   :  { %v6282_v26 = vpack.c.bf16 %v6274_v18, %v6274_v18  ;;  %7046 = vmatprep.subr.bf16.mxu1 %v20157_v29  ;;  %v20186_v29 = vld [vmem:[#allocation12 + $0x128] ss:$12 sps:$4 sm:$0xff]  }
 0x6a1   :  { %v20788_v22 = vpop.eup %20787  ;;  %v20187_v18 = vld [vmem:[#allocation12 + $0x168] ss:$12 sps:$4 sm:$0xff]  }
 0x6a2   :  { %19650 = vmatmul.mubr.msk.bf16.vlgmr.msra.gmra.mxu0 %vm367_vm1, %v6282_v26  ;;  %v6276_v0 = vmul.f32 %v20788_v22, %v21563_v45  ;;  %v20158_v45 = vld [vmem:[#allocation12 + $0x50] ss:$12 sps:$4 sm:$0xff]  }
 0x6a3   :  { %19660 = vmatpush3.bf16.msra.mxu0 %v6612_v15  ;;  %19661 = vmatprep.mubr.msk.bf16.mxu0 %vm21002_vm0, %v21001_v1  ;;  %v20190_v26 = vld [vmem:[#allocation12 + $0x110] ss:$12 sps:$4 sm:$0xff]  }
 0x6a4   :  { %19665 = vmatprep.subr.bf16.mxu0 %v21001_v1  ;;  %v6284_v63 = vpack.c.bf16 %v6276_v0, %v6276_v0  ;;  %v20191_v15 = vld [vmem:[#allocation12 + $0x150] ss:$12 sps:$4 sm:$0xff]  }
 0x6a5   :  { %v20197_v0 = vld [vmem:[#allocation12 + $0x13c] ss:$12 sps:$4 sm:$0xff]  }
 0x6aa   :  { %19662 = vmatmul.mubr.msk.bf16.vlgmr.msra.gmra.mxu0 %vm367_vm1, %v6284_v63  ;;  %v20194_v63 = vld [vmem:[#allocation12 + $0xf8] ss:$12 sps:$4 sm:$0xff]  }
 0x6ab   :  { %19666 = vmatpush3.bf16.msra.mxu0 %v20151_v16  ;;  %19681 = vmatprep.mubr.msk.bf16.mxu0 %vm21002_vm0, %v21001_v1 }
 0x6ac   :  { %19667 = vmatprep.subr.bf16.mxu0 %v21001_v1 }
 0x6af   :  { %19668 = vmatpush3.bf16.msra.mxu0 %v20152_v12 }
 0x6b0   :  { %19669 = vmatprep.subr.bf16.mxu0 %v21001_v1 }
 0x6b3   :  { %19670 = vmatpush3.bf16.msra.mxu0 %v20153_v34  ;;  %v20195_v34 = vld [vmem:[#allocation12 + $0x138] ss:$12 sps:$4 sm:$0xff]  }
 0x6b4   :  { %19671 = vmatprep.subr.bf16.mxu0 %v21001_v1 }
 0x6b7   :  { %19672 = vmatpush3.bf16.msra.mxu0 %v20154_v9  ;;  %v20201_v9 = vld [vmem:[#allocation12 + $0x124] ss:$12 sps:$4 sm:$0xff]  }
 0x6b8   :  { %19673 = vmatprep.subr.bf16.mxu0 %v21001_v1 }
 0x6bb   :  { %19674 = vmatpush3.bf16.msra.mxu0 %v20158_v45  ;;  %v20198_v45 = vld [vmem:[#allocation12 + $0xe0] ss:$12 sps:$4 sm:$0xff]  }
 0x6bc   :  { %19675 = vmatprep.subr.bf16.mxu0 %v21001_v1 }
 0x6bf   :  { %19676 = vmatpush3.bf16.msra.mxu0 %v20162_v36 }
 0x6c0   :  { %19677 = vmatprep.subr.bf16.mxu0 %v21001_v1 }
 0x6c3   :  { %19678 = vmatpush3.bf16.msra.mxu0 %v20166_v39  ;;  %v20199_v39 = vld [vmem:[#allocation12 + $0x120] ss:$12 sps:$4 sm:$0xff]  }
 0x6c4   :  { %19679 = vmatprep.subr.bf16.mxu0 %v21001_v1 }
 0x6c7   :  { %19680 = vmatpush3.bf16.msra.mxu0 %v20170_v61 }
 0x6c8   :  { %19685 = vmatprep.subr.bf16.mxu0 %v21001_v1 }
 0x6ff   :  { %v6257_v40 = vpop.xlane.xlu0 %6256 }
 0x700   :  { %20789 = vrcp.f32 %v6257_v40  ;;  %v20205_v40 = vld [vmem:[#allocation12 + $0x10c] ss:$12 sps:$4 sm:$0xff]  }
 0x70d   :  { %v20790_v48 = vpop.eup %20789 }
 0x70e   :  { %v6275_v41 = vmul.f32 %v20790_v48, %v21589_v57  ;;  %v20202_v48 = vld [vmem:[#allocation12 + $0xc8] ss:$12 sps:$4 sm:$0xff]  }
 0x710   :  { %v6283_v30 = vpack.c.bf16 %v6275_v41, %v6275_v41 }
 0x712   :  { %19656 = vmatmul.mubr.msk.bf16.vlgmr.msra.gmra.mxu1 %vm367_vm1, %v6283_v30 }
 0x713   :  { %7047 = vmatpush1.bf16.msra.mxu1 %v20155_v27  ;;  %7078 = vmatprep.mubr.bf16.mxu1 %v21003_v32  ;;  %v20203_v27 = vld [vmem:[#allocation12 + $0x108] ss:$12 sps:$4 sm:$0xff]  }
 0x714   :  { %7048 = vmatprep.subr.bf16.mxu1 %v20161_v5  ;;  %v20209_v5 = vld [vmem:[#allocation12 + $0xf4] ss:$12 sps:$4 sm:$0xff]  }
 0x717   :  { %7049 = vmatpush1.bf16.msra.mxu1 %v20159_v49  ;;  %v20206_v49 = vld [vmem:[#allocation12 + $0x230] ss:$12 sps:$4 sm:$0xff]  }
 0x718   :  { %7050 = vmatprep.subr.bf16.mxu1 %v20165_v51 }
 0x71b   :  { %7051 = vmatpush1.bf16.msra.mxu1 %v20163_v7  ;;  %v20207_v7 = vld [vmem:[#allocation12 + $0xf0] ss:$12 sps:$4 sm:$0xff]  }
 0x71c   :  { %7052 = vmatprep.subr.bf16.mxu1 %v20169_v13  ;;  %v20213_v13 = vld [vmem:[#allocation12 + $0xdc] ss:$12 sps:$4 sm:$0xff]  }
 0x71f   :  { %7053 = vmatpush1.bf16.msra.mxu1 %v20167_v6  ;;  %v20210_v6 = vld [vmem:[#allocation12 + $0x218] ss:$12 sps:$4 sm:$0xff]  }
 0x720   :  { %7054 = vmatprep.subr.bf16.mxu1 %v20173_v58  ;;  %v20211_v58 = vld [vmem:[#allocation12 + $0xd8] ss:$12 sps:$4 sm:$0xff]  }
 0x721   :  { %v6326_v28 = vpop.f32.mrf.mxu1 }
 0x722   :  { %v6910_v4 = vpack.c.bf16 %v6326_v28, %v6326_v28  ;;  %v20215_v28 = vld [vmem:[#allocation12 + $0xc0] ss:$12 sps:$4 sm:$0xff]  }
 0x723   :  { %7055 = vmatpush1.bf16.msra.mxu1 %v20171_v31  ;;  %v19621_v57 = vpop.f32.mrf.mxu1  ;;  %v20217_v31 = vld [vmem:[#allocation12 + $0xc4] ss:$12 sps:$4 sm:$0xff]  }
 0x724   :  { %19682 = vmatmul.mubr.bf16.vlgmr.msra.gmra.mxu0 %v6910_v4  ;;  %7056 = vmatprep.subr.bf16.mxu1 %v20177_v59  ;;  %v20214_v59 = vld [vmem:[#allocation12 + $0x200] ss:$12 sps:$4 sm:$0xff]   ;;  %v20219_v57 = vld [vmem:[#allocation12 + $0x228] ss:$12 sps:$4 sm:$0xff]  }
 0x725   :  { %19686 = vmatpush3.bf16.msra.mxu0 %v20174_v55  ;;  %v6329_v23 = vpop.f32.mrf.mxu1  ;;  %19701 = vmatprep.mubr.msk.bf16.mxu0 %vm21002_vm0, %v21001_v1  ;;  %v20221_v55 = vld [vmem:[#allocation12 + $0x22c] ss:$12 sps:$4 sm:$0xff]  }
 0x726   :  { %19687 = vmatprep.subr.bf16.mxu0 %v21001_v1  ;;  %v20223_v23 = vld [vmem:[#allocation12 + $0x210] ss:$12 sps:$4 sm:$0xff]  }
 0x727   :  { %7057 = vmatpush1.bf16.msra.mxu1 %v20175_v54  ;;  %v19622_v60 = vpop.f32.mrf.mxu1  ;;  %v20225_v54 = vld [vmem:[#allocation12 + $0x214] ss:$12 sps:$4 sm:$0xff]  }
 0x728   :  { %7058 = vmatprep.subr.bf16.mxu1 %v20181_v8  ;;  %v20222_v8 = vld [vmem:[#allocation12 + $0x1d0] ss:$12 sps:$4 sm:$0xff]   ;;  %v20226_v60 = vld [vmem:[#allocation12 + $0x1b8] ss:$12 sps:$4 sm:$0xff]  }
 0x729   :  { %19688 = vmatpush3.bf16.msra.mxu0 %v20178_v17  ;;  %v6372_v3 = vpop.f32.mrf.mxu0  ;;  %v20229_v17 = vld [vmem:[#allocation12 + $0x1fc] ss:$12 sps:$4 sm:$0xff]  }
 0x72a   :  { %19689 = vmatprep.subr.bf16.mxu0 %v21001_v1  ;;  %v6911_v51 = vpack.c.bf16 %v6372_v3, %v6372_v3  ;;  %v20230_v3 = vld [vmem:[#allocation12 + $0x1a0] ss:$12 sps:$4 sm:$0xff]  }
 0x72b   :  { %7059 = vmatpush1.bf16.msra.mxu1 %v20179_v44  ;;  %v19627_v35 = vpop.f32.mrf.mxu0  ;;  %v20227_v44 = vld [vmem:[#allocation12 + $0x1f8] ss:$12 sps:$4 sm:$0xff]  }
 0x72c   :  { %7060 = vmatprep.subr.bf16.mxu1 %v20185_v33  ;;  %v20233_v33 = vld [vmem:[#allocation12 + $0x1e4] ss:$12 sps:$4 sm:$0xff]   ;;  %v20237_v35 = vld [vmem:[#allocation12 + $0x1cc] ss:$12 sps:$4 sm:$0xff]  }
 0x72d   :  { %19690 = vmatpush3.bf16.msra.mxu0 %v20182_v62  ;;  %v6375_v24 = vpop.f32.mrf.mxu0  ;;  %v20231_v62 = vld [vmem:[#allocation12 + $0x1e0] ss:$12 sps:$4 sm:$0xff]  }
 0x72e   :  { %19691 = vmatprep.subr.bf16.mxu0 %v21001_v1  ;;  %v20235_v24 = vld [vmem:[#allocation12 + $0x1c8] ss:$12 sps:$4 sm:$0xff]  }
 0x72f   :  { %7061 = vmatpush1.bf16.msra.mxu1 %v20183_v11  ;;  %v19628_v19 = vpop.f32.mrf.mxu0  ;;  %v20234_v11 = vld [vmem:[#allocation12 + $0x188] ss:$12 sps:$4 sm:$0xff]  }
 0x730   :  { %7255 = vmatprep.subr.bf16.mxu1 %v20189_v10  ;;  %v20241_v19 = vld [vmem:[#allocation12 + $0x1b4] ss:$12 sps:$4 sm:$0xff]  }
 0x731   :  { %19692 = vmatpush3.bf16.msra.mxu0 %v20186_v29  ;;  %v21636_v25 = vpop.f32.mrf.mxu1 }
 0x732   :  { %7079 = vmatmul.mubr.bf16.vlgmr.msra.gmra.mxu1 %v6910_v4  ;;  %19693 = vmatprep.subr.bf16.mxu0 %v21001_v1  ;;  %v20218_v4 = vld [vmem:[#allocation12 + $0x1e8] ss:$12 sps:$4 sm:$0xff]  }
 0x733   :  { %7256 = vmatpush1.bf16.msra.mxu1 %v20187_v18  ;;  %v19633_v22 = vpop.f32.mrf.mxu1  ;;  %7287 = vmatprep.mubr.bf16.mxu1 %v21003_v32  ;;  %v20238_v18 = vld [vmem:[#allocation12 + $0x2f0] ss:$12 sps:$4 sm:$0xff]  }
 0x734   :  { %7257 = vmatprep.subr.bf16.mxu1 %v20193_v21  ;;  %v6912_v21 = vpack.c.bf16 %v21636_v25, %v21636_v25  ;;  %v20243_v25 = vld [vmem:[#allocation12 + $0x198] ss:$12 sps:$4 sm:$0xff]  }
 0x735   :  { %19694 = vmatpush3.bf16.msra.mxu0 %v20190_v26  ;;  %v6421_v16 = vpop.f32.mrf.mxu1 }
 0x736   :  { %19695 = vmatprep.subr.bf16.mxu0 %v21001_v1 }
 0x737   :  { %7258 = vmatpush1.bf16.msra.mxu1 %v20191_v15  ;;  %v19634_v12 = vpop.f32.mrf.mxu1  ;;  %v20239_v15 = vld [vmem:[#allocation12 + $0x1b0] ss:$12 sps:$4 sm:$0xff]  }
 0x738   :  { %7259 = vmatprep.subr.bf16.mxu1 %v20197_v0  ;;  %v20242_v12 = vld [vmem:[#allocation12 + $0x2d8] ss:$12 sps:$4 sm:$0xff]  }
 0x739   :  { %19696 = vmatpush3.bf16.msra.mxu0 %v20194_v63  ;;  %v20245_v63 = vld [vmem:[#allocation12 + $0x19c] ss:$12 sps:$4 sm:$0xff]  }
 0x73a   :  { %v21641_v36 = vpop.f32.mrf.mxu0  ;;  %19697 = vmatprep.subr.bf16.mxu0 %v21001_v1 }
 0x73b   :  { %7260 = vmatpush1.bf16.msra.mxu1 %v20195_v34 }
 0x73c   :  { %v19639_v61 = vpop.f32.mrf.mxu0  ;;  %7261 = vmatprep.subr.bf16.mxu1 %v20201_v9 }
 0x73d   :  { %19698 = vmatpush3.bf16.msra.mxu0 %v20198_v45  ;;  %v20249_v45 = vld [vmem:[#allocation12 + $0x184] ss:$12 sps:$4 sm:$0xff]  }
 0x73e   :  { %v6467_v41 = vpop.f32.mrf.mxu0  ;;  %19699 = vmatprep.subr.bf16.mxu0 %v21001_v1 }
 0x73f   :  { %7262 = vmatpush1.bf16.msra.mxu1 %v20199_v39  ;;  %v20246_v39 = vld [vmem:[#allocation12 + $0x2c0] ss:$12 sps:$4 sm:$0xff]  }
 0x740   :  { %v19640_v30 = vpop.f32.mrf.mxu0  ;;  %7263 = vmatprep.subr.bf16.mxu1 %v20205_v40  ;;  %v20247_v40 = vld [vmem:[#allocation12 + $0x180] ss:$12 sps:$4 sm:$0xff]  }
 0x741   :  { %19700 = vmatpush3.bf16.msra.mxu0 %v20202_v48  ;;  %v20253_v41 = vld [vmem:[#allocation12 + $0x2ec] ss:$12 sps:$4 sm:$0xff]  }
 0x742   :  { %19705 = vmatprep.subr.bf16.mxu0 %v21001_v1 }
 0x743   :  { %7264 = vmatpush1.bf16.msra.mxu1 %v20203_v27  ;;  %v20250_v27 = vld [vmem:[#allocation12 + $0x2a8] ss:$12 sps:$4 sm:$0xff]  }
 0x744   :  { %19702 = vmatmul.mubr.bf16.vlgmr.msra.gmra.mxu0 %v6911_v51  ;;  %7265 = vmatprep.subr.bf16.mxu1 %v20209_v5  ;;  %v20251_v5 = vld [vmem:[#allocation12 + $0x2e8] ss:$12 sps:$4 sm:$0xff]  }
 0x745   :  { %19706 = vmatpush3.bf16.msra.mxu0 %v20206_v49  ;;  %19721 = vmatprep.mubr.msk.bf16.mxu0 %vm21002_vm0, %v21001_v1 }
 0x746   :  { %19707 = vmatprep.subr.bf16.mxu0 %v21001_v1 }
 0x747   :  { %7266 = vmatpush1.bf16.msra.mxu1 %v20207_v7  ;;  %v20254_v7 = vld [vmem:[#allocation12 + $0x290] ss:$12 sps:$4 sm:$0xff]  }
 0x748   :  { %7267 = vmatprep.subr.bf16.mxu1 %v20213_v13  ;;  %v20255_v13 = vld [vmem:[#allocation12 + $0x2d0] ss:$12 sps:$4 sm:$0xff]  }
 0x749   :  { %19708 = vmatpush3.bf16.msra.mxu0 %v20210_v6  ;;  %v20261_v6 = vld [vmem:[#allocation12 + $0x2bc] ss:$12 sps:$4 sm:$0xff]  }
 0x74a   :  { %19709 = vmatprep.subr.bf16.mxu0 %v21001_v1 }
 0x74b   :  { %7268 = vmatpush1.bf16.msra.mxu1 %v20211_v58  ;;  %v20258_v58 = vld [vmem:[#allocation12 + $0x278] ss:$12 sps:$4 sm:$0xff]  }
 0x74c   :  { %7269 = vmatprep.subr.bf16.mxu1 %v20217_v31  ;;  %v20259_v31 = vld [vmem:[#allocation12 + $0x2b8] ss:$12 sps:$4 sm:$0xff]  }
 0x74d   :  { %19710 = vmatpush3.bf16.msra.mxu0 %v20214_v59  ;;  %v20265_v59 = vld [vmem:[#allocation12 + $0x2a4] ss:$12 sps:$4 sm:$0xff]  }
 0x74e   :  { %19711 = vmatprep.subr.bf16.mxu0 %v21001_v1 }
 0x74f   :  { %7270 = vmatpush1.bf16.msra.mxu1 %v20215_v28  ;;  %v20262_v28 = vld [vmem:[#allocation12 + $0x260] ss:$12 sps:$4 sm:$0xff]  }
 0x750   :  { %7464 = vmatprep.subr.bf16.mxu1 %v20221_v55  ;;  %v20263_v55 = vld [vmem:[#allocation12 + $0x2a0] ss:$12 sps:$4 sm:$0xff]  }
 0x751   :  { %19712 = vmatpush3.bf16.msra.mxu0 %v20218_v4  ;;  %v20269_v4 = vld [vmem:[#allocation12 + $0x28c] ss:$12 sps:$4 sm:$0xff]  }
 0x752   :  { %7288 = vmatmul.mubr.bf16.vlgmr.msra.gmra.mxu1 %v6911_v51  ;;  %19713 = vmatprep.subr.bf16.mxu0 %v21001_v1  ;;  %v20257_v51 = vld [vmem:[#allocation12 + $0x2d4] ss:$12 sps:$4 sm:$0xff]  }
 0x753   :  { %7465 = vmatpush1.bf16.msra.mxu1 %v20219_v57  ;;  %7496 = vmatprep.mubr.bf16.mxu1 %v21003_v32  ;;  %v20266_v57 = vld [vmem:[#allocation12 + $0x248] ss:$12 sps:$4 sm:$0xff]  }
 0x754   :  { %7466 = vmatprep.subr.bf16.mxu1 %v20225_v54  ;;  %v20267_v54 = vld [vmem:[#allocation12 + $0x288] ss:$12 sps:$4 sm:$0xff]  }
 0x755   :  { %19714 = vmatpush3.bf16.msra.mxu0 %v20222_v8  ;;  %v20273_v8 = vld [vmem:[#allocation12 + $0x274] ss:$12 sps:$4 sm:$0xff]  }
 0x756   :  { %19715 = vmatprep.subr.bf16.mxu0 %v21001_v1 }
 0x757   :  { %7467 = vmatpush1.bf16.msra.mxu1 %v20223_v23  ;;  %v20270_v23 = vld [vmem:[#allocation12 + $0x3b0] ss:$12 sps:$4 sm:$0xff]  }
 0x758   :  { %7468 = vmatprep.subr.bf16.mxu1 %v20229_v17  ;;  %v6913_v17 = vpack.c.bf16 %v21641_v36, %v21641_v36  ;;  %v20278_v36 = vld [vmem:[#allocation12 + $0x380] ss:$12 sps:$4 sm:$0xff]  }
 0x759   :  { %19716 = vmatpush3.bf16.msra.mxu0 %v20226_v60  ;;  %v20271_v60 = vld [vmem:[#allocation12 + $0x270] ss:$12 sps:$4 sm:$0xff]  }
 0x75a   :  { %19717 = vmatprep.subr.bf16.mxu0 %v21001_v1 }
 0x75b   :  { %7469 = vmatpush1.bf16.msra.mxu1 %v20227_v44  ;;  %v20277_v44 = vld [vmem:[#allocation12 + $0x25c] ss:$12 sps:$4 sm:$0xff]  }
 0x75c   :  { %7470 = vmatprep.subr.bf16.mxu1 %v20233_v33  ;;  %v20274_v33 = vld [vmem:[#allocation12 + $0x398] ss:$12 sps:$4 sm:$0xff]  }
 0x75d   :  { %19718 = vmatpush3.bf16.msra.mxu0 %v20230_v3  ;;  %v20275_v3 = vld [vmem:[#allocation12 + $0x258] ss:$12 sps:$4 sm:$0xff]  }
 0x75e   :  { %v21655_v10 = vpop.f32.mrf.mxu1  ;;  %19719 = vmatprep.subr.bf16.mxu0 %v21001_v1 }
 0x75f   :  { %7471 = vmatpush1.bf16.msra.mxu1 %v20231_v62  ;;  %v20281_v62 = vld [vmem:[#allocation12 + $0x244] ss:$12 sps:$4 sm:$0xff]  }
 0x760   :  { %v19645_v29 = vpop.f32.mrf.mxu1  ;;  %7472 = vmatprep.subr.bf16.mxu1 %v20237_v35  ;;  %v20279_v35 = vld [vmem:[#allocation12 + $0x240] ss:$12 sps:$4 sm:$0xff]  }
 0x761   :  { %19720 = vmatpush3.bf16.msra.mxu0 %v20234_v11  ;;  %v20285_v11 = vld [vmem:[#allocation12 + $0x3ac] ss:$12 sps:$4 sm:$0xff]   ;;  %v20283_v29 = vld [vmem:[#allocation12 + $0x3a8] ss:$12 sps:$4 sm:$0xff]  }
 0x762   :  { %v6513_v26 = vpop.f32.mrf.mxu1  ;;  %v21660_v22 = vpop.f32.mrf.mxu0  ;;  %19725 = vmatprep.subr.bf16.mxu0 %v21001_v1 }
 0x763   :  { %7473 = vmatpush1.bf16.msra.mxu1 %v20235_v24  ;;  %v20282_v24 = vld [vmem:[#allocation12 + $0x368] ss:$12 sps:$4 sm:$0xff]  }
 0x764   :  { %19722 = vmatmul.mubr.bf16.vlgmr.msra.gmra.mxu0 %v6912_v21  ;;  %v19646_v0 = vpop.f32.mrf.mxu1  ;;  %v19651_v16 = vpop.f32.mrf.mxu0  ;;  %7474 = vmatprep.subr.bf16.mxu1 %v20241_v19  ;;  %v20289_v19 = vld [vmem:[#allocation12 + $0x394] ss:$12 sps:$4 sm:$0xff]   ;;  %v20293_v26 = vld [vmem:[#allocation12 + $0x37c] ss:$12 sps:$4 sm:$0xff]  }
 0x765   :  { %19726 = vmatpush3.bf16.msra.mxu0 %v20238_v18  ;;  %19741 = vmatprep.mubr.msk.bf16.mxu0 %vm21002_vm0, %v21001_v1  ;;  %v20286_v18 = vld [vmem:[#allocation12 + $0x350] ss:$12 sps:$4 sm:$0xff]   ;;  %v20291_v0 = vld [vmem:[#allocation12 + $0x378] ss:$12 sps:$4 sm:$0xff]  }
 0x766   :  { %v6559_v34 = vpop.f32.mrf.mxu0  ;;  %19727 = vmatprep.subr.bf16.mxu0 %v21001_v1  ;;  %v20297_v16 = vld [vmem:[#allocation12 + $0x364] ss:$12 sps:$4 sm:$0xff]  }
 0x767   :  { %7475 = vmatpush1.bf16.msra.mxu1 %v20239_v15  ;;  %v20290_v15 = vld [vmem:[#allocation12 + $0x338] ss:$12 sps:$4 sm:$0xff]  }
 0x768   :  { %v19652_v9 = vpop.f32.mrf.mxu0  ;;  %7476 = vmatprep.subr.bf16.mxu1 %v20245_v63  ;;  %v20294_v63 = vld [vmem:[#allocation12 + $0x320] ss:$12 sps:$4 sm:$0xff]  }
 0x769   :  { %19728 = vmatpush3.bf16.msra.mxu0 %v20242_v12  ;;  %v20295_v12 = vld [vmem:[#allocation12 + $0x360] ss:$12 sps:$4 sm:$0xff]   ;;  %v20299_v9 = vld [vmem:[#allocation12 + $0x348] ss:$12 sps:$4 sm:$0xff]  }
 0x76a   :  { %v21666_v61 = vpop.f32.mrf.mxu0  ;;  %19729 = vmatprep.subr.bf16.mxu0 %v21001_v1  ;;  %v20301_v34 = vld [vmem:[#allocation12 + $0x34c] ss:$12 sps:$4 sm:$0xff]  }
 0x76b   :  { %7477 = vmatpush1.bf16.msra.mxu1 %v20243_v25  ;;  %v20298_v25 = vld [vmem:[#allocation12 + $0x308] ss:$12 sps:$4 sm:$0xff]  }
 0x76c   :  { %v19663_v48 = vpop.f32.mrf.mxu0  ;;  %7478 = vmatprep.subr.bf16.mxu1 %v20249_v45  ;;  %v20305_v45 = vld [vmem:[#allocation12 + $0x334] ss:$12 sps:$4 sm:$0xff]  }
 0x76d   :  { %19730 = vmatpush3.bf16.msra.mxu0 %v20246_v39  ;;  %v20302_v39 = vld [vmem:[#allocation12 + $0x470] ss:$12 sps:$4 sm:$0xff]  }
 0x76e   :  { %v6651_v30 = vpop.f32.mrf.mxu0  ;;  %19731 = vmatprep.subr.bf16.mxu0 %v21001_v1  ;;  %v20303_v48 = vld [vmem:[#allocation12 + $0x330] ss:$12 sps:$4 sm:$0xff]  }
 0x76f   :  { %7479 = vmatpush1.bf16.msra.mxu1 %v20247_v40  ;;  %v6914_v40 = vpack.c.bf16 %v21655_v10, %v21655_v10  ;;  %v20307_v30 = vld [vmem:[#allocation12 + $0x318] ss:$12 sps:$4 sm:$0xff]   ;;  %v20310_v10 = vld [vmem:[#allocation12 + $0x440] ss:$12 sps:$4 sm:$0xff]  }
 0x770   :  { %v19664_v49 = vpop.f32.mrf.mxu0  ;;  %7673 = vmatprep.subr.bf16.mxu1 %v20253_v41  ;;  %v20309_v41 = vld [vmem:[#allocation12 + $0x31c] ss:$12 sps:$4 sm:$0xff]  }
 0x771   :  { %19732 = vmatpush3.bf16.msra.mxu0 %v20250_v27  ;;  %v20306_v27 = vld [vmem:[#allocation12 + $0x458] ss:$12 sps:$4 sm:$0xff]   ;;  %v20311_v49 = vld [vmem:[#allocation12 + $0x300] ss:$12 sps:$4 sm:$0xff]  }
 0x772   :  { %7497 = vmatmul.mubr.bf16.vlgmr.msra.gmra.mxu1 %v6912_v21  ;;  %19733 = vmatprep.subr.bf16.mxu0 %v21001_v1  ;;  %v20287_v21 = vld [vmem:[#allocation12 + $0x390] ss:$12 sps:$4 sm:$0xff]  }
 0x773   :  { %7674 = vmatpush1.bf16.msra.mxu1 %v20251_v5  ;;  %7705 = vmatprep.mubr.bf16.mxu1 %v21003_v32  ;;  %v20313_v5 = vld [vmem:[#allocation12 + $0x304] ss:$12 sps:$4 sm:$0xff]  }
 0x774   :  { %7675 = vmatprep.subr.bf16.mxu1 %v20257_v51  ;;  %v20317_v51 = vld [vmem:[#allocation12 + $0x46c] ss:$12 sps:$4 sm:$0xff]  }
 0x775   :  { %19734 = vmatpush3.bf16.msra.mxu0 %v20254_v7  ;;  %v20314_v7 = vld [vmem:[#allocation12 + $0x428] ss:$12 sps:$4 sm:$0xff]  }
 0x776   :  { %19735 = vmatprep.subr.bf16.mxu0 %v21001_v1 }
 0x777   :  { %7676 = vmatpush1.bf16.msra.mxu1 %v20255_v13  ;;  %v20315_v13 = vld [vmem:[#allocation12 + $0x468] ss:$12 sps:$4 sm:$0xff]  }
 0x778   :  { %7677 = vmatprep.subr.bf16.mxu1 %v20261_v6  ;;  %v20321_v6 = vld [vmem:[#allocation12 + $0x454] ss:$12 sps:$4 sm:$0xff]  }
 0x779   :  { %19736 = vmatpush3.bf16.msra.mxu0 %v20258_v58  ;;  %v20318_v58 = vld [vmem:[#allocation12 + $0x410] ss:$12 sps:$4 sm:$0xff]  }
 0x77a   :  { %19737 = vmatprep.subr.bf16.mxu0 %v21001_v1 }
 0x77b   :  { %7678 = vmatpush1.bf16.msra.mxu1 %v20259_v31  ;;  %v20319_v31 = vld [vmem:[#allocation12 + $0x450] ss:$12 sps:$4 sm:$0xff]  }
 0x77c   :  { %7679 = vmatprep.subr.bf16.mxu1 %v20265_v59  ;;  %v20325_v59 = vld [vmem:[#allocation12 + $0x43c] ss:$12 sps:$4 sm:$0xff]  }
 0x77d   :  { %19738 = vmatpush3.bf16.msra.mxu0 %v20262_v28  ;;  %v20322_v28 = vld [vmem:[#allocation12 + $0x3f8] ss:$12 sps:$4 sm:$0xff]  }
 0x77e   :  { %19739 = vmatprep.subr.bf16.mxu0 %v21001_v1 }
 0x77f   :  { %7680 = vmatpush1.bf16.msra.mxu1 %v20263_v55  ;;  %v20323_v55 = vld [vmem:[#allocation12 + $0x438] ss:$12 sps:$4 sm:$0xff]  }
 0x780   :  { %7681 = vmatprep.subr.bf16.mxu1 %v20269_v4  ;;  %v20329_v4 = vld [vmem:[#allocation12 + $0x424] ss:$12 sps:$4 sm:$0xff]  }
 0x781   :  { %19740 = vmatpush3.bf16.msra.mxu0 %v20266_v57  ;;  %v20326_v57 = vld [vmem:[#allocation12 + $0x3e0] ss:$12 sps:$4 sm:$0xff]  }
 0x782   :  { %19745 = vmatprep.subr.bf16.mxu0 %v21001_v1 }
 0x783   :  { %7682 = vmatpush1.bf16.msra.mxu1 %v20267_v54  ;;  %v20327_v54 = vld [vmem:[#allocation12 + $0x420] ss:$12 sps:$4 sm:$0xff]  }
 0x784   :  { %19742 = vmatmul.mubr.bf16.vlgmr.msra.gmra.mxu0 %v6913_v17  ;;  %7683 = vmatprep.subr.bf16.mxu1 %v20273_v8  ;;  %v20333_v8 = vld [vmem:[#allocation12 + $0x40c] ss:$12 sps:$4 sm:$0xff]  }
 0x785   :  { %19746 = vmatpush3.bf16.msra.mxu0 %v20270_v23  ;;  %19761 = vmatprep.mubr.msk.bf16.mxu0 %vm21002_vm0, %v21001_v1  ;;  %v20330_v23 = vld [vmem:[#allocation12 + $0x3c8] ss:$12 sps:$4 sm:$0xff]  }
 0x786   :  { %19747 = vmatprep.subr.bf16.mxu0 %v21001_v1 }
 0x787   :  { %7684 = vmatpush1.bf16.msra.mxu1 %v20271_v60  ;;  %v20337_v60 = vld [vmem:[#allocation12 + $0x3f4] ss:$12 sps:$4 sm:$0xff]  }
 0x788   :  { %7685 = vmatprep.subr.bf16.mxu1 %v20277_v44  ;;  %v20334_v44 = vld [vmem:[#allocation12 + $0x530] ss:$12 sps:$4 sm:$0xff]  }
 0x789   :  { %19748 = vmatpush3.bf16.msra.mxu0 %v20274_v33  ;;  %v6915_v33 = vpack.c.bf16 %v21660_v22, %v21660_v22  ;;  %v20342_v22 = vld [vmem:[#allocation12 + $0x500] ss:$12 sps:$4 sm:$0xff]  }
 0x78a   :  { %19749 = vmatprep.subr.bf16.mxu0 %v21001_v1 }
 0x78b   :  { %7686 = vmatpush1.bf16.msra.mxu1 %v20275_v3  ;;  %v20335_v3 = vld [vmem:[#allocation12 + $0x3f0] ss:$12 sps:$4 sm:$0xff]  }
 0x78c   :  { %7687 = vmatprep.subr.bf16.mxu1 %v20281_v62  ;;  %v20341_v62 = vld [vmem:[#allocation12 + $0x3dc] ss:$12 sps:$4 sm:$0xff]  }
 0x78d   :  { %19750 = vmatpush3.bf16.msra.mxu0 %v20278_v36  ;;  %v20338_v36 = vld [vmem:[#allocation12 + $0x518] ss:$12 sps:$4 sm:$0xff]  }
 0x78e   :  { %19751 = vmatprep.subr.bf16.mxu0 %v21001_v1 }
 0x78f   :  { %7688 = vmatpush1.bf16.msra.mxu1 %v20279_v35  ;;  %v20339_v35 = vld [vmem:[#allocation12 + $0x3d8] ss:$12 sps:$4 sm:$0xff]  }
 0x790   :  { %7882 = vmatprep.subr.bf16.mxu1 %v20285_v11  ;;  %v20345_v11 = vld [vmem:[#allocation12 + $0x3c4] ss:$12 sps:$4 sm:$0xff]  }
 0x791   :  { %19752 = vmatpush3.bf16.msra.mxu0 %v20282_v24  ;;  %v20343_v24 = vld [vmem:[#allocation12 + $0x3c0] ss:$12 sps:$4 sm:$0xff]  }
 0x792   :  { %7706 = vmatmul.mubr.bf16.vlgmr.msra.gmra.mxu1 %v6913_v17  ;;  %19753 = vmatprep.subr.bf16.mxu0 %v21001_v1  ;;  %v20331_v17 = vld [vmem:[#allocation12 + $0x408] ss:$12 sps:$4 sm:$0xff]  }
 0x793   :  { %7883 = vmatpush1.bf16.msra.mxu1 %v20283_v29  ;;  %7914 = vmatprep.mubr.bf16.mxu1 %v21003_v32  ;;  %v20349_v29 = vld [vmem:[#allocation12 + $0x52c] ss:$12 sps:$4 sm:$0xff]  }
 0x794   :  { %7884 = vmatprep.subr.bf16.mxu1 %v20289_v19  ;;  %v20346_v19 = vld [vmem:[#allocation12 + $0x4e8] ss:$12 sps:$4 sm:$0xff]  }
 0x795   :  { %19754 = vmatpush3.bf16.msra.mxu0 %v20286_v18  ;;  %v20347_v18 = vld [vmem:[#allocation12 + $0x528] ss:$12 sps:$4 sm:$0xff]  }
 0x796   :  { %19755 = vmatprep.subr.bf16.mxu0 %v21001_v1 }
 0x797   :  { %7885 = vmatpush1.bf16.msra.mxu1 %v20287_v21  ;;  %v20353_v21 = vld [vmem:[#allocation12 + $0x514] ss:$12 sps:$4 sm:$0xff]  }
 0x798   :  { %7886 = vmatprep.subr.bf16.mxu1 %v20293_v26  ;;  %v20350_v26 = vld [vmem:[#allocation12 + $0x4d0] ss:$12 sps:$4 sm:$0xff]  }
 0x799   :  { %19756 = vmatpush3.bf16.msra.mxu0 %v20290_v15 }
 0x79a   :  { %19757 = vmatprep.subr.bf16.mxu0 %v21001_v1 }
 0x79b   :  { %7887 = vmatpush1.bf16.msra.mxu1 %v20291_v0  ;;  %v20351_v0 = vld [vmem:[#allocation12 + $0x510] ss:$12 sps:$4 sm:$0xff]  }
 0x79c   :  { %7888 = vmatprep.subr.bf16.mxu1 %v20297_v16 }
 0x79d   :  { %19758 = vmatpush3.bf16.msra.mxu0 %v20294_v63  ;;  %v20357_v63 = vld [vmem:[#allocation12 + $0x4fc] ss:$12 sps:$4 sm:$0xff]  }
 0x79e   :  { %19759 = vmatprep.subr.bf16.mxu0 %v21001_v1 }
 0x79f   :  { %7889 = vmatpush1.bf16.msra.mxu1 %v20295_v12  ;;  %v20354_v12 = vld [vmem:[#allocation12 + $0x4b8] ss:$12 sps:$4 sm:$0xff]  }
 0x7a0   :  { %7890 = vmatprep.subr.bf16.mxu1 %v20301_v34 }
 0x7a1   :  { %19760 = vmatpush3.bf16.msra.mxu0 %v20298_v25  ;;  %v20355_v25 = vld [vmem:[#allocation12 + $0x4f8] ss:$12 sps:$4 sm:$0xff]  }
 0x7a2   :  { %19765 = vmatprep.subr.bf16.mxu0 %v21001_v1 }
 0x7a3   :  { %7891 = vmatpush1.bf16.msra.mxu1 %v20299_v9 }
 0x7a4   :  { %19762 = vmatmul.mubr.bf16.vlgmr.msra.gmra.mxu0 %v6914_v40  ;;  %7892 = vmatprep.subr.bf16.mxu1 %v20305_v45  ;;  %v20361_v45 = vld [vmem:[#allocation12 + $0x4e4] ss:$12 sps:$4 sm:$0xff]  }
 0x7a5   :  { %19766 = vmatpush3.bf16.msra.mxu0 %v20302_v39  ;;  %19781 = vmatprep.mubr.msk.bf16.mxu0 %vm21002_vm0, %v21001_v1  ;;  %v20358_v39 = vld [vmem:[#allocation12 + $0x4a0] ss:$12 sps:$4 sm:$0xff]  }
 0x7a6   :  { %19767 = vmatprep.subr.bf16.mxu0 %v21001_v1 }
 0x7a7   :  { %7893 = vmatpush1.bf16.msra.mxu1 %v20303_v48  ;;  %v20365_v48 = vld [vmem:[#allocation12 + $0x4cc] ss:$12 sps:$4 sm:$0xff]  }
 0x7a8   :  { %7894 = vmatprep.subr.bf16.mxu1 %v20309_v41  ;;  %v20362_v41 = vld [vmem:[#allocation12 + $0x488] ss:$12 sps:$4 sm:$0xff]  }
 0x7a9   :  { %19768 = vmatpush3.bf16.msra.mxu0 %v20306_v27  ;;  %v20363_v27 = vld [vmem:[#allocation12 + $0x4c8] ss:$12 sps:$4 sm:$0xff]  }
 0x7aa   :  { %19769 = vmatprep.subr.bf16.mxu0 %v21001_v1 }
 0x7ab   :  { %7895 = vmatpush1.bf16.msra.mxu1 %v20307_v30  ;;  %v20369_v30 = vld [vmem:[#allocation12 + $0x4b4] ss:$12 sps:$4 sm:$0xff]  }
 0x7ac   :  { %7896 = vmatprep.subr.bf16.mxu1 %v20313_v5  ;;  %v20366_v5 = vld [vmem:[#allocation12 + $0x5f0] ss:$12 sps:$4 sm:$0xff]  }
 0x7ad   :  { %19770 = vmatpush3.bf16.msra.mxu0 %v20310_v10 }
 0x7ae   :  { %19771 = vmatprep.subr.bf16.mxu0 %v21001_v1 }
 0x7af   :  { %7897 = vmatpush1.bf16.msra.mxu1 %v20311_v49  ;;  %v20367_v49 = vld [vmem:[#allocation12 + $0x4b0] ss:$12 sps:$4 sm:$0xff]  }
 0x7b0   :  { %8091 = vmatprep.subr.bf16.mxu1 %v20317_v51 }
 0x7b1   :  { %19772 = vmatpush3.bf16.msra.mxu0 %v20314_v7  ;;  %v20373_v7 = vld [vmem:[#allocation12 + $0x49c] ss:$12 sps:$4 sm:$0xff]  }
 0x7b2   :  { %7915 = vmatmul.mubr.bf16.vlgmr.msra.gmra.mxu1 %v6914_v40  ;;  %19773 = vmatprep.subr.bf16.mxu0 %v21001_v1  ;;  %v20359_v40 = vld [vmem:[#allocation12 + $0x4e0] ss:$12 sps:$4 sm:$0xff]  }
 0x7b3   :  { %8092 = vmatpush1.bf16.msra.mxu1 %v20315_v13  ;;  %8123 = vmatprep.mubr.bf16.mxu1 %v21003_v32  ;;  %v20370_v13 = vld [vmem:[#allocation12 + $0x5d8] ss:$12 sps:$4 sm:$0xff]  }
 0x7b4   :  { %8093 = vmatprep.subr.bf16.mxu1 %v20321_v6 }
 0x7b5   :  { %19774 = vmatpush3.bf16.msra.mxu0 %v20318_v58  ;;  %v20371_v58 = vld [vmem:[#allocation12 + $0x498] ss:$12 sps:$4 sm:$0xff]  }
 0x7b6   :  { %19775 = vmatprep.subr.bf16.mxu0 %v21001_v1 }
 0x7b7   :  { %8094 = vmatpush1.bf16.msra.mxu1 %v20319_v31 }
 0x7b8   :  { %8095 = vmatprep.subr.bf16.mxu1 %v20325_v59  ;;  %v20377_v59 = vld [vmem:[#allocation12 + $0x484] ss:$12 sps:$4 sm:$0xff]  }
 0x7b9   :  { %19776 = vmatpush3.bf16.msra.mxu0 %v20322_v28  ;;  %v20374_v28 = vld [vmem:[#allocation12 + $0x5c0] ss:$12 sps:$4 sm:$0xff]  }
 0x7ba   :  { %19777 = vmatprep.subr.bf16.mxu0 %v21001_v1 }
 0x7bb   :  { %8096 = vmatpush1.bf16.msra.mxu1 %v20323_v55 }
 0x7bc   :  { %8097 = vmatprep.subr.bf16.mxu1 %v20329_v4  ;;  %v20375_v4 = vld [vmem:[#allocation12 + $0x480] ss:$12 sps:$4 sm:$0xff]  }
 0x7bd   :  { %19778 = vmatpush3.bf16.msra.mxu0 %v20326_v57  ;;  %v20381_v57 = vld [vmem:[#allocation12 + $0x5ec] ss:$12 sps:$4 sm:$0xff]  }
 0x7be   :  { %19779 = vmatprep.subr.bf16.mxu0 %v21001_v1 }
 0x7bf   :  { %8098 = vmatpush1.bf16.msra.mxu1 %v20327_v54  ;;  %v20378_v54 = vld [vmem:[#allocation12 + $0x5a8] ss:$12 sps:$4 sm:$0xff]  }
 0x7c0   :  { %8099 = vmatprep.subr.bf16.mxu1 %v20333_v8  ;;  %v20379_v8 = vld [vmem:[#allocation12 + $0x5e8] ss:$12 sps:$4 sm:$0xff]  }
 0x7c1   :  { %19780 = vmatpush3.bf16.msra.mxu0 %v20330_v23  ;;  %v20385_v23 = vld [vmem:[#allocation12 + $0x5d4] ss:$12 sps:$4 sm:$0xff]  }
 0x7c2   :  { %19785 = vmatprep.subr.bf16.mxu0 %v21001_v1 }
 0x7c3   :  { %8100 = vmatpush1.bf16.msra.mxu1 %v20331_v17  ;;  %v20382_v17 = vld [vmem:[#allocation12 + $0x590] ss:$12 sps:$4 sm:$0xff]  }
 0x7c4   :  { %19782 = vmatmul.mubr.bf16.vlgmr.msra.gmra.mxu0 %v6915_v33  ;;  %8101 = vmatprep.subr.bf16.mxu1 %v20337_v60 }
 0x7c5   :  { %19786 = vmatpush3.bf16.msra.mxu0 %v20334_v44  ;;  %19801 = vmatprep.mubr.msk.bf16.mxu0 %vm21002_vm0, %v21001_v1  ;;  %v20383_v44 = vld [vmem:[#allocation12 + $0x5d0] ss:$12 sps:$4 sm:$0xff]  }
 0x7c6   :  { %19787 = vmatprep.subr.bf16.mxu0 %v21001_v1 }
 0x7c7   :  { %8102 = vmatpush1.bf16.msra.mxu1 %v20335_v3  ;;  %v20389_v3 = vld [vmem:[#allocation12 + $0x5bc] ss:$12 sps:$4 sm:$0xff]  }
 0x7c8   :  { %8103 = vmatprep.subr.bf16.mxu1 %v20341_v62  ;;  %v20386_v62 = vld [vmem:[#allocation12 + $0x578] ss:$12 sps:$4 sm:$0xff]  }
 0x7c9   :  { %19788 = vmatpush3.bf16.msra.mxu0 %v20338_v36 }
 0x7ca   :  { %19789 = vmatprep.subr.bf16.mxu0 %v21001_v1 }
 0x7cb   :  { %8104 = vmatpush1.bf16.msra.mxu1 %v20339_v35  ;;  %v20387_v35 = vld [vmem:[#allocation12 + $0x5b8] ss:$12 sps:$4 sm:$0xff]  }
 0x7cc   :  { %8105 = vmatprep.subr.bf16.mxu1 %v20345_v11 }
 0x7cd   :  { %19790 = vmatpush3.bf16.msra.mxu0 %v20342_v22  ;;  %v20393_v22 = vld [vmem:[#allocation12 + $0x5a4] ss:$12 sps:$4 sm:$0xff]  }
 0x7ce   :  { %19791 = vmatprep.subr.bf16.mxu0 %v21001_v1 }
 0x7cf   :  { %8106 = vmatpush1.bf16.msra.mxu1 %v20343_v24  ;;  %v20390_v24 = vld [vmem:[#allocation12 + $0x560] ss:$12 sps:$4 sm:$0xff]  }
 0x7d0   :  { %8300 = vmatprep.subr.bf16.mxu1 %v20349_v29  ;;  %v20391_v29 = vld [vmem:[#allocation12 + $0x5a0] ss:$12 sps:$4 sm:$0xff]  }
 0x7d1   :  { %19792 = vmatpush3.bf16.msra.mxu0 %v20346_v19  ;;  %v20397_v19 = vld [vmem:[#allocation12 + $0x58c] ss:$12 sps:$4 sm:$0xff]  }
 0x7d2   :  { %8124 = vmatmul.mubr.bf16.vlgmr.msra.gmra.mxu1 %v6915_v33  ;;  %v6602_v15 = vpop.f32.mrf.mxu1  ;;  %19793 = vmatprep.subr.bf16.mxu0 %v21001_v1 }
 0x7d3   :  { %8301 = vmatpush1.bf16.msra.mxu1 %v20347_v18  ;;  %8332 = vmatprep.mubr.bf16.mxu1 %v21003_v32  ;;  %v6916_v10 = vpack.c.bf16 %v6602_v15, %v6602_v15  ;;  %v20394_v18 = vld [vmem:[#allocation12 + $0x548] ss:$12 sps:$4 sm:$0xff]   ;;  %v6917_v15 = vpack.c.bf16 %v21666_v61, %v21666_v61 }
 0x7d4   :  { %v19657_v16 = vpop.f32.mrf.mxu1  ;;  %8302 = vmatprep.subr.bf16.mxu1 %v20353_v21  ;;  %v20395_v21 = vld [vmem:[#allocation12 + $0x588] ss:$12 sps:$4 sm:$0xff]  }
 0x7d5   :  { %19794 = vmatpush3.bf16.msra.mxu0 %v20350_v26  ;;  %v20400_v26 = vld [vmem:[#allocation12 + $0x574] ss:$12 sps:$4 sm:$0xff]  }
 0x7d6   :  { %v6605_v34 = vpop.f32.mrf.mxu1  ;;  %19795 = vmatprep.subr.bf16.mxu0 %v21001_v1 }
 0x7d7   :  { %8303 = vmatpush1.bf16.msra.mxu1 %v20351_v0  ;;  %v20398_v0 = vld [vmem:[#allocation12 + $0x570] ss:$12 sps:$4 sm:$0xff]  }
 0x7d8   :  { %v19658_v9 = vpop.f32.mrf.mxu1  ;;  %8304 = vmatprep.subr.bf16.mxu1 %v20357_v63  ;;  %v20403_v63 = vld [vmem:[#allocation12 + $0x55c] ss:$12 sps:$4 sm:$0xff]  }
 0x7d9   :  { %19796 = vmatpush3.bf16.msra.mxu0 %v20354_v12 }
 0x7da   :  { %19797 = vmatprep.subr.bf16.mxu0 %v21001_v1 }
 0x7db   :  { %8305 = vmatpush1.bf16.msra.mxu1 %v20355_v25  ;;  %v20401_v25 = vld [vmem:[#allocation12 + $0x558] ss:$12 sps:$4 sm:$0xff]  }
 0x7dc   :  { %8306 = vmatprep.subr.bf16.mxu1 %v20361_v45  ;;  %v20406_v45 = vld [vmem:[#allocation12 + $0x544] ss:$12 sps:$4 sm:$0xff]  }
 0x7dd   :  { %19798 = vmatpush3.bf16.msra.mxu0 %v20358_v39 }
 0x7de   :  { %19799 = vmatprep.subr.bf16.mxu0 %v21001_v1 }
 0x7df   :  { %8307 = vmatpush1.bf16.msra.mxu1 %v20359_v40  ;;  %v20404_v40 = vld [vmem:[#allocation12 + $0x540] ss:$12 sps:$4 sm:$0xff]  }
 0x7e0   :  { %8308 = vmatprep.subr.bf16.mxu1 %v20365_v48 }
 0x7e1   :  { %19800 = vmatpush3.bf16.msra.mxu0 %v20362_v41 }
 0x7e2   :  { %19805 = vmatprep.subr.bf16.mxu0 %v21001_v1 }
 0x7e3   :  { %8309 = vmatpush1.bf16.msra.mxu1 %v20363_v27 }
 0x7e4   :  { %19802 = vmatmul.mubr.bf16.vlgmr.msra.gmra.mxu0 %v6916_v10  ;;  %v21715_v51 = vpop.f32.mrf.mxu0  ;;  %8310 = vmatprep.subr.bf16.mxu1 %v20369_v30 }
 0x7e5   :  { %19806 = vmatpush3.bf16.msra.mxu0 %v20366_v5  ;;  %19821 = vmatprep.mubr.msk.bf16.mxu0 %vm21002_vm0, %v21001_v1 }
 0x7e6   :  { %v19683_v6 = vpop.f32.mrf.mxu0  ;;  %19807 = vmatprep.subr.bf16.mxu0 %v21001_v1 }
 0x7e7   :  { %8311 = vmatpush1.bf16.msra.mxu1 %v20367_v49  ;;  %v8818_v49 = vld [vmem:[#allocation10 + $0x17a0] sm:$0xff] }
 0x7e8   :  { %v7124_v31 = vpop.f32.mrf.mxu0  ;;  %8312 = vmatprep.subr.bf16.mxu1 %v20373_v7  ;;  %v8794_v6 = vld [vmem:[#allocation10 + $0x16e0] sm:$0xff] }
 0x7e9   :  { %19808 = vmatpush3.bf16.msra.mxu0 %v20370_v13 }
 0x7ea   :  { %v19684_v55 = vpop.f32.mrf.mxu0  ;;  %19809 = vmatprep.subr.bf16.mxu0 %v21001_v1 }
 0x7eb   :  { %8313 = vmatpush1.bf16.msra.mxu1 %v20371_v58 }
 0x7ec   :  { %8314 = vmatprep.subr.bf16.mxu1 %v20377_v59  ;;  %v8758_v59 = vld [vmem:[#allocation10 + $0x15c0] sm:$0xff] }
 0x7ed   :  { %19810 = vmatpush3.bf16.msra.mxu0 %v20374_v28  ;;  %v8770_v28 = vld [vmem:[#allocation10 + $0x1620] sm:$0xff] }
 0x7ee   :  { %19811 = vmatprep.subr.bf16.mxu0 %v21001_v1 }
 0x7ef   :  { %8315 = vmatpush1.bf16.msra.mxu1 %v20375_v4  ;;  %v18519_v4 = vcombine.high %v8758_v59, %v8770_v28 }
 0x7f0   :  { %8509 = vmatprep.subr.bf16.mxu1 %v20381_v57 }
 0x7f1   :  { %19812 = vmatpush3.bf16.msra.mxu0 %v20378_v54  ;;  %v18518_v54 = vcombine.low %v8758_v59, %v8770_v28 }
 0x7f2   :  { %v7080_v60 = vpop.f32.mrf.mxu1  ;;  %8333 = vmatmul.mubr.bf16.vlgmr.msra.gmra.mxu1 %v6916_v10  ;;  %19813 = vmatprep.subr.bf16.mxu0 %v21001_v1  ;;  %v8806_v10 = vld [vmem:[#allocation10 + $0x1740] sm:$0xff] }
 0x7f3   :  { %8510 = vmatpush1.bf16.msra.mxu1 %v20379_v8  ;;  %8541 = vmatprep.mubr.bf16.mxu1 %v21003_v32  ;;  %v18566_v7 = vcombine.low %v8806_v10, %v8818_v49  ;;  %v18567_v13 = vcombine.high %v8806_v10, %v8818_v49 }
 0x7f4   :  { %v7082_v33 = vpop.f32.mrf.mxu1  ;;  %8511 = vmatprep.subr.bf16.mxu1 %v20385_v23  ;;  %v8734_v23 = vld [vmem:[#allocation10 + $0x1500] sm:$0xff] }
 0x7f5   :  { %19814 = vmatpush3.bf16.msra.mxu0 %v20382_v17  ;;  %v8746_v17 = vld [vmem:[#allocation10 + $0x1560] sm:$0xff] }
 0x7f6   :  { %v7084_v36 = vpop.f32.mrf.mxu1  ;;  %19815 = vmatprep.subr.bf16.mxu0 %v21001_v1 }
 0x7f7   :  { %8512 = vmatpush1.bf16.msra.mxu1 %v20383_v44  ;;  %v18494_v44 = vcombine.low %v8734_v23, %v8746_v17  ;;  %v9202_v36 = vld [vmem:[#allocation10 + $0x23a0] sm:$0xff] }
 0x7f8   :  { %v7085_v11 = vpop.f32.mrf.mxu1  ;;  %8513 = vmatprep.subr.bf16.mxu1 %v20389_v3 }
 0x7f9   :  { %19816 = vmatpush3.bf16.msra.mxu0 %v20386_v62  ;;  %v9190_v62 = vld [vmem:[#allocation10 + $0x2340] sm:$0xff] }
 0x7fa   :  { %19817 = vmatprep.subr.bf16.mxu0 %v21001_v1  ;;  %v18950_v11 = vcombine.low %v9190_v62, %v9202_v36 }
 0x7fb   :  { %8514 = vmatpush1.bf16.msra.mxu1 %v20387_v35  ;;  %v8710_v35 = vld [vmem:[#allocation10 + $0x1440] sm:$0xff] }
 0x7fc   :  { %8515 = vmatprep.subr.bf16.mxu1 %v20393_v22  ;;  %v18951_v22 = vcombine.high %v9190_v62, %v9202_v36  ;;  %v8986_v62 = vld [vmem:[#allocation10 + $0x1ce0] sm:$0xff] }
 0x7fd   :  { %19818 = vmatpush3.bf16.msra.mxu0 %v20390_v24  ;;  %v8722_v24 = vld [vmem:[#allocation10 + $0x14a0] sm:$0xff] }
 0x7fe   :  { %19819 = vmatprep.subr.bf16.mxu0 %v21001_v1 }
 0x7ff   :  { %8516 = vmatpush1.bf16.msra.mxu1 %v20391_v29  ;;  %v9166_v29 = vld [vmem:[#allocation10 + $0x2280] sm:$0xff] }
 0x800   :  { %8517 = vmatprep.subr.bf16.mxu1 %v20397_v19  ;;  %v9178_v19 = vld [vmem:[#allocation10 + $0x22e0] sm:$0xff] }
 0x801   :  { %19820 = vmatpush3.bf16.msra.mxu0 %v20394_v18  ;;  %v18470_v18 = vcombine.low %v8710_v35, %v8722_v24 }
 0x802   :  { %12261 = vmatprep.subr.bf16.mxu0 %v18951_v22 }
 0x803   :  { %8518 = vmatpush1.bf16.msra.mxu1 %v20395_v21  ;;  %v18471_v21 = vcombine.high %v8710_v35, %v8722_v24 }
 0x804   :  { %v7330_v16 = vpop.f32.mrf.mxu0  ;;  %19822 = vmatmul.mubr.bf16.vlgmr.msra.gmra.mxu0 %v6917_v15  ;;  %8519 = vmatprep.subr.bf16.mxu1 %v20400_v26  ;;  %v18927_v26 = vcombine.high %v9166_v29, %v9178_v19 }
 0x805   :  { %v8604_v12 = vadd.f32 %v7330_v16, %v21715_v51  ;;  %12293 = vmatprep.mubr.bf16.mxu0 %v21003_v32  ;;  %v8782_v51 = vld [vmem:[#allocation10 + $0x1680] sm:$0xff]  ;;  %12262 = vmatpush1.bf16.msra.mxu0 %v18950_v11 }
 0x806   :  { %v19703_v34 = vpop.f32.mrf.mxu0  ;;  %v18543_v58 = vcombine.high %v8782_v51, %v8794_v6  ;;  %v18542_v31 = vcombine.low %v8782_v51, %v8794_v6  ;;  %12263 = vmatprep.subr.bf16.mxu0 %v18927_v26  ;;  %v8638_v6 = vld [vmem:[#allocation10 + $0x1200] sm:$0xff] }
 0x807   :  { %8520 = vmatpush1.bf16.msra.mxu1 %v20398_v0  ;;  %v8698_v0 = vld [vmem:[#allocation10 + $0x13e0] sm:$0xff] }
 0x808   :  { %v7333_v9 = vpop.f32.mrf.mxu0  ;;  %8521 = vmatprep.subr.bf16.mxu1 %v20403_v63  ;;  %v18926_v63 = vcombine.low %v9166_v29, %v9178_v19  ;;  %v9046_v29 = vld [vmem:[#allocation10 + $0x1ec0] sm:$0xff] }
 0x809   :  { %v9154_v9 = vld [vmem:[#allocation10 + $0x2220] sm:$0xff] }
 0x80a   :  { %v19704_v39 = vpop.f32.mrf.mxu0  ;;  %12264 = vmatpush1.bf16.msra.mxu0 %v18926_v63  ;;  %v9058_v19 = vld [vmem:[#allocation10 + $0x1f20] sm:$0xff] }
 0x80b   :  { %8522 = vmatpush1.bf16.msra.mxu1 %v20401_v25  ;;  %v9142_v25 = vld [vmem:[#allocation10 + $0x21c0] sm:$0xff] }
 0x80c   :  { %8523 = vmatprep.subr.bf16.mxu1 %v20406_v45  ;;  %v18903_v39 = vcombine.high %v9142_v25, %v9154_v9  ;;  %v8962_v26 = vld [vmem:[#allocation10 + $0x1c20] sm:$0xff] }
 0x80e   :  { %12265 = vmatprep.subr.bf16.mxu0 %v18903_v39 }
 0x80f   :  { %8524 = vmatpush1.bf16.msra.mxu1 %v20404_v40  ;;  %v8662_v40 = vld [vmem:[#allocation10 + $0x12c0] sm:$0xff] }
 0x810   :  { %12220 = vmatprep.subr.bf16.mxu1 %v18567_v13  ;;  %v9130_v13 = vld [vmem:[#allocation10 + $0x2160] sm:$0xff] }
 0x812   :  { %v7289_v61 = vpop.f32.mrf.mxu1  ;;  %8542 = vmatmul.mubr.bf16.vlgmr.msra.gmra.mxu1 %v6917_v15  ;;  %v8686_v15 = vld [vmem:[#allocation10 + $0x1380] sm:$0xff] }
 0x813   :  { %v8590_v48 = vadd.f32 %v7289_v61, %v7080_v60  ;;  %12221 = vmatpush1.bf16.msra.mxu1 %v18566_v7  ;;  %v18447_v16 = vcombine.high %v8686_v15, %v8698_v0  ;;  %v8674_v61 = vld [vmem:[#allocation10 + $0x1320] sm:$0xff] }
 0x814   :  { %v7291_v41 = vpop.f32.mrf.mxu1  ;;  %12222 = vmatprep.subr.bf16.mxu1 %v18543_v58  ;;  %v18422_v49 = vcombine.low %v8662_v40, %v8674_v61  ;;  %v9118_v7 = vld [vmem:[#allocation10 + $0x2100] sm:$0xff] }
 0x815   :  { %v21731_v27 = vadd.f32 %v7291_v41, %v7082_v33  ;;  %v18495_v33 = vcombine.high %v8734_v23, %v8746_v17  ;;  %v8650_v58 = vld [vmem:[#allocation10 + $0x1260] sm:$0xff]  ;;  %v18878_v59 = vcombine.low %v9118_v7, %v9130_v13 }
 0x816   :  { %v7293_v30 = vpop.f32.mrf.mxu1  ;;  %v18398_v28 = vcombine.low %v8638_v6, %v8650_v58  ;;  %v9010_v23 = vld [vmem:[#allocation10 + $0x1da0] sm:$0xff] }
 0x817   :  { %12223 = vmatpush1.bf16.msra.mxu1 %v18542_v31  ;;  %v18902_v30 = vcombine.low %v9142_v25, %v9154_v9  ;;  %v9070_v17 = vld [vmem:[#allocation10 + $0x1f80] sm:$0xff] }
 0x818   :  { %v7294_v5 = vpop.f32.mrf.mxu1  ;;  %12224 = vmatprep.subr.bf16.mxu1 %v18519_v4  ;;  %v9094_v4 = vld [vmem:[#allocation10 + $0x2040] sm:$0xff] }
 0x819   :  { %v18423_v5 = vcombine.high %v8662_v40, %v8674_v61  ;;  %12266 = vmatpush1.bf16.msra.mxu0 %v18902_v30  ;;  %v9022_v25 = vld [vmem:[#allocation10 + $0x1e00] sm:$0xff] }
 0x81a   :  { %v9034_v9 = vld [vmem:[#allocation10 + $0x1e60] sm:$0xff] }
 0x81b   :  { %12225 = vmatpush1.bf16.msra.mxu1 %v18518_v54  ;;  %v9106_v54 = vld [vmem:[#allocation10 + $0x20a0] sm:$0xff]  ;;  %v18783_v39 = vcombine.high %v9022_v25, %v9034_v9  ;;  %v18782_v30 = vcombine.low %v9022_v25, %v9034_v9 }
 0x81c   :  { %12226 = vmatprep.subr.bf16.mxu1 %v18495_v33  ;;  %v8926_v40 = vld [vmem:[#allocation10 + $0x1b00] sm:$0xff] }
 0x81d   :  { %v8938_v61 = vld [vmem:[#allocation10 + $0x1b60] sm:$0xff] }
 0x81f   :  { %12227 = vmatpush1.bf16.msra.mxu1 %v18494_v44  ;;  %v18854_v44 = vcombine.low %v9094_v4, %v9106_v54 }
 0x820   :  { %12228 = vmatprep.subr.bf16.mxu1 %v18471_v21  ;;  %v8950_v21 = vld [vmem:[#allocation10 + $0x1bc0] sm:$0xff] }
 0x823   :  { %12229 = vmatpush1.bf16.msra.mxu1 %v18470_v18  ;;  %v18807_v18 = vcombine.high %v9046_v29, %v9058_v19 }
 0x824   :  { %v7539_v55 = vpop.f32.mrf.mxu0  ;;  %12230 = vmatprep.subr.bf16.mxu1 %v18447_v16  ;;  %v18711_v16 = vcombine.high %v8950_v21, %v8962_v26 }
 0x825   :  { %v21733_v57 = vadd.f32 %v8604_v12, %v7539_v55  ;;  %v18446_v12 = vcombine.low %v8686_v15, %v8698_v0  ;;  %v18399_v55 = vcombine.high %v8638_v6, %v8650_v58  ;;  %v18806_v0 = vcombine.low %v9046_v29, %v9058_v19  ;;  %v8902_v6 = vld [vmem:[#allocation10 + $0x1a40] sm:$0xff]  ;;  %v21751_v29 = vld [vmem:[#allocation10 + $0x2348] sm:$0xff] }
 0x826   :  { %v19723_v8 = vpop.f32.mrf.mxu0  ;;  %v8914_v58 = vld [vmem:[#allocation10 + $0x1aa0] sm:$0xff] }
 0x827   :  { %12231 = vmatpush1.bf16.msra.mxu1 %v18446_v12  ;;  %v8998_v8 = vld [vmem:[#allocation10 + $0x1d40] sm:$0xff]  ;;  %v18710_v12 = vcombine.low %v8950_v21, %v8962_v26 }
 0x828   :  { %v7542_v60 = vpop.f32.mrf.mxu0  ;;  %12232 = vmatprep.subr.bf16.mxu1 %v18423_v5  ;;  %v18759_v33 = vcombine.high %v8998_v8, %v9010_v23  ;;  %v18758_v36 = vcombine.low %v8998_v8, %v9010_v23  ;;  %v18687_v5 = vcombine.high %v8926_v40, %v8938_v61  ;;  %v8854_v23 = vld [vmem:[#allocation10 + $0x18c0] sm:$0xff] }
 0x829   :  { %v9082_v60 = vld [vmem:[#allocation10 + $0x1fe0] sm:$0xff] }
 0x82a   :  { %v19724_v3 = vpop.f32.mrf.mxu0  ;;  %v18831_v35 = vcombine.high %v9070_v17, %v9082_v60  ;;  %v18830_v22 = vcombine.low %v9070_v17, %v9082_v60  ;;  %v8866_v17 = vld [vmem:[#allocation10 + $0x1920] sm:$0xff] }
 0x82b   :  { %12233 = vmatpush1.bf16.msra.mxu1 %v18422_v49  ;;  %v8974_v3 = vld [vmem:[#allocation10 + $0x1c80] sm:$0xff]  ;;  %v18686_v49 = vcombine.low %v8926_v40, %v8938_v61 }
 0x82c   :  { %12234 = vmatprep.subr.bf16.mxu1 %v18399_v55  ;;  %v18735_v11 = vcombine.high %v8974_v3, %v8986_v62  ;;  %v18734_v24 = vcombine.low %v8974_v3, %v8986_v62  ;;  %v8890_v55 = vld [vmem:[#allocation10 + $0x19e0] sm:$0xff]  ;;  %v18614_v3 = vcombine.low %v8854_v23, %v8866_v17 }
 0x82f   :  { %12235 = vmatpush1.bf16.msra.mxu1 %v18398_v28  ;;  %v8878_v28 = vld [vmem:[#allocation10 + $0x1980] sm:$0xff] }
 0x830   :  { %12236 = vmatprep.subr.bf16.mxu1 %v18759_v33 }
 0x832   :  { %v7498_v34 = vpop.f32.mrf.mxu1 }
 0x833   :  { %v21735_v45 = vadd.f32 %v8590_v48, %v7498_v34  ;;  %v18879_v48 = vcombine.high %v9118_v7, %v9130_v13  ;;  %12237 = vmatpush2.bf16.msra.mxu1 %v18758_v36  ;;  %v21743_v7 = vld [vmem:[#allocation10 + $0x17a8] sm:$0xff]  ;;  %v8830_v36 = vld [vmem:[#allocation10 + $0x1800] sm:$0xff] }
 0x834   :  { %v7500_v41 = vpop.f32.mrf.mxu1  ;;  %12238 = vmatprep.subr.bf16.mxu1 %v18735_v11 }
 0x835   :  { %v21738_v10 = vadd.f32 %v21731_v27, %v7500_v41  ;;  %12267 = vmatprep.subr.bf16.mxu0 %v18879_v48  ;;  %v18855_v27 = vcombine.high %v9094_v4, %v9106_v54  ;;  %v18638_v4 = vcombine.low %v8878_v28, %v8890_v55  ;;  %v18639_v54 = vcombine.high %v8878_v28, %v8890_v55 }
 0x836   :  { %v7502_v51 = vpop.f32.mrf.mxu1  ;;  %12268 = vmatpush1.bf16.msra.mxu0 %v18878_v59  ;;  %v18663_v59 = vcombine.high %v8902_v6, %v8914_v58 }
 0x837   :  { %12269 = vmatprep.subr.bf16.mxu0 %v18855_v27  ;;  %12239 = vmatpush2.bf16.msra.mxu1 %v18734_v24 }
 0x838   :  { %v7503_v31 = vpop.f32.mrf.mxu1  ;;  %12240 = vmatprep.subr.bf16.mxu1 %v18711_v16 }
 0x839   :  { %v18662_v31 = vcombine.low %v8902_v6, %v8914_v58 }
 0x83a   :  { %12270 = vmatpush1.bf16.msra.mxu0 %v18854_v44  ;;  %v18615_v44 = vcombine.high %v8854_v23, %v8866_v17 }
 0x83b   :  { %12271 = vmatprep.subr.bf16.mxu0 %v18831_v35  ;;  %12241 = vmatpush2.bf16.msra.mxu1 %v18710_v12  ;;  %v8842_v35 = vld [vmem:[#allocation10 + $0x1860] sm:$0xff] }
 0x83c   :  { %12242 = vmatprep.subr.bf16.mxu1 %v18687_v5  ;;  %v18590_v24 = vcombine.low %v8830_v36, %v8842_v35 }
 0x83e   :  { %12272 = vmatpush1.bf16.msra.mxu0 %v18830_v22  ;;  %v18591_v22 = vcombine.high %v8830_v36, %v8842_v35  ;;  %v8795_v36 = vld [vmem:[#allocation10 + $0x16e8] sm:$0xff] }
 0x83f   :  { %12273 = vmatprep.subr.bf16.mxu0 %v18807_v18  ;;  %12243 = vmatpush2.bf16.msra.mxu1 %v18686_v49 }
 0x840   :  { %12244 = vmatprep.subr.bf16.mxu1 %v18663_v59 }
 0x842   :  { %12274 = vmatpush1.bf16.msra.mxu0 %v18806_v0 }
 0x843   :  { %12275 = vmatprep.subr.bf16.mxu0 %v18783_v39  ;;  %12245 = vmatpush2.bf16.msra.mxu1 %v18662_v31 }
 0x844   :  { %v7748_v15 = vpop.f32.mrf.mxu0  ;;  %12246 = vmatprep.subr.bf16.mxu1 %v18639_v54  ;;  %v8611_v54 = vld [vmem:[#allocation13 + $0x30] sm:$0x7] }
 0x845   :  { %v8606_v63 = vadd.f32 %v21733_v57, %v7748_v15  ;;  %v21741_v57 = vld [vmem:[#allocation10 + $0x1748] sm:$0xff]  ;;  %v8624_v23 = vrot.slane %v8611_v54, %v21192_v38 }
 0x846   :  { %v19743_v34 = vpop.f32.mrf.mxu0  ;;  %12276 = vmatpush1.bf16.msra.mxu0 %v18782_v30  ;;  %v18568_v13 = vcombine.low %v21741_v57, %v21743_v7  ;;  %v18569_v48 = vcombine.high %v21741_v57, %v21743_v7 }
 0x847   :  { %12247 = vmatpush2.bf16.msra.mxu1 %v18638_v4 }
 0x848   :  { %v7751_v41 = vpop.f32.mrf.mxu0  ;;  %12302 = vmatprep.subr.bf16.mxu0 %v18569_v48  ;;  %12248 = vmatprep.subr.bf16.mxu1 %v18615_v44 }
 0x84a   :  { %v19744_v51 = vpop.f32.mrf.mxu0 }
 0x84b   :  { %12249 = vmatpush2.bf16.msra.mxu1 %v18614_v3 }
 0x84c   :  { %12250 = vmatprep.subr.bf16.mxu1 %v18591_v22 }
 0x84f   :  { %12251 = vmatpush2.bf16.msra.mxu1 %v18590_v24 }
 0x852   :  { %v7707_v8 = vpop.f32.mrf.mxu1 }
 0x853   :  { %v8592_v27 = vadd.f32 %v21735_v45, %v7707_v8  ;;  %v21753_v45 = vld [vmem:[#allocation10 + $0x23a8] sm:$0xff] }
 0x854   :  { %v7709_v60 = vpop.f32.mrf.mxu1  ;;  %v18953_v19 = vcombine.high %v21751_v29, %v21753_v45 }
 0x855   :  { %v8599_v33 = vadd.f32 %v21738_v10, %v7709_v60  ;;  %v18952_v10 = vcombine.low %v21751_v29, %v21753_v45  ;;  %v8999_v45 = vld [vmem:[#allocation10 + $0x1d48] sm:$0xff] }
 0x856   :  { %v7711_v62 = vpop.f32.mrf.mxu1  ;;  %12343 = vmatprep.subr.bf16.mxu1 %v18953_v19  ;;  %v8759_v19 = vld [vmem:[#allocation10 + $0x15c8] sm:$0xff] }
 0x857   :  { %v8783_v62 = vld [vmem:[#allocation10 + $0x1688] sm:$0xff] }
 0x858   :  { %v7712_v11 = vpop.f32.mrf.mxu1  ;;  %v18545_v24 = vcombine.high %v8783_v62, %v8795_v36 }
 0x864   :  { %v7957_v18 = vpop.f32.mrf.mxu0 }
 0x865   :  { %v8607_v21 = vadd.f32 %v8606_v63, %v7957_v18  ;;  %v8771_v18 = vld [vmem:[#allocation10 + $0x1628] sm:$0xff] }
 0x866   :  { %v19763_v26 = vpop.f32.mrf.mxu0 }
 0x868   :  { %v7960_v15 = vpop.f32.mrf.mxu0 }
 0x869   :  { %v18521_v15 = vcombine.high %v8759_v19, %v8771_v18 }
 0x86a   :  { %v19764_v0 = vpop.f32.mrf.mxu0 }
 0x86b   :  { %v8747_v0 = vld [vmem:[#allocation10 + $0x1568] sm:$0xff] }
 0x872   :  { %v7916_v16 = vpop.f32.mrf.mxu1 }
 0x873   :  { %v8593_v12 = vadd.f32 %v8592_v27, %v7916_v16 }
 0x874   :  { %v7918_v34 = vpop.f32.mrf.mxu1 }
 0x875   :  { %v8600_v25 = vadd.f32 %v8599_v33, %v7918_v34 }
 0x876   :  { %v7920_v9 = vpop.f32.mrf.mxu1 }
 0x877   :  { %v8616_v9 = vrot.slane %v8611_v54, %v21166_v42 }
 0x878   :  { %v7921_v39 = vpop.f32.mrf.mxu1 }
 0x884   :  { %v8166_v40 = vpop.f32.mrf.mxu0 }
 0x885   :  { %v8608_v8 = vadd.f32 %v8607_v21, %v8166_v40  ;;  %v18544_v21 = vcombine.low %v8783_v62, %v8795_v36  ;;  %v18520_v40 = vcombine.low %v8759_v19, %v8771_v18  ;;  %v9119_v19 = vld [vmem:[#allocation10 + $0x2108] sm:$0xff] }
 0x886   :  { %v19783_v61 = vpop.f32.mrf.mxu0  ;;  %v9131_v18 = vld [vmem:[#allocation10 + $0x2168] sm:$0xff] }
 0x887   :  { %v18881_v29 = vcombine.high %v9119_v19, %v9131_v18 }
 0x888   :  { %v8169_v41 = vpop.f32.mrf.mxu0 }
 0x88a   :  { %v19784_v30 = vpop.f32.mrf.mxu0 }
 0x88b   :  { %v8620_v30 = vrot.slane %v8611_v54, %v21171_v47 }
 0x892   :  { %v8125_v5 = vpop.f32.mrf.mxu1 }
 0x893   :  { %v8594_v26 = vadd.f32 %v8593_v12, %v8125_v5  ;;  %v8723_v12 = vld [vmem:[#allocation10 + $0x14a8] sm:$0xff] }
 0x894   :  { %v8127_v49 = vpop.f32.mrf.mxu1 }
 0x895   :  { %v8601_v16 = vadd.f32 %v8600_v25, %v8127_v49 }
 0x896   :  { %v8129_v51 = vpop.f32.mrf.mxu1 }
 0x898   :  { %v8130_v48 = vpop.f32.mrf.mxu1 }
 0x8a4   :  { %v8375_v6 = vpop.f32.mrf.mxu0 }
 0x8a5   :  { %v8609_v27 = vadd.f32 %v8608_v8, %v8375_v6 }
 0x8a6   :  { %v19803_v58 = vpop.f32.mrf.mxu0 }
 0x8a8   :  { %v8378_v63 = vpop.f32.mrf.mxu0 }
 0x8aa   :  { %v19804_v31 = vpop.f32.mrf.mxu0 }
 0x8ab   :  { %v8687_v31 = vld [vmem:[#allocation10 + $0x1388] sm:$0xff] }
 0x8b2   :  { %v8334_v59 = vpop.f32.mrf.mxu1 }
 0x8b3   :  { %v8595_v34 = vadd.f32 %v8594_v26, %v8334_v59  ;;  %v8699_v59 = vld [vmem:[#allocation10 + $0x13e8] sm:$0xff] }
 0x8b4   :  { %v8336_v28 = vpop.f32.mrf.mxu1 }
 0x8b5   :  { %v8602_v61 = vadd.f32 %v8601_v16, %v8336_v28 }
 0x8b6   :  { %v8338_v55 = vpop.f32.mrf.mxu1 }
 0x8b7   :  { %v9167_v55 = vld [vmem:[#allocation10 + $0x2288] sm:$0xff] }
 0x8b8   :  { %v8339_v4 = vpop.f32.mrf.mxu1 }
 0x8b9   :  { %v9179_v4 = vld [vmem:[#allocation10 + $0x22e8] sm:$0xff] }
 0x8c4   :  { %v8584_v17 = vpop.f32.mrf.mxu0 }
 0x8c5   :  { %v8610_v60 = vadd.f32 %v8609_v27, %v8584_v17  ;;  %v18449_v27 = vcombine.high %v8687_v31, %v8699_v59  ;;  %v8663_v17 = vld [vmem:[#allocation10 + $0x12c8] sm:$0xff] }
 0x8c6   :  { %v19823_v44 = vpop.f32.mrf.mxu0 }
 0x8c7   :  { %v8630_v33 = vadd.f32 %v8624_v23, %v8610_v60  ;;  %v18929_v23 = vcombine.high %v9167_v55, %v9179_v4  ;;  %v8675_v60 = vld [vmem:[#allocation10 + $0x1328] sm:$0xff] }
 0x8c8   :  { %v8587_v3 = vpop.f32.mrf.mxu0  ;;  %v9155_v44 = vld [vmem:[#allocation10 + $0x2228] sm:$0xff]  ;;  %v18425_v62 = vcombine.high %v8663_v17, %v8675_v60 }
 0x8c9   :  { %v21761_v35 = vadd.f32 %v8630_v33, %v21128_v50  ;;  %v8735_v50 = vld [vmem:[#allocation10 + $0x1508] sm:$0xff]  ;;  %v18448_v33 = vcombine.low %v8687_v31, %v8699_v59  ;;  %v18928_v3 = vcombine.low %v9167_v55, %v9179_v4 }
 0x8ca   :  { %v19824_v11 = vpop.f32.mrf.mxu0  ;;  %v18497_v57 = vcombine.high %v8735_v50, %v8747_v0  ;;  %v18496_v25 = vcombine.low %v8735_v50, %v8747_v0  ;;  %v9095_v50 = vld [vmem:[#allocation10 + $0x2048] sm:$0xff] }
 0x8cb   :  { %v21765_v22 = vpack.c.bf16 %v21761_v35, %v21761_v35  ;;  %v8639_v11 = vld [vmem:[#allocation10 + $0x1208] sm:$0xff] }
 0x8cc   :  { %v9107_v0 = vld [vmem:[#allocation10 + $0x20a8] sm:$0xff] }
 0x8cd   :  { %12294 = vmatmul.mubr.bf16.vlgmr.msra.gmra.mxu0 %v21765_v22  ;;  %v8927_v59 = vld [vmem:[#allocation10 + $0x1b08] sm:$0xff] }
 0x8ce   :  { %12303 = vmatpush1.bf16.msra.mxu0 %v18568_v13  ;;  %v8711_v13 = vld [vmem:[#allocation10 + $0x1448] sm:$0xff] }
 0x8cf   :  { %12304 = vmatprep.subr.bf16.mxu0 %v18545_v24  ;;  %v18473_v6 = vcombine.high %v8711_v13, %v8723_v12  ;;  %v18472_v54 = vcombine.low %v8711_v13, %v8723_v12  ;;  %v8651_v24 = vld [vmem:[#allocation10 + $0x1268] sm:$0xff] }
 0x8d0   :  { %v18400_v16 = vcombine.low %v8639_v11, %v8651_v24  ;;  %v8939_v55 = vld [vmem:[#allocation10 + $0x1b68] sm:$0xff] }
 0x8d1   :  { %v9023_v4 = vld [vmem:[#allocation10 + $0x1e08] sm:$0xff] }
 0x8d2   :  { %12305 = vmatpush1.bf16.msra.mxu0 %v18544_v21  ;;  %v8543_v39 = vpop.f32.mrf.mxu1  ;;  %v18424_v21 = vcombine.low %v8663_v17, %v8675_v60  ;;  %v18689_v17 = vcombine.high %v8927_v59, %v8939_v55 }
 0x8d3   :  { %v8596_v41 = vadd.f32 %v8595_v34, %v8543_v39  ;;  %12306 = vmatprep.subr.bf16.mxu0 %v18521_v15  ;;  %v18401_v15 = vcombine.high %v8639_v11, %v8651_v24  ;;  %v18880_v34 = vcombine.low %v9119_v19, %v9131_v18  ;;  %v18857_v39 = vcombine.high %v9095_v50, %v9107_v0  ;;  %v8879_v19 = vld [vmem:[#allocation10 + $0x1988] sm:$0xff] }
 0x8d4   :  { %v8545_v7 = vpop.f32.mrf.mxu1  ;;  %v8891_v18 = vld [vmem:[#allocation10 + $0x19e8] sm:$0xff] }
 0x8d5   :  { %v8628_v5 = vadd.f32 %v8616_v9, %v8596_v41  ;;  %v8603_v51 = vadd.f32 %v8602_v61, %v8545_v7  ;;  %v8987_v61 = vld [vmem:[#allocation10 + $0x1ce8] sm:$0xff]  ;;  %v18856_v7 = vcombine.low %v9095_v50, %v9107_v0 }
 0x8d6   :  { %12307 = vmatpush1.bf16.msra.mxu0 %v18520_v40  ;;  %v8547_v48 = vpop.f32.mrf.mxu1  ;;  %v8975_v40 = vld [vmem:[#allocation10 + $0x1c88] sm:$0xff] }
 0x8d7   :  { %v8629_v49 = vadd.f32 %v8620_v30, %v8603_v51  ;;  %12308 = vmatprep.subr.bf16.mxu0 %v18497_v57  ;;  %v21774_v58 = vadd.f32 %v8628_v5, %v21130_v52  ;;  %v9071_v41 = vld [vmem:[#allocation10 + $0x1f88] sm:$0xff]  ;;  %v18737_v13 = vcombine.high %v8975_v40, %v8987_v61 }
 0x8d8   :  { %v8548_v63 = vpop.f32.mrf.mxu1  ;;  %v9083_v30 = vld [vmem:[#allocation10 + $0x1fe8] sm:$0xff] }
 0x8d9   :  { %v21777_v28 = vadd.f32 %v8629_v49, %v21132_v53  ;;  %v21785_v52 = vpack.c.bf16 %v21774_v58, %v21774_v58  ;;  %v9143_v53 = vld [vmem:[#allocation10 + $0x21c8] sm:$0xff]  ;;  %v18833_v12 = vcombine.high %v9071_v41, %v9083_v30  ;;  %v18736_v49 = vcombine.low %v8975_v40, %v8987_v61 }
 0x8da   :  { %12309 = vmatpush1.bf16.msra.mxu0 %v18496_v25  ;;  %v18905_v36 = vcombine.high %v9143_v53, %v9155_v44  ;;  %v18904_v26 = vcombine.low %v9143_v53, %v9155_v44  ;;  %v8951_v5 = vld [vmem:[#allocation10 + $0x1bc8] sm:$0xff] }
 0x8db   :  { %v21781_v8 = vpack.c.bf16 %v21777_v28, %v21777_v28  ;;  %12310 = vmatprep.subr.bf16.mxu0 %v18473_v6  ;;  %v8963_v51 = vld [vmem:[#allocation10 + $0x1c28] sm:$0xff]  ;;  %v18832_v6 = vcombine.low %v9071_v41, %v9083_v30 }
 0x8dc   :  { %v9047_v48 = vld [vmem:[#allocation10 + $0x1ec8] sm:$0xff]  ;;  %v18713_v63 = vcombine.high %v8951_v5, %v8963_v51 }
 0x8dd   :  { %12252 = vmatprep.mubr.bf16.mxu1 %v21781_v8  ;;  %12334 = vmatprep.mubr.bf16.mxu0 %v21781_v8  ;;  %v9059_v25 = vld [vmem:[#allocation10 + $0x1f28] sm:$0xff] }
 0x8de   :  { %12311 = vmatpush1.bf16.msra.mxu0 %v18472_v54  ;;  %12253 = vmatmul.mubr.bf16.vlgmr.msra.gmra.mxu1 %v21785_v52  ;;  %v18809_v31 = vcombine.high %v9047_v48, %v9059_v25  ;;  %v9035_v54 = vld [vmem:[#allocation10 + $0x1e68] sm:$0xff] }
 0x8df   :  { %12344 = vmatpush1.bf16.msra.mxu1 %v18952_v10  ;;  %12312 = vmatprep.subr.bf16.mxu0 %v18449_v27  ;;  %v9011_v10 = vld [vmem:[#allocation10 + $0x1da8] sm:$0xff]  ;;  %v18712_v27 = vcombine.low %v8951_v5, %v8963_v51  ;;  %v18785_v60 = vcombine.high %v9023_v4, %v9035_v54 }
 0x8e0   :  { %12345 = vmatprep.subr.bf16.mxu1 %v18929_v23  ;;  %12375 = vmatprep.mubr.bf16.mxu1 %v21003_v32  ;;  %v18761_v9 = vcombine.high %v8999_v45, %v9011_v10  ;;  %v18760_v57 = vcombine.low %v8999_v45, %v9011_v10  ;;  %v18808_v23 = vcombine.low %v9047_v48, %v9059_v25  ;;  %v8903_v53 = vld [vmem:[#allocation10 + $0x1a48] sm:$0xff]  ;;  %v9192_v48 = vld [vmem:[#allocation10 + $0x2350] sm:$0xff] }
 0x8e1   :  { %v8915_v44 = vld [vmem:[#allocation10 + $0x1aa8] sm:$0xff]  ;;  %v18641_v45 = vcombine.high %v8879_v19, %v8891_v18  ;;  %v9204_v25 = vld [vmem:[#allocation10 + $0x23b0] sm:$0xff] }
 0x8e2   :  { %12313 = vmatpush1.bf16.msra.mxu0 %v18448_v33  ;;  %v8808_v33 = vld [vmem:[#allocation10 + $0x1750] sm:$0xff]  ;;  %v18665_v11 = vcombine.high %v8903_v53, %v8915_v44  ;;  %v8855_v50 = vld [vmem:[#allocation10 + $0x18c8] sm:$0xff] }
 0x8e3   :  { %12346 = vmatpush1.bf16.msra.mxu1 %v18928_v3  ;;  %12314 = vmatprep.subr.bf16.mxu0 %v18425_v62  ;;  %v8820_v3 = vld [vmem:[#allocation10 + $0x17b0] sm:$0xff]  ;;  %v18688_v62 = vcombine.low %v8927_v59, %v8939_v55  ;;  %v8867_v0 = vld [vmem:[#allocation10 + $0x1928] sm:$0xff]  ;;  %v18955_v59 = vcombine.high %v9192_v48, %v9204_v25 }
 0x8e4   :  { %12347 = vmatprep.subr.bf16.mxu1 %v18905_v36  ;;  %v18784_v36 = vcombine.low %v9023_v4, %v9035_v54  ;;  %v18571_v24 = vcombine.high %v8808_v33, %v8820_v3  ;;  %v18617_v40 = vcombine.high %v8855_v50, %v8867_v0  ;;  %v8831_v41 = vld [vmem:[#allocation10 + $0x1808] sm:$0xff]  ;;  %v9168_v4 = vld [vmem:[#allocation10 + $0x2290] sm:$0xff] }
 0x8e5   :  { %v8843_v30 = vld [vmem:[#allocation10 + $0x1868] sm:$0xff]  ;;  %v9180_v54 = vld [vmem:[#allocation10 + $0x22f0] sm:$0xff] }
 0x8e6   :  { %12315 = vmatpush1.bf16.msra.mxu0 %v18424_v21  ;;  %v8784_v21 = vld [vmem:[#allocation10 + $0x1690] sm:$0xff]  ;;  %v18593_v5 = vcombine.high %v8831_v41, %v8843_v30 }
 0x8e7   :  { %12348 = vmatpush1.bf16.msra.mxu1 %v18904_v26  ;;  %12316 = vmatprep.subr.bf16.mxu0 %v18401_v15  ;;  %v8796_v26 = vld [vmem:[#allocation10 + $0x16f0] sm:$0xff]  ;;  %v18664_v15 = vcombine.low %v8903_v53, %v8915_v44  ;;  %v18931_v53 = vcombine.high %v9168_v4, %v9180_v54 }
 0x8e8   :  { %12349 = vmatprep.subr.bf16.mxu1 %v18881_v29  ;;  %v18570_v29 = vcombine.low %v8808_v33, %v8820_v3  ;;  %v18547_v10 = vcombine.high %v8784_v21, %v8796_v26  ;;  %v9144_v33 = vld [vmem:[#allocation10 + $0x21d0] sm:$0xff] }
 0x8e9   :  { %v9156_v3 = vld [vmem:[#allocation10 + $0x2230] sm:$0xff] }
 0x8ea   :  { %12317 = vmatpush1.bf16.msra.mxu0 %v18400_v16  ;;  %v8760_v16 = vld [vmem:[#allocation10 + $0x15d0] sm:$0xff] }
 0x8eb   :  { %12350 = vmatpush1.bf16.msra.mxu1 %v18880_v34  ;;  %12318 = vmatprep.subr.bf16.mxu0 %v18761_v9  ;;  %v8772_v34 = vld [vmem:[#allocation10 + $0x1630] sm:$0xff]  ;;  %v18640_v9 = vcombine.low %v8879_v19, %v8891_v18  ;;  %v18907_v19 = vcombine.high %v9144_v33, %v9156_v3 }
 0x8ec   :  { %12351 = vmatprep.subr.bf16.mxu1 %v18857_v39  ;;  %v18546_v39 = vcombine.low %v8784_v21, %v8796_v26  ;;  %v18523_v61 = vcombine.high %v8760_v16, %v8772_v34  ;;  %v9120_v21 = vld [vmem:[#allocation10 + $0x2110] sm:$0xff] }
 0x8ed   :  { %v9132_v26 = vld [vmem:[#allocation10 + $0x2170] sm:$0xff] }
 0x8ee   :  { %12319 = vmatpush2.bf16.msra.mxu0 %v18760_v57  ;;  %v8736_v57 = vld [vmem:[#allocation10 + $0x1510] sm:$0xff] }
 0x8ef   :  { %12352 = vmatpush1.bf16.msra.mxu1 %v18856_v7  ;;  %12320 = vmatprep.subr.bf16.mxu0 %v18737_v13  ;;  %v8748_v7 = vld [vmem:[#allocation10 + $0x1570] sm:$0xff]  ;;  %v18616_v13 = vcombine.low %v8855_v50, %v8867_v0  ;;  %v18883_v50 = vcombine.high %v9120_v21, %v9132_v26 }
 0x8f0   :  { %12353 = vmatprep.subr.bf16.mxu1 %v18833_v12  ;;  %v18522_v12 = vcombine.low %v8760_v16, %v8772_v34  ;;  %v18499_v51 = vcombine.high %v8736_v57, %v8748_v7  ;;  %v9096_v16 = vld [vmem:[#allocation10 + $0x2050] sm:$0xff] }
 0x8f1   :  { %v9108_v34 = vld [vmem:[#allocation10 + $0x20b0] sm:$0xff] }
 0x8f2   :  { %12321 = vmatpush2.bf16.msra.mxu0 %v18736_v49  ;;  %v8712_v49 = vld [vmem:[#allocation10 + $0x1450] sm:$0xff] }
 0x8f3   :  { %12354 = vmatpush1.bf16.msra.mxu1 %v18832_v6  ;;  %12322 = vmatprep.subr.bf16.mxu0 %v18713_v63  ;;  %v8724_v6 = vld [vmem:[#allocation10 + $0x14b0] sm:$0xff]  ;;  %v18592_v63 = vcombine.low %v8831_v41, %v8843_v30  ;;  %v18859_v41 = vcombine.high %v9096_v16, %v9108_v34 }
 0x8f4   :  { %12355 = vmatprep.subr.bf16.mxu1 %v18809_v31  ;;  %v18498_v31 = vcombine.low %v8736_v57, %v8748_v7  ;;  %v18475_v55 = vcombine.high %v8712_v49, %v8724_v6  ;;  %v9072_v57 = vld [vmem:[#allocation10 + $0x1f90] sm:$0xff] }
 0x8f5   :  { %v9084_v7 = vld [vmem:[#allocation10 + $0x1ff0] sm:$0xff] }
 0x8f6   :  { %12323 = vmatpush2.bf16.msra.mxu0 %v18712_v27  ;;  %v8688_v27 = vld [vmem:[#allocation10 + $0x1390] sm:$0xff] }
 0x8f7   :  { %12356 = vmatpush1.bf16.msra.mxu1 %v18808_v23  ;;  %12324 = vmatprep.subr.bf16.mxu0 %v18689_v17  ;;  %v8700_v23 = vld [vmem:[#allocation10 + $0x13f0] sm:$0xff]  ;;  %v18954_v17 = vcombine.low %v9192_v48, %v9204_v25  ;;  %v18835_v48 = vcombine.high %v9072_v57, %v9084_v7 }
 0x8f8   :  { %12357 = vmatprep.subr.bf16.mxu1 %v18785_v60  ;;  %v18474_v60 = vcombine.low %v8712_v49, %v8724_v6  ;;  %v18451_v44 = vcombine.high %v8688_v27, %v8700_v23  ;;  %v9048_v49 = vld [vmem:[#allocation10 + $0x1ed0] sm:$0xff] }
 0x8f9   :  { %v9060_v6 = vld [vmem:[#allocation10 + $0x1f30] sm:$0xff] }
 0x8fa   :  { %12325 = vmatpush2.bf16.msra.mxu0 %v18688_v62  ;;  %v8664_v62 = vld [vmem:[#allocation10 + $0x12d0] sm:$0xff] }
 0x8fb   :  { %12358 = vmatpush1.bf16.msra.mxu1 %v18784_v36  ;;  %12326 = vmatprep.subr.bf16.mxu0 %v18665_v11  ;;  %v8676_v36 = vld [vmem:[#allocation10 + $0x1330] sm:$0xff]  ;;  %v18930_v11 = vcombine.low %v9168_v4, %v9180_v54  ;;  %v18811_v4 = vcombine.high %v9048_v49, %v9060_v6 }
 0x8fc   :  { %12384 = vmatprep.subr.bf16.mxu1 %v18571_v24  ;;  %v18450_v24 = vcombine.low %v8688_v27, %v8700_v23  ;;  %v18427_v18 = vcombine.high %v8664_v62, %v8676_v36  ;;  %v9024_v27 = vld [vmem:[#allocation10 + $0x1e10] sm:$0xff] }
 0x8fd   :  { %v9036_v23 = vld [vmem:[#allocation10 + $0x1e70] sm:$0xff] }
 0x8fe   :  { %12327 = vmatpush2.bf16.msra.mxu0 %v18664_v15  ;;  %12376 = vmatmul.mubr.bf16.vlgmr.msra.gmra.mxu1 %v21765_v22  ;;  %v8640_v15 = vld [vmem:[#allocation10 + $0x1210] sm:$0xff] }
 0x8ff   :  { %12385 = vmatpush1.bf16.msra.mxu1 %v18570_v29  ;;  %12416 = vmatprep.mubr.bf16.mxu1 %v21781_v8  ;;  %v8652_v29 = vld [vmem:[#allocation10 + $0x1270] sm:$0xff] }
 0x900   :  { %12328 = vmatprep.subr.bf16.mxu0 %v18641_v45  ;;  %12386 = vmatprep.subr.bf16.mxu1 %v18547_v10  ;;  %v18906_v45 = vcombine.low %v9144_v33, %v9156_v3  ;;  %v18426_v10 = vcombine.low %v8664_v62, %v8676_v36  ;;  %v18403_v0 = vcombine.high %v8640_v15, %v8652_v29  ;;  %v8809_v62 = vld [vmem:[#allocation10 + $0x1758] sm:$0xff] }
 0x901   :  { %v18787_v33 = vcombine.high %v9024_v27, %v9036_v23  ;;  %v8821_v36 = vld [vmem:[#allocation10 + $0x17b8] sm:$0xff] }
 0x902   :  { %12329 = vmatpush2.bf16.msra.mxu0 %v18640_v9  ;;  %v9000_v9 = vld [vmem:[#allocation10 + $0x1d50] sm:$0xff] }
 0x903   :  { %12387 = vmatpush1.bf16.msra.mxu1 %v18546_v39  ;;  %12330 = vmatprep.subr.bf16.mxu0 %v18617_v40  ;;  %v9012_v39 = vld [vmem:[#allocation10 + $0x1db0] sm:$0xff]  ;;  %v18882_v40 = vcombine.low %v9120_v21, %v9132_v26  ;;  %v18573_v21 = vcombine.high %v8809_v62, %v8821_v36 }
 0x904   :  { %12388 = vmatprep.subr.bf16.mxu1 %v18523_v61  ;;  %v18402_v61 = vcombine.low %v8640_v15, %v8652_v29  ;;  %v18763_v30 = vcombine.high %v9000_v9, %v9012_v39  ;;  %v8785_v15 = vld [vmem:[#allocation10 + $0x1698] sm:$0xff] }
 0x905   :  { %v8797_v29 = vld [vmem:[#allocation10 + $0x16f8] sm:$0xff] }
 0x906   :  { %12331 = vmatpush2.bf16.msra.mxu0 %v18616_v13  ;;  %v8976_v13 = vld [vmem:[#allocation10 + $0x1c90] sm:$0xff] }
 0x907   :  { %12389 = vmatpush1.bf16.msra.mxu1 %v18522_v12  ;;  %12332 = vmatprep.subr.bf16.mxu0 %v18593_v5  ;;  %v8988_v12 = vld [vmem:[#allocation10 + $0x1cf0] sm:$0xff]  ;;  %v18858_v5 = vcombine.low %v9096_v16, %v9108_v34  ;;  %v18549_v16 = vcombine.high %v8785_v15, %v8797_v29 }
 0x908   :  { %12390 = vmatprep.subr.bf16.mxu1 %v18499_v51  ;;  %v18762_v51 = vcombine.low %v9000_v9, %v9012_v39  ;;  %v18739_v25 = vcombine.high %v8976_v13, %v8988_v12  ;;  %v8761_v9 = vld [vmem:[#allocation10 + $0x15d8] sm:$0xff] }
 0x909   :  { %v8773_v39 = vld [vmem:[#allocation10 + $0x1638] sm:$0xff] }
 0x90a   :  { %12333 = vmatpush2.bf16.msra.mxu0 %v18592_v63  ;;  %v8952_v63 = vld [vmem:[#allocation10 + $0x1bd0] sm:$0xff] }
 0x90b   :  { %12391 = vmatpush1.bf16.msra.mxu1 %v18498_v31  ;;  %12425 = vmatprep.subr.bf16.mxu0 %v18955_v59  ;;  %v8964_v31 = vld [vmem:[#allocation10 + $0x1c30] sm:$0xff]  ;;  %v18834_v59 = vcombine.low %v9072_v57, %v9084_v7  ;;  %v18525_v57 = vcombine.high %v8761_v9, %v8773_v39 }
 0x90c   :  { %12392 = vmatprep.subr.bf16.mxu1 %v18475_v55  ;;  %v18738_v55 = vcombine.low %v8976_v13, %v8988_v12  ;;  %v18715_v54 = vcombine.high %v8952_v63, %v8964_v31  ;;  %v8737_v13 = vld [vmem:[#allocation10 + $0x1518] sm:$0xff] }
 0x90d   :  { %12335 = vmatmul.mubr.bf16.vlgmr.msra.gmra.mxu0 %v21785_v52  ;;  %v8749_v12 = vld [vmem:[#allocation10 + $0x1578] sm:$0xff] }
 0x90e   :  { %12426 = vmatpush1.bf16.msra.mxu0 %v18954_v17  ;;  %12457 = vmatprep.mubr.bf16.mxu0 %v21003_v32  ;;  %v8928_v17 = vld [vmem:[#allocation10 + $0x1b10] sm:$0xff] }
 0x90f   :  { %12393 = vmatpush1.bf16.msra.mxu1 %v18474_v60  ;;  %12427 = vmatprep.subr.bf16.mxu0 %v18931_v53  ;;  %v8940_v60 = vld [vmem:[#allocation10 + $0x1b70] sm:$0xff]  ;;  %v18810_v53 = vcombine.low %v9048_v49, %v9060_v6  ;;  %v18501_v49 = vcombine.high %v8737_v13, %v8749_v12 }
 0x910   :  { %12394 = vmatprep.subr.bf16.mxu1 %v18451_v44  ;;  %v18714_v44 = vcombine.low %v8952_v63, %v8964_v31  ;;  %v18691_v3 = vcombine.high %v8928_v17, %v8940_v60  ;;  %v8713_v63 = vld [vmem:[#allocation10 + $0x1458] sm:$0xff] }
 0x911   :  { %v8725_v31 = vld [vmem:[#allocation10 + $0x14b8] sm:$0xff] }
 0x912   :  { %12428 = vmatpush1.bf16.msra.mxu0 %v18930_v11  ;;  %v8904_v11 = vld [vmem:[#allocation10 + $0x1a50] sm:$0xff] }
 0x913   :  { %12395 = vmatpush1.bf16.msra.mxu1 %v18450_v24  ;;  %12429 = vmatprep.subr.bf16.mxu0 %v18907_v19  ;;  %v8916_v24 = vld [vmem:[#allocation10 + $0x1ab0] sm:$0xff]  ;;  %v18786_v19 = vcombine.low %v9024_v27, %v9036_v23  ;;  %v18477_v27 = vcombine.high %v8713_v63, %v8725_v31 }
 0x914   :  { %12396 = vmatprep.subr.bf16.mxu1 %v18427_v18  ;;  %v18690_v18 = vcombine.low %v8928_v17, %v8940_v60  ;;  %v18667_v26 = vcombine.high %v8904_v11, %v8916_v24  ;;  %v8689_v17 = vld [vmem:[#allocation10 + $0x1398] sm:$0xff] }
 0x915   :  { %v8701_v60 = vld [vmem:[#allocation10 + $0x13f8] sm:$0xff] }
 0x916   :  { %12430 = vmatpush1.bf16.msra.mxu0 %v18906_v45  ;;  %v8880_v45 = vld [vmem:[#allocation10 + $0x1990] sm:$0xff] }
 0x917   :  { %12397 = vmatpush1.bf16.msra.mxu1 %v18426_v10  ;;  %12431 = vmatprep.subr.bf16.mxu0 %v18883_v50  ;;  %v8892_v10 = vld [vmem:[#allocation10 + $0x19f0] sm:$0xff]  ;;  %v18572_v50 = vcombine.low %v8809_v62, %v8821_v36  ;;  %v18453_v62 = vcombine.high %v8689_v17, %v8701_v60 }
 0x918   :  { %12398 = vmatprep.subr.bf16.mxu1 %v18403_v0  ;;  %v18666_v0 = vcombine.low %v8904_v11, %v8916_v24  ;;  %v18643_v34 = vcombine.high %v8880_v45, %v8892_v10  ;;  %v8665_v11 = vld [vmem:[#allocation10 + $0x12d8] sm:$0xff] }
 0x919   :  { %v8677_v24 = vld [vmem:[#allocation10 + $0x1338] sm:$0xff] }
 0x91a   :  { %12432 = vmatpush1.bf16.msra.mxu0 %v18882_v40  ;;  %v8856_v40 = vld [vmem:[#allocation10 + $0x18d0] sm:$0xff] }
 0x91b   :  { %12399 = vmatpush1.bf16.msra.mxu1 %v18402_v61  ;;  %12433 = vmatprep.subr.bf16.mxu0 %v18859_v41  ;;  %v8868_v61 = vld [vmem:[#allocation10 + $0x1930] sm:$0xff]  ;;  %v18548_v41 = vcombine.low %v8785_v15, %v8797_v29  ;;  %v18429_v15 = vcombine.high %v8665_v11, %v8677_v24 }
 0x91c   :  { %12400 = vmatprep.subr.bf16.mxu1 %v18763_v30  ;;  %v18642_v30 = vcombine.low %v8880_v45, %v8892_v10  ;;  %v18619_v7 = vcombine.high %v8856_v40, %v8868_v61  ;;  %v8641_v45 = vld [vmem:[#allocation10 + $0x1218] sm:$0xff] }
 0x91d   :  { %v8653_v10 = vld [vmem:[#allocation10 + $0x1278] sm:$0xff] }
 0x91e   :  { %12434 = vmatpush1.bf16.msra.mxu0 %v18858_v5  ;;  %v8832_v5 = vld [vmem:[#allocation10 + $0x1810] sm:$0xff] }
 0x91f   :  { %12401 = vmatpush2.bf16.msra.mxu1 %v18762_v51  ;;  %12435 = vmatprep.subr.bf16.mxu0 %v18835_v48  ;;  %v8844_v51 = vld [vmem:[#allocation10 + $0x1870] sm:$0xff]  ;;  %v18524_v48 = vcombine.low %v8761_v9, %v8773_v39  ;;  %v18405_v9 = vcombine.high %v8641_v45, %v8653_v10 }
 0x920   :  { %12402 = vmatprep.subr.bf16.mxu1 %v18739_v25  ;;  %v18618_v25 = vcombine.low %v8856_v40, %v8868_v61  ;;  %v18595_v6 = vcombine.high %v8832_v5, %v8844_v51  ;;  %v9001_v40 = vld [vmem:[#allocation10 + $0x1d58] sm:$0xff] }
 0x921   :  { %v9013_v61 = vld [vmem:[#allocation10 + $0x1db8] sm:$0xff] }
 0x922   :  { %12436 = vmatpush1.bf16.msra.mxu0 %v18834_v59  ;;  %v9193_v59 = vld [vmem:[#allocation10 + $0x2358] sm:$0xff] }
 0x923   :  { %12403 = vmatpush2.bf16.msra.mxu1 %v18738_v55  ;;  %12437 = vmatprep.subr.bf16.mxu0 %v18811_v4  ;;  %v9205_v55 = vld [vmem:[#allocation10 + $0x23b8] sm:$0xff]  ;;  %v18500_v4 = vcombine.low %v8737_v13, %v8749_v12  ;;  %v18765_v13 = vcombine.high %v9001_v40, %v9013_v61 }
 0x924   :  { %12404 = vmatprep.subr.bf16.mxu1 %v18715_v54  ;;  %v18594_v54 = vcombine.low %v8832_v5, %v8844_v51  ;;  %v18957_v23 = vcombine.high %v9193_v59, %v9205_v55  ;;  %v8977_v5 = vld [vmem:[#allocation10 + $0x1c98] sm:$0xff] }
 0x925   :  { %v8989_v51 = vld [vmem:[#allocation10 + $0x1cf8] sm:$0xff] }
 0x926   :  { %12438 = vmatpush1.bf16.msra.mxu0 %v18810_v53  ;;  %v9169_v53 = vld [vmem:[#allocation10 + $0x2298] sm:$0xff] }
 0x927   :  { %12405 = vmatpush2.bf16.msra.mxu1 %v18714_v44  ;;  %12439 = vmatprep.subr.bf16.mxu0 %v18787_v33  ;;  %v9181_v44 = vld [vmem:[#allocation10 + $0x22f8] sm:$0xff]  ;;  %v18476_v33 = vcombine.low %v8713_v63, %v8725_v31  ;;  %v18741_v63 = vcombine.high %v8977_v5, %v8989_v51 }
 0x928   :  { %12406 = vmatprep.subr.bf16.mxu1 %v18691_v3  ;;  %v18956_v3 = vcombine.low %v9193_v59, %v9205_v55  ;;  %v18933_v36 = vcombine.high %v9169_v53, %v9181_v44  ;;  %v8953_v59 = vld [vmem:[#allocation10 + $0x1bd8] sm:$0xff] }
 0x929   :  { %v8965_v55 = vld [vmem:[#allocation10 + $0x1c38] sm:$0xff] }
 0x92a   :  { %12440 = vmatpush1.bf16.msra.mxu0 %v18786_v19  ;;  %v9145_v19 = vld [vmem:[#allocation10 + $0x21d8] sm:$0xff] }
 0x92b   :  { %12407 = vmatpush2.bf16.msra.mxu1 %v18690_v18  ;;  %12466 = vmatprep.subr.bf16.mxu0 %v18573_v21  ;;  %v9157_v18 = vld [vmem:[#allocation10 + $0x2238] sm:$0xff]  ;;  %v18452_v21 = vcombine.low %v8689_v17, %v8701_v60  ;;  %v18717_v17 = vcombine.high %v8953_v59, %v8965_v55 }
 0x92c   :  { %12408 = vmatprep.subr.bf16.mxu1 %v18667_v26  ;;  %v18932_v26 = vcombine.low %v9169_v53, %v9181_v44  ;;  %v18909_v29 = vcombine.high %v9145_v19, %v9157_v18  ;;  %v8929_v53 = vld [vmem:[#allocation10 + $0x1b18] sm:$0xff] }
 0x92d   :  { %12458 = vmatmul.mubr.bf16.vlgmr.msra.gmra.mxu0 %v21765_v22  ;;  %v8941_v44 = vld [vmem:[#allocation10 + $0x1b78] sm:$0xff] }
 0x92e   :  { %12467 = vmatpush1.bf16.msra.mxu0 %v18572_v50  ;;  %12498 = vmatprep.mubr.bf16.mxu0 %v21781_v8  ;;  %v9121_v50 = vld [vmem:[#allocation10 + $0x2118] sm:$0xff] }
 0x92f   :  { %12409 = vmatpush2.bf16.msra.mxu1 %v18666_v0  ;;  %12468 = vmatprep.subr.bf16.mxu0 %v18549_v16  ;;  %v9133_v0 = vld [vmem:[#allocation10 + $0x2178] sm:$0xff]  ;;  %v18428_v16 = vcombine.low %v8665_v11, %v8677_v24  ;;  %v18693_v11 = vcombine.high %v8929_v53, %v8941_v44 }
 0x930   :  { %12410 = vmatprep.subr.bf16.mxu1 %v18643_v34  ;;  %v18908_v34 = vcombine.low %v9145_v19, %v9157_v18  ;;  %v18885_v39 = vcombine.high %v9121_v50, %v9133_v0  ;;  %v8905_v19 = vld [vmem:[#allocation10 + $0x1a58] sm:$0xff] }
 0x931   :  { %v8917_v18 = vld [vmem:[#allocation10 + $0x1ab8] sm:$0xff] }
 0x932   :  { %12469 = vmatpush1.bf16.msra.mxu0 %v18548_v41  ;;  %v9097_v41 = vld [vmem:[#allocation10 + $0x2058] sm:$0xff] }
 0x933   :  { %12411 = vmatpush2.bf16.msra.mxu1 %v18642_v30  ;;  %12470 = vmatprep.subr.bf16.mxu0 %v18525_v57  ;;  %v9109_v30 = vld [vmem:[#allocation10 + $0x20b8] sm:$0xff]  ;;  %v18404_v57 = vcombine.low %v8641_v45, %v8653_v10  ;;  %v18669_v45 = vcombine.high %v8905_v19, %v8917_v18 }
 0x934   :  { %12412 = vmatprep.subr.bf16.mxu1 %v18619_v7  ;;  %v18884_v7 = vcombine.low %v9121_v50, %v9133_v0  ;;  %v18861_v12 = vcombine.high %v9097_v41, %v9109_v30  ;;  %v8881_v50 = vld [vmem:[#allocation10 + $0x1998] sm:$0xff] }
 0x935   :  { %v8893_v0 = vld [vmem:[#allocation10 + $0x19f8] sm:$0xff] }
 0x936   :  { %12471 = vmatpush1.bf16.msra.mxu0 %v18524_v48  ;;  %v9073_v48 = vld [vmem:[#allocation10 + $0x1f98] sm:$0xff] }
 0x937   :  { %12413 = vmatpush2.bf16.msra.mxu1 %v18618_v25  ;;  %12472 = vmatprep.subr.bf16.mxu0 %v18501_v49  ;;  %v9085_v25 = vld [vmem:[#allocation10 + $0x1ff8] sm:$0xff]  ;;  %v18764_v49 = vcombine.low %v9001_v40, %v9013_v61  ;;  %v18645_v40 = vcombine.high %v8881_v50, %v8893_v0 }
 0x938   :  { %12414 = vmatprep.subr.bf16.mxu1 %v18595_v6  ;;  %v18860_v6 = vcombine.low %v9097_v41, %v9109_v30  ;;  %v18837_v31 = vcombine.high %v9073_v48, %v9085_v25  ;;  %v8857_v41 = vld [vmem:[#allocation10 + $0x18d8] sm:$0xff] }
 0x939   :  { %v8869_v30 = vld [vmem:[#allocation10 + $0x1938] sm:$0xff] }
 0x93a   :  { %12473 = vmatpush1.bf16.msra.mxu0 %v18500_v4  ;;  %v9049_v4 = vld [vmem:[#allocation10 + $0x1ed8] sm:$0xff] }
 0x93b   :  { %12415 = vmatpush2.bf16.msra.mxu1 %v18594_v54  ;;  %12474 = vmatprep.subr.bf16.mxu0 %v18477_v27  ;;  %v9061_v54 = vld [vmem:[#allocation10 + $0x1f38] sm:$0xff]  ;;  %v18740_v27 = vcombine.low %v8977_v5, %v8989_v51  ;;  %v18621_v5 = vcombine.high %v8857_v41, %v8869_v30 }
 0x93c   :  { %12507 = vmatprep.subr.bf16.mxu1 %v18957_v23  ;;  %v18836_v23 = vcombine.low %v9073_v48, %v9085_v25  ;;  %v18813_v60 = vcombine.high %v9049_v4, %v9061_v54  ;;  %v8833_v48 = vld [vmem:[#allocation10 + $0x1818] sm:$0xff] }
 0x93d   :  { %v8845_v25 = vld [vmem:[#allocation10 + $0x1878] sm:$0xff] }
 0x93e   :  { %12417 = vmatmul.mubr.bf16.vlgmr.msra.gmra.mxu1 %v21785_v52  ;;  %12475 = vmatpush1.bf16.msra.mxu0 %v18476_v33  ;;  %v9025_v33 = vld [vmem:[#allocation10 + $0x1e18] sm:$0xff] }
 0x93f   :  { %12508 = vmatpush1.bf16.msra.mxu1 %v18956_v3  ;;  %12476 = vmatprep.subr.bf16.mxu0 %v18453_v62  ;;  %v9037_v3 = vld [vmem:[#allocation10 + $0x1e78] sm:$0xff]  ;;  %v18716_v62 = vcombine.low %v8953_v59, %v8965_v55  ;;  %v18597_v59 = vcombine.high %v8833_v48, %v8845_v25 }
 0x940   :  { %12509 = vmatprep.subr.bf16.mxu1 %v18933_v36  ;;  %12539 = vmatprep.mubr.bf16.mxu1 %v21003_v32  ;;  %v18812_v36 = vcombine.low %v9049_v4, %v9061_v54  ;;  %v18789_v24 = vcombine.high %v9025_v33, %v9037_v3  ;;  %v9194_v4 = vld [vmem:[#allocation10 + $0x2360] sm:$0xff] }
 0x941   :  { %v9206_v54 = vld [vmem:[#allocation10 + $0x23c0] sm:$0xff] }
 0x942   :  { %12477 = vmatpush1.bf16.msra.mxu0 %v18452_v21  ;;  %v8810_v21 = vld [vmem:[#allocation10 + $0x1760] sm:$0xff] }
 0x943   :  { %12510 = vmatpush1.bf16.msra.mxu1 %v18932_v26  ;;  %12478 = vmatprep.subr.bf16.mxu0 %v18429_v15  ;;  %v8822_v26 = vld [vmem:[#allocation10 + $0x17c0] sm:$0xff]  ;;  %v18692_v15 = vcombine.low %v8929_v53, %v8941_v44  ;;  %v18959_v53 = vcombine.high %v9194_v4, %v9206_v54 }
 0x944   :  { %12511 = vmatprep.subr.bf16.mxu1 %v18909_v29  ;;  %v18788_v29 = vcombine.low %v9025_v33, %v9037_v3  ;;  %v18575_v10 = vcombine.high %v8810_v21, %v8822_v26  ;;  %v9170_v33 = vld [vmem:[#allocation10 + $0x22a0] sm:$0xff] }
 0x945   :  { %v9182_v3 = vld [vmem:[#allocation10 + $0x2300] sm:$0xff] }
 0x946   :  { %12479 = vmatpush1.bf16.msra.mxu0 %v18428_v16  ;;  %v8786_v16 = vld [vmem:[#allocation10 + $0x16a0] sm:$0xff] }
 0x947   :  { %12512 = vmatpush1.bf16.msra.mxu1 %v18908_v34  ;;  %12480 = vmatprep.subr.bf16.mxu0 %v18405_v9  ;;  %v8798_v34 = vld [vmem:[#allocation10 + $0x1700] sm:$0xff]  ;;  %v18668_v9 = vcombine.low %v8905_v19, %v8917_v18  ;;  %v18935_v19 = vcombine.high %v9170_v33, %v9182_v3 }
 0x948   :  { %12513 = vmatprep.subr.bf16.mxu1 %v18885_v39  ;;  %v18574_v39 = vcombine.low %v8810_v21, %v8822_v26  ;;  %v18551_v61 = vcombine.high %v8786_v16, %v8798_v34  ;;  %v9146_v21 = vld [vmem:[#allocation10 + $0x21e0] sm:$0xff] }
 0x949   :  { %v9158_v26 = vld [vmem:[#allocation10 + $0x2240] sm:$0xff] }
 0x94a   :  { %12481 = vmatpush1.bf16.msra.mxu0 %v18404_v57  ;;  %v8762_v57 = vld [vmem:[#allocation10 + $0x15e0] sm:$0xff] }
 0x94b   :  { %12514 = vmatpush1.bf16.msra.mxu1 %v18884_v7  ;;  %12482 = vmatprep.subr.bf16.mxu0 %v18765_v13  ;;  %v8774_v7 = vld [vmem:[#allocation10 + $0x1640] sm:$0xff]  ;;  %v18644_v13 = vcombine.low %v8881_v50, %v8893_v0  ;;  %v18911_v50 = vcombine.high %v9146_v21, %v9158_v26 }
 0x94c   :  { %12515 = vmatprep.subr.bf16.mxu1 %v18861_v12  ;;  %v18550_v12 = vcombine.low %v8786_v16, %v8798_v34  ;;  %v18527_v51 = vcombine.high %v8762_v57, %v8774_v7  ;;  %v9122_v16 = vld [vmem:[#allocation10 + $0x2120] sm:$0xff] }
 0x94d   :  { %v9134_v34 = vld [vmem:[#allocation10 + $0x2180] sm:$0xff] }
 0x94e   :  { %12483 = vmatpush2.bf16.msra.mxu0 %v18764_v49  ;;  %v8738_v49 = vld [vmem:[#allocation10 + $0x1520] sm:$0xff] }
 0x94f   :  { %12516 = vmatpush1.bf16.msra.mxu1 %v18860_v6  ;;  %12484 = vmatprep.subr.bf16.mxu0 %v18741_v63  ;;  %v8750_v6 = vld [vmem:[#allocation10 + $0x1580] sm:$0xff]  ;;  %v18620_v63 = vcombine.low %v8857_v41, %v8869_v30  ;;  %v18887_v41 = vcombine.high %v9122_v16, %v9134_v34 }
 0x950   :  { %12517 = vmatprep.subr.bf16.mxu1 %v18837_v31  ;;  %v18526_v31 = vcombine.low %v8762_v57, %v8774_v7  ;;  %v18503_v55 = vcombine.high %v8738_v49, %v8750_v6  ;;  %v9098_v57 = vld [vmem:[#allocation10 + $0x2060] sm:$0xff] }
 0x951   :  { %v9110_v7 = vld [vmem:[#allocation10 + $0x20c0] sm:$0xff] }
 0x952   :  { %12485 = vmatpush2.bf16.msra.mxu0 %v18740_v27  ;;  %v8714_v27 = vld [vmem:[#allocation10 + $0x1460] sm:$0xff] }
 0x953   :  { %12518 = vmatpush1.bf16.msra.mxu1 %v18836_v23  ;;  %12486 = vmatprep.subr.bf16.mxu0 %v18717_v17  ;;  %v8726_v23 = vld [vmem:[#allocation10 + $0x14c0] sm:$0xff]  ;;  %v18596_v17 = vcombine.low %v8833_v48, %v8845_v25  ;;  %v18863_v48 = vcombine.high %v9098_v57, %v9110_v7 }
 0x954   :  { %12519 = vmatprep.subr.bf16.mxu1 %v18813_v60  ;;  %v18502_v60 = vcombine.low %v8738_v49, %v8750_v6  ;;  %v18479_v44 = vcombine.high %v8714_v27, %v8726_v23  ;;  %v9074_v49 = vld [vmem:[#allocation10 + $0x1fa0] sm:$0xff] }
 0x955   :  { %v9086_v6 = vld [vmem:[#allocation10 + $0x2000] sm:$0xff] }
 0x956   :  { %12487 = vmatpush2.bf16.msra.mxu0 %v18716_v62  ;;  %v8690_v62 = vld [vmem:[#allocation10 + $0x13a0] sm:$0xff] }
 0x957   :  { %12520 = vmatpush1.bf16.msra.mxu1 %v18812_v36  ;;  %12488 = vmatprep.subr.bf16.mxu0 %v18693_v11  ;;  %v8702_v36 = vld [vmem:[#allocation10 + $0x1400] sm:$0xff]  ;;  %v18958_v11 = vcombine.low %v9194_v4, %v9206_v54  ;;  %v18839_v4 = vcombine.high %v9074_v49, %v9086_v6 }
 0x958   :  { %12521 = vmatprep.subr.bf16.mxu1 %v18789_v24  ;;  %v18478_v24 = vcombine.low %v8714_v27, %v8726_v23  ;;  %v18455_v18 = vcombine.high %v8690_v62, %v8702_v36  ;;  %v9050_v27 = vld [vmem:[#allocation10 + $0x1ee0] sm:$0xff] }
 0x959   :  { %v9062_v23 = vld [vmem:[#allocation10 + $0x1f40] sm:$0xff] }
 0x95a   :  { %12489 = vmatpush2.bf16.msra.mxu0 %v18692_v15  ;;  %v8666_v15 = vld [vmem:[#allocation10 + $0x12e0] sm:$0xff] }
 0x95b   :  { %12522 = vmatpush1.bf16.msra.mxu1 %v18788_v29  ;;  %12490 = vmatprep.subr.bf16.mxu0 %v18669_v45  ;;  %v8678_v29 = vld [vmem:[#allocation10 + $0x1340] sm:$0xff]  ;;  %v18934_v45 = vcombine.low %v9170_v33, %v9182_v3  ;;  %v18815_v33 = vcombine.high %v9050_v27, %v9062_v23 }
 0x95c   :  { %12548 = vmatprep.subr.bf16.mxu1 %v18575_v10  ;;  %v18454_v10 = vcombine.low %v8690_v62, %v8702_v36  ;;  %v18431_v0 = vcombine.high %v8666_v15, %v8678_v29  ;;  %v9026_v62 = vld [vmem:[#allocation10 + $0x1e20] sm:$0xff] }
 0x95d   :  { %v9038_v36 = vld [vmem:[#allocation10 + $0x1e80] sm:$0xff] }
 0x95e   :  { %12491 = vmatpush2.bf16.msra.mxu0 %v18668_v9  ;;  %12540 = vmatmul.mubr.bf16.vlgmr.msra.gmra.mxu1 %v21765_v22  ;;  %v8642_v9 = vld [vmem:[#allocation10 + $0x1220] sm:$0xff] }
 0x95f   :  { %12549 = vmatpush1.bf16.msra.mxu1 %v18574_v39  ;;  %12580 = vmatprep.mubr.bf16.mxu1 %v21781_v8  ;;  %v8654_v39 = vld [vmem:[#allocation10 + $0x1280] sm:$0xff] }
 0x960   :  { %12492 = vmatprep.subr.bf16.mxu0 %v18645_v40  ;;  %12550 = vmatprep.subr.bf16.mxu1 %v18551_v61  ;;  %v18910_v40 = vcombine.low %v9146_v21, %v9158_v26  ;;  %v18430_v61 = vcombine.low %v8666_v15, %v8678_v29  ;;  %v18407_v30 = vcombine.high %v8642_v9, %v8654_v39  ;;  %v8811_v15 = vld [vmem:[#allocation10 + $0x1768] sm:$0xff] }
 0x961   :  { %v18791_v21 = vcombine.high %v9026_v62, %v9038_v36  ;;  %v8823_v29 = vld [vmem:[#allocation10 + $0x17c8] sm:$0xff] }
 0x962   :  { %12493 = vmatpush2.bf16.msra.mxu0 %v18644_v13  ;;  %v9002_v13 = vld [vmem:[#allocation10 + $0x1d60] sm:$0xff] }
 0x963   :  { %12551 = vmatpush1.bf16.msra.mxu1 %v18550_v12  ;;  %12494 = vmatprep.subr.bf16.mxu0 %v18621_v5  ;;  %v9014_v12 = vld [vmem:[#allocation10 + $0x1dc0] sm:$0xff]  ;;  %v18886_v5 = vcombine.low %v9122_v16, %v9134_v34  ;;  %v18577_v16 = vcombine.high %v8811_v15, %v8823_v29 }
 0x964   :  { %12552 = vmatprep.subr.bf16.mxu1 %v18527_v51  ;;  %v18406_v51 = vcombine.low %v8642_v9, %v8654_v39  ;;  %v18767_v25 = vcombine.high %v9002_v13, %v9014_v12  ;;  %v8787_v9 = vld [vmem:[#allocation10 + $0x16a8] sm:$0xff] }
 0x965   :  { %v8799_v39 = vld [vmem:[#allocation10 + $0x1708] sm:$0xff] }
 0x966   :  { %12495 = vmatpush2.bf16.msra.mxu0 %v18620_v63  ;;  %v8978_v63 = vld [vmem:[#allocation10 + $0x1ca0] sm:$0xff] }
 0x967   :  { %12553 = vmatpush1.bf16.msra.mxu1 %v18526_v31  ;;  %12496 = vmatprep.subr.bf16.mxu0 %v18597_v59  ;;  %v8990_v31 = vld [vmem:[#allocation10 + $0x1d00] sm:$0xff]  ;;  %v18862_v59 = vcombine.low %v9098_v57, %v9110_v7  ;;  %v18553_v57 = vcombine.high %v8787_v9, %v8799_v39 }
 0x968   :  { %12554 = vmatprep.subr.bf16.mxu1 %v18503_v55  ;;  %v18766_v55 = vcombine.low %v9002_v13, %v9014_v12  ;;  %v18743_v54 = vcombine.high %v8978_v63, %v8990_v31  ;;  %v8763_v13 = vld [vmem:[#allocation10 + $0x15e8] sm:$0xff] }
 0x969   :  { %v8775_v12 = vld [vmem:[#allocation10 + $0x1648] sm:$0xff] }
 0x96a   :  { %12497 = vmatpush2.bf16.msra.mxu0 %v18596_v17  ;;  %v8954_v17 = vld [vmem:[#allocation10 + $0x1be0] sm:$0xff] }
 0x96b   :  { %12555 = vmatpush1.bf16.msra.mxu1 %v18502_v60  ;;  %12589 = vmatprep.subr.bf16.mxu0 %v18959_v53  ;;  %v8966_v60 = vld [vmem:[#allocation10 + $0x1c40] sm:$0xff]  ;;  %v18838_v53 = vcombine.low %v9074_v49, %v9086_v6 }
 0x96c   :  { %12556 = vmatprep.subr.bf16.mxu1 %v18479_v44  ;;  %v18742_v44 = vcombine.low %v8978_v63, %v8990_v31  ;;  %v18719_v3 = vcombine.high %v8954_v17, %v8966_v60  ;;  %v18529_v63 = vcombine.high %v8763_v13, %v8775_v12 }
 0x96d   :  { %12499 = vmatmul.mubr.bf16.vlgmr.msra.gmra.mxu0 %v21785_v52 }
 0x96e   :  { %12590 = vmatpush1.bf16.msra.mxu0 %v18958_v11  ;;  %12621 = vmatprep.mubr.bf16.mxu0 %v21003_v32  ;;  %v8930_v11 = vld [vmem:[#allocation10 + $0x1b20] sm:$0xff] }
 0x96f   :  { %12557 = vmatpush1.bf16.msra.mxu1 %v18478_v24  ;;  %12591 = vmatprep.subr.bf16.mxu0 %v18935_v19  ;;  %v8942_v24 = vld [vmem:[#allocation10 + $0x1b80] sm:$0xff]  ;;  %v18814_v19 = vcombine.low %v9050_v27, %v9062_v23  ;;  %v18528_v23 = vcombine.low %v8763_v13, %v8775_v12 }
 0x970   :  { %12558 = vmatprep.subr.bf16.mxu1 %v18455_v18  ;;  %v18718_v18 = vcombine.low %v8954_v17, %v8966_v60  ;;  %v18695_v26 = vcombine.high %v8930_v11, %v8942_v24  ;;  %v8846_v27 = vld [vmem:[#allocation10 + $0x1880] sm:$0xff] }
 0x972   :  { %12592 = vmatpush1.bf16.msra.mxu0 %v18934_v45  ;;  %v8906_v45 = vld [vmem:[#allocation10 + $0x1a60] sm:$0xff] }
 0x973   :  { %12559 = vmatpush1.bf16.msra.mxu1 %v18454_v10  ;;  %12593 = vmatprep.subr.bf16.mxu0 %v18911_v50  ;;  %v8918_v10 = vld [vmem:[#allocation10 + $0x1ac0] sm:$0xff]  ;;  %v18790_v50 = vcombine.low %v9026_v62, %v9038_v36  ;;  %v9195_v62 = vld [vmem:[#allocation10 + $0x2368] sm:$0xff] }
 0x974   :  { %12560 = vmatprep.subr.bf16.mxu1 %v18431_v0  ;;  %v18694_v0 = vcombine.low %v8930_v11, %v8942_v24  ;;  %v18671_v34 = vcombine.high %v8906_v45, %v8918_v10  ;;  %v9207_v36 = vld [vmem:[#allocation10 + $0x23c8] sm:$0xff] }
 0x976   :  { %12594 = vmatpush1.bf16.msra.mxu0 %v18910_v40  ;;  %v8882_v40 = vld [vmem:[#allocation10 + $0x19a0] sm:$0xff] }
 0x977   :  { %12561 = vmatpush1.bf16.msra.mxu1 %v18430_v61  ;;  %12595 = vmatprep.subr.bf16.mxu0 %v18887_v41  ;;  %v8894_v61 = vld [vmem:[#allocation10 + $0x1a00] sm:$0xff]  ;;  %v18576_v41 = vcombine.low %v8811_v15, %v8823_v29  ;;  %v8703_v15 = vld [vmem:[#allocation10 + $0x1408] sm:$0xff] }
 0x978   :  { %12562 = vmatprep.subr.bf16.mxu1 %v18407_v30  ;;  %v18670_v30 = vcombine.low %v8906_v45, %v8918_v10  ;;  %v18647_v7 = vcombine.high %v8882_v40, %v8894_v61  ;;  %v18646_v6 = vcombine.low %v8882_v40, %v8894_v61  ;;  %v9171_v29 = vld [vmem:[#allocation10 + $0x22a8] sm:$0xff] }
 0x979   :  { %v9183_v45 = vld [vmem:[#allocation10 + $0x2308] sm:$0xff] }
 0x97a   :  { %12596 = vmatpush1.bf16.msra.mxu0 %v18886_v5  ;;  %v9147_v61 = vld [vmem:[#allocation10 + $0x21e8] sm:$0xff]  ;;  %v18936_v13 = vcombine.low %v9171_v29, %v9183_v45 }
 0x97b   :  { %12563 = vmatpush1.bf16.msra.mxu1 %v18406_v51  ;;  %12597 = vmatprep.subr.bf16.mxu0 %v18863_v48  ;;  %v8858_v51 = vld [vmem:[#allocation10 + $0x18e0] sm:$0xff] }
 0x97c   :  { %12564 = vmatprep.subr.bf16.mxu1 %v18767_v25  ;;  %v8870_v48 = vld [vmem:[#allocation10 + $0x1940] sm:$0xff]  ;;  %v18552_v25 = vcombine.low %v8787_v9, %v8799_v39  ;;  %v8667_v9 = vld [vmem:[#allocation10 + $0x12e8] sm:$0xff] }
 0x97d   :  { %v18623_v31 = vcombine.high %v8858_v51, %v8870_v48  ;;  %v18622_v60 = vcombine.low %v8858_v51, %v8870_v48  ;;  %v8679_v39 = vld [vmem:[#allocation10 + $0x1348] sm:$0xff] }
 0x97e   :  { %12598 = vmatpush1.bf16.msra.mxu0 %v18862_v59  ;;  %v8739_v59 = vld [vmem:[#allocation10 + $0x1528] sm:$0xff]  ;;  %v18433_v12 = vcombine.high %v8667_v9, %v8679_v39 }
 0x97f   :  { %12565 = vmatpush2.bf16.msra.mxu1 %v18766_v55  ;;  %12599 = vmatprep.subr.bf16.mxu0 %v18839_v4  ;;  %v8751_v55 = vld [vmem:[#allocation10 + $0x1588] sm:$0xff] }
 0x980   :  { %12566 = vmatprep.subr.bf16.mxu1 %v18743_v54  ;;  %v8834_v54 = vld [vmem:[#allocation10 + $0x1820] sm:$0xff]  ;;  %v18504_v11 = vcombine.low %v8739_v59, %v8751_v55 }
 0x981   :  { %v18598_v24 = vcombine.low %v8834_v54, %v8846_v27 }
 0x982   :  { %12600 = vmatpush1.bf16.msra.mxu0 %v18838_v53  ;;  %v18505_v53 = vcombine.high %v8739_v59, %v8751_v55  ;;  %v9123_v59 = vld [vmem:[#allocation10 + $0x2128] sm:$0xff] }
 0x983   :  { %12567 = vmatpush2.bf16.msra.mxu1 %v18742_v44  ;;  %12601 = vmatprep.subr.bf16.mxu0 %v18815_v33  ;;  %v18599_v44 = vcombine.high %v8834_v54, %v8846_v27  ;;  %v8715_v33 = vld [vmem:[#allocation10 + $0x1468] sm:$0xff]  ;;  %v18432_v54 = vcombine.low %v8667_v9, %v8679_v39 }
 0x984   :  { %12568 = vmatprep.subr.bf16.mxu1 %v18719_v3  ;;  %v8727_v3 = vld [vmem:[#allocation10 + $0x14c8] sm:$0xff] }
 0x985   :  { %v18480_v10 = vcombine.low %v8715_v33, %v8727_v3  ;;  %v9135_v55 = vld [vmem:[#allocation10 + $0x2188] sm:$0xff] }
 0x986   :  { %12602 = vmatpush1.bf16.msra.mxu0 %v18814_v19  ;;  %v18481_v19 = vcombine.high %v8715_v33, %v8727_v3  ;;  %v9015_v33 = vld [vmem:[#allocation10 + $0x1dc8] sm:$0xff] }
 0x987   :  { %12569 = vmatpush2.bf16.msra.mxu1 %v18718_v18  ;;  %12603 = vmatprep.subr.bf16.mxu0 %v18791_v21  ;;  %v18961_v18 = vcombine.high %v9195_v62, %v9207_v36  ;;  %v21812_v21 = vld [vmem:[#allocation13 + $0x18] sm:$0xff]  ;;  %v9111_v3 = vld [vmem:[#allocation10 + $0x20c8] sm:$0xff] }
 0x988   :  { %12570 = vmatprep.subr.bf16.mxu1 %v18695_v26  ;;  %v8691_v26 = vld [vmem:[#allocation10 + $0x13a8] sm:$0xff]  ;;  %v9227_v40 = vrot.slane %v21812_v21, %v21171_v47 }
 0x98a   :  { %12604 = vmatpush1.bf16.msra.mxu0 %v18790_v50  ;;  %v18960_v50 = vcombine.low %v9195_v62, %v9207_v36  ;;  %v18888_v36 = vcombine.low %v9123_v59, %v9135_v55 }
 0x98b   :  { %12571 = vmatpush2.bf16.msra.mxu1 %v18694_v0  ;;  %12630 = vmatprep.subr.bf16.mxu0 %v18577_v16  ;;  %v9223_v0 = vrot.slane %v21812_v21, %v21166_v42  ;;  %v18457_v16 = vcombine.high %v8691_v26, %v8703_v15 }
 0x98c   :  { %12572 = vmatprep.subr.bf16.mxu1 %v18671_v34  ;;  %v18937_v34 = vcombine.high %v9171_v29, %v9183_v45 }
 0x98d   :  { %12622 = vmatmul.mubr.bf16.vlgmr.msra.gmra.mxu0 %v21765_v22  ;;  %v21807_v5 = vpop.f32.mrf.mxu0 }
 0x98e   :  { %12631 = vmatpush1.bf16.msra.mxu0 %v18576_v41  ;;  %12662 = vmatprep.mubr.bf16.mxu0 %v21781_v8  ;;  %v9159_v41 = vld [vmem:[#allocation10 + $0x2248] sm:$0xff] }
 0x98f   :  { %12573 = vmatpush2.bf16.msra.mxu1 %v18670_v30  ;;  %v21810_v49 = vpop.f32.mrf.mxu0  ;;  %12632 = vmatprep.subr.bf16.mxu0 %v18553_v57  ;;  %v18456_v57 = vcombine.low %v8691_v26, %v8703_v15  ;;  %v18913_v48 = vcombine.high %v9147_v61, %v9159_v41  ;;  %v9087_v26 = vld [vmem:[#allocation10 + $0x2008] sm:$0xff] }
 0x990   :  { %12574 = vmatprep.subr.bf16.mxu1 %v18647_v7 }
 0x991   :  { %v12299_v4 = vpop.f32.mrf.mxu0 }
 0x992   :  { %12633 = vmatpush1.bf16.msra.mxu0 %v18552_v25  ;;  %v8643_v25 = vld [vmem:[#allocation10 + $0x1228] sm:$0xff] }
 0x993   :  { %12575 = vmatpush2.bf16.msra.mxu1 %v18646_v6  ;;  %v12300_v17 = vpop.f32.mrf.mxu0  ;;  %12634 = vmatprep.subr.bf16.mxu0 %v18529_v63  ;;  %v8655_v6 = vld [vmem:[#allocation10 + $0x1288] sm:$0xff] }
 0x994   :  { %12576 = vmatprep.subr.bf16.mxu1 %v18623_v31  ;;  %v18409_v17 = vcombine.high %v8643_v25, %v8655_v6  ;;  %v18408_v62 = vcombine.low %v8643_v25, %v8655_v6  ;;  %v8907_v25 = vld [vmem:[#allocation10 + $0x1a68] sm:$0xff] }
 0x995   :  { %v8919_v6 = vld [vmem:[#allocation10 + $0x1ac8] sm:$0xff] }
 0x996   :  { %12635 = vmatpush1.bf16.msra.mxu0 %v18528_v23  ;;  %v18912_v23 = vcombine.low %v9147_v61, %v9159_v41  ;;  %v8931_v41 = vld [vmem:[#allocation10 + $0x1b28] sm:$0xff] }
 0x997   :  { %12577 = vmatpush2.bf16.msra.mxu1 %v18622_v60  ;;  %12636 = vmatprep.subr.bf16.mxu0 %v18505_v53  ;;  %v18889_v53 = vcombine.high %v9123_v59, %v9135_v55  ;;  %v8824_v59 = vld [vmem:[#allocation10 + $0x17d0] sm:$0xff] }
 0x998   :  { %12578 = vmatprep.subr.bf16.mxu1 %v18599_v44  ;;  %v9003_v44 = vld [vmem:[#allocation10 + $0x1d68] sm:$0xff] }
 0x999   :  { %v18768_v15 = vcombine.low %v9003_v44, %v9015_v33 }
 0x99a   :  { %12637 = vmatpush1.bf16.msra.mxu0 %v18504_v11  ;;  %v18769_v11 = vcombine.high %v9003_v44, %v9015_v33  ;;  %v8800_v44 = vld [vmem:[#allocation10 + $0x1710] sm:$0xff]  ;;  %v18672_v33 = vcombine.low %v8907_v25, %v8919_v6 }
 0x99b   :  { %12579 = vmatpush2.bf16.msra.mxu1 %v18598_v24  ;;  %12638 = vmatprep.subr.bf16.mxu0 %v18481_v19  ;;  %v8979_v24 = vld [vmem:[#allocation10 + $0x1ca8] sm:$0xff] }
 0x99c   :  { %12671 = vmatprep.subr.bf16.mxu1 %v18961_v18  ;;  %v8991_v19 = vld [vmem:[#allocation10 + $0x1d08] sm:$0xff] }
 0x99d   :  { %v9075_v18 = vld [vmem:[#allocation10 + $0x1fa8] sm:$0xff]  ;;  %v18745_v45 = vcombine.high %v8979_v24, %v8991_v19  ;;  %v18744_v9 = vcombine.low %v8979_v24, %v8991_v19  ;;  %v8776_v24 = vld [vmem:[#allocation10 + $0x1650] sm:$0xff] }
 0x99e   :  { %12581 = vmatmul.mubr.bf16.vlgmr.msra.gmra.mxu1 %v21785_v52  ;;  %12639 = vmatpush1.bf16.msra.mxu0 %v18480_v10  ;;  %v12254_v30 = vpop.f32.mrf.mxu1  ;;  %v18841_v10 = vcombine.high %v9075_v18, %v9087_v26  ;;  %v18840_v39 = vcombine.low %v9075_v18, %v9087_v26 }
 0x99f   :  { %v12255_v7 = vadd.f32 %v12254_v30, %v9223_v0  ;;  %12672 = vmatpush1.bf16.msra.mxu1 %v18960_v50  ;;  %12640 = vmatprep.subr.bf16.mxu0 %v18457_v16  ;;  %v8955_v50 = vld [vmem:[#allocation10 + $0x1be8] sm:$0xff] }
 0x9a0   :  { %v12256_v51 = vpop.f32.mrf.mxu1  ;;  %12673 = vmatprep.subr.bf16.mxu1 %v18937_v34  ;;  %12703 = vmatprep.mubr.bf16.mxu1 %v21003_v32  ;;  %v8967_v0 = vld [vmem:[#allocation10 + $0x1c48] sm:$0xff] }
 0x9a1   :  { %v21821_v63 = vadd.f32 %v21807_v5, %v12255_v7  ;;  %v12257_v31 = vadd.f32 %v12256_v51, %v9227_v40  ;;  %v9099_v5 = vld [vmem:[#allocation10 + $0x2068] sm:$0xff]  ;;  %v18721_v40 = vcombine.high %v8955_v50, %v8967_v0 }
 0x9a2   :  { %12641 = vmatpush1.bf16.msra.mxu0 %v18456_v57  ;;  %v12258_v4 = vpop.f32.mrf.mxu1  ;;  %v18864_v29 = vcombine.low %v9099_v5, %v9111_v3  ;;  %v9051_v16 = vld [vmem:[#allocation10 + $0x1ee8] sm:$0xff] }
 0x9a3   :  { %v21824_v27 = vadd.f32 %v21810_v49, %v12257_v31  ;;  %12674 = vmatpush1.bf16.msra.mxu1 %v18936_v13  ;;  %12642 = vmatprep.subr.bf16.mxu0 %v18433_v12  ;;  %v18865_v49 = vcombine.high %v9099_v5, %v9111_v3  ;;  %v9063_v34 = vld [vmem:[#allocation10 + $0x1f48] sm:$0xff]  ;;  %v18720_v13 = vcombine.low %v8955_v50, %v8967_v0  ;;  %v8812_v31 = vld [vmem:[#allocation10 + $0x1770] sm:$0xff] }
 0x9a4   :  { %v12259_v60 = vpop.f32.mrf.mxu1  ;;  %12675 = vmatprep.subr.bf16.mxu1 %v18913_v48  ;;  %v18817_v61 = vcombine.high %v9051_v16, %v9063_v34  ;;  %v8943_v30 = vld [vmem:[#allocation10 + $0x1b88] sm:$0xff]  ;;  %v18816_v12 = vcombine.low %v9051_v16, %v9063_v34  ;;  %v18578_v5 = vcombine.low %v8812_v31, %v8824_v59  ;;  %v8740_v0 = vld [vmem:[#allocation10 + $0x1530] sm:$0xff] }
 0x9a5   :  { %v9027_v57 = vld [vmem:[#allocation10 + $0x1e28] sm:$0xff]  ;;  %v18697_v51 = vcombine.high %v8931_v41, %v8943_v30  ;;  %v18696_v55 = vcombine.low %v8931_v41, %v8943_v30  ;;  %v8752_v16 = vld [vmem:[#allocation10 + $0x1590] sm:$0xff] }
 0x9a6   :  { %12643 = vmatpush1.bf16.msra.mxu0 %v18432_v54  ;;  %v9039_v7 = vld [vmem:[#allocation10 + $0x1e88] sm:$0xff]  ;;  %v18673_v54 = vcombine.high %v8907_v25, %v8919_v6  ;;  %v18507_v41 = vcombine.high %v8740_v0, %v8752_v16  ;;  %v9196_v30 = vld [vmem:[#allocation10 + $0x2370] sm:$0xff] }
 0x9a7   :  { %12676 = vmatpush1.bf16.msra.mxu1 %v18912_v23  ;;  %12644 = vmatprep.subr.bf16.mxu0 %v18409_v17  ;;  %v18793_v48 = vcombine.high %v9027_v57, %v9039_v7  ;;  %v18792_v4 = vcombine.low %v9027_v57, %v9039_v7  ;;  %v18579_v23 = vcombine.high %v8812_v31, %v8824_v59  ;;  %v8883_v17 = vld [vmem:[#allocation10 + $0x19a8] sm:$0xff]  ;;  %v9208_v57 = vld [vmem:[#allocation10 + $0x23d0] sm:$0xff] }
 0x9a8   :  { %12677 = vmatprep.subr.bf16.mxu1 %v18889_v53  ;;  %v8895_v60 = vld [vmem:[#allocation10 + $0x1a08] sm:$0xff]  ;;  %v8788_v53 = vld [vmem:[#allocation10 + $0x16b0] sm:$0xff] }
 0x9a9   :  { %v18649_v3 = vcombine.high %v8883_v17, %v8895_v60  ;;  %v18648_v18 = vcombine.low %v8883_v17, %v8895_v60  ;;  %v18554_v26 = vcombine.low %v8788_v53, %v8800_v44  ;;  %v8847_v50 = vld [vmem:[#allocation10 + $0x1888] sm:$0xff]  ;;  %v8716_v7 = vld [vmem:[#allocation10 + $0x1470] sm:$0xff]  ;;  %v9235_v60 = vrot.slane %v21812_v21, %v21195_v43 }
 0x9aa   :  { %12645 = vmatpush1.bf16.msra.mxu0 %v18408_v62  ;;  %v18555_v62 = vcombine.high %v8788_v53, %v8800_v44  ;;  %v9172_v6 = vld [vmem:[#allocation10 + $0x22b0] sm:$0xff] }
 0x9ab   :  { %12678 = vmatpush1.bf16.msra.mxu1 %v18888_v36  ;;  %12646 = vmatprep.subr.bf16.mxu0 %v18769_v11  ;;  %v8859_v36 = vld [vmem:[#allocation10 + $0x18e8] sm:$0xff]  ;;  %v9184_v31 = vld [vmem:[#allocation10 + $0x2310] sm:$0xff] }
 0x9ac   :  { %12679 = vmatprep.subr.bf16.mxu1 %v18865_v49  ;;  %v8871_v11 = vld [vmem:[#allocation10 + $0x1948] sm:$0xff]  ;;  %v8764_v49 = vld [vmem:[#allocation10 + $0x15f0] sm:$0xff]  ;;  %v18939_v17 = vcombine.high %v9172_v6, %v9184_v31 }
 0x9ad   :  { %v8692_v59 = vld [vmem:[#allocation10 + $0x13b0] sm:$0xff] }
 0x9ae   :  { %12647 = vmatpush2.bf16.msra.mxu0 %v18768_v15  ;;  %v18625_v15 = vcombine.high %v8859_v36, %v8871_v11  ;;  %v9148_v44 = vld [vmem:[#allocation10 + $0x21f0] sm:$0xff] }
 0x9af   :  { %12680 = vmatpush1.bf16.msra.mxu1 %v18864_v29  ;;  %12648 = vmatprep.subr.bf16.mxu0 %v18745_v45  ;;  %v18531_v45 = vcombine.high %v8764_v49, %v8776_v24 }
 0x9b0   :  { %12681 = vmatprep.subr.bf16.mxu1 %v18841_v10  ;;  %v8835_v10 = vld [vmem:[#allocation10 + $0x1828] sm:$0xff] }
 0x9b2   :  { %12649 = vmatpush2.bf16.msra.mxu0 %v18744_v9  ;;  %v18624_v9 = vcombine.low %v8859_v36, %v8871_v11  ;;  %v18938_v11 = vcombine.low %v9172_v6, %v9184_v31 }
 0x9b3   :  { %12682 = vmatpush1.bf16.msra.mxu1 %v18840_v39  ;;  %12650 = vmatprep.subr.bf16.mxu0 %v18721_v40  ;;  %v18530_v39 = vcombine.low %v8764_v49, %v8776_v24  ;;  %v18601_v40 = vcombine.high %v8835_v10, %v8847_v50 }
 0x9b4   :  { %12683 = vmatprep.subr.bf16.mxu1 %v18817_v61 }
 0x9b6   :  { %12651 = vmatpush2.bf16.msra.mxu0 %v18720_v13  ;;  %v8728_v13 = vld [vmem:[#allocation10 + $0x14d0] sm:$0xff] }
 0x9b7   :  { %12684 = vmatpush1.bf16.msra.mxu1 %v18816_v12  ;;  %12652 = vmatprep.subr.bf16.mxu0 %v18697_v51  ;;  %v18600_v12 = vcombine.low %v8835_v10, %v8847_v50  ;;  %v18506_v51 = vcombine.low %v8740_v0, %v8752_v16  ;;  %v18483_v25 = vcombine.high %v8716_v7, %v8728_v13  ;;  %v9124_v10 = vld [vmem:[#allocation10 + $0x2130] sm:$0xff] }
 0x9b8   :  { %12685 = vmatprep.subr.bf16.mxu1 %v18793_v48  ;;  %v18963_v48 = vcombine.high %v9196_v30, %v9208_v57  ;;  %v9136_v50 = vld [vmem:[#allocation10 + $0x2190] sm:$0xff] }
 0x9b9   :  { %v8644_v16 = vld [vmem:[#allocation10 + $0x1230] sm:$0xff] }
 0x9ba   :  { %12653 = vmatpush2.bf16.msra.mxu0 %v18696_v55  ;;  %v8704_v55 = vld [vmem:[#allocation10 + $0x1410] sm:$0xff] }
 0x9bb   :  { %12686 = vmatpush1.bf16.msra.mxu1 %v18792_v4  ;;  %12654 = vmatprep.subr.bf16.mxu0 %v18673_v54  ;;  %v9231_v4 = vrot.slane %v21812_v21, %v21192_v38  ;;  %v18962_v54 = vcombine.low %v9196_v30, %v9208_v57  ;;  %v18459_v53 = vcombine.high %v8692_v59, %v8704_v55  ;;  %v9100_v57 = vld [vmem:[#allocation10 + $0x2070] sm:$0xff] }
 0x9bc   :  { %12712 = vmatprep.subr.bf16.mxu1 %v18579_v23  ;;  %v18482_v23 = vcombine.low %v8716_v7, %v8728_v13  ;;  %v18458_v24 = vcombine.low %v8692_v59, %v8704_v55  ;;  %v18891_v30 = vcombine.high %v9124_v10, %v9136_v50 }
 0x9be   :  { %v21826_v19 = vpop.f32.mrf.mxu1  ;;  %12655 = vmatpush2.bf16.msra.mxu0 %v18672_v33  ;;  %12704 = vmatmul.mubr.bf16.vlgmr.msra.gmra.mxu1 %v21765_v22  ;;  %v9160_v33 = vld [vmem:[#allocation10 + $0x2250] sm:$0xff] }
 0x9bf   :  { %12713 = vmatpush1.bf16.msra.mxu1 %v18578_v5  ;;  %12744 = vmatprep.mubr.bf16.mxu1 %v21781_v8 }
 0x9c0   :  { %v21830_v29 = vpop.f32.mrf.mxu1  ;;  %12656 = vmatprep.subr.bf16.mxu0 %v18649_v3  ;;  %12714 = vmatprep.subr.bf16.mxu1 %v18555_v62  ;;  %v8668_v3 = vld [vmem:[#allocation10 + $0x12f0] sm:$0xff] }
 0x9c1   :  { %v8680_v62 = vld [vmem:[#allocation10 + $0x1350] sm:$0xff] }
 0x9c2   :  { %v12381_v34 = vpop.f32.mrf.mxu1  ;;  %12657 = vmatpush2.bf16.msra.mxu0 %v18648_v18  ;;  %v18915_v18 = vcombine.high %v9148_v44, %v9160_v33 }
 0x9c3   :  { %12715 = vmatpush1.bf16.msra.mxu1 %v18554_v26  ;;  %12658 = vmatprep.subr.bf16.mxu0 %v18625_v15  ;;  %v8656_v34 = vld [vmem:[#allocation10 + $0x1290] sm:$0xff] }
 0x9c4   :  { %v12382_v61 = vpop.f32.mrf.mxu1  ;;  %12716 = vmatprep.subr.bf16.mxu1 %v18531_v45  ;;  %v18435_v45 = vcombine.high %v8668_v3, %v8680_v62  ;;  %v18410_v55 = vcombine.low %v8644_v16, %v8656_v34 }
 0x9c5   :  { %v18914_v61 = vcombine.low %v9148_v44, %v9160_v33  ;;  %v9088_v44 = vld [vmem:[#allocation10 + $0x2010] sm:$0xff] }
 0x9c6   :  { %12659 = vmatpush2.bf16.msra.mxu0 %v18624_v9  ;;  %v8980_v33 = vld [vmem:[#allocation10 + $0x1cb0] sm:$0xff] }
 0x9c7   :  { %12717 = vmatpush1.bf16.msra.mxu1 %v18530_v39  ;;  %12660 = vmatprep.subr.bf16.mxu0 %v18601_v40 }
 0x9c8   :  { %12718 = vmatprep.subr.bf16.mxu1 %v18507_v41 }
 0x9ca   :  { %12661 = vmatpush2.bf16.msra.mxu0 %v18600_v12  ;;  %v18411_v12 = vcombine.high %v8644_v16, %v8656_v34  ;;  %v9064_v16 = vld [vmem:[#allocation10 + $0x1f50] sm:$0xff] }
 0x9cb   :  { %12719 = vmatpush1.bf16.msra.mxu1 %v18506_v51  ;;  %12753 = vmatprep.subr.bf16.mxu0 %v18963_v48  ;;  %v9112_v51 = vld [vmem:[#allocation10 + $0x20d0] sm:$0xff] }
 0x9cc   :  { %12720 = vmatprep.subr.bf16.mxu1 %v18483_v25  ;;  %v9004_v48 = vld [vmem:[#allocation10 + $0x1d70] sm:$0xff] }
 0x9cd   :  { %v12336_v5 = vpop.f32.mrf.mxu0  ;;  %12663 = vmatmul.mubr.bf16.vlgmr.msra.gmra.mxu0 %v21785_v52  ;;  %v9016_v25 = vld [vmem:[#allocation10 + $0x1dd0] sm:$0xff] }
 0x9ce   :  { %v12337_v36 = vadd.f32 %v12336_v5, %v9231_v4  ;;  %12754 = vmatpush1.bf16.msra.mxu0 %v18962_v54  ;;  %12785 = vmatprep.mubr.bf16.mxu0 %v21003_v32  ;;  %v18867_v4 = vcombine.high %v9100_v57, %v9112_v51  ;;  %v9076_v54 = vld [vmem:[#allocation10 + $0x1fb0] sm:$0xff] }
 0x9cf   :  { %v12338_v49 = vpop.f32.mrf.mxu0  ;;  %12721 = vmatpush1.bf16.msra.mxu1 %v18482_v23  ;;  %12755 = vmatprep.subr.bf16.mxu0 %v18939_v17  ;;  %v8992_v5 = vld [vmem:[#allocation10 + $0x1d10] sm:$0xff]  ;;  %v18842_v34 = vcombine.low %v9076_v54, %v9088_v44 }
 0x9d0   :  { %v12378_v26 = vadd.f32 %v21826_v19, %v12337_v36  ;;  %v12339_v15 = vadd.f32 %v12338_v49, %v9235_v60  ;;  %12722 = vmatprep.subr.bf16.mxu1 %v18459_v53  ;;  %v18434_v19 = vcombine.low %v8668_v3, %v8680_v62  ;;  %v18866_v3 = vcombine.low %v9100_v57, %v9112_v51 }
 0x9d1   :  { %v12340_v0 = vpop.f32.mrf.mxu0 }
 0x9d2   :  { %v13204_v9 = vcombine.low %v21821_v63, %v12378_v26  ;;  %v13205_v39 = vcombine.high %v21821_v63, %v12378_v26  ;;  %v12380_v40 = vadd.f32 %v21830_v29, %v12339_v15  ;;  %12756 = vmatpush1.bf16.msra.mxu0 %v18938_v11  ;;  %v18890_v63 = vcombine.low %v9124_v10, %v9136_v50  ;;  %v9052_v0 = vld [vmem:[#allocation10 + $0x1ef0] sm:$0xff] }
 0x9d3   :  { %v12341_v41 = vpop.f32.mrf.mxu0  ;;  %12723 = vmatpush1.bf16.msra.mxu1 %v18458_v24  ;;  %12757 = vmatprep.subr.bf16.mxu0 %v18915_v18  ;;  %v18770_v24 = vcombine.low %v9004_v48, %v9016_v25  ;;  %v18843_v18 = vcombine.high %v9076_v54, %v9088_v44  ;;  %v18747_v26 = vcombine.high %v8980_v33, %v8992_v5 }
 0x9d4   :  { %v13220_v7 = vcombine.low %v21824_v27, %v12380_v40  ;;  %v13221_v13 = vcombine.high %v21824_v27, %v12380_v40  ;;  %12724 = vmatprep.subr.bf16.mxu1 %v18435_v45  ;;  %v13212_v29 = vrot.slane %v13204_v9, %v21205_v20  ;;  %v13219_v6 = vrot.slane %v13205_v39, %v21205_v20  ;;  %v8956_v9 = vld [vmem:[#allocation10 + $0x1bf0] sm:$0xff] }
 0x9d5   :  { %v18771_v27 = vcombine.high %v9004_v48, %v9016_v25  ;;  %v8968_v39 = vld [vmem:[#allocation10 + $0x1c50] sm:$0xff]  ;;  %v18819_v57 = vcombine.high %v9052_v0, %v9064_v16 }
 0x9d6   :  { %v13228_v31 = vrot.slane %v13220_v7, %v21205_v20  ;;  %v13235_v59 = vrot.slane %v13221_v13, %v21205_v20  ;;  %12758 = vmatpush1.bf16.msra.mxu0 %v18914_v61  ;;  %v18723_v7 = vcombine.high %v8956_v9, %v8968_v39  ;;  %v9028_v13 = vld [vmem:[#allocation10 + $0x1e30] sm:$0xff] }
 0x9d7   :  { %12725 = vmatpush1.bf16.msra.mxu1 %v18434_v19  ;;  %12759 = vmatprep.subr.bf16.mxu0 %v18891_v30  ;;  %v18746_v30 = vcombine.low %v8980_v33, %v8992_v5  ;;  %v8932_v25 = vld [vmem:[#allocation10 + $0x1b30] sm:$0xff] }
 0x9d8   :  { %v13268_v23 = vcombine.low %v13212_v29, %v13228_v31  ;;  %v13269_v17 = vcombine.high %v13212_v29, %v13228_v31  ;;  %v13284_v60 = vcombine.low %v13219_v6, %v13235_v59  ;;  %v13285_v53 = vcombine.high %v13219_v6, %v13235_v59  ;;  %12726 = vmatprep.subr.bf16.mxu1 %v18411_v12  ;;  %v9040_v12 = vld [vmem:[#allocation10 + $0x1e90] sm:$0xff] }
 0x9d9   :  { %v18818_v31 = vcombine.low %v9052_v0, %v9064_v16  ;;  %v18722_v59 = vcombine.low %v8956_v9, %v8968_v39  ;;  %v8908_v5 = vld [vmem:[#allocation10 + $0x1a70] sm:$0xff]  ;;  %v8765_v9 = vld [vmem:[#allocation10 + $0x15f8] sm:$0xff] }
 0x9da   :  { %v13276_v62 = vrot.slane %v13268_v23, %v21213_v14  ;;  %v13283_v36 = vrot.slane %v13269_v17, %v21213_v14  ;;  %v13292_v11 = vrot.slane %v13284_v60, %v21213_v14  ;;  %v13299_v49 = vrot.slane %v13285_v53, %v21213_v14  ;;  %12760 = vmatpush1.bf16.msra.mxu0 %v18890_v63  ;;  %v8944_v63 = vld [vmem:[#allocation10 + $0x1b90] sm:$0xff]  ;;  %v8813_v60 = vld [vmem:[#allocation10 + $0x1778] sm:$0xff] }
 0x9db   :  { %12727 = vmatpush1.bf16.msra.mxu1 %v18410_v55  ;;  %12761 = vmatprep.subr.bf16.mxu0 %v18867_v4  ;;  %v18699_v17 = vcombine.high %v8932_v25, %v8944_v63  ;;  %v8825_v53 = vld [vmem:[#allocation10 + $0x17d8] sm:$0xff] }
 0x9dc   :  { %v18974_v15 = vcombine.low %v13276_v62, %v13283_v36  ;;  %v18976_v45 = vcombine.high %v13276_v62, %v13283_v36  ;;  %v18978_v10 = vcombine.low %v13292_v11, %v13299_v49  ;;  %v18980_v50 = vcombine.high %v13292_v11, %v13299_v49  ;;  %12728 = vmatprep.subr.bf16.mxu1 %v18771_v27  ;;  %v8777_v39 = vld [vmem:[#allocation10 + $0x1658] sm:$0xff] }
 0x9dd   :  { %v18795_v27 = vcombine.high %v9028_v13, %v9040_v12  ;;  %v18794_v11 = vcombine.low %v9028_v13, %v9040_v12  ;;  %v18698_v49 = vcombine.low %v8932_v25, %v8944_v63  ;;  %v8741_v12 = vld [vmem:[#allocation10 + $0x1538] sm:$0xff]  ;;  %v8836_v25 = vld [vmem:[#allocation10 + $0x1830] sm:$0xff] }
 0x9de   :  { %v13620_v40 = vrot.slane %v18974_v15, %v21205_v20  ;;  %v13636_v61 = vrot.slane %v18976_v45, %v21205_v20  ;;  %v13652_v41 = vrot.slane %v18978_v10, %v21205_v20  ;;  %v13668_v19 = vrot.slane %v18980_v50, %v21205_v20  ;;  %12762 = vmatpush1.bf16.msra.mxu0 %v18866_v3  ;;  %v8920_v3 = vld [vmem:[#allocation10 + $0x1ad0] sm:$0xff]  ;;  %v8801_v15 = vld [vmem:[#allocation10 + $0x1718] sm:$0xff] }
 0x9df   :  { %12729 = vmatpush2.bf16.msra.mxu1 %v18770_v24  ;;  %12763 = vmatprep.subr.bf16.mxu0 %v18843_v18  ;;  %v18581_v24 = vcombine.high %v8813_v60, %v8825_v53  ;;  %v18675_v18 = vcombine.high %v8908_v5, %v8920_v3  ;;  %v8884_v45 = vld [vmem:[#allocation10 + $0x19b0] sm:$0xff]  ;;  %v18580_v50 = vcombine.low %v8813_v60, %v8825_v53 }
 0x9e0   :  { %12730 = vmatprep.subr.bf16.mxu1 %v18747_v26  ;;  %v13676_v51 = vcombine.low %v13620_v40, %v13636_v61  ;;  %v13708_v48 = vcombine.low %v13652_v41, %v13668_v19  ;;  %v13677_v29 = vcombine.high %v13620_v40, %v13636_v61  ;;  %v13709_v6 = vcombine.high %v13652_v41, %v13668_v19  ;;  %v8789_v26 = vld [vmem:[#allocation10 + $0x16b8] sm:$0xff]  ;;  %v8896_v10 = vld [vmem:[#allocation10 + $0x1a10] sm:$0xff] }
 0x9e1   :  { %v18674_v0 = vcombine.low %v8908_v5, %v8920_v3  ;;  %v18557_v16 = vcombine.high %v8789_v26, %v8801_v15  ;;  %v8860_v61 = vld [vmem:[#allocation10 + $0x18f0] sm:$0xff]  ;;  %v18556_v19 = vcombine.low %v8789_v26, %v8801_v15  ;;  %v8693_v3 = vld [vmem:[#allocation10 + $0x13b8] sm:$0xff]  ;;  %v9239_v26 = vrot.slane %v21812_v21, %v21231_v56 }
 0x9e2   :  { %12764 = vmatpush1.bf16.msra.mxu0 %v18842_v34  ;;  %v13684_v55 = vrot.slane %v13676_v51, %v21213_v14  ;;  %v13716_v4 = vrot.slane %v13708_v48, %v21213_v14  ;;  %v13691_v54 = vrot.slane %v13677_v29, %v21213_v14  ;;  %v13723_v23 = vrot.slane %v13709_v6, %v21213_v14  ;;  %v8872_v41 = vld [vmem:[#allocation10 + $0x1950] sm:$0xff]  ;;  %v8753_v51 = vld [vmem:[#allocation10 + $0x1598] sm:$0xff] }
 0x9e3   :  { %12731 = vmatpush2.bf16.msra.mxu1 %v18746_v30  ;;  %12765 = vmatprep.subr.bf16.mxu0 %v18819_v57  ;;  %v18651_v34 = vcombine.high %v8884_v45, %v8896_v10  ;;  %v18650_v57 = vcombine.low %v8884_v45, %v8896_v10  ;;  %v18627_v13 = vcombine.high %v8860_v61, %v8872_v41  ;;  %v8848_v63 = vld [vmem:[#allocation10 + $0x1890] sm:$0xff] }
 0x9e4   :  { %12732 = vmatprep.subr.bf16.mxu1 %v18723_v7  ;;  %v21860_v44 = vcombine.low %v13684_v55, %v13716_v4  ;;  %v21862_v33 = vcombine.high %v13684_v55, %v13716_v4  ;;  %v21864_v62 = vcombine.low %v13691_v54, %v13723_v23  ;;  %v21866_v36 = vcombine.high %v13691_v54, %v13723_v23  ;;  %v8717_v4 = vld [vmem:[#allocation10 + $0x1478] sm:$0xff] }
 0x9e5   :  { %v18533_v7 = vcombine.high %v8765_v9, %v8777_v39  ;;  %v18532_v29 = vcombine.low %v8765_v9, %v8777_v39  ;;  %v18603_v55 = vcombine.high %v8836_v25, %v8848_v63  ;;  %v9197_v54 = vld [vmem:[#allocation10 + $0x2378] sm:$0xff]  ;;  %v18602_v60 = vcombine.low %v8836_v25, %v8848_v63 }
 0x9e6   :  { %12766 = vmatpush1.bf16.msra.mxu0 %v18818_v31  ;;  %v18626_v31 = vcombine.low %v8860_v61, %v8872_v41  ;;  %v9209_v23 = vld [vmem:[#allocation10 + $0x23d8] sm:$0xff] }
 0x9e7   :  { %12733 = vmatpush2.bf16.msra.mxu1 %v18722_v59  ;;  %12767 = vmatprep.subr.bf16.mxu0 %v18795_v27  ;;  %v18509_v59 = vcombine.high %v8741_v12, %v8753_v51  ;;  %v8729_v27 = vld [vmem:[#allocation10 + $0x14d8] sm:$0xff]  ;;  %v18965_v5 = vcombine.high %v9197_v54, %v9209_v23  ;;  %v18964_v15 = vcombine.low %v9197_v54, %v9209_v23 }
 0x9e8   :  { %12734 = vmatprep.subr.bf16.mxu1 %v18699_v17  ;;  %v18508_v17 = vcombine.low %v8741_v12, %v8753_v51  ;;  %v18485_v53 = vcombine.high %v8717_v4, %v8729_v27  ;;  %v9161_v9 = vld [vmem:[#allocation10 + $0x2258] sm:$0xff] }
 0x9e9   :  { %v8645_v12 = vld [vmem:[#allocation10 + $0x1238] sm:$0xff] }
 0x9ea   :  { %12768 = vmatpush1.bf16.msra.mxu0 %v18794_v11  ;;  %v8705_v11 = vld [vmem:[#allocation10 + $0x1418] sm:$0xff] }
 0x9eb   :  { %12735 = vmatpush2.bf16.msra.mxu1 %v18698_v49  ;;  %12794 = vmatprep.subr.bf16.mxu0 %v18581_v24  ;;  %v9173_v49 = vld [vmem:[#allocation10 + $0x22b8] sm:$0xff]  ;;  %v18461_v45 = vcombine.high %v8693_v3, %v8705_v11  ;;  %v18460_v61 = vcombine.low %v8693_v3, %v8705_v11 }
 0x9ec   :  { %12736 = vmatprep.subr.bf16.mxu1 %v18675_v18  ;;  %v9185_v24 = vld [vmem:[#allocation10 + $0x2318] sm:$0xff]  ;;  %v18484_v18 = vcombine.low %v8717_v4, %v8729_v27 }
 0x9ed   :  { %v21868_v40 = vpop.f32.mrf.mxu0  ;;  %12786 = vmatmul.mubr.bf16.vlgmr.msra.gmra.mxu0 %v21765_v22  ;;  %v18941_v10 = vcombine.high %v9173_v49, %v9185_v24  ;;  %v8657_v51 = vld [vmem:[#allocation10 + $0x1298] sm:$0xff] }
 0x9ee   :  { %12795 = vmatpush1.bf16.msra.mxu0 %v18580_v50  ;;  %12826 = vmatprep.mubr.bf16.mxu0 %v21781_v8  ;;  %v8669_v50 = vld [vmem:[#allocation10 + $0x12f8] sm:$0xff] }
 0x9ef   :  { %v21872_v30 = vpop.f32.mrf.mxu0  ;;  %12737 = vmatpush2.bf16.msra.mxu1 %v18674_v0  ;;  %12796 = vmatprep.subr.bf16.mxu0 %v18557_v16  ;;  %v8681_v0 = vld [vmem:[#allocation10 + $0x1358] sm:$0xff]  ;;  %v9243_v16 = vrot.slane %v21812_v21, %v21239_v2 }
 0x9f0   :  { %12738 = vmatprep.subr.bf16.mxu1 %v18651_v34  ;;  %v9149_v34 = vld [vmem:[#allocation10 + $0x21f8] sm:$0xff] }
 0x9f1   :  { %v12463_v48 = vpop.f32.mrf.mxu0  ;;  %v9125_v25 = vld [vmem:[#allocation10 + $0x2138] sm:$0xff] }
 0x9f2   :  { %12797 = vmatpush1.bf16.msra.mxu0 %v18556_v19  ;;  %v18940_v19 = vcombine.low %v9173_v49, %v9185_v24  ;;  %v9137_v63 = vld [vmem:[#allocation10 + $0x2198] sm:$0xff] }
 0x9f3   :  { %v12464_v6 = vpop.f32.mrf.mxu0  ;;  %12739 = vmatpush2.bf16.msra.mxu1 %v18650_v57  ;;  %12798 = vmatprep.subr.bf16.mxu0 %v18533_v7  ;;  %v18437_v57 = vcombine.high %v8669_v50, %v8681_v0  ;;  %v18893_v27 = vcombine.high %v9125_v25, %v9137_v63  ;;  %v9005_v54 = vld [vmem:[#allocation10 + $0x1d78] sm:$0xff] }
 0x9f4   :  { %12740 = vmatprep.subr.bf16.mxu1 %v18627_v13  ;;  %v18917_v13 = vcombine.high %v9149_v34, %v9161_v9  ;;  %v18436_v6 = vcombine.low %v8669_v50, %v8681_v0  ;;  %v9017_v23 = vld [vmem:[#allocation10 + $0x1dd8] sm:$0xff] }
 0x9f5   :  { %v8981_v3 = vld [vmem:[#allocation10 + $0x1cb8] sm:$0xff] }
 0x9f6   :  { %12799 = vmatpush1.bf16.msra.mxu0 %v18532_v29  ;;  %v8993_v11 = vld [vmem:[#allocation10 + $0x1d18] sm:$0xff] }
 0x9f7   :  { %12741 = vmatpush2.bf16.msra.mxu1 %v18626_v31  ;;  %12800 = vmatprep.subr.bf16.mxu0 %v18509_v59  ;;  %v18916_v59 = vcombine.low %v9149_v34, %v9161_v9  ;;  %v9077_v49 = vld [vmem:[#allocation10 + $0x1fb8] sm:$0xff]  ;;  %v18748_v34 = vcombine.low %v8981_v3, %v8993_v11 }
 0x9f8   :  { %12742 = vmatprep.subr.bf16.mxu1 %v18603_v55  ;;  %v18413_v55 = vcombine.high %v8645_v12, %v8657_v51  ;;  %v9089_v24 = vld [vmem:[#allocation10 + $0x2018] sm:$0xff] }
 0x9f9   :  { %v8969_v50 = vld [vmem:[#allocation10 + $0x1c58] sm:$0xff]  ;;  %v18844_v9 = vcombine.low %v9077_v49, %v9089_v24 }
 0x9fa   :  { %12801 = vmatpush1.bf16.msra.mxu0 %v18508_v17  ;;  %v9113_v17 = vld [vmem:[#allocation10 + $0x20d8] sm:$0xff] }
 0x9fb   :  { %12743 = vmatpush2.bf16.msra.mxu1 %v18602_v60  ;;  %12802 = vmatprep.subr.bf16.mxu0 %v18485_v53  ;;  %v18412_v60 = vcombine.low %v8645_v12, %v8657_v51  ;;  %v18892_v53 = vcombine.low %v9125_v25, %v9137_v63  ;;  %v9053_v0 = vld [vmem:[#allocation10 + $0x1ef8] sm:$0xff] }
 0x9fc   :  { %12835 = vmatprep.subr.bf16.mxu1 %v18965_v5  ;;  %v18773_v5 = vcombine.high %v9005_v54, %v9017_v23  ;;  %v8909_v25 = vld [vmem:[#allocation10 + $0x1a78] sm:$0xff] }
 0x9fd   :  { %v8921_v63 = vld [vmem:[#allocation10 + $0x1ad8] sm:$0xff] }
 0x9fe   :  { %v12418_v39 = vpop.f32.mrf.mxu1  ;;  %12745 = vmatmul.mubr.bf16.vlgmr.msra.gmra.mxu1 %v21785_v52  ;;  %12803 = vmatpush1.bf16.msra.mxu0 %v18484_v18  ;;  %v18772_v18 = vcombine.low %v9005_v54, %v9017_v23  ;;  %v8885_v54 = vld [vmem:[#allocation10 + $0x19b8] sm:$0xff] }
 0x9ff   :  { %v12419_v41 = vadd.f32 %v12418_v39, %v9239_v26  ;;  %12836 = vmatpush1.bf16.msra.mxu1 %v18964_v15  ;;  %12804 = vmatprep.subr.bf16.mxu0 %v18461_v45  ;;  %v18749_v15 = vcombine.high %v8981_v3, %v8993_v11  ;;  %v18845_v45 = vcombine.high %v9077_v49, %v9089_v24  ;;  %v8897_v23 = vld [vmem:[#allocation10 + $0x1a18] sm:$0xff]  ;;  %v8766_v49 = vld [vmem:[#allocation10 + $0x1600] sm:$0xff] }
 0xa00   :  { %v12420_v7 = vpop.f32.mrf.mxu1  ;;  %12837 = vmatprep.subr.bf16.mxu1 %v18941_v10  ;;  %12867 = vmatprep.mubr.bf16.mxu1 %v21003_v32  ;;  %v8957_v10 = vld [vmem:[#allocation10 + $0x1bf8] sm:$0xff]  ;;  %v8778_v24 = vld [vmem:[#allocation10 + $0x1660] sm:$0xff] }
 0xa01   :  { %v21881_v21 = vadd.f32 %v21868_v40, %v12419_v41  ;;  %v12421_v48 = vadd.f32 %v12420_v7, %v9243_v16  ;;  %v9101_v40 = vld [vmem:[#allocation10 + $0x2078] sm:$0xff]  ;;  %v18725_v39 = vcombine.high %v8957_v10, %v8969_v50 }
 0xa02   :  { %v12422_v29 = vpop.f32.mrf.mxu1  ;;  %12805 = vmatpush1.bf16.msra.mxu0 %v18460_v61  ;;  %v18868_v26 = vcombine.low %v9101_v40, %v9113_v17  ;;  %v9065_v16 = vld [vmem:[#allocation10 + $0x1f58] sm:$0xff] }
 0xa03   :  { %v21884_v31 = vadd.f32 %v21872_v30, %v12421_v48  ;;  %12838 = vmatpush1.bf16.msra.mxu1 %v18940_v19  ;;  %12806 = vmatprep.subr.bf16.mxu0 %v18437_v57  ;;  %v18869_v30 = vcombine.high %v9101_v40, %v9113_v17  ;;  %v18821_v61 = vcombine.high %v9053_v0, %v9065_v16  ;;  %v8933_v41 = vld [vmem:[#allocation10 + $0x1b38] sm:$0xff]  ;;  %v8814_v29 = vld [vmem:[#allocation10 + $0x1780] sm:$0xff] }
 0xa04   :  { %v12423_v4 = vpop.f32.mrf.mxu1  ;;  %12839 = vmatprep.subr.bf16.mxu1 %v18917_v13  ;;  %v8945_v19 = vld [vmem:[#allocation10 + $0x1b98] sm:$0xff]  ;;  %v18724_v13 = vcombine.low %v8957_v10, %v8969_v50  ;;  %v18820_v12 = vcombine.low %v9053_v0, %v9065_v16  ;;  %v8790_v40 = vld [vmem:[#allocation10 + $0x16c0] sm:$0xff]  ;;  %v18535_v50 = vcombine.high %v8766_v49, %v8778_v24 }
 0xa05   :  { %v9029_v57 = vld [vmem:[#allocation10 + $0x1e38] sm:$0xff]  ;;  %v18701_v51 = vcombine.high %v8933_v41, %v8945_v19  ;;  %v18677_v4 = vcombine.high %v8909_v25, %v8921_v63  ;;  %v8802_v17 = vld [vmem:[#allocation10 + $0x1720] sm:$0xff] }
 0xa06   :  { %12807 = vmatpush1.bf16.msra.mxu0 %v18436_v6  ;;  %v9041_v7 = vld [vmem:[#allocation10 + $0x1e98] sm:$0xff]  ;;  %v8826_v6 = vld [vmem:[#allocation10 + $0x17e0] sm:$0xff] }
 0xa07   :  { %12840 = vmatpush1.bf16.msra.mxu1 %v18916_v59  ;;  %12808 = vmatprep.subr.bf16.mxu0 %v18413_v55  ;;  %v18797_v48 = vcombine.high %v9029_v57, %v9041_v7  ;;  %v18700_v59 = vcombine.low %v8933_v41, %v8945_v19  ;;  %v18796_v55 = vcombine.low %v9029_v57, %v9041_v7  ;;  %v8861_v3 = vld [vmem:[#allocation10 + $0x18f8] sm:$0xff] }
 0xa08   :  { %12841 = vmatprep.subr.bf16.mxu1 %v18893_v27  ;;  %v18583_v27 = vcombine.high %v8814_v29, %v8826_v6  ;;  %v8873_v11 = vld [vmem:[#allocation10 + $0x1958] sm:$0xff]  ;;  %v18534_v41 = vcombine.low %v8766_v49, %v8778_v24  ;;  %v8670_v49 = vld [vmem:[#allocation10 + $0x1300] sm:$0xff] }
 0xa09   :  { %v8837_v0 = vld [vmem:[#allocation10 + $0x1838] sm:$0xff]  ;;  %v8682_v24 = vld [vmem:[#allocation10 + $0x1360] sm:$0xff] }
 0xa0a   :  { %12809 = vmatpush1.bf16.msra.mxu0 %v18412_v60  ;;  %v18676_v60 = vcombine.low %v8909_v25, %v8921_v63  ;;  %v8849_v16 = vld [vmem:[#allocation10 + $0x1898] sm:$0xff] }
 0xa0b   :  { %12842 = vmatpush1.bf16.msra.mxu1 %v18892_v53  ;;  %12810 = vmatprep.subr.bf16.mxu0 %v18773_v5  ;;  %v18582_v53 = vcombine.low %v8814_v29, %v8826_v6  ;;  %v18653_v5 = vcombine.high %v8885_v54, %v8897_v23  ;;  %v18605_v19 = vcombine.high %v8837_v0, %v8849_v16 }
 0xa0c   :  { %12843 = vmatprep.subr.bf16.mxu1 %v18869_v30  ;;  %v18559_v30 = vcombine.high %v8790_v40, %v8802_v17  ;;  %v18604_v25 = vcombine.low %v8837_v0, %v8849_v16 }
 0xa0e   :  { %12811 = vmatpush2.bf16.msra.mxu0 %v18772_v18 }
 0xa0f   :  { %12844 = vmatpush1.bf16.msra.mxu1 %v18868_v26  ;;  %12812 = vmatprep.subr.bf16.mxu0 %v18749_v15  ;;  %v18652_v26 = vcombine.low %v8885_v54, %v8897_v23  ;;  %v18558_v15 = vcombine.low %v8790_v40, %v8802_v17  ;;  %v20825_v54 = vld [vmem:[#allocation13 + $0x18] sm:$0xff] }
 0xa10   :  { %12845 = vmatprep.subr.bf16.mxu1 %v18845_v45  ;;  %v18629_v45 = vcombine.high %v8861_v3, %v8873_v11  ;;  %v9247_v23 = vrot.slane %v20825_v54, %v21264_v37 }
 0xa12   :  { %12813 = vmatpush2.bf16.msra.mxu0 %v18748_v34  ;;  %v8742_v34 = vld [vmem:[#allocation10 + $0x1540] sm:$0xff] }
 0xa13   :  { %12846 = vmatpush1.bf16.msra.mxu1 %v18844_v9  ;;  %12814 = vmatprep.subr.bf16.mxu0 %v18725_v39  ;;  %v8754_v9 = vld [vmem:[#allocation10 + $0x15a0] sm:$0xff] }
 0xa14   :  { %12847 = vmatprep.subr.bf16.mxu1 %v18821_v61  ;;  %v18628_v61 = vcombine.low %v8861_v3, %v8873_v11  ;;  %v18511_v7 = vcombine.high %v8742_v34, %v8754_v9  ;;  %v18510_v63 = vcombine.low %v8742_v34, %v8754_v9  ;;  %v9162_v3 = vld [vmem:[#allocation10 + $0x2260] sm:$0xff]  ;;  %v18439_v9 = vcombine.high %v8670_v49, %v8682_v24 }
 0xa16   :  { %12815 = vmatpush2.bf16.msra.mxu0 %v18724_v13  ;;  %v9198_v13 = vld [vmem:[#allocation10 + $0x2380] sm:$0xff] }
 0xa17   :  { %12848 = vmatpush1.bf16.msra.mxu1 %v18820_v12  ;;  %12816 = vmatprep.subr.bf16.mxu0 %v18701_v51  ;;  %v9210_v12 = vld [vmem:[#allocation10 + $0x23e0] sm:$0xff] }
 0xa18   :  { %12849 = vmatprep.subr.bf16.mxu1 %v18797_v48  ;;  %v8718_v51 = vld [vmem:[#allocation10 + $0x1480] sm:$0xff]  ;;  %v18967_v29 = vcombine.high %v9198_v13, %v9210_v12  ;;  %v18966_v40 = vcombine.low %v9198_v13, %v9210_v12 }
 0xa19   :  { %v8730_v48 = vld [vmem:[#allocation10 + $0x14e0] sm:$0xff] }
 0xa1a   :  { %12817 = vmatpush2.bf16.msra.mxu0 %v18700_v59  ;;  %v18487_v6 = vcombine.high %v8718_v51, %v8730_v48  ;;  %v9174_v59 = vld [vmem:[#allocation10 + $0x22c0] sm:$0xff]  ;;  %v18486_v17 = vcombine.low %v8718_v51, %v8730_v48 }
 0xa1b   :  { %12850 = vmatpush1.bf16.msra.mxu1 %v18796_v55  ;;  %12818 = vmatprep.subr.bf16.mxu0 %v18677_v4  ;;  %v9186_v55 = vld [vmem:[#allocation10 + $0x2320] sm:$0xff] }
 0xa1c   :  { %12876 = vmatprep.subr.bf16.mxu1 %v18583_v27  ;;  %v8694_v4 = vld [vmem:[#allocation10 + $0x13c0] sm:$0xff] }
 0xa1d   :  { %v8706_v27 = vld [vmem:[#allocation10 + $0x1420] sm:$0xff] }
 0xa1e   :  { %v21886_v18 = vpop.f32.mrf.mxu1  ;;  %12819 = vmatpush2.bf16.msra.mxu0 %v18676_v60  ;;  %12868 = vmatmul.mubr.bf16.vlgmr.msra.gmra.mxu1 %v21765_v22  ;;  %v18943_v60 = vcombine.high %v9174_v59, %v9186_v55 }
 0xa1f   :  { %12877 = vmatpush1.bf16.msra.mxu1 %v18582_v53  ;;  %12908 = vmatprep.mubr.bf16.mxu1 %v21781_v8  ;;  %v9251_v53 = vrot.slane %v20825_v54, %v21267_v46 }
 0xa20   :  { %v21890_v10 = vpop.f32.mrf.mxu1  ;;  %12820 = vmatprep.subr.bf16.mxu0 %v18653_v5  ;;  %12878 = vmatprep.subr.bf16.mxu1 %v18559_v30  ;;  %v18463_v5 = vcombine.high %v8694_v4, %v8706_v27  ;;  %v9150_v30 = vld [vmem:[#allocation10 + $0x2200] sm:$0xff] }
 0xa21   :  { %v18919_v0 = vcombine.high %v9150_v30, %v9162_v3  ;;  %v18918_v51 = vcombine.low %v9150_v30, %v9162_v3 }
 0xa22   :  { %v12545_v39 = vpop.f32.mrf.mxu1  ;;  %12821 = vmatpush2.bf16.msra.mxu0 %v18652_v26 }
 0xa23   :  { %12879 = vmatpush1.bf16.msra.mxu1 %v18558_v15  ;;  %12822 = vmatprep.subr.bf16.mxu0 %v18629_v45  ;;  %v18942_v15 = vcombine.low %v9174_v59, %v9186_v55  ;;  %v9126_v39 = vld [vmem:[#allocation10 + $0x2140] sm:$0xff] }
 0xa24   :  { %v12546_v57 = vpop.f32.mrf.mxu1  ;;  %12880 = vmatprep.subr.bf16.mxu1 %v18535_v50  ;;  %v18462_v50 = vcombine.low %v8694_v4, %v8706_v27  ;;  %v9114_v55 = vld [vmem:[#allocation10 + $0x20e0] sm:$0xff] }
 0xa25   :  { %v8658_v57 = vld [vmem:[#allocation10 + $0x12a0] sm:$0xff] }
 0xa26   :  { %12823 = vmatpush2.bf16.msra.mxu0 %v18628_v61  ;;  %v9138_v61 = vld [vmem:[#allocation10 + $0x21a0] sm:$0xff] }
 0xa27   :  { %12881 = vmatpush1.bf16.msra.mxu1 %v18534_v41  ;;  %12824 = vmatprep.subr.bf16.mxu0 %v18605_v19  ;;  %v8646_v19 = vld [vmem:[#allocation10 + $0x1240] sm:$0xff] }
 0xa28   :  { %12882 = vmatprep.subr.bf16.mxu1 %v18511_v7  ;;  %v18415_v59 = vcombine.high %v8646_v19, %v8658_v57  ;;  %v9006_v4 = vld [vmem:[#allocation10 + $0x1d80] sm:$0xff] }
 0xa29   :  { %v9018_v27 = vld [vmem:[#allocation10 + $0x1de0] sm:$0xff] }
 0xa2a   :  { %12825 = vmatpush2.bf16.msra.mxu0 %v18604_v25  ;;  %v18895_v25 = vcombine.high %v9126_v39, %v9138_v61 }
 0xa2b   :  { %12883 = vmatpush1.bf16.msra.mxu1 %v18510_v63  ;;  %12917 = vmatprep.subr.bf16.mxu0 %v18967_v29  ;;  %v9102_v63 = vld [vmem:[#allocation10 + $0x2080] sm:$0xff] }
 0xa2c   :  { %12884 = vmatprep.subr.bf16.mxu1 %v18487_v6 }
 0xa2d   :  { %v12500_v11 = vpop.f32.mrf.mxu0  ;;  %12827 = vmatmul.mubr.bf16.vlgmr.msra.gmra.mxu0 %v21785_v52 }
 0xa2e   :  { %v12501_v26 = vadd.f32 %v12500_v11, %v9247_v23  ;;  %12918 = vmatpush1.bf16.msra.mxu0 %v18966_v40  ;;  %12949 = vmatprep.mubr.bf16.mxu0 %v21003_v32 }
 0xa2f   :  { %v12502_v45 = vpop.f32.mrf.mxu0  ;;  %12885 = vmatpush1.bf16.msra.mxu1 %v18486_v17  ;;  %12919 = vmatprep.subr.bf16.mxu0 %v18943_v60  ;;  %v18414_v17 = vcombine.low %v8646_v19, %v8658_v57  ;;  %v18871_v60 = vcombine.high %v9102_v63, %v9114_v55 }
 0xa30   :  { %v12542_v16 = vadd.f32 %v21886_v18, %v12501_v26  ;;  %v12503_v34 = vadd.f32 %v12502_v45, %v9251_v53  ;;  %12886 = vmatprep.subr.bf16.mxu1 %v18463_v5  ;;  %v18438_v18 = vcombine.low %v8670_v49, %v8682_v24  ;;  %v9078_v53 = vld [vmem:[#allocation10 + $0x1fc0] sm:$0xff] }
 0xa31   :  { %v12504_v41 = vpop.f32.mrf.mxu0  ;;  %v9090_v49 = vld [vmem:[#allocation10 + $0x2020] sm:$0xff] }
 0xa32   :  { %v13236_v7 = vcombine.low %v21881_v21, %v12542_v16  ;;  %v13237_v13 = vcombine.high %v21881_v21, %v12542_v16  ;;  %v12544_v12 = vadd.f32 %v21890_v10, %v12503_v34  ;;  %12920 = vmatpush1.bf16.msra.mxu0 %v18942_v15  ;;  %v18894_v21 = vcombine.low %v9126_v39, %v9138_v61  ;;  %v8982_v24 = vld [vmem:[#allocation10 + $0x1cc0] sm:$0xff] }
 0xa33   :  { %v12505_v48 = vpop.f32.mrf.mxu0  ;;  %12887 = vmatpush1.bf16.msra.mxu1 %v18462_v50  ;;  %12921 = vmatprep.subr.bf16.mxu0 %v18919_v0  ;;  %v8994_v26 = vld [vmem:[#allocation10 + $0x1d20] sm:$0xff]  ;;  %v18870_v15 = vcombine.low %v9102_v63, %v9114_v55  ;;  %v18774_v34 = vcombine.low %v9006_v4, %v9018_v27 }
 0xa34   :  { %v13252_v29 = vcombine.low %v21884_v31, %v12544_v12  ;;  %v13253_v6 = vcombine.high %v21884_v31, %v12544_v12  ;;  %12888 = vmatprep.subr.bf16.mxu1 %v18439_v9  ;;  %v13244_v10 = vrot.slane %v13236_v7, %v21205_v20  ;;  %v13251_v54 = vrot.slane %v13237_v13, %v21205_v20  ;;  %v9054_v7 = vld [vmem:[#allocation10 + $0x1f00] sm:$0xff] }
 0xa35   :  { %v18775_v31 = vcombine.high %v9006_v4, %v9018_v27  ;;  %v18847_v9 = vcombine.high %v9078_v53, %v9090_v49  ;;  %v18751_v39 = vcombine.high %v8982_v24, %v8994_v26  ;;  %v9066_v13 = vld [vmem:[#allocation10 + $0x1f60] sm:$0xff]  ;;  %v18846_v12 = vcombine.low %v9078_v53, %v9090_v49 }
 0xa36   :  { %v13260_v23 = vrot.slane %v13252_v29, %v21205_v20  ;;  %v13267_v40 = vrot.slane %v13253_v6, %v21205_v20  ;;  %12922 = vmatpush1.bf16.msra.mxu0 %v18918_v51  ;;  %v8958_v51 = vld [vmem:[#allocation10 + $0x1c00] sm:$0xff]  ;;  %v18750_v6 = vcombine.low %v8982_v24, %v8994_v26  ;;  %v8815_v24 = vld [vmem:[#allocation10 + $0x1788] sm:$0xff] }
 0xa37   :  { %12889 = vmatpush1.bf16.msra.mxu1 %v18438_v18  ;;  %12923 = vmatprep.subr.bf16.mxu0 %v18895_v25  ;;  %v8970_v48 = vld [vmem:[#allocation10 + $0x1c60] sm:$0xff]  ;;  %v8827_v26 = vld [vmem:[#allocation10 + $0x17e8] sm:$0xff] }
 0xa38   :  { %v13300_v5 = vcombine.low %v13244_v10, %v13260_v23  ;;  %v13301_v30 = vcombine.high %v13244_v10, %v13260_v23  ;;  %v13316_v3 = vcombine.low %v13251_v54, %v13267_v40  ;;  %v13317_v11 = vcombine.high %v13251_v54, %v13267_v40  ;;  %12890 = vmatprep.subr.bf16.mxu1 %v18415_v59  ;;  %v9030_v4 = vld [vmem:[#allocation10 + $0x1e40] sm:$0xff] }
 0xa39   :  { %v18823_v59 = vcombine.high %v9054_v7, %v9066_v13  ;;  %v18727_v55 = vcombine.high %v8958_v51, %v8970_v48  ;;  %v9042_v27 = vld [vmem:[#allocation10 + $0x1ea0] sm:$0xff] }
 0xa3a   :  { %v13308_v45 = vrot.slane %v13300_v5, %v21213_v14  ;;  %v13315_v50 = vrot.slane %v13301_v30, %v21213_v14  ;;  %v13324_v0 = vrot.slane %v13316_v3, %v21213_v14  ;;  %v13331_v16 = vrot.slane %v13317_v11, %v21213_v14  ;;  %12924 = vmatpush1.bf16.msra.mxu0 %v18894_v21  ;;  %v8934_v54 = vld [vmem:[#allocation10 + $0x1b40] sm:$0xff] }
 0xa3b   :  { %12891 = vmatpush1.bf16.msra.mxu1 %v18414_v17  ;;  %12925 = vmatprep.subr.bf16.mxu0 %v18871_v60  ;;  %v8946_v23 = vld [vmem:[#allocation10 + $0x1ba0] sm:$0xff]  ;;  %v18822_v60 = vcombine.low %v9054_v7, %v9066_v13  ;;  %v18799_v30 = vcombine.high %v9030_v4, %v9042_v27 }
 0xa3c   :  { %v18975_v61 = vcombine.low %v13308_v45, %v13315_v50  ;;  %v18977_v41 = vcombine.high %v13308_v45, %v13315_v50  ;;  %v18979_v19 = vcombine.low %v13324_v0, %v13331_v16  ;;  %v18981_v57 = vcombine.high %v13324_v0, %v13331_v16  ;;  %12892 = vmatprep.subr.bf16.mxu1 %v18775_v31  ;;  %v8910_v50 = vld [vmem:[#allocation10 + $0x1a80] sm:$0xff] }
 0xa3d   :  { %v18726_v31 = vcombine.low %v8958_v51, %v8970_v48  ;;  %v18703_v49 = vcombine.high %v8934_v54, %v8946_v23  ;;  %v8922_v0 = vld [vmem:[#allocation10 + $0x1ae0] sm:$0xff] }
 0xa3e   :  { %v13627_v18 = vrot.slane %v18975_v61, %v21205_v20  ;;  %v13643_v25 = vrot.slane %v18977_v41, %v21205_v20  ;;  %v13659_v63 = vrot.slane %v18979_v19, %v21205_v20  ;;  %v13675_v29 = vrot.slane %v18981_v57, %v21205_v20  ;;  %12926 = vmatpush1.bf16.msra.mxu0 %v18870_v15  ;;  %v8791_v19 = vld [vmem:[#allocation10 + $0x16c8] sm:$0xff]  ;;  %v8886_v7 = vld [vmem:[#allocation10 + $0x19c0] sm:$0xff] }
 0xa3f   :  { %12893 = vmatpush2.bf16.msra.mxu1 %v18774_v34  ;;  %12927 = vmatprep.subr.bf16.mxu0 %v18847_v9  ;;  %v18798_v9 = vcombine.low %v9030_v4, %v9042_v27  ;;  %v18585_v61 = vcombine.high %v8815_v24, %v8827_v26  ;;  %v18679_v41 = vcombine.high %v8910_v50, %v8922_v0  ;;  %v8803_v57 = vld [vmem:[#allocation10 + $0x1728] sm:$0xff]  ;;  %v8898_v13 = vld [vmem:[#allocation10 + $0x1a20] sm:$0xff] }
 0xa40   :  { %12894 = vmatprep.subr.bf16.mxu1 %v18751_v39  ;;  %v13692_v21 = vcombine.low %v13627_v18, %v13643_v25  ;;  %v13724_v10 = vcombine.low %v13659_v63, %v13675_v29  ;;  %v13693_v40 = vcombine.high %v13627_v18, %v13643_v25  ;;  %v13725_v17 = vcombine.high %v13659_v63, %v13675_v29  ;;  %v8767_v25 = vld [vmem:[#allocation10 + $0x1608] sm:$0xff] }
 0xa41   :  { %v18702_v39 = vcombine.low %v8934_v54, %v8946_v23  ;;  %v18678_v51 = vcombine.low %v8910_v50, %v8922_v0  ;;  %v18561_v48 = vcombine.high %v8791_v19, %v8803_v57  ;;  %v18655_v18 = vcombine.high %v8886_v7, %v8898_v13  ;;  %v8779_v63 = vld [vmem:[#allocation10 + $0x1668] sm:$0xff] }
 0xa42   :  { %12928 = vmatpush1.bf16.msra.mxu0 %v18846_v12  ;;  %v13700_v53 = vrot.slane %v13692_v21, %v21213_v14  ;;  %v13732_v5 = vrot.slane %v13724_v10, %v21213_v14  ;;  %v13707_v3 = vrot.slane %v13693_v40, %v21213_v14  ;;  %v13739_v11 = vrot.slane %v13725_v17, %v21213_v14  ;;  %v8743_v54 = vld [vmem:[#allocation10 + $0x1548] sm:$0xff]  ;;  %v8838_v17 = vld [vmem:[#allocation10 + $0x1840] sm:$0xff] }
 0xa43   :  { %12895 = vmatpush2.bf16.msra.mxu1 %v18750_v6  ;;  %12929 = vmatprep.subr.bf16.mxu0 %v18823_v59  ;;  %v18584_v12 = vcombine.low %v8815_v24, %v8827_v26  ;;  %v8862_v6 = vld [vmem:[#allocation10 + $0x1900] sm:$0xff]  ;;  %v18654_v27 = vcombine.low %v8886_v7, %v8898_v13  ;;  %v18537_v21 = vcombine.high %v8767_v25, %v8779_v63  ;;  %v8755_v23 = vld [vmem:[#allocation10 + $0x15a8] sm:$0xff] }
 0xa44   :  { %12896 = vmatprep.subr.bf16.mxu1 %v18727_v55  ;;  %v21918_v15 = vcombine.low %v13700_v53, %v13732_v5  ;;  %v21920_v45 = vcombine.high %v13700_v53, %v13732_v5  ;;  %v21922_v16 = vcombine.low %v13707_v3, %v13739_v11  ;;  %v21924_v34 = vcombine.high %v13707_v3, %v13739_v11  ;;  %v8874_v59 = vld [vmem:[#allocation10 + $0x1960] sm:$0xff]  ;;  %v8719_v11 = vld [vmem:[#allocation10 + $0x1488] sm:$0xff] }
 0xa45   :  { %v18560_v55 = vcombine.low %v8791_v19, %v8803_v57  ;;  %v18631_v10 = vcombine.high %v8862_v6, %v8874_v59  ;;  %v18630_v5 = vcombine.low %v8862_v6, %v8874_v59  ;;  %v9199_v24 = vld [vmem:[#allocation10 + $0x2388] sm:$0xff]  ;;  %v18512_v50 = vcombine.low %v8743_v54, %v8755_v23 }
 0xa46   :  { %12930 = vmatpush1.bf16.msra.mxu0 %v18822_v60  ;;  %v8850_v60 = vld [vmem:[#allocation10 + $0x18a0] sm:$0xff]  ;;  %v9211_v26 = vld [vmem:[#allocation10 + $0x23e8] sm:$0xff] }
 0xa47   :  { %12897 = vmatpush2.bf16.msra.mxu1 %v18726_v31  ;;  %12931 = vmatprep.subr.bf16.mxu0 %v18799_v30  ;;  %v18536_v31 = vcombine.low %v8767_v25, %v8779_v63  ;;  %v18513_v30 = vcombine.high %v8743_v54, %v8755_v23  ;;  %v18607_v3 = vcombine.high %v8838_v17, %v8850_v60  ;;  %v8707_v19 = vld [vmem:[#allocation10 + $0x1428] sm:$0xff] }
 0xa48   :  { %12898 = vmatprep.subr.bf16.mxu1 %v18703_v49  ;;  %v8731_v49 = vld [vmem:[#allocation10 + $0x14e8] sm:$0xff]  ;;  %v18606_v0 = vcombine.low %v8838_v17, %v8850_v60 }
 0xa49   :  { %v9175_v57 = vld [vmem:[#allocation10 + $0x22c8] sm:$0xff]  ;;  %v18488_v13 = vcombine.low %v8719_v11, %v8731_v49 }
 0xa4a   :  { %12932 = vmatpush1.bf16.msra.mxu0 %v18798_v9  ;;  %v18489_v9 = vcombine.high %v8719_v11, %v8731_v49  ;;  %v9187_v7 = vld [vmem:[#allocation10 + $0x2328] sm:$0xff] }
 0xa4b   :  { %12899 = vmatpush2.bf16.msra.mxu1 %v18702_v39  ;;  %12958 = vmatprep.subr.bf16.mxu0 %v18585_v61  ;;  %v21932_v39 = vld [vmem:[#allocation13 + $0x20] sm:$0xff]  ;;  %v18969_v61 = vcombine.high %v9199_v24, %v9211_v26  ;;  %v8671_v25 = vld [vmem:[#allocation10 + $0x1308] sm:$0xff]  ;;  %v18944_v54 = vcombine.low %v9175_v57, %v9187_v7 }
 0xa4c   :  { %12900 = vmatprep.subr.bf16.mxu1 %v18679_v41  ;;  %v8695_v41 = vld [vmem:[#allocation10 + $0x13c8] sm:$0xff]  ;;  %v9259_v6 = vrot.slane %v21932_v39, %v21171_v47 }
 0xa4d   :  { %v21926_v29 = vpop.f32.mrf.mxu0  ;;  %12950 = vmatmul.mubr.bf16.vlgmr.msra.gmra.mxu0 %v21765_v22  ;;  %v8683_v63 = vld [vmem:[#allocation10 + $0x1368] sm:$0xff] }
 0xa4e   :  { %12959 = vmatpush1.bf16.msra.mxu0 %v18584_v12  ;;  %12990 = vmatprep.mubr.bf16.mxu0 %v21781_v8  ;;  %v9255_v12 = vrot.slane %v21932_v39, %v21166_v42  ;;  %v9151_v59 = vld [vmem:[#allocation10 + $0x2208] sm:$0xff]  ;;  %v18441_v23 = vcombine.high %v8671_v25, %v8683_v63  ;;  %v18440_v49 = vcombine.low %v8671_v25, %v8683_v63 }
 0xa4f   :  { %v21930_v4 = vpop.f32.mrf.mxu0  ;;  %12901 = vmatpush2.bf16.msra.mxu1 %v18678_v51  ;;  %12960 = vmatprep.subr.bf16.mxu0 %v18561_v48  ;;  %v18968_v51 = vcombine.low %v9199_v24, %v9211_v26  ;;  %v18465_v48 = vcombine.high %v8695_v41, %v8707_v19  ;;  %v8647_v60 = vld [vmem:[#allocation10 + $0x1248] sm:$0xff] }
 0xa50   :  { %12902 = vmatprep.subr.bf16.mxu1 %v18655_v18  ;;  %v18945_v18 = vcombine.high %v9175_v57, %v9187_v7 }
 0xa51   :  { %v12627_v40 = vpop.f32.mrf.mxu0 }
 0xa52   :  { %12961 = vmatpush1.bf16.msra.mxu0 %v18560_v55  ;;  %v9163_v55 = vld [vmem:[#allocation10 + $0x2268] sm:$0xff] }
 0xa53   :  { %v12628_v53 = vpop.f32.mrf.mxu0  ;;  %12903 = vmatpush2.bf16.msra.mxu1 %v18654_v27  ;;  %12962 = vmatprep.subr.bf16.mxu0 %v18537_v21  ;;  %v18464_v21 = vcombine.low %v8695_v41, %v8707_v19  ;;  %v18921_v17 = vcombine.high %v9151_v59, %v9163_v55  ;;  %v18920_v26 = vcombine.low %v9151_v59, %v9163_v55  ;;  %v9019_v41 = vld [vmem:[#allocation10 + $0x1de8] sm:$0xff] }
 0xa54   :  { %12904 = vmatprep.subr.bf16.mxu1 %v18631_v10  ;;  %v9115_v19 = vld [vmem:[#allocation10 + $0x20e8] sm:$0xff] }
 0xa55   :  { %v8959_v55 = vld [vmem:[#allocation10 + $0x1c08] sm:$0xff] }
 0xa56   :  { %12963 = vmatpush1.bf16.msra.mxu0 %v18536_v31  ;;  %v8659_v31 = vld [vmem:[#allocation10 + $0x12a8] sm:$0xff] }
 0xa57   :  { %12905 = vmatpush2.bf16.msra.mxu1 %v18630_v5  ;;  %12964 = vmatprep.subr.bf16.mxu0 %v18513_v30  ;;  %v9127_v30 = vld [vmem:[#allocation10 + $0x2148] sm:$0xff]  ;;  %v18416_v57 = vcombine.low %v8647_v60, %v8659_v31 }
 0xa58   :  { %12906 = vmatprep.subr.bf16.mxu1 %v18607_v3  ;;  %v9139_v3 = vld [vmem:[#allocation10 + $0x21a8] sm:$0xff] }
 0xa59   :  { %v18896_v7 = vcombine.low %v9127_v30, %v9139_v3 }
 0xa5a   :  { %12965 = vmatpush1.bf16.msra.mxu0 %v18512_v50  ;;  %v18417_v50 = vcombine.high %v8647_v60, %v8659_v31  ;;  %v8935_v60 = vld [vmem:[#allocation10 + $0x1b48] sm:$0xff] }
 0xa5b   :  { %12907 = vmatpush2.bf16.msra.mxu1 %v18606_v0  ;;  %12966 = vmatprep.subr.bf16.mxu0 %v18489_v9  ;;  %v18897_v9 = vcombine.high %v9127_v30, %v9139_v3  ;;  %v8947_v31 = vld [vmem:[#allocation10 + $0x1ba8] sm:$0xff] }
 0xa5c   :  { %12999 = vmatprep.subr.bf16.mxu1 %v18969_v61  ;;  %v9007_v61 = vld [vmem:[#allocation10 + $0x1d88] sm:$0xff] }
 0xa5d   :  { %v18776_v25 = vcombine.low %v9007_v61, %v9019_v41  ;;  %v9043_v30 = vld [vmem:[#allocation10 + $0x1ea8] sm:$0xff] }
 0xa5e   :  { %v12582_v27 = vpop.f32.mrf.mxu1  ;;  %12909 = vmatmul.mubr.bf16.vlgmr.msra.gmra.mxu1 %v21785_v52  ;;  %12967 = vmatpush1.bf16.msra.mxu0 %v18488_v13  ;;  %v18777_v13 = vcombine.high %v9007_v61, %v9019_v41  ;;  %v8828_v61 = vld [vmem:[#allocation10 + $0x17f0] sm:$0xff]  ;;  %v18704_v41 = vcombine.low %v8935_v60, %v8947_v31 }
 0xa5f   :  { %v12583_v10 = vadd.f32 %v12582_v27, %v9255_v12  ;;  %13000 = vmatpush1.bf16.msra.mxu1 %v18968_v51  ;;  %12968 = vmatprep.subr.bf16.mxu0 %v18465_v48  ;;  %v8983_v12 = vld [vmem:[#allocation10 + $0x1cc8] sm:$0xff] }
 0xa60   :  { %v12584_v40 = vpop.f32.mrf.mxu1  ;;  %13001 = vmatprep.subr.bf16.mxu1 %v18945_v18  ;;  %13031 = vmatprep.mubr.bf16.mxu1 %v21003_v32  ;;  %v8995_v51 = vld [vmem:[#allocation10 + $0x1d28] sm:$0xff] }
 0xa61   :  { %v21941_v53 = vadd.f32 %v21926_v29, %v12583_v10  ;;  %v12585_v5 = vadd.f32 %v12584_v40, %v9259_v6  ;;  %v9103_v29 = vld [vmem:[#allocation10 + $0x2088] sm:$0xff]  ;;  %v18753_v6 = vcombine.high %v8983_v12, %v8995_v51 }
 0xa62   :  { %v12586_v11 = vpop.f32.mrf.mxu1  ;;  %12969 = vmatpush1.bf16.msra.mxu0 %v18464_v21  ;;  %v9079_v48 = vld [vmem:[#allocation10 + $0x1fc8] sm:$0xff]  ;;  %v18872_v63 = vcombine.low %v9103_v29, %v9115_v19 }
 0xa63   :  { %v21944_v24 = vadd.f32 %v21930_v4, %v12585_v5  ;;  %13002 = vmatpush1.bf16.msra.mxu1 %v18944_v54  ;;  %12970 = vmatprep.subr.bf16.mxu0 %v18441_v23  ;;  %v18873_v4 = vcombine.high %v9103_v29, %v9115_v19  ;;  %v9091_v18 = vld [vmem:[#allocation10 + $0x2028] sm:$0xff]  ;;  %v18752_v54 = vcombine.low %v8983_v12, %v8995_v51  ;;  %v8804_v12 = vld [vmem:[#allocation10 + $0x1730] sm:$0xff] }
 0xa64   :  { %v12587_v0 = vpop.f32.mrf.mxu1  ;;  %13003 = vmatprep.subr.bf16.mxu1 %v18921_v17  ;;  %v18849_v59 = vcombine.high %v9079_v48, %v9091_v18  ;;  %v8971_v27 = vld [vmem:[#allocation10 + $0x1c68] sm:$0xff]  ;;  %v18848_v23 = vcombine.low %v9079_v48, %v9091_v18 }
 0xa65   :  { %v9055_v21 = vld [vmem:[#allocation10 + $0x1f08] sm:$0xff]  ;;  %v18729_v40 = vcombine.high %v8959_v55, %v8971_v27  ;;  %v18728_v3 = vcombine.low %v8959_v55, %v8971_v27  ;;  %v8780_v55 = vld [vmem:[#allocation10 + $0x1670] sm:$0xff] }
 0xa66   :  { %12971 = vmatpush1.bf16.msra.mxu0 %v18440_v49  ;;  %v9067_v10 = vld [vmem:[#allocation10 + $0x1f68] sm:$0xff]  ;;  %v18705_v49 = vcombine.high %v8935_v60, %v8947_v31  ;;  %v8744_v31 = vld [vmem:[#allocation10 + $0x1550] sm:$0xff] }
 0xa67   :  { %13004 = vmatpush1.bf16.msra.mxu1 %v18920_v26  ;;  %12972 = vmatprep.subr.bf16.mxu0 %v18417_v50  ;;  %v18825_v17 = vcombine.high %v9055_v21, %v9067_v10  ;;  %v9031_v5 = vld [vmem:[#allocation10 + $0x1e48] sm:$0xff]  ;;  %v18824_v11 = vcombine.low %v9055_v21, %v9067_v10 }
 0xa68   :  { %13005 = vmatprep.subr.bf16.mxu1 %v18897_v9  ;;  %v18801_v26 = vcombine.high %v9031_v5, %v9043_v30  ;;  %v8911_v50 = vld [vmem:[#allocation10 + $0x1a88] sm:$0xff]  ;;  %v8816_v9 = vld [vmem:[#allocation10 + $0x1790] sm:$0xff]  ;;  %v18800_v29 = vcombine.low %v9031_v5, %v9043_v30 }
 0xa69   :  { %v8923_v0 = vld [vmem:[#allocation10 + $0x1ae8] sm:$0xff]  ;;  %v18586_v48 = vcombine.low %v8816_v9, %v8828_v61  ;;  %v8756_v5 = vld [vmem:[#allocation10 + $0x15b0] sm:$0xff] }
 0xa6a   :  { %12973 = vmatpush1.bf16.msra.mxu0 %v18416_v57  ;;  %v18681_v19 = vcombine.high %v8911_v50, %v8923_v0  ;;  %v18587_v57 = vcombine.high %v8816_v9, %v8828_v61  ;;  %v18680_v51 = vcombine.low %v8911_v50, %v8923_v0  ;;  %v8851_v60 = vld [vmem:[#allocation10 + $0x18a8] sm:$0xff]  ;;  %v18515_v50 = vcombine.high %v8744_v31, %v8756_v5  ;;  %v9200_v0 = vld [vmem:[#allocation10 + $0x2390] sm:$0xff] }
 0xa6b   :  { %13006 = vmatpush1.bf16.msra.mxu1 %v18896_v7  ;;  %12974 = vmatprep.subr.bf16.mxu0 %v18777_v13  ;;  %v8887_v7 = vld [vmem:[#allocation10 + $0x19c8] sm:$0xff]  ;;  %v9212_v9 = vld [vmem:[#allocation10 + $0x23f0] sm:$0xff] }
 0xa6c   :  { %13007 = vmatprep.subr.bf16.mxu1 %v18873_v4  ;;  %v8899_v13 = vld [vmem:[#allocation10 + $0x1a28] sm:$0xff]  ;;  %v8792_v4 = vld [vmem:[#allocation10 + $0x16d0] sm:$0xff] }
 0xa6d   :  { %v18657_v18 = vcombine.high %v8887_v7, %v8899_v13  ;;  %v18656_v21 = vcombine.low %v8887_v7, %v8899_v13  ;;  %v18562_v10 = vcombine.low %v8792_v4, %v8804_v12  ;;  %v8720_v61 = vld [vmem:[#allocation10 + $0x1490] sm:$0xff] }
 0xa6e   :  { %12975 = vmatpush2.bf16.msra.mxu0 %v18776_v25  ;;  %v18563_v25 = vcombine.high %v8792_v4, %v8804_v12  ;;  %v9176_v13 = vld [vmem:[#allocation10 + $0x22d0] sm:$0xff] }
 0xa6f   :  { %13008 = vmatpush1.bf16.msra.mxu1 %v18872_v63  ;;  %12976 = vmatprep.subr.bf16.mxu0 %v18753_v6  ;;  %v8863_v63 = vld [vmem:[#allocation10 + $0x1908] sm:$0xff]  ;;  %v9188_v4 = vld [vmem:[#allocation10 + $0x2330] sm:$0xff] }
 0xa70   :  { %13009 = vmatprep.subr.bf16.mxu1 %v18849_v59  ;;  %v8875_v6 = vld [vmem:[#allocation10 + $0x1968] sm:$0xff]  ;;  %v8768_v59 = vld [vmem:[#allocation10 + $0x1610] sm:$0xff] }
 0xa71   :  { %v8696_v12 = vld [vmem:[#allocation10 + $0x13d0] sm:$0xff] }
 0xa72   :  { %12977 = vmatpush2.bf16.msra.mxu0 %v18752_v54  ;;  %v18633_v54 = vcombine.high %v8863_v63, %v8875_v6 }
 0xa73   :  { %13010 = vmatpush1.bf16.msra.mxu1 %v18848_v23  ;;  %12978 = vmatprep.subr.bf16.mxu0 %v18729_v40  ;;  %v18539_v40 = vcombine.high %v8768_v59, %v8780_v55 }
 0xa74   :  { %13011 = vmatprep.subr.bf16.mxu1 %v18825_v17  ;;  %v8839_v17 = vld [vmem:[#allocation10 + $0x1848] sm:$0xff] }
 0xa76   :  { %12979 = vmatpush2.bf16.msra.mxu0 %v18728_v3  ;;  %v18632_v3 = vcombine.low %v8863_v63, %v8875_v6  ;;  %v18947_v63 = vcombine.high %v9176_v13, %v9188_v4  ;;  %v9267_v6 = vrot.slane %v21932_v39, %v21195_v43 }
 0xa77   :  { %13012 = vmatpush1.bf16.msra.mxu1 %v18824_v11  ;;  %12980 = vmatprep.subr.bf16.mxu0 %v18705_v49  ;;  %v18538_v11 = vcombine.low %v8768_v59, %v8780_v55  ;;  %v18609_v49 = vcombine.high %v8839_v17, %v8851_v60  ;;  %v9152_v55 = vld [vmem:[#allocation10 + $0x2210] sm:$0xff] }
 0xa78   :  { %13013 = vmatprep.subr.bf16.mxu1 %v18801_v26 }
 0xa7a   :  { %12981 = vmatpush2.bf16.msra.mxu0 %v18704_v41  ;;  %v8732_v41 = vld [vmem:[#allocation10 + $0x14f0] sm:$0xff] }
 0xa7b   :  { %13014 = vmatpush1.bf16.msra.mxu1 %v18800_v29  ;;  %12982 = vmatprep.subr.bf16.mxu0 %v18681_v19  ;;  %v18608_v29 = vcombine.low %v8839_v17, %v8851_v60  ;;  %v18514_v19 = vcombine.low %v8744_v31, %v8756_v5  ;;  %v18491_v7 = vcombine.high %v8720_v61, %v8732_v41 }
 0xa7c   :  { %13040 = vmatprep.subr.bf16.mxu1 %v18587_v57  ;;  %v18971_v57 = vcombine.high %v9200_v0, %v9212_v9  ;;  %v18946_v60 = vcombine.low %v9176_v13, %v9188_v4  ;;  %v9104_v4 = vld [vmem:[#allocation10 + $0x2090] sm:$0xff] }
 0xa7e   :  { %v21946_v27 = vpop.f32.mrf.mxu1  ;;  %12983 = vmatpush2.bf16.msra.mxu0 %v18680_v51  ;;  %13032 = vmatmul.mubr.bf16.vlgmr.msra.gmra.mxu1 %v21765_v22  ;;  %v8708_v51 = vld [vmem:[#allocation10 + $0x1430] sm:$0xff] }
 0xa7f   :  { %13041 = vmatpush1.bf16.msra.mxu1 %v18586_v48  ;;  %13072 = vmatprep.mubr.bf16.mxu1 %v21781_v8  ;;  %v9263_v48 = vrot.slane %v21932_v39, %v21192_v38  ;;  %v18467_v59 = vcombine.high %v8696_v12, %v8708_v51  ;;  %v18466_v5 = vcombine.low %v8696_v12, %v8708_v51 }
 0xa80   :  { %v21950_v23 = vpop.f32.mrf.mxu1  ;;  %12984 = vmatprep.subr.bf16.mxu0 %v18657_v18  ;;  %13042 = vmatprep.subr.bf16.mxu1 %v18563_v25  ;;  %v18970_v18 = vcombine.low %v9200_v0, %v9212_v9  ;;  %v18490_v25 = vcombine.low %v8720_v61, %v8732_v41  ;;  %v8648_v9 = vld [vmem:[#allocation10 + $0x1250] sm:$0xff] }
 0xa81   :  { %v8660_v61 = vld [vmem:[#allocation10 + $0x12b0] sm:$0xff] }
 0xa82   :  { %v12709_v30 = vpop.f32.mrf.mxu1  ;;  %12985 = vmatpush2.bf16.msra.mxu0 %v18656_v21  ;;  %v9164_v21 = vld [vmem:[#allocation10 + $0x2270] sm:$0xff] }
 0xa83   :  { %13043 = vmatpush1.bf16.msra.mxu1 %v18562_v10  ;;  %12986 = vmatprep.subr.bf16.mxu0 %v18633_v54  ;;  %v8672_v54 = vld [vmem:[#allocation10 + $0x1310] sm:$0xff]  ;;  %v18923_v30 = vcombine.high %v9152_v55, %v9164_v21 }
 0xa84   :  { %v12710_v26 = vpop.f32.mrf.mxu1  ;;  %13044 = vmatprep.subr.bf16.mxu1 %v18539_v40  ;;  %v8684_v40 = vld [vmem:[#allocation10 + $0x1370] sm:$0xff] }
 0xa85   :  { %v9128_v26 = vld [vmem:[#allocation10 + $0x2150] sm:$0xff] }
 0xa86   :  { %12987 = vmatpush2.bf16.msra.mxu0 %v18632_v3 }
 0xa87   :  { %13045 = vmatpush1.bf16.msra.mxu1 %v18538_v11  ;;  %12988 = vmatprep.subr.bf16.mxu0 %v18609_v49  ;;  %v18443_v49 = vcombine.high %v8672_v54, %v8684_v40 }
 0xa88   :  { %13046 = vmatprep.subr.bf16.mxu1 %v18515_v50  ;;  %v9140_v50 = vld [vmem:[#allocation10 + $0x21b0] sm:$0xff] }
 0xa89   :  { %v18899_v13 = vcombine.high %v9128_v26, %v9140_v50 }
 0xa8a   :  { %12989 = vmatpush2.bf16.msra.mxu0 %v18608_v29 }
 0xa8b   :  { %13047 = vmatpush1.bf16.msra.mxu1 %v18514_v19  ;;  %13081 = vmatprep.subr.bf16.mxu0 %v18971_v57  ;;  %v18922_v57 = vcombine.low %v9152_v55, %v9164_v21  ;;  %v18418_v21 = vcombine.low %v8648_v9, %v8660_v61 }
 0xa8c   :  { %13048 = vmatprep.subr.bf16.mxu1 %v18491_v7 }
 0xa8d   :  { %v12664_v10 = vpop.f32.mrf.mxu0  ;;  %12991 = vmatmul.mubr.bf16.vlgmr.msra.gmra.mxu0 %v21785_v52 }
 0xa8e   :  { %v12665_v17 = vadd.f32 %v12664_v10, %v9263_v48  ;;  %13082 = vmatpush1.bf16.msra.mxu0 %v18970_v18  ;;  %13113 = vmatprep.mubr.bf16.mxu0 %v21003_v32  ;;  %v18419_v48 = vcombine.high %v8648_v9, %v8660_v61  ;;  %v9116_v18 = vld [vmem:[#allocation10 + $0x20f0] sm:$0xff] }
 0xa8f   :  { %v12666_v31 = vpop.f32.mrf.mxu0  ;;  %13049 = vmatpush1.bf16.msra.mxu1 %v18490_v25  ;;  %13083 = vmatprep.subr.bf16.mxu0 %v18947_v63  ;;  %v9008_v25 = vld [vmem:[#allocation10 + $0x1d90] sm:$0xff]  ;;  %v18875_v10 = vcombine.high %v9104_v4, %v9116_v18 }
 0xa90   :  { %v12706_v3 = vadd.f32 %v21946_v27, %v12665_v17  ;;  %v12667_v11 = vadd.f32 %v12666_v31, %v9267_v6  ;;  %13050 = vmatprep.subr.bf16.mxu1 %v18467_v59  ;;  %v18442_v27 = vcombine.low %v8672_v54, %v8684_v40  ;;  %v9020_v63 = vld [vmem:[#allocation10 + $0x1df0] sm:$0xff] }
 0xa91   :  { %v12668_v0 = vpop.f32.mrf.mxu0  ;;  %v9080_v54 = vld [vmem:[#allocation10 + $0x1fd0] sm:$0xff]  ;;  %v18778_v9 = vcombine.low %v9008_v25, %v9020_v63 }
 0xa92   :  { %v13340_v41 = vcombine.low %v21941_v53, %v12706_v3  ;;  %v13341_v29 = vcombine.high %v21941_v53, %v12706_v3  ;;  %v12708_v19 = vadd.f32 %v21950_v23, %v12667_v11  ;;  %13084 = vmatpush1.bf16.msra.mxu0 %v18946_v60  ;;  %v18898_v53 = vcombine.low %v9128_v26, %v9140_v50  ;;  %v8996_v3 = vld [vmem:[#allocation10 + $0x1d30] sm:$0xff] }
 0xa93   :  { %v12669_v7 = vpop.f32.mrf.mxu0  ;;  %13051 = vmatpush1.bf16.msra.mxu1 %v18466_v5  ;;  %13085 = vmatprep.subr.bf16.mxu0 %v18923_v30  ;;  %v9092_v5 = vld [vmem:[#allocation10 + $0x2030] sm:$0xff]  ;;  %v18874_v11 = vcombine.low %v9104_v4, %v9116_v18 }
 0xa94   :  { %v13356_v12 = vcombine.low %v21944_v24, %v12708_v19  ;;  %v13357_v51 = vcombine.high %v21944_v24, %v12708_v19  ;;  %13052 = vmatprep.subr.bf16.mxu1 %v18443_v49  ;;  %v13348_v23 = vrot.slane %v13340_v41, %v21205_v20  ;;  %v13355_v6 = vrot.slane %v13341_v29, %v21205_v20  ;;  %v8984_v30 = vld [vmem:[#allocation10 + $0x1cd0] sm:$0xff] }
 0xa95   :  { %v18779_v24 = vcombine.high %v9008_v25, %v9020_v63  ;;  %v18851_v61 = vcombine.high %v9080_v54, %v9092_v5  ;;  %v18755_v41 = vcombine.high %v8984_v30, %v8996_v3  ;;  %v9056_v29 = vld [vmem:[#allocation10 + $0x1f10] sm:$0xff]  ;;  %v18754_v63 = vcombine.low %v8984_v30, %v8996_v3 }
 0xa96   :  { %v13364_v59 = vrot.slane %v13356_v12, %v21205_v20  ;;  %v13371_v55 = vrot.slane %v13357_v51, %v21205_v20  ;;  %13086 = vmatpush1.bf16.msra.mxu0 %v18922_v57  ;;  %v8960_v4 = vld [vmem:[#allocation10 + $0x1c10] sm:$0xff]  ;;  %v18850_v51 = vcombine.low %v9080_v54, %v9092_v5 }
 0xa97   :  { %13053 = vmatpush1.bf16.msra.mxu1 %v18442_v27  ;;  %13087 = vmatprep.subr.bf16.mxu0 %v18899_v13  ;;  %v9068_v13 = vld [vmem:[#allocation10 + $0x1f70] sm:$0xff] }
 0xa98   :  { %v13404_v40 = vcombine.low %v13348_v23, %v13364_v59  ;;  %v13405_v17 = vcombine.high %v13348_v23, %v13364_v59  ;;  %v13420_v60 = vcombine.low %v13355_v6, %v13371_v55  ;;  %v13421_v31 = vcombine.high %v13355_v6, %v13371_v55  ;;  %13054 = vmatprep.subr.bf16.mxu1 %v18419_v48  ;;  %v8972_v12 = vld [vmem:[#allocation10 + $0x1c70] sm:$0xff] }
 0xa99   :  { %v18827_v23 = vcombine.high %v9056_v29, %v9068_v13  ;;  %v18731_v6 = vcombine.high %v8960_v4, %v8972_v12  ;;  %v9032_v59 = vld [vmem:[#allocation10 + $0x1e50] sm:$0xff]  ;;  %v18730_v3 = vcombine.low %v8960_v4, %v8972_v12  ;;  %v8793_v12 = vld [vmem:[#allocation10 + $0x16d8] sm:$0xff] }
 0xa9a   :  { %v13412_v49 = vrot.slane %v13404_v40, %v21213_v14  ;;  %v13419_v26 = vrot.slane %v13405_v17, %v21213_v14  ;;  %v13428_v50 = vrot.slane %v13420_v60, %v21213_v14  ;;  %v13435_v0 = vrot.slane %v13421_v31, %v21213_v14  ;;  %13088 = vmatpush1.bf16.msra.mxu0 %v18898_v53  ;;  %v9044_v55 = vld [vmem:[#allocation10 + $0x1eb0] sm:$0xff] }
 0xa9b   :  { %13055 = vmatpush1.bf16.msra.mxu1 %v18418_v21  ;;  %13089 = vmatprep.subr.bf16.mxu0 %v18875_v10  ;;  %v8936_v21 = vld [vmem:[#allocation10 + $0x1b50] sm:$0xff]  ;;  %v18826_v60 = vcombine.low %v9056_v29, %v9068_v13 }
 0xa9c   :  { %v18982_v19 = vcombine.low %v13412_v49, %v13419_v26  ;;  %v18984_v57 = vcombine.high %v13412_v49, %v13419_v26  ;;  %v18986_v7 = vcombine.low %v13428_v50, %v13435_v0  ;;  %v18988_v27 = vcombine.high %v13428_v50, %v13435_v0  ;;  %13056 = vmatprep.subr.bf16.mxu1 %v18779_v24  ;;  %v8948_v10 = vld [vmem:[#allocation10 + $0x1bb0] sm:$0xff]  ;;  %v8817_v50 = vld [vmem:[#allocation10 + $0x1798] sm:$0xff] }
 0xa9d   :  { %v18803_v49 = vcombine.high %v9032_v59, %v9044_v55  ;;  %v18707_v26 = vcombine.high %v8936_v21, %v8948_v10  ;;  %v8829_v0 = vld [vmem:[#allocation10 + $0x17f8] sm:$0xff] }
 0xa9e   :  { %13090 = vmatpush1.bf16.msra.mxu0 %v18874_v11  ;;  %v13756_v48 = vrot.slane %v18982_v19, %v21205_v20  ;;  %v13772_v18 = vrot.slane %v18984_v57, %v21205_v20  ;;  %v13788_v53 = vrot.slane %v18986_v7, %v21205_v20  ;;  %v13804_v25 = vrot.slane %v18988_v27, %v21205_v20  ;;  %v8912_v19 = vld [vmem:[#allocation10 + $0x1a90] sm:$0xff] }
 0xa9f   :  { %13057 = vmatpush2.bf16.msra.mxu1 %v18778_v9  ;;  %13091 = vmatprep.subr.bf16.mxu0 %v18851_v61  ;;  %v8924_v57 = vld [vmem:[#allocation10 + $0x1af0] sm:$0xff]  ;;  %v18802_v7 = vcombine.low %v9032_v59, %v9044_v55  ;;  %v18706_v27 = vcombine.low %v8936_v21, %v8948_v10  ;;  %v18589_v13 = vcombine.high %v8817_v50, %v8829_v0  ;;  %v8781_v59 = vld [vmem:[#allocation10 + $0x1678] sm:$0xff] }
 0xaa0   :  { %13058 = vmatprep.subr.bf16.mxu1 %v18755_v41  ;;  %v13812_v24 = vcombine.low %v13756_v48, %v13772_v18  ;;  %v13844_v54 = vcombine.low %v13788_v53, %v13804_v25  ;;  %v13813_v40 = vcombine.high %v13756_v48, %v13772_v18  ;;  %v13845_v17 = vcombine.high %v13788_v53, %v13804_v25  ;;  %v8888_v48 = vld [vmem:[#allocation10 + $0x19d0] sm:$0xff] }
 0xaa1   :  { %v18683_v4 = vcombine.high %v8912_v19, %v8924_v57  ;;  %v8900_v18 = vld [vmem:[#allocation10 + $0x1a30] sm:$0xff]  ;;  %v18588_v53 = vcombine.low %v8817_v50, %v8829_v0  ;;  %v18682_v25 = vcombine.low %v8912_v19, %v8924_v57  ;;  %v8721_v19 = vld [vmem:[#allocation10 + $0x1498] sm:$0xff] }
 0xaa2   :  { %13092 = vmatpush1.bf16.msra.mxu0 %v18850_v51  ;;  %v13820_v31 = vrot.slane %v13812_v24, %v21213_v14  ;;  %v13852_v5 = vrot.slane %v13844_v54, %v21213_v14  ;;  %v13827_v11 = vrot.slane %v13813_v40, %v21213_v14  ;;  %v13859_v30 = vrot.slane %v13845_v17, %v21213_v14  ;;  %v8805_v51 = vld [vmem:[#allocation10 + $0x1738] sm:$0xff]  ;;  %v8864_v21 = vld [vmem:[#allocation10 + $0x1910] sm:$0xff] }
 0xaa3   :  { %13059 = vmatpush2.bf16.msra.mxu1 %v18754_v63  ;;  %13093 = vmatprep.subr.bf16.mxu0 %v18827_v23  ;;  %v18565_v63 = vcombine.high %v8793_v12, %v8805_v51  ;;  %v18659_v23 = vcombine.high %v8888_v48, %v8900_v18  ;;  %v8876_v10 = vld [vmem:[#allocation10 + $0x1970] sm:$0xff]  ;;  %v18564_v24 = vcombine.low %v8793_v12, %v8805_v51  ;;  %v8733_v57 = vld [vmem:[#allocation10 + $0x14f8] sm:$0xff] }
 0xaa4   :  { %13060 = vmatprep.subr.bf16.mxu1 %v18731_v6  ;;  %v21980_v9 = vcombine.low %v13820_v31, %v13852_v5  ;;  %v21982_v61 = vcombine.low %v13827_v11, %v13859_v30  ;;  %v21984_v41 = vcombine.high %v13820_v31, %v13852_v5  ;;  %v21986_v29 = vcombine.high %v13827_v11, %v13859_v30  ;;  %v8769_v6 = vld [vmem:[#allocation10 + $0x1618] sm:$0xff]  ;;  %v8840_v30 = vld [vmem:[#allocation10 + $0x1850] sm:$0xff] }
 0xaa5   :  { %v18658_v40 = vcombine.low %v8888_v48, %v8900_v18  ;;  %v18541_v17 = vcombine.high %v8769_v6, %v8781_v59  ;;  %v8745_v31 = vld [vmem:[#allocation10 + $0x1558] sm:$0xff]  ;;  %v18493_v12 = vcombine.high %v8721_v19, %v8733_v57 }
 0xaa6   :  { %13094 = vmatpush1.bf16.msra.mxu0 %v18826_v60  ;;  %v18635_v60 = vcombine.high %v8864_v21, %v8876_v10  ;;  %v8757_v5 = vld [vmem:[#allocation10 + $0x15b8] sm:$0xff] }
 0xaa7   :  { %13061 = vmatpush2.bf16.msra.mxu1 %v18730_v3  ;;  %13095 = vmatprep.subr.bf16.mxu0 %v18803_v49  ;;  %v8852_v3 = vld [vmem:[#allocation10 + $0x18b0] sm:$0xff]  ;;  %v18540_v49 = vcombine.low %v8769_v6, %v8781_v59  ;;  %v18517_v50 = vcombine.high %v8745_v31, %v8757_v5  ;;  %v8697_v48 = vld [vmem:[#allocation10 + $0x13d8] sm:$0xff] }
 0xaa8   :  { %13062 = vmatprep.subr.bf16.mxu1 %v18707_v26  ;;  %v18611_v0 = vcombine.high %v8840_v30, %v8852_v3  ;;  %v8709_v18 = vld [vmem:[#allocation10 + $0x1438] sm:$0xff] }
 0xaa9   :  { %v18469_v6 = vcombine.high %v8697_v48, %v8709_v18 }
 0xaaa   :  { %13096 = vmatpush1.bf16.msra.mxu0 %v18802_v7  ;;  %v9201_v7 = vld [vmem:[#allocation10 + $0x2398] sm:$0xff] }
 0xaab   :  { %13063 = vmatpush2.bf16.msra.mxu1 %v18706_v27  ;;  %13122 = vmatprep.subr.bf16.mxu0 %v18589_v13  ;;  %v9213_v27 = vld [vmem:[#allocation10 + $0x23f8] sm:$0xff]  ;;  %v18516_v13 = vcombine.low %v8745_v31, %v8757_v5 }
 0xaac   :  { %13064 = vmatprep.subr.bf16.mxu1 %v18683_v4  ;;  %v18610_v4 = vcombine.low %v8840_v30, %v8852_v3  ;;  %v18973_v51 = vcombine.high %v9201_v7, %v9213_v27  ;;  %v8649_v3 = vld [vmem:[#allocation10 + $0x1258] sm:$0xff] }
 0xaad   :  { %v21988_v55 = vpop.f32.mrf.mxu0  ;;  %13114 = vmatmul.mubr.bf16.vlgmr.msra.gmra.mxu0 %v21765_v22 }
 0xaae   :  { %13123 = vmatpush1.bf16.msra.mxu0 %v18588_v53  ;;  %13154 = vmatprep.mubr.bf16.mxu0 %v21781_v8  ;;  %v18634_v8 = vcombine.low %v8864_v21, %v8876_v10  ;;  %v9177_v53 = vld [vmem:[#allocation10 + $0x22d8] sm:$0xff] }
 0xaaf   :  { %v21992_v54 = vpop.f32.mrf.mxu0  ;;  %13065 = vmatpush2.bf16.msra.mxu1 %v18682_v25  ;;  %13124 = vmatprep.subr.bf16.mxu0 %v18565_v63  ;;  %v9189_v25 = vld [vmem:[#allocation10 + $0x2338] sm:$0xff]  ;;  %v18492_v63 = vcombine.low %v8721_v19, %v8733_v57 }
 0xab0   :  { %13066 = vmatprep.subr.bf16.mxu1 %v18659_v23  ;;  %v18972_v23 = vcombine.low %v9201_v7, %v9213_v27  ;;  %v18949_v59 = vcombine.high %v9177_v53, %v9189_v25  ;;  %v8673_v21 = vld [vmem:[#allocation10 + $0x1318] sm:$0xff]  ;;  %v18948_v31 = vcombine.low %v9177_v53, %v9189_v25 }
 0xab1   :  { %v12791_v11 = vpop.f32.mrf.mxu0  ;;  %v8685_v10 = vld [vmem:[#allocation10 + $0x1378] sm:$0xff] }
 0xab2   :  { %13125 = vmatpush1.bf16.msra.mxu0 %v18564_v24  ;;  %v9153_v24 = vld [vmem:[#allocation10 + $0x2218] sm:$0xff]  ;;  %v18445_v5 = vcombine.high %v8673_v21, %v8685_v10 }
 0xab3   :  { %v12792_v26 = vpop.f32.mrf.mxu0  ;;  %13067 = vmatpush2.bf16.msra.mxu1 %v18658_v40  ;;  %13126 = vmatprep.subr.bf16.mxu0 %v18541_v17  ;;  %v9165_v40 = vld [vmem:[#allocation10 + $0x2278] sm:$0xff] }
 0xab4   :  { %13068 = vmatprep.subr.bf16.mxu1 %v18635_v60  ;;  %v18468_v60 = vcombine.low %v8697_v48, %v8709_v18  ;;  %v18925_v30 = vcombine.high %v9153_v24, %v9165_v40  ;;  %v9129_v26 = vld [vmem:[#allocation10 + $0x2158] sm:$0xff]  ;;  %v18924_v19 = vcombine.low %v9153_v24, %v9165_v40 }
 0xab6   :  { %13127 = vmatpush1.bf16.msra.mxu0 %v18540_v49  ;;  %v8661_v49 = vld [vmem:[#allocation10 + $0x12b8] sm:$0xff] }
 0xab7   :  { %13069 = vmatpush2.bf16.msra.mxu1 %v18634_v8  ;;  %13128 = vmatprep.subr.bf16.mxu0 %v18517_v50  ;;  %v9141_v8 = vld [vmem:[#allocation10 + $0x21b8] sm:$0xff]  ;;  %v18421_v57 = vcombine.high %v8649_v3, %v8661_v49  ;;  %v18420_v48 = vcombine.low %v8649_v3, %v8661_v49 }
 0xab8   :  { %13070 = vmatprep.subr.bf16.mxu1 %v18611_v0  ;;  %v18444_v0 = vcombine.low %v8673_v21, %v8685_v10  ;;  %v18901_v27 = vcombine.high %v9129_v26, %v9141_v8  ;;  %v18900_v18 = vcombine.low %v9129_v26, %v9141_v8 }
 0xaba   :  { %13129 = vmatpush1.bf16.msra.mxu0 %v18516_v13  ;;  %v9009_v13 = vld [vmem:[#allocation10 + $0x1d98] sm:$0xff] }
 0xabb   :  { %13071 = vmatpush2.bf16.msra.mxu1 %v18610_v4  ;;  %13130 = vmatprep.subr.bf16.mxu0 %v18493_v12  ;;  %v9021_v4 = vld [vmem:[#allocation10 + $0x1df8] sm:$0xff] }
 0xabc   :  { %13163 = vmatprep.subr.bf16.mxu1 %v18973_v51  ;;  %v9105_v12 = vld [vmem:[#allocation10 + $0x2098] sm:$0xff]  ;;  %v18781_v53 = vcombine.high %v9009_v13, %v9021_v4  ;;  %v18780_v21 = vcombine.low %v9009_v13, %v9021_v4 }
 0xabd   :  { %v9117_v51 = vld [vmem:[#allocation10 + $0x20f8] sm:$0xff] }
 0xabe   :  { %v21994_v17 = vpop.f32.mrf.mxu1  ;;  %13073 = vmatmul.mubr.bf16.vlgmr.msra.gmra.mxu1 %v21785_v52  ;;  %13131 = vmatpush1.bf16.msra.mxu0 %v18492_v63  ;;  %v18877_v25 = vcombine.high %v9105_v12, %v9117_v51  ;;  %v8985_v63 = vld [vmem:[#allocation10 + $0x1cd8] sm:$0xff]  ;;  %v18876_v10 = vcombine.low %v9105_v12, %v9117_v51 }
 0xabf   :  { %13164 = vmatpush1.bf16.msra.mxu1 %v18972_v23  ;;  %13132 = vmatprep.subr.bf16.mxu0 %v18469_v6  ;;  %v8997_v23 = vld [vmem:[#allocation10 + $0x1d38] sm:$0xff] }
 0xac0   :  { %v21997_v11 = vpop.f32.mrf.mxu1  ;;  %13165 = vmatprep.subr.bf16.mxu1 %v18949_v59  ;;  %13195 = vmatprep.mubr.bf16.mxu1 %v21003_v32  ;;  %v9081_v6 = vld [vmem:[#allocation10 + $0x1fd8] sm:$0xff]  ;;  %v18757_v24 = vcombine.high %v8985_v63, %v8997_v23  ;;  %v18756_v3 = vcombine.low %v8985_v63, %v8997_v23 }
 0xac1   :  { %v9093_v59 = vld [vmem:[#allocation10 + $0x2038] sm:$0xff] }
 0xac2   :  { %v12750_v50 = vpop.f32.mrf.mxu1  ;;  %13133 = vmatpush1.bf16.msra.mxu0 %v18468_v60  ;;  %v18853_v40 = vcombine.high %v9081_v6, %v9093_v59  ;;  %v8961_v60 = vld [vmem:[#allocation10 + $0x1c18] sm:$0xff]  ;;  %v18852_v49 = vcombine.low %v9081_v6, %v9093_v59 }
 0xac3   :  { %13166 = vmatpush1.bf16.msra.mxu1 %v18948_v31  ;;  %13134 = vmatprep.subr.bf16.mxu0 %v18445_v5  ;;  %v8973_v31 = vld [vmem:[#allocation10 + $0x1c78] sm:$0xff] }
 0xac4   :  { %v12751_v7 = vpop.f32.mrf.mxu1  ;;  %13167 = vmatprep.subr.bf16.mxu1 %v18925_v30  ;;  %v9057_v5 = vld [vmem:[#allocation10 + $0x1f18] sm:$0xff]  ;;  %v18733_v26 = vcombine.high %v8961_v60, %v8973_v31 }
 0xac5   :  { %v9069_v30 = vld [vmem:[#allocation10 + $0x1f78] sm:$0xff]  ;;  %v18732_v7 = vcombine.low %v8961_v60, %v8973_v31 }
 0xac6   :  { %13135 = vmatpush1.bf16.msra.mxu0 %v18444_v0  ;;  %v18829_v8 = vcombine.high %v9057_v5, %v9069_v30  ;;  %v8937_v50 = vld [vmem:[#allocation10 + $0x1b58] sm:$0xff] }
 0xac7   :  { %13168 = vmatpush1.bf16.msra.mxu1 %v18924_v19  ;;  %13136 = vmatprep.subr.bf16.mxu0 %v18421_v57  ;;  %v8949_v0 = vld [vmem:[#allocation10 + $0x1bb8] sm:$0xff] }
 0xac8   :  { %13169 = vmatprep.subr.bf16.mxu1 %v18901_v27  ;;  %v9033_v19 = vld [vmem:[#allocation10 + $0x1e58] sm:$0xff]  ;;  %v18828_v27 = vcombine.low %v9057_v5, %v9069_v30  ;;  %v18709_v13 = vcombine.high %v8937_v50, %v8949_v0 }
 0xac9   :  { %v9045_v57 = vld [vmem:[#allocation10 + $0x1eb8] sm:$0xff] }
 0xaca   :  { %13137 = vmatpush1.bf16.msra.mxu0 %v18420_v48  ;;  %v18805_v4 = vcombine.high %v9033_v19, %v9045_v57  ;;  %v8913_v12 = vld [vmem:[#allocation10 + $0x1a98] sm:$0xff]  ;;  %v18708_v48 = vcombine.low %v8937_v50, %v8949_v0  ;;  %v9271_v0 = vrot.slane %v21932_v39, %v21231_v56 }
 0xacb   :  { %13170 = vmatpush1.bf16.msra.mxu1 %v18900_v18  ;;  %13138 = vmatprep.subr.bf16.mxu0 %v18781_v53  ;;  %v8925_v51 = vld [vmem:[#allocation10 + $0x1af8] sm:$0xff]  ;;  %v18804_v18 = vcombine.low %v9033_v19, %v9045_v57  ;;  %v9275_v19 = vrot.slane %v21932_v39, %v21239_v2  ;;  %v14029_v57 = vpack.c.bf16 %v21984_v41, %v21984_v41 }
 0xacc   :  { %13171 = vmatprep.subr.bf16.mxu1 %v18877_v25  ;;  %v18685_v53 = vcombine.high %v8913_v12, %v8925_v51  ;;  %v8889_v25 = vld [vmem:[#allocation10 + $0x19d8] sm:$0xff]  ;;  %v18684_v23 = vcombine.low %v8913_v12, %v8925_v51 }
 0xacd   :  { %v8901_v63 = vld [vmem:[#allocation10 + $0x1a38] sm:$0xff] }
 0xace   :  { %13139 = vmatpush2.bf16.msra.mxu0 %v18780_v21  ;;  %v18661_v6 = vcombine.high %v8889_v25, %v8901_v63  ;;  %v8865_v59 = vld [vmem:[#allocation10 + $0x1918] sm:$0xff] }
 0xacf   :  { %13172 = vmatpush1.bf16.msra.mxu1 %v18876_v10  ;;  %13140 = vmatprep.subr.bf16.mxu0 %v18757_v24  ;;  %v8877_v21 = vld [vmem:[#allocation10 + $0x1978] sm:$0xff]  ;;  %v14028_v10 = vpack.c.bf16 %v21980_v9, %v21980_v9 }
 0xad0   :  { %13173 = vmatprep.subr.bf16.mxu1 %v18853_v40  ;;  %v18660_v40 = vcombine.low %v8889_v25, %v8901_v63  ;;  %v18637_v60 = vcombine.high %v8865_v59, %v8877_v21  ;;  %v8841_v5 = vld [vmem:[#allocation10 + $0x1858] sm:$0xff]  ;;  %v14021_v25 = vpack.c.bf16 %v21862_v33, %v21862_v33 }
 0xad1   :  { %v8853_v30 = vld [vmem:[#allocation10 + $0x18b8] sm:$0xff] }
 0xad2   :  { %13141 = vmatpush2.bf16.msra.mxu0 %v18756_v3  ;;  %v18613_v9 = vcombine.high %v8841_v5, %v8853_v30  ;;  %v18612_v50 = vcombine.low %v8841_v5, %v8853_v30  ;;  %v14023_v30 = vpack.c.bf16 %v21866_v36, %v21866_v36 }
 0xad3   :  { %13174 = vmatpush1.bf16.msra.mxu1 %v18852_v49  ;;  %13142 = vmatprep.subr.bf16.mxu0 %v18733_v26  ;;  %v18636_v49 = vcombine.low %v8865_v59, %v8877_v21 }
 0xad4   :  { %13175 = vmatprep.subr.bf16.mxu1 %v18829_v8  ;;  %v14030_v8 = vpack.c.bf16 %v21982_v61, %v21982_v61  ;;  %v12747_v61 = vadd.f32 %v21994_v17, %v9271_v0 }
 0xad6   :  { %13143 = vmatpush2.bf16.msra.mxu0 %v18732_v7  ;;  %v14022_v7 = vpack.c.bf16 %v21864_v62, %v21864_v62  ;;  %v12788_v41 = vadd.f32 %v21988_v55, %v12747_v61  ;;  %v14031_v55 = vpack.c.bf16 %v21986_v29, %v21986_v29 }
 0xad7   :  { %13176 = vmatpush1.bf16.msra.mxu1 %v18828_v27  ;;  %13144 = vmatprep.subr.bf16.mxu0 %v18709_v13  ;;  %v9283_v27 = vrot.slane %v21932_v39, %v21267_v46 }
 0xad8   :  { %13177 = vmatprep.subr.bf16.mxu1 %v18805_v4  ;;  %v12749_v4 = vadd.f32 %v21997_v11, %v9275_v19 }
 0xada   :  { %13145 = vmatpush2.bf16.msra.mxu0 %v18708_v48 }
 0xadb   :  { %13178 = vmatpush1.bf16.msra.mxu1 %v18804_v18  ;;  %13146 = vmatprep.subr.bf16.mxu0 %v18685_v53 }
 0xadc   :  { %19825 = vmatprep.subr.bf16.mxu1 %v21001_v1 }
 0xade   :  { %v12869_v24 = vpop.f32.mrf.mxu1  ;;  %13147 = vmatpush2.bf16.msra.mxu0 %v18684_v23  ;;  %13196 = vmatmul.mubr.bf16.vlgmr.msra.gmra.mxu1 %v21765_v22  ;;  %v14020_v22 = vpack.c.bf16 %v21860_v44, %v21860_v44  ;;  %v9279_v44 = vrot.slane %v21932_v39, %v21264_v37 }
 0xadf   :  { %19826 = vmatpush3.bf16.xpose.msra.mxu1 %v14028_v10  ;;  %13148 = vmatprep.subr.bf16.mxu0 %v18661_v6 }
 0xae0   :  { %v12871_v31 = vpop.f32.mrf.mxu1  ;;  %19827 = vmatprep.mubr.msk.bf16.mxu1 %vm21002_vm0, %v21001_v1  ;;  %19837 = vmatprep.subr.bf16.mxu1 %v21001_v1 }
 0xae2   :  { %v12873_v3 = vpop.f32.mrf.mxu1  ;;  %13149 = vmatpush2.bf16.msra.mxu0 %v18660_v40 }
 0xae3   :  { %13150 = vmatprep.subr.bf16.mxu0 %v18637_v60 }
 0xae4   :  { %v12874_v26 = vpop.f32.mrf.mxu1 }
 0xae6   :  { %13151 = vmatpush2.bf16.msra.mxu0 %v18636_v49  ;;  %19828 = vmatmul.mubr.bf16.vlgmr.msra.gmra.mxu1 %v14020_v22 }
 0xae7   :  { %19838 = vmatpush3.bf16.xpose.msra.mxu1 %v14030_v8  ;;  %13152 = vmatprep.subr.bf16.mxu0 %v18613_v9 }
 0xae8   :  { %19839 = vmatprep.mubr.msk.bf16.mxu1 %vm21002_vm0, %v21001_v1  ;;  %19849 = vmatprep.subr.bf16.mxu1 %v21001_v1 }
 0xaea   :  { %13153 = vmatpush2.bf16.msra.mxu0 %v18612_v50 }
 0xaeb   :  { %19831 = vmatprep.subr.bf16.mxu0 %v21001_v1 }
 0xaed   :  { %v12828_v13 = vpop.f32.mrf.mxu0  ;;  %13155 = vmatmul.mubr.bf16.vlgmr.msra.gmra.mxu0 %v21785_v52  ;;  %v12790_v52 = vadd.f32 %v21992_v54, %v12749_v4 }
 0xaee   :  { %v12829_v12 = vadd.f32 %v12828_v13, %v9279_v44  ;;  %19832 = vmatpush3.bf16.xpose.msra.mxu0 %v14029_v57  ;;  %19840 = vmatmul.mubr.bf16.vlgmr.msra.gmra.mxu1 %v14022_v7 }
 0xaef   :  { %v12830_v51 = vpop.f32.mrf.mxu0  ;;  %19833 = vmatprep.mubr.msk.bf16.mxu0 %vm21002_vm0, %v21001_v1  ;;  %19843 = vmatprep.subr.bf16.mxu0 %v21001_v1 }
 0xaf0   :  { %v12870_v62 = vadd.f32 %v12869_v24, %v12829_v12  ;;  %v12831_v17 = vadd.f32 %v12830_v51, %v9283_v27  ;;  %19851 = vmatprep.mubr.msk.bf16.mxu1 %vm21002_vm0, %v21001_v1 }
 0xaf1   :  { %v12832_v39 = vpop.f32.mrf.mxu0 }
 0xaf2   :  { %v13372_v11 = vcombine.low %v12788_v41, %v12870_v62  ;;  %v13373_v48 = vcombine.high %v12788_v41, %v12870_v62  ;;  %v12872_v18 = vadd.f32 %v12871_v31, %v12831_v17 }
 0xaf3   :  { %v12833_v53 = vpop.f32.mrf.mxu0 }
 0xaf4   :  { %v13388_v63 = vcombine.low %v12790_v52, %v12872_v18  ;;  %v13389_v23 = vcombine.high %v12790_v52, %v12872_v18  ;;  %v13380_v6 = vrot.slane %v13372_v11, %v21205_v20  ;;  %v13387_v59 = vrot.slane %v13373_v48, %v21205_v20 }
 0xaf5   :  { %19834 = vmatmul.mubr.bf16.vlgmr.msra.gmra.mxu0 %v14021_v25  ;;  %v14024_v52 = vpack.c.bf16 %v21918_v15, %v21918_v15  ;;  %v14025_v11 = vpack.c.bf16 %v21920_v45, %v21920_v45  ;;  %v14026_v45 = vpack.c.bf16 %v21922_v16, %v21922_v16  ;;  %v22084_v16 = vld [vmem:[#allocation13 + $0x28] sm:$0xff] }
 0xaf6   :  { %v13396_v21 = vrot.slane %v13388_v63, %v21205_v20  ;;  %v13403_v54 = vrot.slane %v13389_v23, %v21205_v20  ;;  %19844 = vmatpush3.bf16.xpose.msra.mxu0 %v14031_v55  ;;  %19845 = vmatprep.mubr.msk.bf16.mxu0 %vm21002_vm0, %v21001_v1  ;;  %v14027_v63 = vpack.c.bf16 %v21924_v34, %v21924_v34 }
 0xaf7   :  { %19855 = vmatprep.subr.bf16.mxu0 %v21001_v1  ;;  %v9287_v34 = vrot.slane %v22084_v16, %v21166_v42 }
 0xaf8   :  { %v13436_v33 = vcombine.low %v13380_v6, %v13396_v21  ;;  %v13437_v10 = vcombine.high %v13380_v6, %v13396_v21  ;;  %v13452_v24 = vcombine.low %v13387_v59, %v13403_v54  ;;  %v13453_v40 = vcombine.high %v13387_v59, %v13403_v54 }
 0xafa   :  { %v13444_v29 = vrot.slane %v13436_v33, %v21213_v14  ;;  %v13451_v60 = vrot.slane %v13437_v10, %v21213_v14  ;;  %v13460_v31 = vrot.slane %v13452_v24, %v21213_v14  ;;  %v13467_v5 = vrot.slane %v13453_v40, %v21213_v14 }
 0xafb   :  { %v9291_v24 = vrot.slane %v22084_v16, %v21171_v47  ;;  %v9295_v40 = vrot.slane %v22084_v16, %v21192_v38 }
 0xafc   :  { %v18983_v3 = vcombine.low %v13444_v29, %v13451_v60  ;;  %v18985_v49 = vcombine.high %v13444_v29, %v13451_v60  ;;  %v18987_v9 = vcombine.low %v13460_v31, %v13467_v5  ;;  %v18989_v26 = vcombine.high %v13460_v31, %v13467_v5 }
 0xafd   :  { %19846 = vmatmul.mubr.bf16.vlgmr.msra.gmra.mxu0 %v14023_v30  ;;  %v9299_v60 = vrot.slane %v22084_v16, %v21195_v43 }
 0xafe   :  { %v13763_v22 = vrot.slane %v18983_v3, %v21205_v20  ;;  %v13779_v8 = vrot.slane %v18985_v49, %v21205_v20  ;;  %v13795_v50 = vrot.slane %v18987_v9, %v21205_v20  ;;  %v13811_v0 = vrot.slane %v18989_v26, %v21205_v20  ;;  %19857 = vmatprep.mubr.msk.bf16.mxu0 %vm21002_vm0, %v21001_v1 }
 0xb00   :  { %v13828_v19 = vcombine.low %v13763_v22, %v13779_v8  ;;  %v13860_v44 = vcombine.low %v13795_v50, %v13811_v0  ;;  %v13829_v61 = vcombine.high %v13763_v22, %v13779_v8  ;;  %v13861_v36 = vcombine.high %v13795_v50, %v13811_v0 }
 0xb02   :  { %v13836_v57 = vrot.slane %v13828_v19, %v21213_v14  ;;  %v13868_v7 = vrot.slane %v13860_v44, %v21213_v14  ;;  %v13843_v27 = vrot.slane %v13829_v61, %v21213_v14  ;;  %v13875_v13 = vrot.slane %v13861_v36, %v21213_v14 }
 0xb04   :  { %v13880_v4 = vcombine.low %v13836_v57, %v13868_v7  ;;  %v13881_v12 = vcombine.high %v13836_v57, %v13868_v7  ;;  %v13882_v51 = vcombine.low %v13843_v27, %v13875_v13  ;;  %v13883_v41 = vcombine.high %v13843_v27, %v13875_v13 }
 0xb06   :  { %v14032_v62 = vpack.c.bf16 %v13880_v4, %v13880_v4  ;;  %v14033_v17 = vpack.c.bf16 %v13881_v12, %v13881_v12  ;;  %v14034_v48 = vpack.c.bf16 %v13882_v51, %v13882_v51  ;;  %v14035_v18 = vpack.c.bf16 %v13883_v41, %v13883_v41 }
 0xb08   :  { %19850 = vmatpush3.bf16.xpose.msra.mxu1 %v14032_v62  ;;  %19856 = vmatpush3.bf16.xpose.msra.mxu0 %v14033_v17 }
 0xb09   :  { %19861 = vmatprep.subr.bf16.mxu1 %v21001_v1  ;;  %19867 = vmatprep.subr.bf16.mxu0 %v21001_v1 }
 0xb0d   :  { %v12951_v39 = vpop.f32.mrf.mxu0 }
 0xb0f   :  { %v12953_v53 = vpop.f32.mrf.mxu0  ;;  %19852 = vmatmul.mubr.bf16.vlgmr.msra.gmra.mxu1 %v14024_v52  ;;  %19858 = vmatmul.mubr.bf16.vlgmr.msra.gmra.mxu0 %v14025_v11 }
 0xb10   :  { %19862 = vmatpush3.bf16.xpose.msra.mxu1 %v14034_v48  ;;  %19868 = vmatpush3.bf16.xpose.msra.mxu0 %v14035_v18 }
 0xb11   :  { %v12955_v25 = vpop.f32.mrf.mxu0  ;;  %19863 = vmatprep.mubr.msk.bf16.mxu1 %vm21002_vm0, %v21001_v1  ;;  %19869 = vmatprep.mubr.msk.bf16.mxu0 %vm21002_vm0, %v21001_v1 }
 0xb12   :  { %19873 = vmatprep.subr.bf16.mxu1 %v21001_v1  ;;  %19879 = vmatprep.subr.bf16.mxu0 %v21001_v1 }
 0xb13   :  { %v12956_v15 = vpop.f32.mrf.mxu0 }
 0xb17   :  { %19864 = vmatmul.mubr.bf16.vlgmr.msra.gmra.mxu1 %v14026_v45  ;;  %19870 = vmatmul.mubr.bf16.vlgmr.msra.gmra.mxu0 %v14027_v63 }
 0xb18   :  { %19875 = vmatprep.mubr.msk.bf16.mxu1 %vm21002_vm0, %v21001_v1  ;;  %19881 = vmatprep.mubr.msk.bf16.mxu0 %vm21002_vm0, %v21001_v1 }
 0xb1e   :  { %v12910_v23 = vpop.f32.mrf.mxu1 }
 0xb1f   :  { %v12911_v29 = vadd.f32 %v12910_v23, %v9287_v34 }
 0xb20   :  { %v12912_v55 = vpop.f32.mrf.mxu1 }
 0xb21   :  { %v12913_v5 = vadd.f32 %v12912_v55, %v9291_v24  ;;  %v12952_v49 = vadd.f32 %v12951_v39, %v12911_v29 }
 0xb22   :  { %v12914_v6 = vpop.f32.mrf.mxu1 }
 0xb23   :  { %v12954_v8 = vadd.f32 %v12953_v53, %v12913_v5 }
 0xb24   :  { %v12915_v59 = vpop.f32.mrf.mxu1 }
 0xb3e   :  { %v13033_v21 = vpop.f32.mrf.mxu1 }
 0xb40   :  { %v13035_v54 = vpop.f32.mrf.mxu1 }
 0xb42   :  { %v13037_v33 = vpop.f32.mrf.mxu1 }
 0xb44   :  { %v13038_v10 = vpop.f32.mrf.mxu1 }
 0xb4d   :  { %v12992_v31 = vpop.f32.mrf.mxu0 }
 0xb4e   :  { %v12993_v30 = vadd.f32 %v12992_v31, %v9295_v40 }
 0xb4f   :  { %v12994_v3 = vpop.f32.mrf.mxu0 }
 0xb50   :  { %v13034_v9 = vadd.f32 %v13033_v21, %v12993_v30  ;;  %v12995_v26 = vadd.f32 %v12994_v3, %v9299_v60 }
 0xb51   :  { %v12996_v22 = vpop.f32.mrf.mxu0 }
 0xb52   :  { %v13476_v50 = vcombine.low %v12952_v49, %v13034_v9  ;;  %v13477_v0 = vcombine.high %v12952_v49, %v13034_v9  ;;  %v13036_v19 = vadd.f32 %v13035_v54, %v12995_v26  ;;  %v9303_v26 = vrot.slane %v22084_v16, %v21231_v56 }
 0xb53   :  { %v12997_v44 = vpop.f32.mrf.mxu0  ;;  %v9307_v22 = vrot.slane %v22084_v16, %v21239_v2 }
 0xb54   :  { %v13492_v61 = vcombine.low %v12954_v8, %v13036_v19  ;;  %v13493_v36 = vcombine.high %v12954_v8, %v13036_v19  ;;  %v13484_v57 = vrot.slane %v13476_v50, %v21205_v20  ;;  %v13491_v7 = vrot.slane %v13477_v0, %v21205_v20 }
 0xb56   :  { %v13500_v43 = vrot.slane %v13492_v61, %v21205_v20  ;;  %v13507_v27 = vrot.slane %v13493_v36, %v21205_v20 }
 0xb58   :  { %v13540_v13 = vcombine.low %v13484_v57, %v13500_v43  ;;  %v13541_v4 = vcombine.high %v13484_v57, %v13500_v43  ;;  %v13556_v12 = vcombine.low %v13491_v7, %v13507_v27  ;;  %v13557_v51 = vcombine.high %v13491_v7, %v13507_v27 }
 0xb5a   :  { %v13548_v41 = vrot.slane %v13540_v13, %v21213_v14  ;;  %v13555_v62 = vrot.slane %v13541_v4, %v21213_v14  ;;  %v13564_v17 = vrot.slane %v13556_v12, %v21213_v14  ;;  %v13571_v39 = vrot.slane %v13557_v51, %v21213_v14 }
 0xb5b   :  { %v9311_v51 = vrot.slane %v22084_v16, %v21264_v37 }
 0xb5c   :  { %v18990_v52 = vcombine.low %v13548_v41, %v13555_v62  ;;  %v18992_v11 = vcombine.high %v13548_v41, %v13555_v62  ;;  %v18994_v48 = vcombine.low %v13564_v17, %v13571_v39  ;;  %v18996_v18 = vcombine.high %v13564_v17, %v13571_v39 }
 0xb5d   :  { %v9315_v62 = vrot.slane %v22084_v16, %v21267_v46 }
 0xb5e   :  { %v13892_v53 = vrot.slane %v18990_v52, %v21205_v20  ;;  %v13908_v25 = vrot.slane %v18992_v11, %v21205_v20  ;;  %v13924_v15 = vrot.slane %v18994_v48, %v21205_v20  ;;  %v13940_v45 = vrot.slane %v18996_v18, %v21205_v20 }
 0xb60   :  { %v13948_v63 = vcombine.low %v13892_v53, %v13908_v25  ;;  %v13980_v23 = vcombine.low %v13924_v15, %v13940_v45  ;;  %v13949_v55 = vcombine.high %v13892_v53, %v13908_v25  ;;  %v13981_v6 = vcombine.high %v13924_v15, %v13940_v45 }
 0xb62   :  { %v13956_v59 = vrot.slane %v13948_v63, %v21213_v14  ;;  %v13988_v21 = vrot.slane %v13980_v23, %v21213_v14  ;;  %v13963_v54 = vrot.slane %v13949_v55, %v21213_v14  ;;  %v13995_v33 = vrot.slane %v13981_v6, %v21213_v14 }
 0xb64   :  { %v14012_v10 = vcombine.low %v13956_v59, %v13988_v21  ;;  %v14013_v34 = vcombine.high %v13956_v59, %v13988_v21  ;;  %v22110_v24 = vcombine.low %v13963_v54, %v13995_v33  ;;  %v22112_v40 = vcombine.high %v13963_v54, %v13995_v33 }
 0xb66   :  { %v14036_v29 = vpack.c.bf16 %v14012_v10, %v14012_v10  ;;  %v14037_v60 = vpack.c.bf16 %v14013_v34, %v14013_v34 }
 0xb68   :  { %v14464_v31 = vsel %vm6288_vm2, %v14036_v29, 0  ;;  %v14510_v5 = vsel %vm6288_vm2, %v14037_v60, 0 }
 0xb69   :  { %19874 = vmatpush3.bf16.msra.mxu1 %v14464_v31  ;;  %19880 = vmatpush3.bf16.msra.mxu0 %v14510_v5 }
 0xb6a   :  { %19885 = vmatprep.subr.bf16.mxu1 %v21001_v1  ;;  %19891 = vmatprep.subr.bf16.mxu0 %v21001_v1 }
 0xb6d   :  { %v13115_v30 = vpop.f32.mrf.mxu0 }
 0xb6f   :  { %v13117_v3 = vpop.f32.mrf.mxu0 }
 0xb71   :  { %v13119_v49 = vpop.f32.mrf.mxu0 }
 0xb73   :  { %v13120_v9 = vpop.f32.mrf.mxu0 }
 0xb7e   :  { %v13074_v8 = vpop.f32.mrf.mxu1 }
 0xb7f   :  { %v13075_v50 = vadd.f32 %v13074_v8, %v9303_v26 }
 0xb80   :  { %v13076_v0 = vpop.f32.mrf.mxu1 }
 0xb81   :  { %v13116_v19 = vadd.f32 %v13115_v30, %v13075_v50  ;;  %v13077_v44 = vadd.f32 %v13076_v0, %v9307_v22 }
 0xb82   :  { %v13078_v61 = vpop.f32.mrf.mxu1 }
 0xb83   :  { %v13118_v36 = vadd.f32 %v13117_v3, %v13077_v44 }
 0xb84   :  { %v13079_v57 = vpop.f32.mrf.mxu1 }
 0xb9e   :  { %v13197_v7 = vpop.f32.mrf.mxu1 }
 0xba0   :  { %v13199_v43 = vpop.f32.mrf.mxu1 }
 0xba2   :  { %v13201_v27 = vpop.f32.mrf.mxu1 }
 0xba4   :  { %v13202_v13 = vpop.f32.mrf.mxu1 }
 0xba6   :  { %v22122_v4 = vpop.f32.mrf.mxu1 }
 0xba7   :  { %v14364_v56 = vsel %vm367_vm1, %v22122_v4, -inf }
 0xba8   :  { %14365 = vmax.xlane.f32.xlu0 %v14364_v56  ;;  %v19829_v12 = vpop.f32.mrf.mxu1 }
 0xbaa   :  { %v14081_v2 = vpop.f32.mrf.mxu1 }
 0xbac   :  { %v19830_v41 = vpop.f32.mrf.mxu1 }
 0xbad   :  { %v13156_v17 = vpop.f32.mrf.mxu0 }
 0xbae   :  { %v13157_v39 = vadd.f32 %v13156_v17, %v9311_v51  ;;  %v22130_v52 = vpop.f32.mrf.mxu1 }
 0xbaf   :  { %v13158_v11 = vpop.f32.mrf.mxu0  ;;  %v14370_v48 = vsel %vm367_vm1, %v22130_v52, -inf }
 0xbb0   :  { %v13198_v18 = vadd.f32 %v13197_v7, %v13157_v39  ;;  %v13159_v53 = vadd.f32 %v13158_v11, %v9315_v62  ;;  %14371 = vmax.xlane.f32.xlu0 %v14370_v48  ;;  %v19841_v25 = vpop.f32.mrf.mxu1 }
 0xbb1   :  { %v13160_v15 = vpop.f32.mrf.mxu0 }
 0xbb2   :  { %v13508_v45 = vcombine.low %v13116_v19, %v13198_v18  ;;  %v13509_v63 = vcombine.high %v13116_v19, %v13198_v18  ;;  %v13200_v37 = vadd.f32 %v13199_v43, %v13159_v53  ;;  %v14161_v23 = vpop.f32.mrf.mxu1 }
 0xbb3   :  { %v13161_v55 = vpop.f32.mrf.mxu0 }
 0xbb4   :  { %v13524_v6 = vcombine.low %v13118_v36, %v13200_v37  ;;  %v13525_v46 = vcombine.high %v13118_v36, %v13200_v37  ;;  %v19842_v16 = vpop.f32.mrf.mxu1  ;;  %v13516_v59 = vrot.slane %v13508_v45, %v21205_v20  ;;  %v13523_v54 = vrot.slane %v13509_v63, %v21205_v20 }
 0xbb5   :  { %v22135_v21 = vpop.f32.mrf.mxu0 }
 0xbb6   :  { %v13532_v33 = vrot.slane %v13524_v6, %v21205_v20  ;;  %v13539_v10 = vrot.slane %v13525_v46, %v21205_v20  ;;  %v14367_v34 = vsel %vm367_vm1, %v22135_v21, -inf }
 0xbb7   :  { %14368 = vmax.xlane.f32.xlu1 %v14367_v34  ;;  %v19835_v29 = vpop.f32.mrf.mxu0 }
 0xbb8   :  { %v13572_v60 = vcombine.low %v13516_v59, %v13532_v33  ;;  %v13573_v31 = vcombine.high %v13516_v59, %v13532_v33  ;;  %v13588_v5 = vcombine.low %v13523_v54, %v13539_v10  ;;  %v13589_v30 = vcombine.high %v13523_v54, %v13539_v10 }
 0xbb9   :  { %v14121_v3 = vpop.f32.mrf.mxu0 }
 0xbba   :  { %v13580_v49 = vrot.slane %v13572_v60, %v21213_v14  ;;  %v13587_v9 = vrot.slane %v13573_v31, %v21213_v14  ;;  %v13596_v26 = vrot.slane %v13588_v5, %v21213_v14  ;;  %v13603_v22 = vrot.slane %v13589_v30, %v21213_v14 }
 0xbbb   :  { %v19836_v8 = vpop.f32.mrf.mxu0 }
 0xbbc   :  { %v18991_v50 = vcombine.low %v13580_v49, %v13587_v9  ;;  %v18993_v0 = vcombine.high %v13580_v49, %v13587_v9  ;;  %v18995_v19 = vcombine.low %v13596_v26, %v13603_v22  ;;  %v18997_v44 = vcombine.high %v13596_v26, %v13603_v22 }
 0xbbd   :  { %v14198_v61 = vpop.f32.mrf.mxu0 }
 0xbbe   :  { %v14373_v36 = vsel %vm367_vm1, %v14198_v61, -inf  ;;  %v13899_v57 = vrot.slane %v18991_v50, %v21205_v20  ;;  %v13915_v7 = vrot.slane %v18993_v0, %v21205_v20  ;;  %v13931_v43 = vrot.slane %v18995_v19, %v21205_v20 }
 0xbbf   :  { %v19847_v27 = vpop.f32.mrf.mxu0  ;;  %14374 = vmax.xlane.f32.xlu0 %v14373_v36  ;;  %v13947_v13 = vrot.slane %v18997_v44, %v21205_v20 }
 0xbc0   :  { %v13964_v56 = vcombine.low %v13899_v57, %v13915_v7  ;;  %v13965_v12 = vcombine.high %v13899_v57, %v13915_v7 }
 0xbc1   :  { %v14201_v2 = vpop.f32.mrf.mxu0  ;;  %v13996_v51 = vcombine.low %v13931_v43, %v13947_v13  ;;  %v13997_v41 = vcombine.high %v13931_v43, %v13947_v13 }
 0xbc2   :  { %v13972_v62 = vrot.slane %v13964_v56, %v21213_v14  ;;  %v13979_v17 = vrot.slane %v13965_v12, %v21213_v14 }
 0xbc3   :  { %v19848_v39 = vpop.f32.mrf.mxu0  ;;  %v14004_v11 = vrot.slane %v13996_v51, %v21213_v14  ;;  %v14011_v48 = vrot.slane %v13997_v41, %v21213_v14 }
 0xbc5   :  { %v22155_v18 = vcombine.low %v13972_v62, %v14004_v11  ;;  %v22157_v53 = vcombine.high %v13972_v62, %v14004_v11  ;;  %v22159_v25 = vcombine.low %v13979_v17, %v14011_v48  ;;  %v22161_v20 = vcombine.high %v13979_v17, %v14011_v48 }
 0xbcf   :  { %v14238_v15 = vpop.f32.mrf.mxu1  ;;  %v14278_v45 = vpop.f32.mrf.mxu0 }
 0xbd0   :  { %v14376_v63 = vsel %vm367_vm1, %v14238_v15, -inf  ;;  %v14379_v46 = vsel %vm367_vm1, %v14278_v45, -inf }
 0xbd1   :  { %v19859_v37 = vpop.f32.mrf.mxu0  ;;  %14377 = vmax.xlane.f32.xlu0 %v14376_v63  ;;  %v19853_v23 = vpop.f32.mrf.mxu1 }
 0xbd3   :  { %v14241_v55 = vpop.f32.mrf.mxu1  ;;  %v14281_v6 = vpop.f32.mrf.mxu0 }
 0xbd5   :  { %v19860_v14 = vpop.f32.mrf.mxu0  ;;  %14380 = vmax.xlane.f32.xlu0 %v14379_v46  ;;  %v19854_v16 = vpop.f32.mrf.mxu1 }
 0xbd6   :  { %v14038_v16 = vpack.c.bf16 %v22110_v24, %v22110_v24 }
 0xbd7   :  { %v22165_v59 = vpop.f32.mrf.mxu1  ;;  %v14358_v54 = vpop.f32.mrf.mxu0 }
 0xbd8   :  { %v14385_v33 = vsel %vm367_vm1, %v14358_v54, -inf  ;;  %v14382_v56 = vsel %vm367_vm1, %v22165_v59, -inf }
 0xbd9   :  { %v19871_v10 = vpop.f32.mrf.mxu0  ;;  %14386 = vmax.xlane.f32.xlu0 %v14385_v33  ;;  %v19865_v34 = vpop.f32.mrf.mxu1  ;;  %v14556_v33 = vsel %vm6288_vm2, %v14038_v16, 0  ;;  %v20415_v16 = vld [vmem:[#allocation12 + $0x690] ss:$12 sps:$4 sm:$0xff]  }
 0xbdb   :  { %v14321_v29 = vpop.f32.mrf.mxu1  ;;  %v14361_v60 = vpop.f32.mrf.mxu0 }
 0xbdd   :  { %v19866_v31 = vpop.f32.mrf.mxu1  ;;  %v19872_v5 = vpop.f32.mrf.mxu0 }
 0xc31   :  { %v14366_v30 = vpop.xlane.xlu0 %14365 }
 0xc32   :  { %v14388_v3 = vsub.f32 %v22122_v4, %v14366_v30  ;;  %v14039_v30 = vpack.c.bf16 %v22112_v40, %v22112_v40 }
 0xc34   :  { %v14396_v49 = vmul.f32 1.442695, %v14388_v3 }
 0xc36   :  { %20791 = vpow2.f32 %v14396_v49 }
 0xc39   :  { %v14372_v9 = vpop.xlane.xlu0 %14371 }
 0xc3a   :  { %v14390_v26 = vsub.f32 %v22130_v52, %v14372_v9 }
 0xc3c   :  { %v14400_v0 = vmul.f32 1.442695, %v14390_v26  ;;  %v14602_v26 = vsel %vm6288_vm2, %v14039_v30, 0 }
 0xc40   :  { %v14369_v22 = vpop.xlane.xlu1 %14368 }
 0xc41   :  { %v14389_v8 = vsub.f32 %v22135_v21, %v14369_v22  ;;  %v14040_v22 = vpack.c.bf16 %v22155_v18, %v22155_v18 }
 0xc43   :  { %v20792_v50 = vpop.eup %20791  ;;  %v14398_v19 = vmul.f32 1.442695, %v14389_v8  ;;  %v14648_v40 = vsel %vm6288_vm2, %v14040_v22, 0 }
 0xc44   :  { %v14412_v44 = vsel %vm367_vm1, %v20792_v50, 0.0 }
 0xc45   :  { %20793 = vpow2.f32 %v14398_v19  ;;  %14413 = vadd.xlane.f32.xlu1 %v14412_v44  ;;  %v14041_v44 = vpack.c.bf16 %v22157_v53, %v22157_v53  ;;  %v14042_v53 = vpack.c.bf16 %v22159_v25, %v22159_v25 }
 0xc46   :  { %20795 = vpow2.f32 %v14400_v0 }
 0xc48   :  { %v14375_v36 = vpop.xlane.xlu0 %14374 }
 0xc49   :  { %v14391_v57 = vsub.f32 %v14198_v61, %v14375_v36 }
 0xc4b   :  { %v14402_v7 = vmul.f32 1.442695, %v14391_v57 }
 0xc4d   :  { %20797 = vpow2.f32 %v14402_v7  ;;  %v14694_v7 = vsel %vm6288_vm2, %v14041_v44, 0 }
 0xc52   :  { %v20794_v4 = vpop.eup %20793 }
 0xc53   :  { %v14415_v43 = vsel %vm367_vm1, %v20794_v4, 0.0  ;;  %v20796_v27 = vpop.eup %20795 }
 0xc54   :  { %14416 = vadd.xlane.f32.xlu1 %v14415_v43  ;;  %v14418_v52 = vsel %vm367_vm1, %v20796_v27, 0.0 }
 0xc58   :  { %14419 = vadd.xlane.f32.xlu1 %v14418_v52 }
 0xc5a   :  { %v14378_v21 = vpop.xlane.xlu0 %14377  ;;  %v22176_v12 = vpop.eup %20797 }
 0xc5b   :  { %v14392_v13 = vsub.f32 %v14238_v15, %v14378_v21  ;;  %v14421_v41 = vsel %vm367_vm1, %v22176_v12, 0.0 }
 0xc5c   :  { %14383 = vmax.xlane.f32.xlu1 %v14382_v56  ;;  %v14740_v56 = vsel %vm6288_vm2, %v14042_v53, 0  ;;  %v20450_v53 = vld [vmem:[#allocation12 + $0x6f8] ss:$12 sps:$4 sm:$0xff]  }
 0xc5d   :  { %v14404_v2 = vmul.f32 1.442695, %v14392_v13 }
 0xc5e   :  { %v14381_v61 = vpop.xlane.xlu0 %14380 }
 0xc5f   :  { %20799 = vpow2.f32 %v14404_v2  ;;  %v14393_v51 = vsub.f32 %v14278_v45, %v14381_v61 }
 0xc60   :  { %14422 = vadd.xlane.f32.xlu1 %v14421_v41  ;;  %v20407_v41 = vld [vmem:[#allocation12 + $0x6b0] ss:$12 sps:$4 sm:$0xff]  }
 0xc61   :  { %v14406_v62 = vmul.f32 1.442695, %v14393_v51 }
 0xc62   :  { %v14387_v17 = vpop.xlane.xlu0 %14386 }
 0xc63   :  { %20801 = vpow2.f32 %v14406_v62  ;;  %v14395_v39 = vsub.f32 %v14358_v54, %v14387_v17  ;;  %v20408_v17 = vld [vmem:[#allocation12 + $0x698] ss:$12 sps:$4 sm:$0xff]  }
 0xc65   :  { %v14410_v11 = vmul.f32 1.442695, %v14395_v39  ;;  %v20409_v39 = vld [vmem:[#allocation12 + $0x680] ss:$12 sps:$4 sm:$0xff]  }
 0xc67   :  { %20803 = vpow2.f32 %v14410_v11  ;;  %v20410_v11 = vld [vmem:[#allocation12 + $0x668] ss:$12 sps:$4 sm:$0xff]  }
 0xc6c   :  { %v22180_v48 = vpop.eup %20799 }
 0xc6d   :  { %v14424_v15 = vsel %vm367_vm1, %v22180_v48, 0.0 }
 0xc6e   :  { %14425 = vadd.xlane.f32.xlu0 %v14424_v15  ;;  %v20418_v15 = vld [vmem:[#allocation12 + $0x638] ss:$12 sps:$4 sm:$0xff]  }
 0xc70   :  { %v22184_v63 = vpop.eup %20801 }
 0xc71   :  { %v14427_v45 = vsel %vm367_vm1, %v22184_v63, 0.0 }
 0xc72   :  { %14428 = vadd.xlane.f32.xlu1 %v14427_v45  ;;  %v20426_v45 = vld [vmem:[#allocation12 + $0x608] ss:$12 sps:$4 sm:$0xff]  }
 0xc74   :  { %v22188_v37 = vpop.eup %20803 }
 0xc75   :  { %v14433_v23 = vsel %vm367_vm1, %v22188_v37, 0.0 }
 0xc76   :  { %14434 = vadd.xlane.f32.xlu1 %v14433_v23 }
 0xcce   :  { %v14414_v55 = vpop.xlane.xlu1 %14413 }
 0xccf   :  { %20805 = vrcp.f32 %v14414_v55 }
 0xcdc   :  { %v20806_v6 = vpop.eup %20805 }
 0xcdd   :  { %v14444_v46 = vmul.f32 %v20806_v6, %v20792_v50  ;;  %v14417_v14 = vpop.xlane.xlu1 %14416  ;;  %v20411_v6 = vld [vmem:[#allocation12 + $0x6a8] ss:$12 sps:$4 sm:$0xff]  }
 0xcde   :  { %20807 = vrcp.f32 %v14417_v14  ;;  %v20417_v14 = vld [vmem:[#allocation12 + $0x694] ss:$12 sps:$4 sm:$0xff]  }
 0xcdf   :  { %v14452_v54 = vpack.c.bf16 %v14444_v46, %v14444_v46 }
 0xce1   :  { %19876 = vmatmul.mubr.msk.bf16.vlgmr.msra.gmra.mxu1 %vm367_vm1, %v14452_v54  ;;  %v14420_v10 = vpop.xlane.xlu1 %14419  ;;  %v20421_v54 = vld [vmem:[#allocation12 + $0x67c] ss:$12 sps:$4 sm:$0xff]  }
 0xce2   :  { %19886 = vmatpush3.bf16.msra.mxu1 %v14556_v33  ;;  %20809 = vrcp.f32 %v14420_v10  ;;  %19887 = vmatprep.mubr.msk.bf16.mxu1 %vm21002_vm0, %v21001_v1  ;;  %v20419_v33 = vld [vmem:[#allocation12 + $0x678] ss:$12 sps:$4 sm:$0xff]  }
 0xce3   :  { %19897 = vmatprep.subr.bf16.mxu1 %v21001_v1  ;;  %v20425_v10 = vld [vmem:[#allocation12 + $0x664] ss:$12 sps:$4 sm:$0xff]  }
 0xce5   :  { %v14384_v34 = vpop.xlane.xlu1 %14383 }
 0xce6   :  { %v14394_v29 = vsub.f32 %v22165_v59, %v14384_v34  ;;  %v20423_v34 = vld [vmem:[#allocation12 + $0x660] ss:$12 sps:$4 sm:$0xff]  }
 0xce8   :  { %v14408_v60 = vmul.f32 1.442695, %v14394_v29  ;;  %v20429_v29 = vld [vmem:[#allocation12 + $0x64c] ss:$12 sps:$4 sm:$0xff]  }
 0xce9   :  { %v14423_v31 = vpop.xlane.xlu1 %14422 }
 0xcea   :  { %20811 = vpow2.f32 %v14408_v60 }
 0xceb   :  { %v20808_v24 = vpop.eup %20807  ;;  %20813 = vrcp.f32 %v14423_v31  ;;  %v20430_v31 = vld [vmem:[#allocation12 + $0x770] ss:$12 sps:$4 sm:$0xff]  }
 0xcec   :  { %v14445_v5 = vmul.f32 %v20808_v24, %v20794_v4 }
 0xcee   :  { %v14453_v3 = vpack.c.bf16 %v14445_v5, %v14445_v5  ;;  %v20427_v5 = vld [vmem:[#allocation12 + $0x648] ss:$12 sps:$4 sm:$0xff]  }
 0xcef   :  { %v20810_v49 = vpop.eup %20809 }
 0xcf0   :  { %v14446_v9 = vmul.f32 %v20810_v49, %v20796_v27  ;;  %19882 = vmatmul.mubr.msk.bf16.vlgmr.msra.gmra.mxu0 %vm367_vm1, %v14453_v3  ;;  %v20433_v3 = vld [vmem:[#allocation12 + $0x634] ss:$12 sps:$4 sm:$0xff]  }
 0xcf1   :  { %19892 = vmatpush3.bf16.msra.mxu0 %v14602_v26  ;;  %19893 = vmatprep.mubr.msk.bf16.mxu0 %vm21002_vm0, %v21001_v1  ;;  %v20431_v26 = vld [vmem:[#allocation12 + $0x630] ss:$12 sps:$4 sm:$0xff]  }
 0xcf2   :  { %v14454_v59 = vpack.c.bf16 %v14446_v9, %v14446_v9  ;;  %19903 = vmatprep.subr.bf16.mxu0 %v21001_v1  ;;  %v20434_v9 = vld [vmem:[#allocation12 + $0x758] ss:$12 sps:$4 sm:$0xff]  }
 0xcf4   :  { %19888 = vmatmul.mubr.msk.bf16.vlgmr.msra.gmra.mxu1 %vm367_vm1, %v14454_v59  ;;  %v20437_v59 = vld [vmem:[#allocation12 + $0x61c] ss:$12 sps:$4 sm:$0xff]  }
 0xcf5   :  { %19898 = vmatpush3.bf16.msra.mxu1 %v14648_v40  ;;  %19899 = vmatprep.mubr.msk.bf16.mxu1 %vm21002_vm0, %v21001_v1  ;;  %v20438_v40 = vld [vmem:[#allocation12 + $0x740] ss:$12 sps:$4 sm:$0xff]  }
 0xcf6   :  { %19909 = vmatprep.subr.bf16.mxu1 %v21001_v1 }
 0xcf7   :  { %v22214_v8 = vpop.eup %20811  ;;  %v14426_v18 = vpop.xlane.xlu0 %14425 }
 0xcf8   :  { %v20814_v50 = vpop.eup %20813  ;;  %20815 = vrcp.f32 %v14426_v18  ;;  %v14430_v0 = vsel %vm367_vm1, %v22214_v8, 0.0  ;;  %v20441_v18 = vld [vmem:[#allocation12 + $0x604] ss:$12 sps:$4 sm:$0xff]  }
 0xcf9   :  { %v14447_v19 = vmul.f32 %v20814_v50, %v22176_v12  ;;  %14431 = vadd.xlane.f32.xlu0 %v14430_v0  ;;  %v14043_v12 = vpack.c.bf16 %v22161_v20, %v22161_v20  ;;  %v20413_v20 = vld [vmem:[#allocation12 + $0x6ac] ss:$12 sps:$4 sm:$0xff]   ;;  %v20442_v50 = vld [vmem:[#allocation12 + $0x728] ss:$12 sps:$4 sm:$0xff]  }
 0xcfa   :  { %v20439_v0 = vld [vmem:[#allocation12 + $0x600] ss:$12 sps:$4 sm:$0xff]  }
 0xcfb   :  { %v14455_v36 = vpack.c.bf16 %v14447_v19, %v14447_v19  ;;  %v14429_v57 = vpop.xlane.xlu1 %14428  ;;  %v14786_v25 = vsel %vm6288_vm2, %v14043_v12, 0  ;;  %v20445_v19 = vld [vmem:[#allocation12 + $0x76c] ss:$12 sps:$4 sm:$0xff]  }
 0xcfc   :  { %20817 = vrcp.f32 %v14429_v57 }
 0xcfd   :  { %19894 = vmatmul.mubr.msk.bf16.vlgmr.msra.gmra.mxu0 %vm367_vm1, %v14455_v36  ;;  %v20446_v36 = vld [vmem:[#allocation12 + $0x710] ss:$12 sps:$4 sm:$0xff]  }
 0xcfe   :  { %19904 = vmatpush3.bf16.msra.mxu0 %v14694_v7  ;;  %19905 = vmatprep.mubr.msk.bf16.mxu0 %vm21002_vm0, %v21001_v1  ;;  %v20443_v7 = vld [vmem:[#allocation12 + $0x768] ss:$12 sps:$4 sm:$0xff]  }
 0xcff   :  { %v14435_v4 = vpop.xlane.xlu1 %14434  ;;  %19915 = vmatprep.subr.bf16.mxu0 %v21001_v1 }
 0xd00   :  { %20819 = vrcp.f32 %v14435_v4  ;;  %v20449_v4 = vld [vmem:[#allocation12 + $0x754] ss:$12 sps:$4 sm:$0xff]  }
 0xd05   :  { %v20816_v43 = vpop.eup %20815 }
 0xd06   :  { %v14448_v27 = vmul.f32 %v20816_v43, %v22180_v48  ;;  %v20414_v48 = vld [vmem:[#allocation12 + $0x650] ss:$12 sps:$4 sm:$0xff]  }
 0xd08   :  { %v14456_v52 = vpack.c.bf16 %v14448_v27, %v14448_v27 }
 0xd09   :  { %v20818_v21 = vpop.eup %20817 }
 0xd0a   :  { %v14449_v13 = vmul.f32 %v20818_v21, %v22184_v63  ;;  %19900 = vmatmul.mubr.msk.bf16.vlgmr.msra.gmra.mxu1 %vm367_vm1, %v14456_v52  ;;  %v20422_v63 = vld [vmem:[#allocation12 + $0x620] ss:$12 sps:$4 sm:$0xff]  }
 0xd0b   :  { %19910 = vmatpush3.bf16.msra.mxu1 %v14740_v56  ;;  %19911 = vmatprep.mubr.msk.bf16.mxu1 %vm21002_vm0, %v21001_v1  ;;  %v20453_v56 = vld [vmem:[#allocation12 + $0x73c] ss:$12 sps:$4 sm:$0xff]  }
 0xd0c   :  { %v14457_v2 = vpack.c.bf16 %v14449_v13, %v14449_v13  ;;  %15221 = vmatprep.subr.bf16.mxu1 %v20413_v20  ;;  %v20447_v13 = vld [vmem:[#allocation12 + $0x750] ss:$12 sps:$4 sm:$0xff]   ;;  %v20458_v20 = vld [vmem:[#allocation12 + $0x6c8] ss:$12 sps:$4 sm:$0xff]  }
 0xd0d   :  { %v20820_v61 = vpop.eup %20819 }
 0xd0e   :  { %19906 = vmatmul.mubr.msk.bf16.vlgmr.msra.gmra.mxu0 %vm367_vm1, %v14457_v2  ;;  %v14451_v51 = vmul.f32 %v20820_v61, %v22188_v37  ;;  %v20454_v2 = vld [vmem:[#allocation12 + $0x6e0] ss:$12 sps:$4 sm:$0xff]  }
 0xd0f   :  { %19916 = vmatpush3.bf16.msra.mxu0 %v14786_v25  ;;  %19917 = vmatprep.mubr.msk.bf16.mxu0 %vm21002_vm0, %v21001_v1  ;;  %v20451_v25 = vld [vmem:[#allocation12 + $0x738] ss:$12 sps:$4 sm:$0xff]  }
 0xd10   :  { %19921 = vmatprep.subr.bf16.mxu0 %v21001_v1  ;;  %v14459_v62 = vpack.c.bf16 %v14451_v51, %v14451_v51  ;;  %v20457_v51 = vld [vmem:[#allocation12 + $0x724] ss:$12 sps:$4 sm:$0xff]  }
 0xd16   :  { %19918 = vmatmul.mubr.msk.bf16.vlgmr.msra.gmra.mxu0 %vm367_vm1, %v14459_v62  ;;  %v20455_v62 = vld [vmem:[#allocation12 + $0x720] ss:$12 sps:$4 sm:$0xff]  }
 0xd17   :  { %19922 = vmatpush3.bf16.msra.mxu0 %v20407_v41  ;;  %19937 = vmatprep.mubr.msk.bf16.mxu0 %vm21002_vm0, %v21001_v1 }
 0xd18   :  { %19923 = vmatprep.subr.bf16.mxu0 %v21001_v1 }
 0xd1b   :  { %19924 = vmatpush3.bf16.msra.mxu0 %v20408_v17 }
 0xd1c   :  { %19925 = vmatprep.subr.bf16.mxu0 %v21001_v1 }
 0xd1f   :  { %19926 = vmatpush3.bf16.msra.mxu0 %v20409_v39  ;;  %v20461_v39 = vld [vmem:[#allocation12 + $0x70c] ss:$12 sps:$4 sm:$0xff]  }
 0xd20   :  { %19927 = vmatprep.subr.bf16.mxu0 %v21001_v1 }
 0xd23   :  { %19928 = vmatpush3.bf16.msra.mxu0 %v20410_v11 }
 0xd24   :  { %19929 = vmatprep.subr.bf16.mxu0 %v21001_v1 }
 0xd27   :  { %19930 = vmatpush3.bf16.msra.mxu0 %v20414_v48  ;;  %v20462_v48 = vld [vmem:[#allocation12 + $0x830] ss:$12 sps:$4 sm:$0xff]  }
 0xd28   :  { %19931 = vmatprep.subr.bf16.mxu0 %v21001_v1 }
 0xd2b   :  { %19932 = vmatpush3.bf16.msra.mxu0 %v20418_v15 }
 0xd2c   :  { %19933 = vmatprep.subr.bf16.mxu0 %v21001_v1 }
 0xd2f   :  { %19934 = vmatpush3.bf16.msra.mxu0 %v20422_v63  ;;  %v20459_v63 = vld [vmem:[#allocation12 + $0x708] ss:$12 sps:$4 sm:$0xff]  }
 0xd30   :  { %19935 = vmatprep.subr.bf16.mxu0 %v21001_v1 }
 0xd33   :  { %19936 = vmatpush3.bf16.msra.mxu0 %v20426_v45 }
 0xd34   :  { %19941 = vmatprep.subr.bf16.mxu0 %v21001_v1 }
 0xd82   :  { %v14432_v37 = vpop.xlane.xlu0 %14431 }
 0xd83   :  { %20821 = vrcp.f32 %v14432_v37  ;;  %v20465_v37 = vld [vmem:[#allocation12 + $0x6f4] ss:$12 sps:$4 sm:$0xff]  }
 0xd90   :  { %v20822_v23 = vpop.eup %20821 }
 0xd91   :  { %v14450_v55 = vmul.f32 %v20822_v23, %v22214_v8  ;;  %v20435_v8 = vld [vmem:[#allocation12 + $0x618] ss:$12 sps:$4 sm:$0xff]  }
 0xd92   :  { %v20466_v23 = vld [vmem:[#allocation12 + $0x818] ss:$12 sps:$4 sm:$0xff]  }
 0xd93   :  { %v14458_v46 = vpack.c.bf16 %v14450_v55, %v14450_v55  ;;  %v20463_v55 = vld [vmem:[#allocation12 + $0x6f0] ss:$12 sps:$4 sm:$0xff]  }
 0xd95   :  { %19912 = vmatmul.mubr.msk.bf16.vlgmr.msra.gmra.mxu1 %vm367_vm1, %v14458_v46  ;;  %v20470_v46 = vld [vmem:[#allocation12 + $0x800] ss:$12 sps:$4 sm:$0xff]  }
 0xd96   :  { %15222 = vmatpush1.bf16.msra.mxu1 %v20411_v6  ;;  %15253 = vmatprep.mubr.bf16.mxu1 %v21003_v32  ;;  %v20469_v6 = vld [vmem:[#allocation12 + $0x6dc] ss:$12 sps:$4 sm:$0xff]  }
 0xd97   :  { %15223 = vmatprep.subr.bf16.mxu1 %v20417_v14 }
 0xd9a   :  { %15224 = vmatpush1.bf16.msra.mxu1 %v20415_v16  ;;  %v20467_v16 = vld [vmem:[#allocation12 + $0x6d8] ss:$12 sps:$4 sm:$0xff]  }
 0xd9b   :  { %15225 = vmatprep.subr.bf16.mxu1 %v20421_v54  ;;  %v20473_v54 = vld [vmem:[#allocation12 + $0x6c4] ss:$12 sps:$4 sm:$0xff]  }
 0xd9e   :  { %15226 = vmatpush1.bf16.msra.mxu1 %v20419_v33 }
 0xd9f   :  { %15227 = vmatprep.subr.bf16.mxu1 %v20425_v10  ;;  %v20474_v10 = vld [vmem:[#allocation12 + $0x7e8] ss:$12 sps:$4 sm:$0xff]  }
 0xda1   :  { %v14500_v60 = vpop.f32.mrf.mxu1 }
 0xda2   :  { %v15085_v24 = vpack.c.bf16 %v14500_v60, %v14500_v60  ;;  %15228 = vmatpush1.bf16.msra.mxu1 %v20423_v34  ;;  %v20471_v60 = vld [vmem:[#allocation12 + $0x6c0] ss:$12 sps:$4 sm:$0xff]  }
 0xda3   :  { %v19877_v30 = vpop.f32.mrf.mxu1  ;;  %15229 = vmatprep.subr.bf16.mxu1 %v20429_v29 }
 0xda4   :  { %19938 = vmatmul.mubr.bf16.vlgmr.msra.gmra.mxu0 %v15085_v24  ;;  %v20478_v30 = vld [vmem:[#allocation12 + $0x7d0] ss:$12 sps:$4 sm:$0xff]  }
 0xda5   :  { %19942 = vmatpush3.bf16.msra.mxu0 %v20430_v31  ;;  %v14503_v49 = vpop.f32.mrf.mxu1  ;;  %19957 = vmatprep.mubr.msk.bf16.mxu0 %vm21002_vm0, %v21001_v1  ;;  %v20477_v31 = vld [vmem:[#allocation12 + $0x82c] ss:$12 sps:$4 sm:$0xff]  }
 0xda6   :  { %15230 = vmatpush1.bf16.msra.mxu1 %v20427_v5  ;;  %19943 = vmatprep.subr.bf16.mxu0 %v21001_v1  ;;  %v20475_v49 = vld [vmem:[#allocation12 + $0x828] ss:$12 sps:$4 sm:$0xff]  }
 0xda7   :  { %v19878_v22 = vpop.f32.mrf.mxu1  ;;  %15231 = vmatprep.subr.bf16.mxu1 %v20433_v3 }
 0xda8   :  { %v20482_v22 = vld [vmem:[#allocation12 + $0x7b8] ss:$12 sps:$4 sm:$0xff]  }
 0xda9   :  { %19944 = vmatpush3.bf16.msra.mxu0 %v20434_v9  ;;  %v20481_v9 = vld [vmem:[#allocation12 + $0x814] ss:$12 sps:$4 sm:$0xff]  }
 0xdaa   :  { %15232 = vmatpush1.bf16.msra.mxu1 %v20431_v26  ;;  %19945 = vmatprep.subr.bf16.mxu0 %v21001_v1 }
 0xdab   :  { %15233 = vmatprep.subr.bf16.mxu1 %v20437_v59 }
 0xdad   :  { %19946 = vmatpush3.bf16.msra.mxu0 %v20438_v40  ;;  %v20479_v40 = vld [vmem:[#allocation12 + $0x810] ss:$12 sps:$4 sm:$0xff]  }
 0xdae   :  { %15234 = vmatpush1.bf16.msra.mxu1 %v20435_v8  ;;  %19947 = vmatprep.subr.bf16.mxu0 %v21001_v1  ;;  %v20485_v8 = vld [vmem:[#allocation12 + $0x7fc] ss:$12 sps:$4 sm:$0xff]  }
 0xdaf   :  { %15235 = vmatprep.subr.bf16.mxu1 %v20441_v18 }
 0xdb0   :  { %v14546_v44 = vpop.f32.mrf.mxu0 }
 0xdb1   :  { %19948 = vmatpush3.bf16.msra.mxu0 %v20442_v50  ;;  %v15086_v15 = vpack.c.bf16 %v14546_v44, %v14546_v44  ;;  %v20486_v50 = vld [vmem:[#allocation12 + $0x7a0] ss:$12 sps:$4 sm:$0xff]   ;;  %v20489_v44 = vld [vmem:[#allocation12 + $0x7e4] ss:$12 sps:$4 sm:$0xff]  }
 0xdb2   :  { %15236 = vmatpush1.bf16.msra.mxu1 %v20439_v0  ;;  %v19883_v57 = vpop.f32.mrf.mxu0  ;;  %19949 = vmatprep.subr.bf16.mxu0 %v21001_v1 }
 0xdb3   :  { %15430 = vmatprep.subr.bf16.mxu1 %v20445_v19  ;;  %v20483_v19 = vld [vmem:[#allocation12 + $0x7f8] ss:$12 sps:$4 sm:$0xff]   ;;  %v20490_v57 = vld [vmem:[#allocation12 + $0x788] ss:$12 sps:$4 sm:$0xff]  }
 0xdb4   :  { %v14549_v43 = vpop.f32.mrf.mxu0  ;;  %v22262_v27 = vpop.f32.mrf.mxu1 }
 0xdb5   :  { %15254 = vmatmul.mubr.bf16.vlgmr.msra.gmra.mxu1 %v15085_v24  ;;  %19950 = vmatpush3.bf16.msra.mxu0 %v20446_v36  ;;  %v20494_v43 = vld [vmem:[#allocation12 + $0x8f0] ss:$12 sps:$4 sm:$0xff]  }
 0xdb6   :  { %15431 = vmatpush1.bf16.msra.mxu1 %v20443_v7  ;;  %v19884_v52 = vpop.f32.mrf.mxu0  ;;  %v19889_v21 = vpop.f32.mrf.mxu1  ;;  %19951 = vmatprep.subr.bf16.mxu0 %v21001_v1  ;;  %v20487_v7 = vld [vmem:[#allocation12 + $0x7e0] ss:$12 sps:$4 sm:$0xff]  }
 0xdb7   :  { %15432 = vmatprep.subr.bf16.mxu1 %v20449_v4  ;;  %15462 = vmatprep.mubr.bf16.mxu1 %v21003_v32  ;;  %v20493_v4 = vld [vmem:[#allocation12 + $0x7cc] ss:$12 sps:$4 sm:$0xff]   ;;  %v20491_v52 = vld [vmem:[#allocation12 + $0x7c8] ss:$12 sps:$4 sm:$0xff]  }
 0xdb8   :  { %v14595_v12 = vpop.f32.mrf.mxu1  ;;  %v20497_v21 = vld [vmem:[#allocation12 + $0x7b4] ss:$12 sps:$4 sm:$0xff]  }
 0xdb9   :  { %19952 = vmatpush3.bf16.msra.mxu0 %v20450_v53  ;;  %v15087_v53 = vpack.c.bf16 %v22262_v27, %v22262_v27  ;;  %v20501_v12 = vld [vmem:[#allocation12 + $0x79c] ss:$12 sps:$4 sm:$0xff]   ;;  %v20502_v27 = vld [vmem:[#allocation12 + $0x8c0] ss:$12 sps:$4 sm:$0xff]  }
 0xdba   :  { %15433 = vmatpush1.bf16.msra.mxu1 %v20447_v13  ;;  %v19890_v61 = vpop.f32.mrf.mxu1  ;;  %19953 = vmatprep.subr.bf16.mxu0 %v21001_v1  ;;  %v20498_v13 = vld [vmem:[#allocation12 + $0x8d8] ss:$12 sps:$4 sm:$0xff]  }
 0xdbb   :  { %15434 = vmatprep.subr.bf16.mxu1 %v20453_v56  ;;  %v20495_v56 = vld [vmem:[#allocation12 + $0x7b0] ss:$12 sps:$4 sm:$0xff]  }
 0xdbc   :  { %v20505_v61 = vld [vmem:[#allocation12 + $0x784] ss:$12 sps:$4 sm:$0xff]  }
 0xdbd   :  { %v22267_v41 = vpop.f32.mrf.mxu0  ;;  %19954 = vmatpush3.bf16.msra.mxu0 %v20454_v2  ;;  %v20499_v2 = vld [vmem:[#allocation12 + $0x798] ss:$12 sps:$4 sm:$0xff]  }
 0xdbe   :  { %15435 = vmatpush1.bf16.msra.mxu1 %v20451_v25  ;;  %19955 = vmatprep.subr.bf16.mxu0 %v21001_v1  ;;  %v20506_v25 = vld [vmem:[#allocation12 + $0x8a8] ss:$12 sps:$4 sm:$0xff]  }
 0xdbf   :  { %v19895_v17 = vpop.f32.mrf.mxu0  ;;  %15436 = vmatprep.subr.bf16.mxu1 %v20457_v51  ;;  %v20503_v51 = vld [vmem:[#allocation12 + $0x780] ss:$12 sps:$4 sm:$0xff]  }
 0xdc0   :  { %v20507_v17 = vld [vmem:[#allocation12 + $0x8e8] ss:$12 sps:$4 sm:$0xff]  }
 0xdc1   :  { %v14641_v11 = vpop.f32.mrf.mxu0  ;;  %19956 = vmatpush3.bf16.msra.mxu0 %v20458_v20  ;;  %v20509_v20 = vld [vmem:[#allocation12 + $0x8ec] ss:$12 sps:$4 sm:$0xff]  }
 0xdc2   :  { %15437 = vmatpush1.bf16.msra.mxu1 %v20455_v62  ;;  %19961 = vmatprep.subr.bf16.mxu0 %v21001_v1  ;;  %v20510_v62 = vld [vmem:[#allocation12 + $0x890] ss:$12 sps:$4 sm:$0xff]   ;;  %v20514_v11 = vld [vmem:[#allocation12 + $0x878] ss:$12 sps:$4 sm:$0xff]  }
 0xdc3   :  { %v19896_v45 = vpop.f32.mrf.mxu0  ;;  %15438 = vmatprep.subr.bf16.mxu1 %v20461_v39  ;;  %v20513_v39 = vld [vmem:[#allocation12 + $0x8d4] ss:$12 sps:$4 sm:$0xff]  }
 0xdc4   :  { %19958 = vmatmul.mubr.bf16.vlgmr.msra.gmra.mxu0 %v15086_v15  ;;  %v20515_v45 = vld [vmem:[#allocation12 + $0x8b8] ss:$12 sps:$4 sm:$0xff]  }
 0xdc5   :  { %19962 = vmatpush3.bf16.msra.mxu0 %v20462_v48  ;;  %19977 = vmatprep.mubr.msk.bf16.mxu0 %vm21002_vm0, %v21001_v1  ;;  %v20511_v48 = vld [vmem:[#allocation12 + $0x8d0] ss:$12 sps:$4 sm:$0xff]  }
 0xdc6   :  { %15439 = vmatpush1.bf16.msra.mxu1 %v20459_v63  ;;  %19963 = vmatprep.subr.bf16.mxu0 %v21001_v1  ;;  %v20518_v63 = vld [vmem:[#allocation12 + $0x860] ss:$12 sps:$4 sm:$0xff]  }
 0xdc7   :  { %15440 = vmatprep.subr.bf16.mxu1 %v20465_v37  ;;  %v20521_v37 = vld [vmem:[#allocation12 + $0x8a4] ss:$12 sps:$4 sm:$0xff]  }
 0xdc9   :  { %19964 = vmatpush3.bf16.msra.mxu0 %v20466_v23  ;;  %v20522_v23 = vld [vmem:[#allocation12 + $0x848] ss:$12 sps:$4 sm:$0xff]  }
 0xdca   :  { %15441 = vmatpush1.bf16.msra.mxu1 %v20463_v55  ;;  %v22274_v14 = vpop.f32.mrf.mxu1  ;;  %19965 = vmatprep.subr.bf16.mxu0 %v21001_v1  ;;  %v20519_v55 = vld [vmem:[#allocation12 + $0x8a0] ss:$12 sps:$4 sm:$0xff]  }
 0xdcb   :  { %15442 = vmatprep.subr.bf16.mxu1 %v20469_v6  ;;  %v20525_v6 = vld [vmem:[#allocation12 + $0x88c] ss:$12 sps:$4 sm:$0xff]  }
 0xdcc   :  { %v19901_v33 = vpop.f32.mrf.mxu1 }
 0xdcd   :  { %19966 = vmatpush3.bf16.msra.mxu0 %v20470_v46  ;;  %v20526_v46 = vld [vmem:[#allocation12 + $0x9b0] ss:$12 sps:$4 sm:$0xff]   ;;  %v20529_v33 = vld [vmem:[#allocation12 + $0x874] ss:$12 sps:$4 sm:$0xff]  }
 0xdce   :  { %15443 = vmatpush1.bf16.msra.mxu1 %v20467_v16  ;;  %v14687_v34 = vpop.f32.mrf.mxu1  ;;  %v22277_v29 = vpop.f32.mrf.mxu0  ;;  %19967 = vmatprep.subr.bf16.mxu0 %v21001_v1  ;;  %v15088_v16 = vpack.c.bf16 %v22267_v41, %v22267_v41  ;;  %v20534_v41 = vld [vmem:[#allocation12 + $0x980] ss:$12 sps:$4 sm:$0xff]  }
 0xdcf   :  { %15444 = vmatprep.subr.bf16.mxu1 %v20473_v54  ;;  %v20523_v54 = vld [vmem:[#allocation12 + $0x888] ss:$12 sps:$4 sm:$0xff]   ;;  %v20527_v34 = vld [vmem:[#allocation12 + $0x870] ss:$12 sps:$4 sm:$0xff]  }
 0xdd0   :  { %v19902_v24 = vpop.f32.mrf.mxu1  ;;  %v19907_v5 = vpop.f32.mrf.mxu0 }
 0xdd1   :  { %19968 = vmatpush3.bf16.msra.mxu0 %v20474_v10  ;;  %v20530_v10 = vld [vmem:[#allocation12 + $0x998] ss:$12 sps:$4 sm:$0xff]   ;;  %v20538_v5 = vld [vmem:[#allocation12 + $0x968] ss:$12 sps:$4 sm:$0xff]  }
 0xdd2   :  { %15445 = vmatpush1.bf16.msra.mxu1 %v20471_v60  ;;  %v14733_v3 = vpop.f32.mrf.mxu0  ;;  %19969 = vmatprep.subr.bf16.mxu0 %v21001_v1  ;;  %v20533_v60 = vld [vmem:[#allocation12 + $0x85c] ss:$12 sps:$4 sm:$0xff]   ;;  %v20537_v24 = vld [vmem:[#allocation12 + $0x844] ss:$12 sps:$4 sm:$0xff]  }
 0xdd3   :  { %15639 = vmatprep.subr.bf16.mxu1 %v20477_v31  ;;  %v20531_v31 = vld [vmem:[#allocation12 + $0x858] ss:$12 sps:$4 sm:$0xff]  }
 0xdd4   :  { %v19908_v26 = vpop.f32.mrf.mxu0  ;;  %v20541_v3 = vld [vmem:[#allocation12 + $0x9ac] ss:$12 sps:$4 sm:$0xff]  }
 0xdd5   :  { %15463 = vmatmul.mubr.bf16.vlgmr.msra.gmra.mxu1 %v15086_v15  ;;  %19970 = vmatpush3.bf16.msra.mxu0 %v20478_v30  ;;  %v20517_v15 = vld [vmem:[#allocation12 + $0x8bc] ss:$12 sps:$4 sm:$0xff]   ;;  %v20535_v30 = vld [vmem:[#allocation12 + $0x840] ss:$12 sps:$4 sm:$0xff]  }
 0xdd6   :  { %15640 = vmatpush1.bf16.msra.mxu1 %v20475_v49  ;;  %v22281_v59 = vpop.f32.mrf.mxu0  ;;  %19971 = vmatprep.subr.bf16.mxu0 %v21001_v1  ;;  %v20542_v49 = vld [vmem:[#allocation12 + $0x950] ss:$12 sps:$4 sm:$0xff]   ;;  %v20545_v26 = vld [vmem:[#allocation12 + $0x994] ss:$12 sps:$4 sm:$0xff]  }
 0xdd7   :  { %15641 = vmatprep.subr.bf16.mxu1 %v20481_v9  ;;  %15671 = vmatprep.mubr.bf16.mxu1 %v21003_v32  ;;  %v20539_v9 = vld [vmem:[#allocation12 + $0x9a8] ss:$12 sps:$4 sm:$0xff]  }
 0xdd8   :  { %v19919_v18 = vpop.f32.mrf.mxu0 }
 0xdd9   :  { %19972 = vmatpush3.bf16.msra.mxu0 %v20482_v22  ;;  %v20546_v22 = vld [vmem:[#allocation12 + $0x938] ss:$12 sps:$4 sm:$0xff]   ;;  %v20550_v18 = vld [vmem:[#allocation12 + $0x920] ss:$12 sps:$4 sm:$0xff]  }
 0xdda   :  { %15642 = vmatpush1.bf16.msra.mxu1 %v20479_v40  ;;  %v14825_v0 = vpop.f32.mrf.mxu0  ;;  %19973 = vmatprep.subr.bf16.mxu0 %v21001_v1  ;;  %v20543_v40 = vld [vmem:[#allocation12 + $0x990] ss:$12 sps:$4 sm:$0xff]  }
 0xddb   :  { %15643 = vmatprep.subr.bf16.mxu1 %v20485_v8  ;;  %v20549_v8 = vld [vmem:[#allocation12 + $0x97c] ss:$12 sps:$4 sm:$0xff]   ;;  %v20553_v0 = vld [vmem:[#allocation12 + $0x964] ss:$12 sps:$4 sm:$0xff]  }
 0xddc   :  { %v19920_v36 = vpop.f32.mrf.mxu0 }
 0xddd   :  { %19974 = vmatpush3.bf16.msra.mxu0 %v20486_v50  ;;  %v20547_v50 = vld [vmem:[#allocation12 + $0x978] ss:$12 sps:$4 sm:$0xff]  }
 0xdde   :  { %15644 = vmatpush1.bf16.msra.mxu1 %v20483_v19  ;;  %19975 = vmatprep.subr.bf16.mxu0 %v21001_v1  ;;  %v20554_v19 = vld [vmem:[#allocation12 + $0x908] ss:$12 sps:$4 sm:$0xff]   ;;  %v20557_v36 = vld [vmem:[#allocation12 + $0x94c] ss:$12 sps:$4 sm:$0xff]  }
 0xddf   :  { %15645 = vmatprep.subr.bf16.mxu1 %v20489_v44  ;;  %v20551_v44 = vld [vmem:[#allocation12 + $0x960] ss:$12 sps:$4 sm:$0xff]  }
 0xde1   :  { %19976 = vmatpush3.bf16.msra.mxu0 %v20490_v57  ;;  %v20558_v57 = vld [vmem:[#allocation12 + $0xa70] ss:$12 sps:$4 sm:$0xff]  }
 0xde2   :  { %15646 = vmatpush1.bf16.msra.mxu1 %v20487_v7  ;;  %19981 = vmatprep.subr.bf16.mxu0 %v21001_v1  ;;  %v15089_v7 = vpack.c.bf16 %v22274_v14, %v22274_v14  ;;  %v20566_v14 = vld [vmem:[#allocation12 + $0xa40] ss:$12 sps:$4 sm:$0xff]  }
 0xde3   :  { %15647 = vmatprep.subr.bf16.mxu1 %v20493_v4  ;;  %v20555_v4 = vld [vmem:[#allocation12 + $0x948] ss:$12 sps:$4 sm:$0xff]  }
 0xde4   :  { %19978 = vmatmul.mubr.bf16.vlgmr.msra.gmra.mxu0 %v15087_v53 }
 0xde5   :  { %19982 = vmatpush3.bf16.msra.mxu0 %v20494_v43  ;;  %19997 = vmatprep.mubr.msk.bf16.mxu0 %vm21002_vm0, %v21001_v1  ;;  %v20561_v43 = vld [vmem:[#allocation12 + $0x934] ss:$12 sps:$4 sm:$0xff]  }
 0xde6   :  { %15648 = vmatpush1.bf16.msra.mxu1 %v20491_v52  ;;  %19983 = vmatprep.subr.bf16.mxu0 %v21001_v1  ;;  %v20559_v52 = vld [vmem:[#allocation12 + $0x930] ss:$12 sps:$4 sm:$0xff]  }
 0xde7   :  { %15649 = vmatprep.subr.bf16.mxu1 %v20497_v21  ;;  %v20565_v21 = vld [vmem:[#allocation12 + $0x91c] ss:$12 sps:$4 sm:$0xff]  }
 0xde9   :  { %19984 = vmatpush3.bf16.msra.mxu0 %v20498_v13  ;;  %v20563_v13 = vld [vmem:[#allocation12 + $0x918] ss:$12 sps:$4 sm:$0xff]  }
 0xdea   :  { %15650 = vmatpush1.bf16.msra.mxu1 %v20495_v56  ;;  %19985 = vmatprep.subr.bf16.mxu0 %v21001_v1  ;;  %v20569_v56 = vld [vmem:[#allocation12 + $0x904] ss:$12 sps:$4 sm:$0xff]  }
 0xdeb   :  { %15651 = vmatprep.subr.bf16.mxu1 %v20501_v12  ;;  %v20570_v12 = vld [vmem:[#allocation12 + $0xa28] ss:$12 sps:$4 sm:$0xff]  }
 0xded   :  { %19986 = vmatpush3.bf16.msra.mxu0 %v20502_v27  ;;  %v20567_v27 = vld [vmem:[#allocation12 + $0x900] ss:$12 sps:$4 sm:$0xff]  }
 0xdee   :  { %15652 = vmatpush1.bf16.msra.mxu1 %v20499_v2  ;;  %19987 = vmatprep.subr.bf16.mxu0 %v21001_v1  ;;  %v20573_v2 = vld [vmem:[#allocation12 + $0xa6c] ss:$12 sps:$4 sm:$0xff]  }
 0xdef   :  { %15653 = vmatprep.subr.bf16.mxu1 %v20505_v61  ;;  %v20574_v61 = vld [vmem:[#allocation12 + $0xa10] ss:$12 sps:$4 sm:$0xff]  }
 0xdf1   :  { %19988 = vmatpush3.bf16.msra.mxu0 %v20506_v25  ;;  %v20571_v25 = vld [vmem:[#allocation12 + $0xa68] ss:$12 sps:$4 sm:$0xff]  }
 0xdf2   :  { %15654 = vmatpush1.bf16.msra.mxu1 %v20503_v51  ;;  %19989 = vmatprep.subr.bf16.mxu0 %v21001_v1  ;;  %v20577_v51 = vld [vmem:[#allocation12 + $0xa54] ss:$12 sps:$4 sm:$0xff]  }
 0xdf3   :  { %15848 = vmatprep.subr.bf16.mxu1 %v20509_v20  ;;  %v20578_v20 = vld [vmem:[#allocation12 + $0x9f8] ss:$12 sps:$4 sm:$0xff]  }
 0xdf5   :  { %15672 = vmatmul.mubr.bf16.vlgmr.msra.gmra.mxu1 %v15087_v53  ;;  %19990 = vmatpush3.bf16.msra.mxu0 %v20510_v62  ;;  %v20562_v53 = vld [vmem:[#allocation12 + $0xa58] ss:$12 sps:$4 sm:$0xff]   ;;  %v20575_v62 = vld [vmem:[#allocation12 + $0xa50] ss:$12 sps:$4 sm:$0xff]  }
 0xdf6   :  { %15849 = vmatpush1.bf16.msra.mxu1 %v20507_v17  ;;  %19991 = vmatprep.subr.bf16.mxu0 %v21001_v1  ;;  %v20581_v17 = vld [vmem:[#allocation12 + $0xa3c] ss:$12 sps:$4 sm:$0xff]  }
 0xdf7   :  { %15850 = vmatprep.subr.bf16.mxu1 %v20513_v39  ;;  %15880 = vmatprep.mubr.bf16.mxu1 %v21003_v32  ;;  %v20582_v39 = vld [vmem:[#allocation12 + $0x9e0] ss:$12 sps:$4 sm:$0xff]  }
 0xdf9   :  { %19992 = vmatpush3.bf16.msra.mxu0 %v20514_v11  ;;  %v20579_v11 = vld [vmem:[#allocation12 + $0xa38] ss:$12 sps:$4 sm:$0xff]  }
 0xdfa   :  { %15851 = vmatpush1.bf16.msra.mxu1 %v20511_v48  ;;  %19993 = vmatprep.subr.bf16.mxu0 %v21001_v1  ;;  %v20585_v48 = vld [vmem:[#allocation12 + $0xa24] ss:$12 sps:$4 sm:$0xff]  }
 0xdfb   :  { %15852 = vmatprep.subr.bf16.mxu1 %v20517_v15  ;;  %v20586_v15 = vld [vmem:[#allocation12 + $0x9c8] ss:$12 sps:$4 sm:$0xff]  }
 0xdfd   :  { %19994 = vmatpush3.bf16.msra.mxu0 %v20518_v63  ;;  %v20583_v63 = vld [vmem:[#allocation12 + $0xa20] ss:$12 sps:$4 sm:$0xff]  }
 0xdfe   :  { %15853 = vmatpush1.bf16.msra.mxu1 %v20515_v45  ;;  %19995 = vmatprep.subr.bf16.mxu0 %v21001_v1  ;;  %v20589_v45 = vld [vmem:[#allocation12 + $0xa0c] ss:$12 sps:$4 sm:$0xff]  }
 0xdff   :  { %15854 = vmatprep.subr.bf16.mxu1 %v20521_v37  ;;  %v20590_v37 = vld [vmem:[#allocation12 + $0xb30] ss:$12 sps:$4 sm:$0xff]  }
 0xe01   :  { %19996 = vmatpush3.bf16.msra.mxu0 %v20522_v23  ;;  %v15090_v23 = vpack.c.bf16 %v22277_v29, %v22277_v29  ;;  %v20598_v29 = vld [vmem:[#allocation12 + $0xb00] ss:$12 sps:$4 sm:$0xff]  }
 0xe02   :  { %15855 = vmatpush1.bf16.msra.mxu1 %v20519_v55  ;;  %20001 = vmatprep.subr.bf16.mxu0 %v21001_v1  ;;  %v20587_v55 = vld [vmem:[#allocation12 + $0xa08] ss:$12 sps:$4 sm:$0xff]  }
 0xe03   :  { %15856 = vmatprep.subr.bf16.mxu1 %v20525_v6  ;;  %v20593_v6 = vld [vmem:[#allocation12 + $0x9f4] ss:$12 sps:$4 sm:$0xff]  }
 0xe04   :  { %19998 = vmatmul.mubr.bf16.vlgmr.msra.gmra.mxu0 %v15088_v16 }
 0xe05   :  { %20002 = vmatpush3.bf16.msra.mxu0 %v20526_v46  ;;  %20017 = vmatprep.mubr.msk.bf16.mxu0 %vm21002_vm0, %v21001_v1  ;;  %v20594_v46 = vld [vmem:[#allocation12 + $0xb18] ss:$12 sps:$4 sm:$0xff]  }
 0xe06   :  { %15857 = vmatpush1.bf16.msra.mxu1 %v20523_v54  ;;  %20003 = vmatprep.subr.bf16.mxu0 %v21001_v1  ;;  %v20597_v54 = vld [vmem:[#allocation12 + $0x9dc] ss:$12 sps:$4 sm:$0xff]  }
 0xe07   :  { %15858 = vmatprep.subr.bf16.mxu1 %v20529_v33  ;;  %v20595_v33 = vld [vmem:[#allocation12 + $0x9d8] ss:$12 sps:$4 sm:$0xff]  }
 0xe09   :  { %20004 = vmatpush3.bf16.msra.mxu0 %v20530_v10  ;;  %v20601_v10 = vld [vmem:[#allocation12 + $0x9c4] ss:$12 sps:$4 sm:$0xff]  }
 0xe0a   :  { %15859 = vmatpush1.bf16.msra.mxu1 %v20527_v34  ;;  %20005 = vmatprep.subr.bf16.mxu0 %v21001_v1  ;;  %v20602_v34 = vld [vmem:[#allocation12 + $0xae8] ss:$12 sps:$4 sm:$0xff]  }
 0xe0b   :  { %15860 = vmatprep.subr.bf16.mxu1 %v20533_v60  ;;  %v20599_v60 = vld [vmem:[#allocation12 + $0x9c0] ss:$12 sps:$4 sm:$0xff]  }
 0xe0d   :  { %20006 = vmatpush3.bf16.msra.mxu0 %v20534_v41  ;;  %v20605_v41 = vld [vmem:[#allocation12 + $0xb2c] ss:$12 sps:$4 sm:$0xff]  }
 0xe0e   :  { %15861 = vmatpush1.bf16.msra.mxu1 %v20531_v31  ;;  %20007 = vmatprep.subr.bf16.mxu0 %v21001_v1  ;;  %v20606_v31 = vld [vmem:[#allocation12 + $0xad0] ss:$12 sps:$4 sm:$0xff]  }
 0xe0f   :  { %15862 = vmatprep.subr.bf16.mxu1 %v20537_v24  ;;  %v20603_v24 = vld [vmem:[#allocation12 + $0xb28] ss:$12 sps:$4 sm:$0xff]  }
 0xe11   :  { %20008 = vmatpush3.bf16.msra.mxu0 %v20538_v5  ;;  %v20609_v5 = vld [vmem:[#allocation12 + $0xb14] ss:$12 sps:$4 sm:$0xff]  }
 0xe12   :  { %15863 = vmatpush1.bf16.msra.mxu1 %v20535_v30  ;;  %20009 = vmatprep.subr.bf16.mxu0 %v21001_v1 }
 0xe13   :  { %16057 = vmatprep.subr.bf16.mxu1 %v20541_v3  ;;  %v20610_v3 = vld [vmem:[#allocation12 + $0xab8] ss:$12 sps:$4 sm:$0xff]  }
 0xe15   :  { %15881 = vmatmul.mubr.bf16.vlgmr.msra.gmra.mxu1 %v15088_v16  ;;  %20010 = vmatpush3.bf16.msra.mxu0 %v20542_v49  ;;  %v20591_v16 = vld [vmem:[#allocation12 + $0x9f0] ss:$12 sps:$4 sm:$0xff]  }
 0xe16   :  { %16058 = vmatpush1.bf16.msra.mxu1 %v20539_v9  ;;  %20011 = vmatprep.subr.bf16.mxu0 %v21001_v1  ;;  %v20607_v49 = vld [vmem:[#allocation12 + $0xb10] ss:$12 sps:$4 sm:$0xff]  }
 0xe17   :  { %16059 = vmatprep.subr.bf16.mxu1 %v20545_v26  ;;  %16089 = vmatprep.mubr.bf16.mxu1 %v21003_v32  ;;  %v20613_v26 = vld [vmem:[#allocation12 + $0xafc] ss:$12 sps:$4 sm:$0xff]  }
 0xe19   :  { %20012 = vmatpush3.bf16.msra.mxu0 %v20546_v22 }
 0xe1a   :  { %16060 = vmatpush1.bf16.msra.mxu1 %v20543_v40  ;;  %20013 = vmatprep.subr.bf16.mxu0 %v21001_v1  ;;  %v20614_v40 = vld [vmem:[#allocation12 + $0xaa0] ss:$12 sps:$4 sm:$0xff]  }
 0xe1b   :  { %16061 = vmatprep.subr.bf16.mxu1 %v20549_v8  ;;  %v20611_v8 = vld [vmem:[#allocation12 + $0xaf8] ss:$12 sps:$4 sm:$0xff]  }
 0xe1d   :  { %20014 = vmatpush3.bf16.msra.mxu0 %v20550_v18 }
 0xe1e   :  { %16062 = vmatpush1.bf16.msra.mxu1 %v20547_v50  ;;  %20015 = vmatprep.subr.bf16.mxu0 %v21001_v1  ;;  %v20617_v50 = vld [vmem:[#allocation12 + $0xae4] ss:$12 sps:$4 sm:$0xff]  }
 0xe1f   :  { %16063 = vmatprep.subr.bf16.mxu1 %v20553_v0  ;;  %v20618_v0 = vld [vmem:[#allocation12 + $0xa88] ss:$12 sps:$4 sm:$0xff]  }
 0xe21   :  { %20016 = vmatpush3.bf16.msra.mxu0 %v20554_v19  ;;  %v20615_v19 = vld [vmem:[#allocation12 + $0xae0] ss:$12 sps:$4 sm:$0xff]  }
 0xe22   :  { %16064 = vmatpush1.bf16.msra.mxu1 %v20551_v44  ;;  %20021 = vmatprep.subr.bf16.mxu0 %v21001_v1  ;;  %v20621_v44 = vld [vmem:[#allocation12 + $0xacc] ss:$12 sps:$4 sm:$0xff]  }
 0xe23   :  { %16065 = vmatprep.subr.bf16.mxu1 %v20557_v36  ;;  %v20622_v36 = vld [vmem:[#allocation12 + $0xbf0] ss:$12 sps:$4 sm:$0xff]  }
 0xe24   :  { %20018 = vmatmul.mubr.bf16.vlgmr.msra.gmra.mxu0 %v15089_v7 }
 0xe25   :  { %20022 = vmatpush3.bf16.msra.mxu0 %v20558_v57  ;;  %20037 = vmatprep.mubr.msk.bf16.mxu0 %vm21002_vm0, %v21001_v1 }
 0xe26   :  { %16066 = vmatpush1.bf16.msra.mxu1 %v20555_v4  ;;  %20023 = vmatprep.subr.bf16.mxu0 %v21001_v1  ;;  %v20625_v4 = vld [vmem:[#allocation12 + $0xab4] ss:$12 sps:$4 sm:$0xff]  }
 0xe27   :  { %16067 = vmatprep.subr.bf16.mxu1 %v20561_v43 }
 0xe29   :  { %20024 = vmatpush3.bf16.msra.mxu0 %v20562_v53  ;;  %v20626_v53 = vld [vmem:[#allocation12 + $0xbd8] ss:$12 sps:$4 sm:$0xff]  }
 0xe2a   :  { %16068 = vmatpush1.bf16.msra.mxu1 %v20559_v52  ;;  %20025 = vmatprep.subr.bf16.mxu0 %v21001_v1 }
 0xe2b   :  { %16069 = vmatprep.subr.bf16.mxu1 %v20565_v21  ;;  %v20623_v21 = vld [vmem:[#allocation12 + $0xab0] ss:$12 sps:$4 sm:$0xff]  }
 0xe2d   :  { %20026 = vmatpush3.bf16.msra.mxu0 %v20566_v14  ;;  %v20629_v14 = vld [vmem:[#allocation12 + $0xa9c] ss:$12 sps:$4 sm:$0xff]  }
 0xe2e   :  { %16070 = vmatpush1.bf16.msra.mxu1 %v20563_v13  ;;  %20027 = vmatprep.subr.bf16.mxu0 %v21001_v1 }
 0xe2f   :  { %16071 = vmatprep.subr.bf16.mxu1 %v20569_v56  ;;  %v20630_v56 = vld [vmem:[#allocation12 + $0xbc0] ss:$12 sps:$4 sm:$0xff]  }
 0xe31   :  { %20028 = vmatpush3.bf16.msra.mxu0 %v20570_v12 }
 0xe32   :  { %16072 = vmatpush1.bf16.msra.mxu1 %v20567_v27  ;;  %20029 = vmatprep.subr.bf16.mxu0 %v21001_v1  ;;  %v20627_v27 = vld [vmem:[#allocation12 + $0xa98] ss:$12 sps:$4 sm:$0xff]  }
 0xe33   :  { %16266 = vmatprep.subr.bf16.mxu1 %v20573_v2  ;;  %v20633_v2 = vld [vmem:[#allocation12 + $0xa84] ss:$12 sps:$4 sm:$0xff]  }
 0xe35   :  { %16090 = vmatmul.mubr.bf16.vlgmr.msra.gmra.mxu1 %v15089_v7  ;;  %20030 = vmatpush3.bf16.msra.mxu0 %v20574_v61  ;;  %v20619_v7 = vld [vmem:[#allocation12 + $0xac8] ss:$12 sps:$4 sm:$0xff]  }
 0xe36   :  { %16267 = vmatpush1.bf16.msra.mxu1 %v20571_v25  ;;  %20031 = vmatprep.subr.bf16.mxu0 %v21001_v1  ;;  %v20634_v61 = vld [vmem:[#allocation12 + $0xba8] ss:$12 sps:$4 sm:$0xff]   ;;  %v20631_v25 = vld [vmem:[#allocation12 + $0xa80] ss:$12 sps:$4 sm:$0xff]  }
 0xe37   :  { %16268 = vmatprep.subr.bf16.mxu1 %v20577_v51  ;;  %16298 = vmatprep.mubr.bf16.mxu1 %v21003_v32  ;;  %v20637_v51 = vld [vmem:[#allocation12 + $0xbec] ss:$12 sps:$4 sm:$0xff]  }
 0xe39   :  { %20032 = vmatpush3.bf16.msra.mxu0 %v20578_v20  ;;  %v20638_v20 = vld [vmem:[#allocation12 + $0xb90] ss:$12 sps:$4 sm:$0xff]  }
 0xe3a   :  { %16269 = vmatpush1.bf16.msra.mxu1 %v20575_v62  ;;  %20033 = vmatprep.subr.bf16.mxu0 %v21001_v1  ;;  %v20635_v62 = vld [vmem:[#allocation12 + $0xbe8] ss:$12 sps:$4 sm:$0xff]  }
 0xe3b   :  { %16270 = vmatprep.subr.bf16.mxu1 %v20581_v17  ;;  %v20641_v17 = vld [vmem:[#allocation12 + $0xbd4] ss:$12 sps:$4 sm:$0xff]  }
 0xe3d   :  { %20034 = vmatpush3.bf16.msra.mxu0 %v20582_v39 }
 0xe3e   :  { %16271 = vmatpush1.bf16.msra.mxu1 %v20579_v11  ;;  %20035 = vmatprep.subr.bf16.mxu0 %v21001_v1  ;;  %v20642_v11 = vld [vmem:[#allocation12 + $0xb78] ss:$12 sps:$4 sm:$0xff]  }
 0xe3f   :  { %16272 = vmatprep.subr.bf16.mxu1 %v20585_v48  ;;  %v20639_v48 = vld [vmem:[#allocation12 + $0xbd0] ss:$12 sps:$4 sm:$0xff]  }
 0xe41   :  { %20036 = vmatpush3.bf16.msra.mxu0 %v20586_v15 }
 0xe42   :  { %16273 = vmatpush1.bf16.msra.mxu1 %v20583_v63  ;;  %20041 = vmatprep.subr.bf16.mxu0 %v21001_v1  ;;  %v20645_v63 = vld [vmem:[#allocation12 + $0xbbc] ss:$12 sps:$4 sm:$0xff]  }
 0xe43   :  { %16274 = vmatprep.subr.bf16.mxu1 %v20589_v45 }
 0xe44   :  { %20038 = vmatmul.mubr.bf16.vlgmr.msra.gmra.mxu0 %v15090_v23 }
 0xe45   :  { %20042 = vmatpush3.bf16.msra.mxu0 %v20590_v37  ;;  %20057 = vmatprep.mubr.msk.bf16.mxu0 %vm21002_vm0, %v21001_v1  ;;  %v20646_v37 = vld [vmem:[#allocation12 + $0xb60] ss:$12 sps:$4 sm:$0xff]  }
 0xe46   :  { %16275 = vmatpush1.bf16.msra.mxu1 %v20587_v55  ;;  %20043 = vmatprep.subr.bf16.mxu0 %v21001_v1 }
 0xe47   :  { %16276 = vmatprep.subr.bf16.mxu1 %v20593_v6  ;;  %v20649_v6 = vld [vmem:[#allocation12 + $0xba4] ss:$12 sps:$4 sm:$0xff]  }
 0xe49   :  { %20044 = vmatpush3.bf16.msra.mxu0 %v20594_v46  ;;  %v20650_v46 = vld [vmem:[#allocation12 + $0xb48] ss:$12 sps:$4 sm:$0xff]  }
 0xe4a   :  { %16277 = vmatpush1.bf16.msra.mxu1 %v20591_v16  ;;  %20045 = vmatprep.subr.bf16.mxu0 %v21001_v1  ;;  %v20647_v16 = vld [vmem:[#allocation12 + $0xba0] ss:$12 sps:$4 sm:$0xff]  }
 0xe4b   :  { %16278 = vmatprep.subr.bf16.mxu1 %v20597_v54  ;;  %v20653_v54 = vld [vmem:[#allocation12 + $0xb8c] ss:$12 sps:$4 sm:$0xff]  }
 0xe4d   :  { %20046 = vmatpush3.bf16.msra.mxu0 %v20598_v29  ;;  %v15092_v29 = vpack.c.bf16 %v22281_v59, %v22281_v59  ;;  %v20662_v59 = vld [vmem:[#allocation12 + $0xb44] ss:$12 sps:$4 sm:$0xff]  }
 0xe4e   :  { %16279 = vmatpush1.bf16.msra.mxu1 %v20595_v33  ;;  %20047 = vmatprep.subr.bf16.mxu0 %v21001_v1  ;;  %v20651_v33 = vld [vmem:[#allocation12 + $0xb88] ss:$12 sps:$4 sm:$0xff]  }
 0xe4f   :  { %16280 = vmatprep.subr.bf16.mxu1 %v20601_v10  ;;  %v20656_v10 = vld [vmem:[#allocation12 + $0xb74] ss:$12 sps:$4 sm:$0xff]  }
 0xe51   :  { %20048 = vmatpush3.bf16.msra.mxu0 %v20602_v34 }
 0xe52   :  { %16281 = vmatpush1.bf16.msra.mxu1 %v20599_v60  ;;  %20049 = vmatprep.subr.bf16.mxu0 %v21001_v1 }
 0xe53   :  { %16475 = vmatprep.subr.bf16.mxu1 %v20605_v41 }
 0xe55   :  { %16299 = vmatmul.mubr.bf16.vlgmr.msra.gmra.mxu1 %v15090_v23  ;;  %20050 = vmatpush3.bf16.msra.mxu0 %v20606_v31  ;;  %v14776_v30 = vpop.f32.mrf.mxu1  ;;  %v20643_v23 = vld [vmem:[#allocation12 + $0xbb8] ss:$12 sps:$4 sm:$0xff]   ;;  %v20654_v31 = vld [vmem:[#allocation12 + $0xb70] ss:$12 sps:$4 sm:$0xff]  }
 0xe56   :  { %16476 = vmatpush1.bf16.msra.mxu1 %v20603_v24  ;;  %20051 = vmatprep.subr.bf16.mxu0 %v21001_v1  ;;  %v15091_v57 = vpack.c.bf16 %v14776_v30, %v14776_v30  ;;  %v20659_v24 = vld [vmem:[#allocation12 + $0xb5c] ss:$12 sps:$4 sm:$0xff]  }
 0xe57   :  { %v19913_v9 = vpop.f32.mrf.mxu1  ;;  %16477 = vmatprep.subr.bf16.mxu1 %v20609_v5  ;;  %16507 = vmatprep.mubr.bf16.mxu1 %v21003_v32 }
 0xe59   :  { %20052 = vmatpush3.bf16.msra.mxu0 %v20610_v3  ;;  %v14779_v22 = vpop.f32.mrf.mxu1  ;;  %v20657_v3 = vld [vmem:[#allocation12 + $0xb58] ss:$12 sps:$4 sm:$0xff]  }
 0xe5a   :  { %16478 = vmatpush1.bf16.msra.mxu1 %v20607_v49  ;;  %20053 = vmatprep.subr.bf16.mxu0 %v21001_v1  ;;  %v20660_v49 = vld [vmem:[#allocation12 + $0xb40] ss:$12 sps:$4 sm:$0xff]  }
 0xe5b   :  { %v19914_v18 = vpop.f32.mrf.mxu1  ;;  %16479 = vmatprep.subr.bf16.mxu1 %v20613_v26 }
 0xe5d   :  { %20054 = vmatpush3.bf16.msra.mxu0 %v20614_v40 }
 0xe5e   :  { %16480 = vmatpush1.bf16.msra.mxu1 %v20611_v8  ;;  %20055 = vmatprep.subr.bf16.mxu0 %v21001_v1 }
 0xe5f   :  { %16481 = vmatprep.subr.bf16.mxu1 %v20617_v50  ;;  %v20663_v50 = vld [vmem:[%s22629_s7 + $0x70] ss:$8 sps:$4 sm:$0xff]  }
 0xe61   :  { %20056 = vmatpush3.bf16.msra.mxu0 %v20618_v0  ;;  %v20665_v0 = vld [vmem:[%s22629_s7 + $0x74] ss:$8 sps:$4 sm:$0xff]  }
 0xe62   :  { %16482 = vmatpush1.bf16.msra.mxu1 %v20615_v19  ;;  %20061 = vmatprep.subr.bf16.mxu0 %v21001_v1 }
 0xe63   :  { %16483 = vmatprep.subr.bf16.mxu1 %v20621_v44  ;;  %v20668_v44 = vld [vmem:[%s22629_s7 + $0x64] ss:$8 sps:$4 sm:$0xff]  }
 0xe64   :  { %20058 = vmatmul.mubr.bf16.vlgmr.msra.gmra.mxu0 %v15091_v57  ;;  %v22340_v43 = vpop.f32.mrf.mxu0 }
 0xe65   :  { %20062 = vmatpush3.bf16.msra.mxu0 %v20622_v36  ;;  %20077 = vmatprep.mubr.msk.bf16.mxu0 %vm21002_vm0, %v21001_v1 }
 0xe66   :  { %16484 = vmatpush1.bf16.msra.mxu1 %v20619_v7  ;;  %v19939_v52 = vpop.f32.mrf.mxu0  ;;  %20063 = vmatprep.subr.bf16.mxu0 %v21001_v1 }
 0xe67   :  { %16485 = vmatprep.subr.bf16.mxu1 %v20625_v4 }
 0xe68   :  { %v15299_v13 = vpop.f32.mrf.mxu0 }
 0xe69   :  { %20064 = vmatpush3.bf16.msra.mxu0 %v20626_v53  ;;  %v20671_v53 = vld [vmem:[%s22629_s7 + $0x54] ss:$8 sps:$4 sm:$0xff]   ;;  %v20672_v13 = vld [vmem:[%s22629_s7 + $0x40] ss:$8 sps:$4 sm:$0xff]  }
 0xe6a   :  { %16486 = vmatpush1.bf16.msra.mxu1 %v20623_v21  ;;  %v19940_v12 = vpop.f32.mrf.mxu0  ;;  %20065 = vmatprep.subr.bf16.mxu0 %v21001_v1  ;;  %v20674_v21 = vld [vmem:[%s22629_s7 + $0x44] ss:$8 sps:$4 sm:$0xff]  }
 0xe6b   :  { %16487 = vmatprep.subr.bf16.mxu1 %v20629_v14  ;;  %v20675_v14 = vld [vmem:[%s22629_s7 + $0x170] ss:$8 sps:$4 sm:$0xff]   ;;  %v20680_v12 = vld [vmem:[%s22629_s7 + $0x34] ss:$8 sps:$4 sm:$0xff]  }
 0xe6d   :  { %20066 = vmatpush3.bf16.msra.mxu0 %v20630_v56  ;;  %v20677_v56 = vld [vmem:[%s22629_s7 + $0x174] ss:$8 sps:$4 sm:$0xff]  }
 0xe6e   :  { %16488 = vmatpush1.bf16.msra.mxu1 %v20627_v27  ;;  %20067 = vmatprep.subr.bf16.mxu0 %v21001_v1  ;;  %v20683_v27 = vld [vmem:[%s22629_s7 + $0x164] ss:$8 sps:$4 sm:$0xff]  }
 0xe6f   :  { %16489 = vmatprep.subr.bf16.mxu1 %v20633_v2  ;;  %v20681_v2 = vld [vmem:[%s22629_s7 + $0x160] ss:$8 sps:$4 sm:$0xff]  }
 0xe71   :  { %20068 = vmatpush3.bf16.msra.mxu0 %v20634_v61  ;;  %v20678_v61 = vld [vmem:[%s22629_s7 + $0x30] ss:$8 sps:$4 sm:$0xff]  }
 0xe72   :  { %16490 = vmatpush1.bf16.msra.mxu1 %v20631_v25  ;;  %20069 = vmatprep.subr.bf16.mxu0 %v21001_v1  ;;  %v20686_v25 = vld [vmem:[%s22629_s7 + $0x24] ss:$8 sps:$4 sm:$0xff]  }
 0xe73   :  { %16684 = vmatprep.subr.bf16.mxu1 %v20637_v51  ;;  %v20689_v51 = vld [vmem:[%s22629_s7 + $0x154] ss:$8 sps:$4 sm:$0xff]  }
 0xe75   :  { %v15255_v39 = vpop.f32.mrf.mxu1  ;;  %16508 = vmatmul.mubr.bf16.vlgmr.msra.gmra.mxu1 %v15091_v57  ;;  %20070 = vmatpush3.bf16.msra.mxu0 %v20638_v20  ;;  %v20666_v57 = vld [vmem:[%s22629_s7 + $0x60] ss:$8 sps:$4 sm:$0xff]  }
 0xe76   :  { %16685 = vmatpush1.bf16.msra.mxu1 %v20635_v62  ;;  %20071 = vmatprep.subr.bf16.mxu0 %v21001_v1  ;;  %v20684_v62 = vld [vmem:[%s22629_s7 + $0x20] ss:$8 sps:$4 sm:$0xff]  }
 0xe77   :  { %v15257_v15 = vpop.f32.mrf.mxu1  ;;  %16686 = vmatprep.subr.bf16.mxu1 %v20641_v17  ;;  %16716 = vmatprep.mubr.bf16.mxu1 %v21003_v32  ;;  %v20687_v17 = vld [vmem:[%s22629_s7 + $0x150] ss:$8 sps:$4 sm:$0xff]  }
 0xe79   :  { %v15259_v45 = vpop.f32.mrf.mxu1  ;;  %20072 = vmatpush3.bf16.msra.mxu0 %v20642_v11 }
 0xe7a   :  { %16687 = vmatpush1.bf16.msra.mxu1 %v20639_v48  ;;  %20073 = vmatprep.subr.bf16.mxu0 %v21001_v1 }
 0xe7b   :  { %v15260_v55 = vpop.f32.mrf.mxu1  ;;  %16688 = vmatprep.subr.bf16.mxu1 %v20645_v63  ;;  %v20695_v63 = vld [vmem:[%s22629_s7 + $0x144] ss:$8 sps:$4 sm:$0xff]  }
 0xe7d   :  { %20074 = vmatpush3.bf16.msra.mxu0 %v20646_v37  ;;  %v20690_v37 = vld [vmem:[%s22629_s7 + $0x10] ss:$8 sps:$4 sm:$0xff]  }
 0xe7e   :  { %16689 = vmatpush1.bf16.msra.mxu1 %v20643_v23  ;;  %20075 = vmatprep.subr.bf16.mxu0 %v21001_v1  ;;  %v20693_v23 = vld [vmem:[%s22629_s7 + $0x140] ss:$8 sps:$4 sm:$0xff]  }
 0xe7f   :  { %16690 = vmatprep.subr.bf16.mxu1 %v20649_v6  ;;  %v20696_v6 = vld [vmem:[%s22629_s7] ss:$8 sps:$4 sm:$0xff]  }
 0xe81   :  { %20076 = vmatpush3.bf16.msra.mxu0 %v20650_v46  ;;  %v20698_v46 = vld [vmem:[%s22629_s7 + $0x4] ss:$8 sps:$4 sm:$0xff]  }
 0xe82   :  { %16691 = vmatpush1.bf16.msra.mxu1 %v20647_v16  ;;  %17153 = vmatprep.subr.bf16.mxu0 %v20677_v56  ;;  %v20699_v16 = vld [vmem:[%s22629_s7 + $0x130] ss:$8 sps:$4 sm:$0xff]  }
 0xe83   :  { %16692 = vmatprep.subr.bf16.mxu1 %v20653_v54  ;;  %v20701_v54 = vld [vmem:[%s22629_s7 + $0x134] ss:$8 sps:$4 sm:$0xff]  }
 0xe84   :  { %v15505_v34 = vpop.f32.mrf.mxu0  ;;  %20078 = vmatmul.mubr.bf16.vlgmr.msra.gmra.mxu0 %v15092_v29 }
 0xe85   :  { %v16779_v60 = vadd.f32 %v15505_v34, %v22340_v43  ;;  %17185 = vmatprep.mubr.bf16.mxu0 %v21003_v32  ;;  %v20669_v43 = vld [vmem:[%s22629_s7 + $0x50] ss:$8 sps:$4 sm:$0xff]   ;;  %17154 = vmatpush1.bf16.msra.mxu0 %v20675_v14  ;;  %v20705_v34 = vld [vmem:[%s22629_s7 + $0x120] ss:$8 sps:$4 sm:$0xff]  }
 0xe86   :  { %v19959_v41 = vpop.f32.mrf.mxu0  ;;  %16693 = vmatpush1.bf16.msra.mxu1 %v20651_v33  ;;  %17155 = vmatprep.subr.bf16.mxu0 %v20683_v27  ;;  %v20707_v33 = vld [vmem:[%s22629_s7 + $0x124] ss:$8 sps:$4 sm:$0xff]   ;;  %v20732_v14 = vld [vmem:[%s22629_s7 + $0x80] ss:$8 sps:$4 sm:$0xff]  }
 0xe87   :  { %16694 = vmatprep.subr.bf16.mxu1 %v20656_v10  ;;  %v20702_v10 = vld [vmem:[%s22629_s7 + $0xf0] ss:$8 sps:$4 sm:$0xff]   ;;  %v20710_v41 = vld [vmem:[%s22629_s7 + $0xe4] ss:$8 sps:$4 sm:$0xff]  }
 0xe88   :  { %v15508_v5 = vpop.f32.mrf.mxu0 }
 0xe89   :  { %17156 = vmatpush1.bf16.msra.mxu0 %v20681_v2  ;;  %v20708_v5 = vld [vmem:[%s22629_s7 + $0xe0] ss:$8 sps:$4 sm:$0xff]  }
 0xe8a   :  { %v19960_v30 = vpop.f32.mrf.mxu0  ;;  %16695 = vmatpush1.bf16.msra.mxu1 %v20654_v31  ;;  %17157 = vmatprep.subr.bf16.mxu0 %v20689_v51  ;;  %v20713_v31 = vld [vmem:[%s22629_s7 + $0x114] ss:$8 sps:$4 sm:$0xff]  }
 0xe8b   :  { %16696 = vmatprep.subr.bf16.mxu1 %v20659_v24  ;;  %v20711_v30 = vld [vmem:[%s22629_s7 + $0x110] ss:$8 sps:$4 sm:$0xff]  }
 0xe8d   :  { %17158 = vmatpush1.bf16.msra.mxu0 %v20687_v17 }
 0xe8e   :  { %16697 = vmatpush1.bf16.msra.mxu1 %v20657_v3  ;;  %17159 = vmatprep.subr.bf16.mxu0 %v20695_v63 }
 0xe8f   :  { %16698 = vmatprep.subr.bf16.mxu1 %v20662_v59 }
 0xe91   :  { %17160 = vmatpush1.bf16.msra.mxu0 %v20693_v23 }
 0xe92   :  { %16699 = vmatpush1.bf16.msra.mxu1 %v20660_v49  ;;  %17161 = vmatprep.subr.bf16.mxu0 %v20701_v54  ;;  %v20716_v49 = vld [vmem:[%s22629_s7 + $0xd4] ss:$8 sps:$4 sm:$0xff]  }
 0xe93   :  { %17112 = vmatprep.subr.bf16.mxu1 %v20665_v0  ;;  %v20723_v0 = vld [vmem:[%s22629_s7 + $0xb0] ss:$8 sps:$4 sm:$0xff]  }
 0xe95   :  { %v15464_v9 = vpop.f32.mrf.mxu1  ;;  %16717 = vmatmul.mubr.bf16.vlgmr.msra.gmra.mxu1 %v15092_v29  ;;  %v20704_v29 = vld [vmem:[%s22629_s7 + $0xf4] ss:$8 sps:$4 sm:$0xff]   ;;  %17162 = vmatpush1.bf16.msra.mxu0 %v20699_v16 }
 0xe96   :  { %v16765_v26 = vadd.f32 %v15464_v9, %v15255_v39  ;;  %17113 = vmatpush1.bf16.msra.mxu1 %v20663_v50  ;;  %17163 = vmatprep.subr.bf16.mxu0 %v20707_v33  ;;  %v20719_v9 = vld [vmem:[%s22629_s7 + $0x104] ss:$8 sps:$4 sm:$0xff]   ;;  %v20725_v50 = vld [vmem:[%s22629_s7 + $0xb4] ss:$8 sps:$4 sm:$0xff]  }
 0xe97   :  { %v15466_v22 = vpop.f32.mrf.mxu1  ;;  %17114 = vmatprep.subr.bf16.mxu1 %v20668_v44 }
 0xe98   :  { %v16772_v40 = vadd.f32 %v15466_v22, %v15257_v15  ;;  %v20692_v15 = vld [vmem:[%s22629_s7 + $0x14] ss:$8 sps:$4 sm:$0xff]   ;;  %v20717_v22 = vld [vmem:[%s22629_s7 + $0x100] ss:$8 sps:$4 sm:$0xff]  }
 0xe99   :  { %v15468_v8 = vpop.f32.mrf.mxu1  ;;  %17164 = vmatpush1.bf16.msra.mxu0 %v20705_v34 }
 0xe9a   :  { %17115 = vmatpush1.bf16.msra.mxu1 %v20666_v57  ;;  %17165 = vmatprep.subr.bf16.mxu0 %v20713_v31  ;;  %v20720_v8 = vld [vmem:[%s22629_s7 + $0xc0] ss:$8 sps:$4 sm:$0xff]  }
 0xe9b   :  { %v15469_v18 = vpop.f32.mrf.mxu1  ;;  %17116 = vmatprep.subr.bf16.mxu1 %v20671_v53 }
 0xe9c   :  { %v20722_v18 = vld [vmem:[%s22629_s7 + $0xc4] ss:$8 sps:$4 sm:$0xff]  }
 0xe9d   :  { %17166 = vmatpush1.bf16.msra.mxu0 %v20711_v30 }
 0xe9e   :  { %17117 = vmatpush1.bf16.msra.mxu1 %v20669_v43  ;;  %17167 = vmatprep.subr.bf16.mxu0 %v20719_v9  ;;  %v20731_v43 = vld [vmem:[%s22629_s7 + $0x94] ss:$8 sps:$4 sm:$0xff]  }
 0xe9f   :  { %17118 = vmatprep.subr.bf16.mxu1 %v20674_v21 }
 0xea1   :  { %17168 = vmatpush1.bf16.msra.mxu0 %v20717_v22  ;;  %v20735_v22 = vld [vmem:[%s22629_s7 + $0x1f0] ss:$8 sps:$4 sm:$0xff]  }
 0xea2   :  { %17119 = vmatpush1.bf16.msra.mxu1 %v20672_v13  ;;  %17311 = vmatprep.subr.bf16.mxu0 %v21003_v32  ;;  %v20734_v13 = vld [vmem:[%s22629_s7 + $0x84] ss:$8 sps:$4 sm:$0xff]  }
 0xea3   :  { %17120 = vmatprep.subr.bf16.mxu1 %v20680_v12 }
 0xea4   :  { %v15714_v19 = vpop.f32.mrf.mxu0 }
 0xea5   :  { %v22365_v36 = vadd.f32 %v16779_v60, %v15714_v19  ;;  %v20728_v19 = vld [vmem:[%s22629_s7 + $0xa4] ss:$8 sps:$4 sm:$0xff]  }
 0xea6   :  { %v19979_v7 = vpop.f32.mrf.mxu0  ;;  %17121 = vmatpush1.bf16.msra.mxu1 %v20678_v61 }
 0xea7   :  { %17122 = vmatprep.subr.bf16.mxu1 %v20686_v25 }
 0xea8   :  { %v15717_v4 = vpop.f32.mrf.mxu0 }
 0xeaa   :  { %v19980_v52 = vpop.f32.mrf.mxu0  ;;  %17123 = vmatpush1.bf16.msra.mxu1 %v20684_v62 }
 0xeab   :  { %17124 = vmatprep.subr.bf16.mxu1 %v20692_v15  ;;  %v20729_v52 = vld [vmem:[%s22629_s7 + $0x90] ss:$8 sps:$4 sm:$0xff]  }
 0xeae   :  { %17125 = vmatpush1.bf16.msra.mxu1 %v20690_v37 }
 0xeaf   :  { %17126 = vmatprep.subr.bf16.mxu1 %v20698_v46 }
 0xeb2   :  { %17127 = vmatpush1.bf16.msra.mxu1 %v20696_v6 }
 0xeb3   :  { %17128 = vmatprep.subr.bf16.mxu1 %v20704_v29 }
 0xeb5   :  { %v15673_v20 = vpop.f32.mrf.mxu1 }
 0xeb6   :  { %v22412_v39 = vadd.f32 %v16765_v26, %v15673_v20  ;;  %17129 = vmatpush2.bf16.msra.mxu1 %v20702_v10  ;;  %v20714_v26 = vld [vmem:[%s22629_s7 + $0xd0] ss:$8 sps:$4 sm:$0xff]  }
 0xeb7   :  { %v15675_v11 = vpop.f32.mrf.mxu1  ;;  %17130 = vmatprep.subr.bf16.mxu1 %v20710_v41 }
 0xeb8   :  { %v22414_v48 = vadd.f32 %v16772_v40, %v15675_v11 }
 0xeb9   :  { %v15677_v45 = vpop.f32.mrf.mxu1 }
 0xeba   :  { %17131 = vmatpush2.bf16.msra.mxu1 %v20708_v5 }
 0xebb   :  { %v15678_v55 = vpop.f32.mrf.mxu1  ;;  %17132 = vmatprep.subr.bf16.mxu1 %v20716_v49 }
 0xebe   :  { %17133 = vmatpush2.bf16.msra.mxu1 %v20714_v26 }
 0xebf   :  { %17134 = vmatprep.subr.bf16.mxu1 %v20722_v18 }
 0xec2   :  { %17135 = vmatpush2.bf16.msra.mxu1 %v20720_v8  ;;  %v20736_v8 = vld [vmem:[%s22629_s7 + $0x1e0] ss:$8 sps:$4 sm:$0xff]  }
 0xec3   :  { %17136 = vmatprep.subr.bf16.mxu1 %v20725_v50 }
 0xec4   :  { %v15923_v60 = vpop.f32.mrf.mxu0 }
 0xec5   :  { %v16781_v24 = vadd.f32 %v22365_v36, %v15923_v60  ;;  %v20726_v36 = vld [vmem:[%s22629_s7 + $0xa0] ss:$8 sps:$4 sm:$0xff]   ;;  %v16786_v60 = vld [vmem:[#allocation13 + $0x33] sm:$0x7] }
 0xec6   :  { %v19999_v3 = vpop.f32.mrf.mxu0  ;;  %17137 = vmatpush2.bf16.msra.mxu1 %v20723_v0  ;;  %v16791_v0 = vrot.slane %v16786_v60, %v21166_v42 }
 0xec7   :  { %17138 = vmatprep.subr.bf16.mxu1 %v20728_v19 }
 0xec8   :  { %v15926_v59 = vpop.f32.mrf.mxu0 }
 0xeca   :  { %v20000_v40 = vpop.f32.mrf.mxu0  ;;  %17139 = vmatpush2.bf16.msra.mxu1 %v20726_v36 }
 0xecb   :  { %17140 = vmatprep.subr.bf16.mxu1 %v20731_v43 }
 0xece   :  { %17141 = vmatpush2.bf16.msra.mxu1 %v20729_v52 }
 0xecf   :  { %17142 = vmatprep.subr.bf16.mxu1 %v20734_v13 }
 0xed2   :  { %17143 = vmatpush2.bf16.msra.mxu1 %v20732_v14 }
 0xed3   :  { %20081 = vmatprep.subr.bf16.mxu1 %v21001_v1 }
 0xed5   :  { %v15882_v44 = vpop.f32.mrf.mxu1 }
 0xed6   :  { %v16767_v57 = vadd.f32 %v22412_v39, %v15882_v44 }
 0xed7   :  { %v15884_v7 = vpop.f32.mrf.mxu1 }
 0xed8   :  { %v16774_v4 = vadd.f32 %v22414_v48, %v15884_v7  ;;  %v20738_v7 = vld [vmem:[%s22629_s7 + $0x1c0] ss:$8 sps:$4 sm:$0xff]  }
 0xed9   :  { %v15886_v53 = vpop.f32.mrf.mxu1 }
 0xedb   :  { %v15887_v21 = vpop.f32.mrf.mxu1 }
 0xee4   :  { %v16132_v56 = vpop.f32.mrf.mxu0 }
 0xee5   :  { %v16782_v12 = vadd.f32 %v16781_v24, %v16132_v56  ;;  %v16799_v24 = vrot.slane %v16786_v60, %v21192_v38 }
 0xee6   :  { %v20019_v27 = vpop.f32.mrf.mxu0 }
 0xee8   :  { %v16135_v2 = vpop.f32.mrf.mxu0 }
 0xee9   :  { %v20739_v2 = vld [vmem:[%s22629_s7 + $0x1b0] ss:$8 sps:$4 sm:$0xff]  }
 0xeea   :  { %v20020_v61 = vpop.f32.mrf.mxu0 }
 0xeeb   :  { %v20742_v61 = vld [vmem:[%s22629_s7 + $0x180] ss:$8 sps:$4 sm:$0xff]  }
 0xef5   :  { %v16091_v25 = vpop.f32.mrf.mxu1 }
 0xef6   :  { %v16768_v51 = vadd.f32 %v16767_v57, %v16091_v25  ;;  %v16795_v57 = vrot.slane %v16786_v60, %v21171_v47  ;;  %v20743_v25 = vld [vmem:[%s22629_s7 + $0x230] ss:$8 sps:$4 sm:$0xff]  }
 0xef7   :  { %v16093_v20 = vpop.f32.mrf.mxu1 }
 0xef8   :  { %v16775_v62 = vadd.f32 %v16774_v4, %v16093_v20  ;;  %v20745_v20 = vld [vmem:[%s22629_s7 + $0x210] ss:$8 sps:$4 sm:$0xff]  }
 0xef9   :  { %v16095_v17 = vpop.f32.mrf.mxu1 }
 0xefa   :  { %v20747_v17 = vld [vmem:[%s22629_s7 + $0x2b0] ss:$8 sps:$4 sm:$0xff]  }
 0xefb   :  { %v16096_v39 = vpop.f32.mrf.mxu1 }
 0xefc   :  { %v20748_v39 = vld [vmem:[%s22629_s7 + $0x2a0] ss:$8 sps:$4 sm:$0xff]  }
 0xf04   :  { %v16341_v11 = vpop.f32.mrf.mxu0 }
 0xf05   :  { %v16783_v41 = vadd.f32 %v16782_v12, %v16341_v11  ;;  %v20750_v11 = vld [vmem:[%s22629_s7 + $0x280] ss:$8 sps:$4 sm:$0xff]  }
 0xf06   :  { %v20039_v48 = vpop.f32.mrf.mxu0 }
 0xf07   :  { %v20751_v48 = vld [vmem:[%s22629_s7 + $0x270] ss:$8 sps:$4 sm:$0xff]  }
 0xf08   :  { %v16344_v15 = vpop.f32.mrf.mxu0 }
 0xf09   :  { %v20752_v15 = vld [vmem:[%s22629_s7 + $0x260] ss:$8 sps:$4 sm:$0xff]  }
 0xf0a   :  { %v20040_v63 = vpop.f32.mrf.mxu0 }
 0xf15   :  { %v16300_v45 = vpop.f32.mrf.mxu1 }
 0xf16   :  { %v16769_v38 = vadd.f32 %v16768_v51, %v16300_v45  ;;  %v20744_v51 = vld [vmem:[%s22629_s7 + $0x220] ss:$8 sps:$4 sm:$0xff]  }
 0xf17   :  { %v16302_v37 = vpop.f32.mrf.mxu1 }
 0xf18   :  { %v16776_v18 = vadd.f32 %v16775_v62, %v16302_v37  ;;  %v20746_v62 = vld [vmem:[%s22629_s7 + $0x200] ss:$8 sps:$4 sm:$0xff]  }
 0xf19   :  { %v16304_v23 = vpop.f32.mrf.mxu1 }
 0xf1b   :  { %v16305_v55 = vpop.f32.mrf.mxu1 }
 0xf1c   :  { %v16860_v55 = vld [vmem:[#allocation13 + $0x36] sm:$0x3] }
 0xf24   :  { %v16550_v6 = vpop.f32.mrf.mxu0 }
 0xf25   :  { %v16784_v31 = vadd.f32 %v16783_v41, %v16550_v6  ;;  %v16865_v6 = vrot.slane %v16860_v55, %v21166_v42 }
 0xf26   :  { %v20059_v46 = vpop.f32.mrf.mxu0 }
 0xf27   :  { %v16869_v46 = vrot.slane %v16860_v55, %v21171_v47  ;;  %v20753_v47 = vld [vmem:[%s22629_s7 + $0x250] ss:$8 sps:$4 sm:$0xff]  }
 0xf28   :  { %v16553_v16 = vpop.f32.mrf.mxu0 }
 0xf2a   :  { %v20060_v54 = vpop.f32.mrf.mxu0 }
 0xf35   :  { %v16509_v29 = vpop.f32.mrf.mxu1 }
 0xf36   :  { %v16770_v50 = vadd.f32 %v16769_v38, %v16509_v29  ;;  %v17197_v29 = vstv %s19246_s12 }
 0xf37   :  { %v16511_v33 = vpop.f32.mrf.mxu1 }
 0xf38   :  { %v16777_v44 = vadd.f32 %v16776_v18, %v16511_v33 }
 0xf39   :  { %v16513_v10 = vpop.f32.mrf.mxu1 }
 0xf3b   :  { %v16514_v34 = vpop.f32.mrf.mxu1 }
 0xf44   :  { %v16759_v5 = vpop.f32.mrf.mxu0 }
 0xf45   :  { %v16785_v30 = vadd.f32 %v16784_v31, %v16759_v5 }
 0xf46   :  { %v20079_v3 = vpop.f32.mrf.mxu0 }
 0xf47   :  { %v16805_v59 = vadd.f32 %v16799_v24, %v16785_v30 }
 0xf48   :  { %v16762_v49 = vpop.f32.mrf.mxu0 }
 0xf49   :  { %v16808_v9 = vadd.f32 %v16805_v59, %v21761_v35  ;;  %v20737_v35 = vld [vmem:[%s22629_s7 + $0x1d0] ss:$8 sps:$4 sm:$0xff]   ;;  %v20754_v49 = vld [vmem:[%s22629_s7 + $0x240] ss:$8 sps:$4 sm:$0xff]  }
 0xf4a   :  { %v20080_v26 = vpop.f32.mrf.mxu0 }
 0xf4b   :  { %v16811_v40 = vpack.c.bf16 %v16808_v9, %v16808_v9  ;;  %v20755_v9 = vld [vmem:[%s22629_s7 + $0x2f0] ss:$8 sps:$4 sm:$0xff]   ;;  %v20756_v26 = vld [vmem:[%s22629_s7 + $0x2e0] ss:$8 sps:$4 sm:$0xff]  }
 0xf4d   :  { %17186 = vmatmul.mubr.bf16.vlgmr.msra.gmra.mxu0 %v16811_v40 }
 0xf4e   :  { %17312 = vmatpush1.bf16.msra.mxu0 %v20735_v22  ;;  %v19247_v22 = vld [vmem:[#allocation13 + $0x38] ss:$0 sm:$0xff] }
 0xf4f   :  { %17313 = vmatprep.subr.bf16.mxu0 %v21003_v32 }
 0xf52   :  { %17314 = vmatpush1.bf16.msra.mxu0 %v20736_v8  ;;  %v17353_v8 = vstv %s19261_s5 }
 0xf53   :  { %17315 = vmatprep.subr.bf16.mxu0 %v21003_v32 }
 0xf55   :  { %v16718_v19 = vpop.f32.mrf.mxu1 }
 0xf56   :  { %v16771_v36 = vadd.f32 %v16770_v50, %v16718_v19  ;;  %17316 = vmatpush1.bf16.msra.mxu0 %v20737_v35 }
 0xf57   :  { %v16720_v4 = vpop.f32.mrf.mxu1  ;;  %17317 = vmatprep.subr.bf16.mxu0 %v21003_v32 }
 0xf58   :  { %v16803_v43 = vadd.f32 %v16791_v0, %v16771_v36  ;;  %v16778_v53 = vadd.f32 %v16777_v44, %v16720_v4  ;;  %v20757_v36 = vld [vmem:[%s22629_s7 + $0x2d0] ss:$8 sps:$4 sm:$0xff]  }
 0xf59   :  { %v16722_v52 = vpop.f32.mrf.mxu1 }
 0xf5a   :  { %v16804_v21 = vadd.f32 %v16795_v57, %v16778_v53  ;;  %17318 = vmatpush1.bf16.msra.mxu0 %v20738_v7  ;;  %v16806_v14 = vadd.f32 %v16803_v43, %v21774_v58  ;;  %v20740_v58 = vld [vmem:[%s22629_s7 + $0x1a0] ss:$8 sps:$4 sm:$0xff]   ;;  %v19262_v7 = vld [vmem:[#allocation13 + $0x39] ss:$0 sm:$0xff]  ;;  %v17470_v43 = vstv %s19271_s22 }
 0xf5b   :  { %v16723_v13 = vpop.f32.mrf.mxu1  ;;  %17319 = vmatprep.subr.bf16.mxu0 %v21003_v32  ;;  %v20758_v57 = vld [vmem:[%s22629_s7 + $0x2c0] ss:$8 sps:$4 sm:$0xff]  }
 0xf5c   :  { %v16807_v56 = vadd.f32 %v16804_v21, %v21777_v28  ;;  %v16809_v27 = vpack.c.bf16 %v16806_v14, %v16806_v14  ;;  %v20741_v28 = vld [vmem:[%s22629_s7 + $0x190] ss:$8 sps:$4 sm:$0xff]  }
 0xf5e   :  { %v16810_v12 = vpack.c.bf16 %v16807_v56, %v16807_v56  ;;  %17320 = vmatpush1.bf16.msra.mxu0 %v20739_v2 }
 0xf5f   :  { %17321 = vmatprep.subr.bf16.mxu0 %v21003_v32 }
 0xf60   :  { %17144 = vmatprep.mubr.bf16.mxu1 %v16810_v12 }
 0xf61   :  { %17145 = vmatmul.mubr.bf16.vlgmr.msra.gmra.mxu1 %v16809_v27 }
 0xf62   :  { %20097 = vmatprep.mubr.msk.bf16.mxu1 %vm21002_vm0, %v21001_v1  ;;  %17322 = vmatpush1.bf16.msra.mxu0 %v20740_v58 }
 0xf63   :  { %17323 = vmatprep.subr.bf16.mxu0 %v21003_v32  ;;  %20082 = vmatpush3.bf16.msra.mxu1 %v20747_v17 }
 0xf64   :  { %20083 = vmatprep.subr.bf16.mxu1 %v21001_v1 }
 0xf66   :  { %17324 = vmatpush1.bf16.msra.mxu0 %v20741_v28 }
 0xf67   :  { %17325 = vmatprep.subr.bf16.mxu0 %v21003_v32  ;;  %20084 = vmatpush3.bf16.msra.mxu1 %v20748_v39 }
 0xf68   :  { %20085 = vmatprep.subr.bf16.mxu1 %v21001_v1 }
 0xf6a   :  { %17326 = vmatpush1.bf16.msra.mxu0 %v20742_v61 }
 0xf6b   :  { %17335 = vmatprep.subr.bf16.mxu0 %v21003_v32 }
 0xf6e   :  { %17336 = vmatpush2.bf16.msra.mxu0 %v20743_v25 }
 0xf6f   :  { %17337 = vmatprep.subr.bf16.mxu0 %v21003_v32 }
 0xf72   :  { %17338 = vmatpush2.bf16.msra.mxu0 %v20744_v51 }
 0xf73   :  { %17339 = vmatprep.subr.bf16.mxu0 %v21003_v32 }
 0xf76   :  { %17340 = vmatpush2.bf16.msra.mxu0 %v20745_v20 }
 0xf77   :  { %17341 = vmatprep.subr.bf16.mxu0 %v21003_v32  ;;  %v20749_v32 = vld [vmem:[%s22629_s7 + $0x290] ss:$8 sps:$4 sm:$0xff]   ;;  %s20954_s7 = scalar_lea.vmem %s17564_s24, 128 }
 0xf78   :  { %20086 = vmatpush3.bf16.msra.mxu1 %v20749_v32  ;;  %p20955_p2 = scmp.ne.s32.totalorder %s17564_s24, %s20954_s7  ;;  %p20960_p4 = scmp.lt.s32.totalorder %s20954_s7, %s20954_s7 }
 0xf79   :  { %20087 = vmatprep.subr.bf16.mxu1 %v21001_v1 }
 0xf7a   :  { %17342 = vmatpush2.bf16.msra.mxu0 %v20746_v62  ;;  %p20961_p5 = por %p20960_p4, %p20959_p3 }
 0xf7b   :  { %20101 = vmatprep.subr.bf16.mxu0 %v21001_v1 }
 0xf7c   :  { %20088 = vmatpush3.bf16.msra.mxu1 %v20750_v11  ;;  %p20962_p6 = pnand %p20961_p5, %p20955_p2 }
 0xf7d   :  { %20089 = vmatprep.subr.bf16.mxu1 %v21001_v1 }
 0xf80   :  { %20090 = vmatpush3.bf16.msra.mxu1 %v20751_v48 }
 0xf81   :  { %20091 = vmatprep.subr.bf16.mxu1 %v21001_v1 }
 0xf84   :  { %20092 = vmatpush3.bf16.msra.mxu1 %v20752_v15 }
 0xf85   :  { %20093 = vmatprep.subr.bf16.mxu1 %v21001_v1 }
 0xf88   :  { %20094 = vmatpush3.bf16.msra.mxu1 %v20753_v47 }
 0xf89   :  { %20095 = vmatprep.subr.bf16.mxu1 %v21001_v1 }
 0xf8c   :  { %20096 = vmatpush3.bf16.msra.mxu1 %v20754_v49 }
0x100d   :  { %v17187_v63 = vpop.f32.mrf.mxu0 }
0x100f   :  { %v17189_v45 = vpop.f32.mrf.mxu0 }
0x1011   :  { %v17191_v37 = vpop.f32.mrf.mxu0 }
0x1013   :  { %v17192_v23 = vpop.f32.mrf.mxu0 }
0x1021   :  { %v17146_v16 = vpop.f32.mrf.mxu1 }
0x1022   :  { %v17147_v54 = vadd.f32 %v17146_v16, %v16865_v6 }
0x1023   :  { %v17148_v33 = vpop.f32.mrf.mxu1 }
0x1024   :  { %v17188_v10 = vadd.f32 %v17187_v63, %v17147_v54  ;;  %v17149_v34 = vadd.f32 %v17148_v33, %v16869_v46 }
0x1025   :  { %v17150_v60 = vpop.f32.mrf.mxu1 }
0x1026   :  { %vm17195_vm3 = vcmp.ge.f32.partialorder %v17188_v10, 0.0  ;;  %v17198_v41 = vmul.f32 %v17197_v29, %v17188_v10  ;;  %v17190_v31 = vadd.f32 %v17189_v45, %v17149_v34 }
0x1027   :  { %v17151_v24 = vpop.f32.mrf.mxu1 }
0x1028   :  { %vm17196_vm4 = vcmp.ge.f32.partialorder %v17190_v31, 0.0  ;;  %v17199_v5 = vmul.f32 %v17197_v29, %v17190_v31  ;;  %v17200_v30 = vsel %vm17195_vm3, %v17188_v10, %v17198_v41 }
0x1029   :  { %v17202_v42 = vpack.c.bf16 %v17200_v30, %v17200_v30 }
0x102a   :  { %v17201_v3 = vsel %vm17196_vm4, %v17190_v31, %v17199_v5 }
0x102b   :  { %v17203_v59 = vpack.c.bf16 %v17201_v3, %v17201_v3 }
0x102d   :  { %19260 = vmatprep.mubr.msk.bf16.mxu0 %vm17307_vm5, %v17203_v59 }
0x102e   :  { %17344 = vmatmul.mubr.bf16.vlgmr.msra.gmra.mxu0 %v17202_v42 }
0x102f   :  { %20109 = vmatprep.mubr.msk.bf16.mxu0 %vm21002_vm0, %v21001_v1  ;;  %20102 = vmatpush3.bf16.msra.mxu0 %v20755_v9 }
0x1030   :  { %20103 = vmatprep.subr.bf16.mxu0 %v21001_v1 }
0x1033   :  { %20104 = vmatpush3.bf16.msra.mxu0 %v20756_v26 }
0x1034   :  { %20105 = vmatprep.subr.bf16.mxu0 %v21001_v1 }
0x1037   :  { %20106 = vmatpush3.bf16.msra.mxu0 %v20757_v36 }
0x1038   :  { %20107 = vmatprep.subr.bf16.mxu0 %v21001_v1  ;;  %v19272_v1 = vld [vmem:[#allocation13 + $0x3a] ss:$0 sm:$0xff] }
0x103b   :  { %20108 = vmatpush3.bf16.msra.mxu0 %v20758_v57 }
0x10ee   :  { %v17345_v40 = vpop.f32.mrf.mxu0 }
0x10ef   :  { %v17346_v38 = vadd.f32 %v19247_v22, %v17345_v40 }
0x10f0   :  { %v17347_v35 = vpop.f32.mrf.mxu0 }
0x10f1   :  { %vm17352_vm6 = vcmp.ge.f32.partialorder %v17346_v38, 0.0  ;;  %v17354_v18 = vmul.f32 %v17353_v8, %v17346_v38 }
0x10f2   :  { %v17348_v50 = vpop.f32.mrf.mxu0 }
0x10f3   :  { %v17355_v0 = vsel %vm17352_vm6, %v17346_v38, %v17354_v18 }
0x10f4   :  { %v17356_v19 = vpack.c.bf16 %v17355_v0, %v17355_v0  ;;  %v17349_v44 = vpop.f32.mrf.mxu0 }
0x10f6   :  { %20098 = vmatmul.mubr.bf16.vlgmr.msra.gmra.mxu1 %v17356_v19 }
0x11b6   :  { %v17462_v4 = vpop.f32.mrf.mxu1 }
0x11b7   :  { %v17463_v53 = vadd.f32 %v19262_v7, %v17462_v4 }
0x11b8   :  { %v20099_v52 = vpop.f32.mrf.mxu1 }
0x11b9   :  { %vm17469_vm7 = vcmp.ge.f32.partialorder %v17463_v53, 0.0  ;;  %v17471_v21 = vmul.f32 %v17470_v43, %v17463_v53 }
0x11ba   :  { %v17465_v14 = vpop.f32.mrf.mxu1 }
0x11bb   :  { %v17472_v13 = vsel %vm17469_vm7, %v17463_v53, %v17471_v21 }
0x11bc   :  { %v17473_v56 = vpack.c.bf16 %v17472_v13, %v17472_v13  ;;  %v20100_v12 = vpop.f32.mrf.mxu1 }
0x11be   :  { %20110 = vmatmul.mubr.msk.bf16.vlgmr.msra.gmra.mxu0 %vm17307_vm5, %v17473_v56 }
0x127e   :  { %v17550_v27 = vpop.f32.mrf.mxu0 }
0x127f   :  { %v17551_v2 = vadd.f32 %v19272_v1, %v17550_v27 }
0x1280   :  { %v20111_v58 = vpop.f32.mrf.mxu0 }
0x1281   :  { %17556 = vst [vmem:[#allocation15] sm:$0xff] %v17551_v2 }
0x1282   :  { %v17553_v28 = vpop.f32.mrf.mxu0 }
0x1283   :  { %20965 = shalt.err (!%p20962_p6)
}
0x1284   :  { %17566 = dma.vmem_to_hbm [thread:$0]  %s17564_s24, 128, %s22630_s8, [#allocation4]   ;;  %v20112_v61 = vpop.f32.mrf.mxu0 }
0x1285   :  { %20984 = dma.done.wait [#allocation4], 128  }
0x1286   :  { %20985 = vsyncadd [#allocation4], 4294967168 }
0x1287   :  { %17570 = vsyncpa [#allocation3], 1 }
0x1288   :  { %17571 = vsyncpa [#allocation8], 1 }
0x1289   :  { %17572 = vsyncpa [#allocation11], 1 }
0x128a   :  { %17573 = vsyncpa [#allocation14], 1 }
0x128b   :  { %17574 = vsyncpa [#allocation4], 1 }
0x128c   :  { %17575 = vsyncpa [#allocation5], 1 }

</bundles_post_ra>
